<compile_context>
chip_gen: v5e
topology: v5e:2x2
jax: 0.10.0
libtpu: 0.0.40
codegen_flags: <defaults>
</compile_context>

<pallas_src>
import functools
import math

import jax
import jax.numpy as jnp
from jax import lax
from jax.experimental import pallas as pl
from jax.experimental.pallas import tpu as pltpu

BN_EPS_DEFAULT = 1e-5


def _cdiv(a, b):
    return -(-a // b)


def _mosaic_params(need_bytes, dims_sem):
    # explicit scoped-VMEM limit with headroom (v5e default is only 16 MiB)
    limit = int(min(max(2 * need_bytes + (4 << 20), 32 << 20), 64 << 20))
    return pltpu.CompilerParams(dimension_semantics=dims_sem,
                                vmem_limit_bytes=limit)


def _pick_tile_hw(hw, d, cin, cm, budget=12 << 20):
    """Largest multiple-of-8 divisor of hw whose per-step VMEM fits `budget`."""
    if hw % 8 != 0:
        return hw                       # single full-dim tile (small frames)
    best = None
    t = 8
    while t <= hw:
        if hw % t == 0:
            need = (2 * d * t * cin * 2      # input block (double buffered)
                    + 2 * d * t * cm * 2     # output block (double buffered)
                    + d * t * cm * 4)        # f32 accumulator
            if need <= budget:
                best = t
        t += 8
    return best if best is not None else 8


# --------------------------------------------------------------------------
# Kernel 1: temporal conv [T,1,1] (stride 1) + eval-BN (folded) + ReLU
# --------------------------------------------------------------------------
def _temporal_conv_kernel(x_ref, w_ref, b_ref, o_ref, acc_ref, *,
                          t_taps, pad_t, d_frames, tile_hw):
    # x_ref  : (D, tile_hw, Cin) bf16      (n squeezed)
    # w_ref  : (T, Cin, Cm)      bf16      (resident, BN scale folded)
    # b_ref  : (1, Cm)           f32
    # o_ref  : (D, tile_hw, Cm)  bf16
    # acc_ref: (D*tile_hw, Cm)   f32 scratch
    cin = x_ref.shape[-1]
    cm = w_ref.shape[-1]
    # Centre tap first: it covers every output frame, so it initialises the
    # accumulator with `=` (no separate memset pass).
    order = [pad_t] + [t for t in range(t_taps) if t != pad_t]
    first = True
    for tt in order:
        lo_out = max(0, pad_t - tt)
        hi_out = min(d_frames, d_frames + pad_t - tt)
        cnt = hi_out - lo_out
        if cnt <= 0:
            continue
        lo_in = lo_out + (tt - pad_t)
        xs = x_ref[pl.ds(lo_in, cnt), :, :].reshape(cnt * tile_hw, cin)
        part = jnp.dot(xs, w_ref[tt], preferred_element_type=jnp.float32)
        if first:
            if cnt == d_frames:
                acc_ref[...] = part
            else:
                acc_ref[...] = jnp.zeros_like(acc_ref)
                acc_ref[pl.ds(lo_out * tile_hw, cnt * tile_hw), :] += part
            first = False
        else:
            acc_ref[pl.ds(lo_out * tile_hw, cnt * tile_hw), :] += part
    y = jnp.maximum(acc_ref[...] + b_ref[...], 0.0)      # eval-BN bias + ReLU
    o_ref[...] = y.astype(o_ref.dtype).reshape(d_frames, tile_hw, cm)


def temporal_conv_bn_relu(x_cl, w_scaled, bias, *, t_taps, tile_hw):
    n, d, hw, cin = x_cl.shape
    cm = w_scaled.shape[-1]
    pad_t = t_taps // 2
    rt = hw // tile_hw
    kernel = functools.partial(_temporal_conv_kernel, t_taps=t_taps,
                               pad_t=pad_t, d_frames=d, tile_hw=tile_hw)
    need = (2 * d * tile_hw * cin * 2 + 2 * d * tile_hw * cm * 2
            + d * tile_hw * cm * 4 + 2 * t_taps * cin * cm * 2)
    return pl.pallas_call(
        kernel,
        out_shape=jax.ShapeDtypeStruct((n, d, hw, cm), jnp.bfloat16),
        grid_spec=pltpu.PrefetchScalarGridSpec(
            num_scalar_prefetch=0,
            grid=(n, rt),
            in_specs=[
                pl.BlockSpec((None, d, tile_hw, cin),
                             lambda nn, rr: (nn, 0, rr, 0)),
                pl.BlockSpec((t_taps, cin, cm), lambda nn, rr: (0, 0, 0)),
                pl.BlockSpec((1, cm), lambda nn, rr: (0, 0)),
            ],
            out_specs=pl.BlockSpec((None, d, tile_hw, cm),
                                   lambda nn, rr: (nn, 0, rr, 0)),
            scratch_shapes=[pltpu.VMEM((d * tile_hw, cm), jnp.float32)],
        ),
        compiler_params=_mosaic_params(need, ("parallel", "parallel")),
    )(x_cl, w_scaled, bias)


# --------------------------------------------------------------------------
# Kernel 2: spatial conv [1,3,3] (+BN+ReLU) fused with pointwise [1,1,1] (+BN)
# --------------------------------------------------------------------------
def _spatial_point_kernel(a_ref, wb_ref, bb_ref, wc_ref, bc_ref, o_ref, acc_ref,
                          *, tap_specs, ho, wo, v_r0, v_c0, cm):
    # a_ref  : (s, s, Hq, Wq, Cm) bf16   phase/pad layout (s==1: raw frame)
    # wb_ref : (KH, KW, Cm, Cm)   bf16 ; wc_ref: (Cm, Cout) bf16
    # bb_ref : (1, Cm) f32        ; bc_ref: (1, Cout) f32
    # o_ref  : (Ho*Wo, Cout)      bf16 (lane dense when Cout % 128 == 0)
    # acc_ref: (acc_h, acc_w, Cm) f32 scratch (halo-padded for stride==1)
    first = True
    for (kh, kw, pr, pc, ir0, ic0, ar0, ac0) in tap_specs:
        xs = a_ref[pr, pc, pl.ds(ir0, ho), pl.ds(ic0, wo), :]
        part = jnp.dot(xs.reshape(ho * wo, cm), wb_ref[kh, kw],
                       preferred_element_type=jnp.float32).reshape(ho, wo, cm)
        if first:
            # first tap's rectangle covers the whole valid output window, so a
            # plain assignment initialises the accumulator (halo cells outside
            # it may stay stale; they are never read back).
            acc_ref[pl.ds(ar0, ho), pl.ds(ac0, wo), :] = part
            first = False
        else:
            acc_ref[pl.ds(ar0, ho), pl.ds(ac0, wo), :] += part
    # conv_b epilogue: BN bias + ReLU, feeding conv_c straight from VMEM
    acc_v = acc_ref[pl.ds(v_r0, ho), pl.ds(v_c0, wo), :]
    b_act = jnp.maximum(acc_v + bb_ref[...], 0.0).astype(jnp.bfloat16)
    y = jnp.dot(b_act.reshape(ho * wo, cm), wc_ref[...],
                preferred_element_type=jnp.float32)
    o_ref[...] = (y + bc_ref[...]).astype(o_ref.dtype)


def _make_tap_specs(kh_taps, kw_taps, stride, dil, ho, wo, padded_phase):
    """Static per-tap (kh, kw, phase_r, phase_c, in_r0, in_c0, acc_r0, acc_c0)."""
    specs = []
    if padded_phase:                     # stride > 1: padded phase layout
        acc_h, acc_w, v_r0, v_c0 = ho, wo, 0, 0
        for kh in range(kh_taps):
            for kw in range(kw_taps):
                specs.append((kh, kw, (kh * dil) % stride, (kw * dil) % stride,
                              (kh * dil) // stride, (kw * dil) // stride, 0, 0))
    else:                                # stride == 1: unpadded frame input
        pad = dil                        # conv_b uses padding == dilation
        acc_h, acc_w = ho + 2 * pad, wo + 2 * pad
        v_r0, v_c0 = pad, pad
        for kh in range(kh_taps):
            for kw in range(kw_taps):
                specs.append((kh, kw, 0, 0, 0, 0,
                              2 * pad - kh * dil, 2 * pad - kw * dil))
    # full-coverage (valid-window) tap first so the kernel initialises acc
    specs.sort(key=lambda t: (t[6] != v_r0) or (t[7] != v_c0))
    assert specs and specs[0][6] == v_r0 and specs[0][7] == v_c0
    return tuple(specs), acc_h, acc_w, v_r0, v_c0


def spatial_point_fused(a7, wb_s, bias_b, wc_s, bias_c, *,
                        tap_specs, acc_h, acc_w, v_r0, v_c0, ho, wo):
    n, d, s1, s2, hq, wq, cm = a7.shape
    kh_taps, kw_taps = wb_s.shape[0], wb_s.shape[1]
    cout = wc_s.shape[-1]
    kernel = functools.partial(_spatial_point_kernel, tap_specs=tap_specs,
                               ho=ho, wo=wo, v_r0=v_r0, v_c0=v_c0, cm=cm)
    need = (2 * s1 * s2 * hq * wq * cm * 2      # frame block (double buffered)
            + 2 * ho * wo * cout * 2            # output block (double buffered)
            + acc_h * acc_w * cm * 4            # f32 accumulator
            + 2 * (kh_taps * kw_taps * cm * cm + cm * cout) * 2)
    return pl.pallas_call(
        kernel,
        out_shape=jax.ShapeDtypeStruct((n, d, ho * wo, cout), jnp.bfloat16),
        grid_spec=pltpu.PrefetchScalarGridSpec(
            num_scalar_prefetch=0,
            grid=(n, d),
            in_specs=[
                pl.BlockSpec((None, None, s1, s2, hq, wq, cm),
                             lambda nn, dd: (nn, dd, 0, 0, 0, 0, 0)),
                pl.BlockSpec((kh_taps, kw_taps, cm, cm),
                             lambda nn, dd: (0, 0, 0, 0)),
                pl.BlockSpec((1, cm), lambda nn, dd: (0, 0)),
                pl.BlockSpec((cm, cout), lambda nn, dd: (0, 0)),
                pl.BlockSpec((1, cout), lambda nn, dd: (0, 0)),
            ],
            out_specs=pl.BlockSpec((None, None, ho * wo, cout),
                                   lambda nn, dd: (nn, dd, 0, 0)),
            scratch_shapes=[pltpu.VMEM((acc_h, acc_w, cm), jnp.float32)],
        ),
        compiler_params=_mosaic_params(need, ("parallel", "parallel")),
    )(a7, wb_s, bias_b, wc_s, bias_c)


# --------------------------------------------------------------------------
# Wrapper: full BottleneckTransform forward (eval mode)
# --------------------------------------------------------------------------
def _bn_fold(params, eps):
    gamma, beta, mean, var = params
    scale = gamma / jnp.sqrt(var + eps)
    return scale, beta - mean * scale


def bottleneck_transform_forward(x, wa, a_bn, wb, b_bn, wc, c_bn, *,
                                 temp_kernel_size, stride, dilation=1,
                                 num_groups=1, stride_1x1=False,
                                 eps=BN_EPS_DEFAULT):
    """x: NCDHW f32; wa:(Cm,Cin,T,1,1) wb:(Cm,Cm,1,3,3) wc:(Cout,Cm,1,1,1).

    Eval-mode BatchNorm (running stats) folded into the conv weights.
    Returns NCDHW bf16.
    """
    if num_groups != 1:
        raise NotImplementedError("num_groups > 1")   # TODO(synk): grouped conv
    if stride_1x1:
        raise NotImplementedError("stride_1x1=True")  # TODO(synk): stride on 1x1
    if temp_kernel_size % 2 != 1:
        raise NotImplementedError("even temporal kernel size")

    n, cin, d, h, w = x.shape
    t_taps = int(temp_kernel_size)
    s = int(stride)
    dl = int(dilation)
    cm = wa.shape[0]
    cout = wc.shape[0]
    kh_taps, kw_taps = wb.shape[3], wb.shape[4]

    # ---- fold eval-mode BN scale into the (tiny) conv weights --------------
    sa, ba = _bn_fold(a_bn, eps)
    sb, bb = _bn_fold(b_bn, eps)
    sc, bc = _bn_fold(c_bn, eps)
    wa_s = (jnp.transpose(wa[:, :, :, 0, 0], (2, 1, 0)) * sa).astype(jnp.bfloat16)
    wb_s = (jnp.transpose(wb[:, :, 0, :, :], (2, 3, 1, 0)) * sb).astype(jnp.bfloat16)
    wc_s = (jnp.transpose(wc[:, :, 0, 0, 0], (1, 0)) * sc).astype(jnp.bfloat16)
    ba_r = ba.reshape(1, cm).astype(jnp.float32)
    bb_r = bb.reshape(1, cm).astype(jnp.float32)
    bc_r = bc.reshape(1, cout).astype(jnp.float32)

    # ---- stage A: temporal conv + BN + ReLU ---------------------------------
    hw = h * w
    # single pass over x: NCDHW -> channels-last rows, cast to bf16.
    # No temporal zero-pad in HBM -- boundaries handled in-kernel.
    x_cl = (jnp.transpose(x, (0, 2, 3, 4, 1))
            .reshape(n, d, hw, cin).astype(jnp.bfloat16))
    tile_hw = _pick_tile_hw(hw, d, cin, cm)
    a = temporal_conv_bn_relu(x_cl, wa_s, ba_r, t_taps=t_taps, tile_hw=tile_hw)

    # ---- stage B+C: 3x3 conv (+BN+ReLU) fused with pointwise 1x1 (+BN) ------
    ho = (h - 1) // s + 1
    wo = (w - 1) // s + 1
    if s == 1:
        # free metadata reshape: K2 consumes K1's output directly; boundary
        # taps accumulate into a halo-padded VMEM scratch instead of HBM pads.
        a7 = a.reshape(n, d, 1, 1, h, w, cm)
        padded_phase = False
    else:
        # single pad + row/column phase transpose so strided taps become
        # contiguous 2-D slices inside the kernel.
        hp, wp = h + 2 * dl, w + 2 * dl
        hq, wq = _cdiv(hp, s), _cdiv(wp, s)
        a_pad = jnp.pad(a.reshape(n, d, h, w, cm),
                        ((0, 0), (0, 0), (dl, dl + hq * s - hp),
                         (dl, dl + wq * s - wp), (0, 0)))
        a7 = jnp.transpose(a_pad.reshape(n, d, hq, s, wq, s, cm),
                           (0, 1, 3, 5, 2, 4, 6))
        padded_phase = True

    tap_specs, acc_h, acc_w, v_r0, v_c0 = _make_tap_specs(
        kh_taps, kw_taps, s, dl, ho, wo, padded_phase)
    out = spatial_point_fused(a7, wb_s, bb_r, wc_s, bc_r,
                              tap_specs=tap_specs, acc_h=acc_h, acc_w=acc_w,
                              v_r0=v_r0, v_c0=v_c0, ho=ho, wo=wo)
    out = out.reshape(n, d, ho, wo, cout)
    return jnp.transpose(out, (0, 4, 1, 2, 3))          # back to NCDHW (bf16)


bottleneck_forward = jax.jit(
    bottleneck_transform_forward,
    static_argnames=("temp_kernel_size", "stride", "dilation", "num_groups",
                     "stride_1x1", "eps"))


# --------------------------------------------------------------------------
# Pure-JAX reference (eval-mode module semantics)
# --------------------------------------------------------------------------
def bottleneck_reference(x, wa, a_bn, wb, b_bn, wc, c_bn, *,
                         temp_kernel_size, stride, dilation=1, num_groups=1,
                         stride_1x1=False, eps=BN_EPS_DEFAULT):
    str1, str3 = (stride, 1) if stride_1x1 else (1, stride)
    dn = ("NCDHW", "OIDHW", "NCDHW")

    def bn(y, p):
        g, b, m, v = p
        inv = (g / jnp.sqrt(v + eps))[None, :, None, None, None]
        return (y - m[None, :, None, None, None]) * inv + b[None, :, None, None, None]

    pt = temp_kernel_size // 2
    y = lax.conv_general_dilated(x, wa, (1, str1, str1),
                                 ((pt, pt), (0, 0), (0, 0)),
                                 dimension_numbers=dn)
    y = jnp.maximum(bn(y, a_bn), 0.0)
    y = lax.conv_general_dilated(y, wb, (1, str3, str3),
                                 ((0, 0), (dilation, dilation), (dilation, dilation)),
                                 rhs_dilation=(1, dilation, dilation),
                                 dimension_numbers=dn,
                                 feature_group_count=num_groups)
    y = jnp.maximum(bn(y, b_bn), 0.0)
    y = lax.conv_general_dilated(y, wc, (1, 1, 1),
                                 ((0, 0), (0, 0), (0, 0)),
                                 dimension_numbers=dn)
    return bn(y, c_bn)


# --------------------------------------------------------------------------
if __name__ == "__main__":
    key = jax.random.PRNGKey(0)
    keys = jax.random.split(key, 8)

    N, D, H, W = 2, 4, 16, 16
    dim_in, dim_inner, dim_out = 64, 32, 128   # Cout=128 -> lane-dense final store
    T = 3

    x = jax.random.normal(keys[0], (N, dim_in, D, H, W), dtype=jnp.float32)

    def conv_w(k, shape):
        fan_in = shape[1] * shape[2] * shape[3] * shape[4]
        bound = 1.0 / math.sqrt(fan_in)
        return jax.random.uniform(k, shape, jnp.float32, -bound, bound)

    wa = conv_w(keys[1], (dim_inner, dim_in, T, 1, 1))
    wb = conv_w(keys[2], (dim_inner, dim_inner, 1, 3, 3))
    wc = conv_w(keys[3], (dim_out, dim_inner, 1, 1, 1))

    def bn_params(k, c):
        k1, k2, k3, k4 = jax.random.split(k, 4)
        gamma = jax.random.uniform(k1, (c,), jnp.float32, 0.5, 1.5)
        beta = 0.1 * jax.random.normal(k2, (c,), jnp.float32)
        mean = 0.1 * jax.random.normal(k3, (c,), jnp.float32)
        var = jax.random.uniform(k4, (c,), jnp.float32, 0.5, 1.5)
        return gamma, beta, mean, var

    a_bn = bn_params(keys[4], dim_inner)
    b_bn = bn_params(keys[5], dim_inner)
    c_bn = bn_params(keys[6], dim_out)

    for stride in (1, 2):
        out = bottleneck_forward(x, wa, a_bn, wb, b_bn, wc, c_bn,
                                 temp_kernel_size=T, stride=stride)
        out = jax.block_until_ready(out)
        Ho = (H - 1) // stride + 1
        Wo = (W - 1) // stride + 1
        assert out.shape == (N, dim_out, D, Ho, Wo), out.shape

        ref = bottleneck_reference(x, wa, a_bn, wb, b_bn, wc, c_bn,
                                   temp_kernel_size=T, stride=stride)
        out_f32 = out.astype(jnp.float32)
        max_err = float(jnp.max(jnp.abs(out_f32 - ref)))
        assert bool(jnp.allclose(out_f32, ref, atol=5e-2, rtol=5e-2)), max_err

    print("KERNEL_OK")
</pallas_src>

<mosaic_0001>
module attributes {stable_mosaic.version = 11 : i64} {
  func.func @_temporal_conv_kernel(%arg0: i32, %arg1: i32, %arg2: memref<1x4x256x64xbf16, #tpu.memory_space<vmem>>, %arg3: memref<3x64x32xbf16, #tpu.memory_space<vmem>>, %arg4: memref<1x32xf32, #tpu.memory_space<vmem>>, %arg5: memref<1x4x256x32xbf16, #tpu.memory_space<vmem>>, %arg6: memref<1024x32xf32, #tpu.memory_space<vmem>>) attributes {dimension_semantics = [#tpu.dimension_semantics<parallel>, #tpu.dimension_semantics<parallel>], iteration_bounds = array<i64: 2, 1>, scalar_prefetch = 0 : i64, scratch_operands = 1 : i64, tpu.core_type = #tpu.core_type<tc>, window_params = [{transform_indices = @transform_0, window_bounds = array<i64: 1, 4, 256, 64>}, {pipeline_mode = #tpu.pipeline_mode<synchronous>, transform_indices = @transform_1, window_bounds = array<i64: 3, 64, 32>}, {pipeline_mode = #tpu.pipeline_mode<synchronous>, transform_indices = @transform_2, window_bounds = array<i64: 1, 32>}, {transform_indices = @transform_3, window_bounds = array<i64: 1, 4, 256, 32>}]} {
    %c0 = arith.constant 0 : index
    %c0_0 = arith.constant 0 : index
    %c0_1 = arith.constant 0 : index
    %c0_2 = arith.constant 0 : index
    %0 = vector.load %arg2[%c0, %c0_0, %c0_1, %c0_2] : memref<1x4x256x64xbf16, #tpu.memory_space<vmem>>, vector<1x4x256x64xbf16>
    %1 = vector.shape_cast %0 : vector<1x4x256x64xbf16> to vector<4x256x64xbf16>
    %2 = vector.shape_cast %1 : vector<4x256x64xbf16> to vector<1024x64xbf16>
    %c1 = arith.constant 1 : index
    %c0_3 = arith.constant 0 : index
    %c0_4 = arith.constant 0 : index
    %3 = vector.load %arg3[%c1, %c0_3, %c0_4] : memref<3x64x32xbf16, #tpu.memory_space<vmem>>, vector<1x64x32xbf16>
    %4 = vector.shape_cast %3 : vector<1x64x32xbf16> to vector<64x32xbf16>
    %cst = arith.constant dense<0.000000e+00> : vector<1024x32xf32>
    %5 = tpu.matmul %2, %4, %cst {dimension_numbers = #tpu.dot_dimension_numbers<[1], [0], [0], [1], [0, 0, 1, 1], [], []>} : vector<1024x64xbf16>, vector<64x32xbf16>, vector<1024x32xf32> -> vector<1024x32xf32>
    %c0_5 = arith.constant 0 : index
    %c0_6 = arith.constant 0 : index
    %6 = vector.load %arg6[%c0_5, %c0_6] : memref<1024x32xf32, #tpu.memory_space<vmem>>, vector<1024x32xf32>
    tpu.vector_store %arg6[%c0_5, %c0_6], %5 {strides = array<i32>} : memref<1024x32xf32, #tpu.memory_space<vmem>>, vector<1024x32xf32>,
    %c0_7 = arith.constant 0 : index
    %c0_8 = arith.constant 0 : index
    %c0_9 = arith.constant 0 : index
    %c0_10 = arith.constant 0 : index
    %7 = vector.load %arg2[%c0_7, %c0_8, %c0_9, %c0_10] : memref<1x4x256x64xbf16, #tpu.memory_space<vmem>>, vector<1x3x256x64xbf16>
    %8 = vector.shape_cast %7 : vector<1x3x256x64xbf16> to vector<3x256x64xbf16>
    %9 = vector.shape_cast %8 : vector<3x256x64xbf16> to vector<768x64xbf16>
    %c0_11 = arith.constant 0 : index
    %c0_12 = arith.constant 0 : index
    %c0_13 = arith.constant 0 : index
    %10 = vector.load %arg3[%c0_11, %c0_12, %c0_13] : memref<3x64x32xbf16, #tpu.memory_space<vmem>>, vector<1x64x32xbf16>
    %11 = vector.shape_cast %10 : vector<1x64x32xbf16> to vector<64x32xbf16>
    %cst_14 = arith.constant dense<0.000000e+00> : vector<768x32xf32>
    %12 = tpu.matmul %9, %11, %cst_14 {dimension_numbers = #tpu.dot_dimension_numbers<[1], [0], [0], [1], [0, 0, 1, 1], [], []>} : vector<768x64xbf16>, vector<64x32xbf16>, vector<768x32xf32> -> vector<768x32xf32>
    %c256 = arith.constant 256 : index
    %c0_15 = arith.constant 0 : index
    %13 = vector.load %arg6[%c256, %c0_15] : memref<1024x32xf32, #tpu.memory_space<vmem>>, vector<768x32xf32>
    %14 = arith.addf %13, %12 : vector<768x32xf32>
    %c256_16 = arith.constant 256 : index
    %c0_17 = arith.constant 0 : index
    %15 = vector.load %arg6[%c256_16, %c0_17] : memref<1024x32xf32, #tpu.memory_space<vmem>>, vector<768x32xf32>
    tpu.vector_store %arg6[%c256_16, %c0_17], %14 {strides = array<i32>} : memref<1024x32xf32, #tpu.memory_space<vmem>>, vector<768x32xf32>,
    %c0_18 = arith.constant 0 : index
    %c1_19 = arith.constant 1 : index
    %c0_20 = arith.constant 0 : index
    %c0_21 = arith.constant 0 : index
    %16 = vector.load %arg2[%c0_18, %c1_19, %c0_20, %c0_21] : memref<1x4x256x64xbf16, #tpu.memory_space<vmem>>, vector<1x3x256x64xbf16>
    %17 = vector.shape_cast %16 : vector<1x3x256x64xbf16> to vector<3x256x64xbf16>
    %18 = vector.shape_cast %17 : vector<3x256x64xbf16> to vector<768x64xbf16>
    %c2 = arith.constant 2 : index
    %c0_22 = arith.constant 0 : index
    %c0_23 = arith.constant 0 : index
    %19 = vector.load %arg3[%c2, %c0_22, %c0_23] : memref<3x64x32xbf16, #tpu.memory_space<vmem>>, vector<1x64x32xbf16>
    %20 = vector.shape_cast %19 : vector<1x64x32xbf16> to vector<64x32xbf16>
    %cst_24 = arith.constant dense<0.000000e+00> : vector<768x32xf32>
    %21 = tpu.matmul %18, %20, %cst_24 {dimension_numbers = #tpu.dot_dimension_numbers<[1], [0], [0], [1], [0, 0, 1, 1], [], []>} : vector<768x64xbf16>, vector<64x32xbf16>, vector<768x32xf32> -> vector<768x32xf32>
    %c0_25 = arith.constant 0 : index
    %c0_26 = arith.constant 0 : index
    %22 = vector.load %arg6[%c0_25, %c0_26] : memref<1024x32xf32, #tpu.memory_space<vmem>>, vector<768x32xf32>
    %23 = arith.addf %22, %21 : vector<768x32xf32>
    %c0_27 = arith.constant 0 : index
    %c0_28 = arith.constant 0 : index
    %24 = vector.load %arg6[%c0_27, %c0_28] : memref<1024x32xf32, #tpu.memory_space<vmem>>, vector<768x32xf32>
    tpu.vector_store %arg6[%c0_27, %c0_28], %23 {strides = array<i32>} : memref<1024x32xf32, #tpu.memory_space<vmem>>, vector<768x32xf32>,
    %c0_29 = arith.constant 0 : index
    %c0_30 = arith.constant 0 : index
    %25 = vector.load %arg6[%c0_29, %c0_30] : memref<1024x32xf32, #tpu.memory_space<vmem>>, vector<1024x32xf32>
    %c0_31 = arith.constant 0 : index
    %c0_32 = arith.constant 0 : index
    %26 = vector.load %arg4[%c0_31, %c0_32] : memref<1x32xf32, #tpu.memory_space<vmem>>, vector<1x32xf32>
    %27 = vector.broadcast %26 : vector<1x32xf32> to vector<1024x32xf32>
    %28 = arith.addf %25, %27 : vector<1024x32xf32>
    %cst_33 = arith.constant 0.000000e+00 : f32
    %29 = vector.broadcast %cst_33 : f32 to vector<1024x32xf32>
    %30 = arith.maximumf %28, %29 : vector<1024x32xf32>
    %31 = arith.truncf %30 : vector<1024x32xf32> to vector<1024x32xbf16>
    %32 = vector.shape_cast %31 : vector<1024x32xbf16> to vector<4x256x32xbf16>
    %c0_34 = arith.constant 0 : index
    %c0_35 = arith.constant 0 : index
    %c0_36 = arith.constant 0 : index
    %c0_37 = arith.constant 0 : index
    %33 = vector.load %arg5[%c0_34, %c0_35, %c0_36, %c0_37] : memref<1x4x256x32xbf16, #tpu.memory_space<vmem>>, vector<1x4x256x32xbf16>
    %34 = vector.shape_cast %33 : vector<1x4x256x32xbf16> to vector<4x256x32xbf16>
    %35 = vector.shape_cast %32 : vector<4x256x32xbf16> to vector<1x4x256x32xbf16>
    tpu.vector_store %arg5[%c0_34, %c0_35, %c0_36, %c0_37], %35 {strides = array<i32>} : memref<1x4x256x32xbf16, #tpu.memory_space<vmem>>, vector<1x4x256x32xbf16>,
    return
  }
  func.func @transform_0(%arg0: i32, %arg1: i32) -> (i32, i32, i32, i32) {
    %c0_i32 = arith.constant 0 : i32
    %c0_i32_0 = arith.constant 0 : i32
    %c0_i32_1 = arith.constant 0 : i32
    return %arg0, %c0_i32, %arg1, %c0_i32_0 : i32, i32, i32, i32
  }
  func.func @transform_1(%arg0: i32, %arg1: i32) -> (i32, i32, i32) {
    %c0_i32 = arith.constant 0 : i32
    %c0_i32_0 = arith.constant 0 : i32
    %c0_i32_1 = arith.constant 0 : i32
    %c0_i32_2 = arith.constant 0 : i32
    return %c0_i32, %c0_i32_0, %c0_i32_1 : i32, i32, i32
  }
  func.func @transform_2(%arg0: i32, %arg1: i32) -> (i32, i32) {
    %c0_i32 = arith.constant 0 : i32
    %c0_i32_0 = arith.constant 0 : i32
    %c0_i32_1 = arith.constant 0 : i32
    return %c0_i32, %c0_i32_0 : i32, i32
  }
  func.func @transform_3(%arg0: i32, %arg1: i32) -> (i32, i32, i32, i32) {
    %c0_i32 = arith.constant 0 : i32
    %c0_i32_0 = arith.constant 0 : i32
    %c0_i32_1 = arith.constant 0 : i32
    return %arg0, %c0_i32, %arg1, %c0_i32_0 : i32, i32, i32, i32
  }
}

module attributes {stable_mosaic.version = 11 : i64} {
  func.func @_spatial_point_kernel(%arg0: i32, %arg1: i32, %arg2: memref<1x1x1x1x16x16x32xbf16, #tpu.memory_space<vmem>>, %arg3: memref<3x3x32x32xbf16, #tpu.memory_space<vmem>>, %arg4: memref<1x32xf32, #tpu.memory_space<vmem>>, %arg5: memref<32x128xbf16, #tpu.memory_space<vmem>>, %arg6: memref<1x128xf32, #tpu.memory_space<vmem>>, %arg7: memref<1x1x256x128xbf16, #tpu.memory_space<vmem>>, %arg8: memref<18x18x32xf32, #tpu.memory_space<vmem>>) attributes {dimension_semantics = [#tpu.dimension_semantics<parallel>, #tpu.dimension_semantics<parallel>], iteration_bounds = array<i64: 2, 4>, scalar_prefetch = 0 : i64, scratch_operands = 1 : i64, tpu.core_type = #tpu.core_type<tc>, window_params = [{transform_indices = @transform_0, window_bounds = array<i64: 1, 1, 1, 1, 16, 16, 32>}, {pipeline_mode = #tpu.pipeline_mode<synchronous>, transform_indices = @transform_1, window_bounds = array<i64: 3, 3, 32, 32>}, {pipeline_mode = #tpu.pipeline_mode<synchronous>, transform_indices = @transform_2, window_bounds = array<i64: 1, 32>}, {pipeline_mode = #tpu.pipeline_mode<synchronous>, transform_indices = @transform_3, window_bounds = array<i64: 32, 128>}, {pipeline_mode = #tpu.pipeline_mode<synchronous>, transform_indices = @transform_4, window_bounds = array<i64: 1, 128>}, {transform_indices = @transform_5, window_bounds = array<i64: 1, 1, 256, 128>}]} {
    %c0 = arith.constant 0 : index
    %c0_0 = arith.constant 0 : index
    %c0_1 = arith.constant 0 : index
    %c0_2 = arith.constant 0 : index
    %c0_3 = arith.constant 0 : index
    %c0_4 = arith.constant 0 : index
    %c0_5 = arith.constant 0 : index
    %0 = vector.load %arg2[%c0, %c0_0, %c0_1, %c0_2, %c0_3, %c0_4, %c0_5] : memref<1x1x1x1x16x16x32xbf16, #tpu.memory_space<vmem>>, vector<1x1x1x1x16x16x32xbf16>
    %1 = vector.shape_cast %0 : vector<1x1x1x1x16x16x32xbf16> to vector<16x16x32xbf16>
    %2 = vector.shape_cast %1 : vector<16x16x32xbf16> to vector<256x32xbf16>
    %c1 = arith.constant 1 : index
    %c1_6 = arith.constant 1 : index
    %c0_7 = arith.constant 0 : index
    %c0_8 = arith.constant 0 : index
    %3 = vector.load %arg3[%c1, %c1_6, %c0_7, %c0_8] : memref<3x3x32x32xbf16, #tpu.memory_space<vmem>>, vector<1x1x32x32xbf16>
    %4 = vector.shape_cast %3 : vector<1x1x32x32xbf16> to vector<32x32xbf16>
    %cst = arith.constant dense<0.000000e+00> : vector<256x32xf32>
    %5 = tpu.matmul %2, %4, %cst {dimension_numbers = #tpu.dot_dimension_numbers<[1], [0], [0], [1], [0, 0, 1, 1], [], []>} : vector<256x32xbf16>, vector<32x32xbf16>, vector<256x32xf32> -> vector<256x32xf32>
    %6 = vector.shape_cast %5 : vector<256x32xf32> to vector<16x16x32xf32>
    %c1_9 = arith.constant 1 : index
    %c1_10 = arith.constant 1 : index
    %c0_11 = arith.constant 0 : index
    %7 = vector.load %arg8[%c1_9, %c1_10, %c0_11] : memref<18x18x32xf32, #tpu.memory_space<vmem>>, vector<16x16x32xf32>
    tpu.vector_store %arg8[%c1_9, %c1_10, %c0_11], %6 {strides = array<i32>} : memref<18x18x32xf32, #tpu.memory_space<vmem>>, vector<16x16x32xf32>,
    %c0_12 = arith.constant 0 : index
    %c0_13 = arith.constant 0 : index
    %c0_14 = arith.constant 0 : index
    %c0_15 = arith.constant 0 : index
    %c0_16 = arith.constant 0 : index
    %c0_17 = arith.constant 0 : index
    %c0_18 = arith.constant 0 : index
    %8 = vector.load %arg2[%c0_12, %c0_13, %c0_14, %c0_15, %c0_16, %c0_17, %c0_18] : memref<1x1x1x1x16x16x32xbf16, #tpu.memory_space<vmem>>, vector<1x1x1x1x16x16x32xbf16>
    %9 = vector.shape_cast %8 : vector<1x1x1x1x16x16x32xbf16> to vector<16x16x32xbf16>
    %10 = vector.shape_cast %9 : vector<16x16x32xbf16> to vector<256x32xbf16>
    %c0_19 = arith.constant 0 : index
    %c0_20 = arith.constant 0 : index
    %c0_21 = arith.constant 0 : index
    %c0_22 = arith.constant 0 : index
    %11 = vector.load %arg3[%c0_19, %c0_20, %c0_21, %c0_22] : memref<3x3x32x32xbf16, #tpu.memory_space<vmem>>, vector<1x1x32x32xbf16>
    %12 = vector.shape_cast %11 : vector<1x1x32x32xbf16> to vector<32x32xbf16>
    %cst_23 = arith.constant dense<0.000000e+00> : vector<256x32xf32>
    %13 = tpu.matmul %10, %12, %cst_23 {dimension_numbers = #tpu.dot_dimension_numbers<[1], [0], [0], [1], [0, 0, 1, 1], [], []>} : vector<256x32xbf16>, vector<32x32xbf16>, vector<256x32xf32> -> vector<256x32xf32>
    %14 = vector.shape_cast %13 : vector<256x32xf32> to vector<16x16x32xf32>
    %c2 = arith.constant 2 : index
    %c2_24 = arith.constant 2 : index
    %c0_25 = arith.constant 0 : index
    %15 = vector.load %arg8[%c2, %c2_24, %c0_25] : memref<18x18x32xf32, #tpu.memory_space<vmem>>, vector<16x16x32xf32>
    %16 = arith.addf %15, %14 : vector<16x16x32xf32>
    %c2_26 = arith.constant 2 : index
    %c2_27 = arith.constant 2 : index
    %c0_28 = arith.constant 0 : index
    %17 = vector.load %arg8[%c2_26, %c2_27, %c0_28] : memref<18x18x32xf32, #tpu.memory_space<vmem>>, vector<16x16x32xf32>
    tpu.vector_store %arg8[%c2_26, %c2_27, %c0_28], %16 {strides = array<i32>} : memref<18x18x32xf32, #tpu.memory_space<vmem>>, vector<16x16x32xf32>,
    %c0_29 = arith.constant 0 : index
    %c0_30 = arith.constant 0 : index
    %c0_31 = arith.constant 0 : index
    %c0_32 = arith.constant 0 : index
    %c0_33 = arith.constant 0 : index
    %c0_34 = arith.constant 0 : index
    %c0_35 = arith.constant 0 : index
    %18 = vector.load %arg2[%c0_29, %c0_30, %c0_31, %c0_32, %c0_33, %c0_34, %c0_35] : memref<1x1x1x1x16x16x32xbf16, #tpu.memory_space<vmem>>, vector<1x1x1x1x16x16x32xbf16>
    %19 = vector.shape_cast %18 : vector<1x1x1x1x16x16x32xbf16> to vector<16x16x32xbf16>
    %20 = vector.shape_cast %19 : vector<16x16x32xbf16> to vector<256x32xbf16>
    %c0_36 = arith.constant 0 : index
    %c1_37 = arith.constant 1 : index
    %c0_38 = arith.constant 0 : index
    %c0_39 = arith.constant 0 : index
    %21 = vector.load %arg3[%c0_36, %c1_37, %c0_38, %c0_39] : memref<3x3x32x32xbf16, #tpu.memory_space<vmem>>, vector<1x1x32x32xbf16>
    %22 = vector.shape_cast %21 : vector<1x1x32x32xbf16> to vector<32x32xbf16>
    %cst_40 = arith.constant dense<0.000000e+00> : vector<256x32xf32>
    %23 = tpu.matmul %20, %22, %cst_40 {dimension_numbers = #tpu.dot_dimension_numbers<[1], [0], [0], [1], [0, 0, 1, 1], [], []>} : vector<256x32xbf16>, vector<32x32xbf16>, vector<256x32xf32> -> vector<256x32xf32>
    %24 = vector.shape_cast %23 : vector<256x32xf32> to vector<16x16x32xf32>
    %c2_41 = arith.constant 2 : index
    %c1_42 = arith.constant 1 : index
    %c0_43 = arith.constant 0 : index
    %25 = vector.load %arg8[%c2_41, %c1_42, %c0_43] : memref<18x18x32xf32, #tpu.memory_space<vmem>>, vector<16x16x32xf32>
    %26 = arith.addf %25, %24 : vector<16x16x32xf32>
    %c2_44 = arith.constant 2 : index
    %c1_45 = arith.constant 1 : index
    %c0_46 = arith.constant 0 : index
    %27 = vector.load %arg8[%c2_44, %c1_45, %c0_46] : memref<18x18x32xf32, #tpu.memory_space<vmem>>, vector<16x16x32xf32>
    tpu.vector_store %arg8[%c2_44, %c1_45, %c0_46], %26 {strides = array<i32>} : memref<18x18x32xf32, #tpu.memory_space<vmem>>, vector<16x16x32xf32>,
    %c0_47 = arith.constant 0 : index
    %c0_48 = arith.constant 0 : index
    %c0_49 = arith.constant 0 : index
    %c0_50 = arith.constant 0 : index
    %c0_51 = arith.constant 0 : index
    %c0_52 = arith.constant 0 : index
    %c0_53 = arith.constant 0 : index
    %28 = vector.load %arg2[%c0_47, %c0_48, %c0_49, %c0_50, %c0_51, %c0_52, %c0_53] : memref<1x1x1x1x16x16x32xbf16, #tpu.memory_space<vmem>>, vector<1x1x1x1x16x16x32xbf16>
    %29 = vector.shape_cast %28 : vector<1x1x1x1x16x16x32xbf16> to vector<16x16x32xbf16>
    %30 = vector.shape_cast %29 : vector<16x16x32xbf16> to vector<256x32xbf16>
    %c0_54 = arith.constant 0 : index
    %c2_55 = arith.constant 2 : index
    %c0_56 = arith.constant 0 : index
    %c0_57 = arith.constant 0 : index
    %31 = vector.load %arg3[%c0_54, %c2_55, %c0_56, %c0_57] : memref<3x3x32x32xbf16, #tpu.memory_space<vmem>>, vector<1x1x32x32xbf16>
    %32 = vector.shape_cast %31 : vector<1x1x32x32xbf16> to vector<32x32xbf16>
    %cst_58 = arith.constant dense<0.000000e+00> : vector<256x32xf32>
    %33 = tpu.matmul %30, %32, %cst_58 {dimension_numbers = #tpu.dot_dimension_numbers<[1], [0], [0], [1], [0, 0, 1, 1], [], []>} : vector<256x32xbf16>, vector<32x32xbf16>, vector<256x32xf32> -> vector<256x32xf32>
    %34 = vector.shape_cast %33 : vector<256x32xf32> to vector<16x16x32xf32>
    %c2_59 = arith.constant 2 : index
    %c0_60 = arith.constant 0 : index
    %c0_61 = arith.constant 0 : index
    %35 = vector.load %arg8[%c2_59, %c0_60, %c0_61] : memref<18x18x32xf32, #tpu.memory_space<vmem>>, vector<16x16x32xf32>
    %36 = arith.addf %35, %34 : vector<16x16x32xf32>
    %c2_62 = arith.constant 2 : index
    %c0_63 = arith.constant 0 : index
    %c0_64 = arith.constant 0 : index
    %37 = vector.load %arg8[%c2_62, %c0_63, %c0_64] : memref<18x18x32xf32, #tpu.memory_space<vmem>>, vector<16x16x32xf32>
    tpu.vector_store %arg8[%c2_62, %c0_63, %c0_64], %36 {strides = array<i32>} : memref<18x18x32xf32, #tpu.memory_space<vmem>>, vector<16x16x32xf32>,
    %c0_65 = arith.constant 0 : index
    %c0_66 = arith.constant 0 : index
    %c0_67 = arith.constant 0 : index
    %c0_68 = arith.constant 0 : index
    %c0_69 = arith.constant 0 : index
    %c0_70 = arith.constant 0 : index
    %c0_71 = arith.constant 0 : index
    %38 = vector.load %arg2[%c0_65, %c0_66, %c0_67, %c0_68, %c0_69, %c0_70, %c0_71] : memref<1x1x1x1x16x16x32xbf16, #tpu.memory_space<vmem>>, vector<1x1x1x1x16x16x32xbf16>
    %39 = vector.shape_cast %38 : vector<1x1x1x1x16x16x32xbf16> to vector<16x16x32xbf16>
    %40 = vector.shape_cast %39 : vector<16x16x32xbf16> to vector<256x32xbf16>
    %c1_72 = arith.constant 1 : index
    %c0_73 = arith.constant 0 : index
    %c0_74 = arith.constant 0 : index
    %c0_75 = arith.constant 0 : index
    %41 = vector.load %arg3[%c1_72, %c0_73, %c0_74, %c0_75] : memref<3x3x32x32xbf16, #tpu.memory_space<vmem>>, vector<1x1x32x32xbf16>
    %42 = vector.shape_cast %41 : vector<1x1x32x32xbf16> to vector<32x32xbf16>
    %cst_76 = arith.constant dense<0.000000e+00> : vector<256x32xf32>
    %43 = tpu.matmul %40, %42, %cst_76 {dimension_numbers = #tpu.dot_dimension_numbers<[1], [0], [0], [1], [0, 0, 1, 1], [], []>} : vector<256x32xbf16>, vector<32x32xbf16>, vector<256x32xf32> -> vector<256x32xf32>
    %44 = vector.shape_cast %43 : vector<256x32xf32> to vector<16x16x32xf32>
    %c1_77 = arith.constant 1 : index
    %c2_78 = arith.constant 2 : index
    %c0_79 = arith.constant 0 : index
    %45 = vector.load %arg8[%c1_77, %c2_78, %c0_79] : memref<18x18x32xf32, #tpu.memory_space<vmem>>, vector<16x16x32xf32>
    %46 = arith.addf %45, %44 : vector<16x16x32xf32>
    %c1_80 = arith.constant 1 : index
    %c2_81 = arith.constant 2 : index
    %c0_82 = arith.constant 0 : index
    %47 = vector.load %arg8[%c1_80, %c2_81, %c0_82] : memref<18x18x32xf32, #tpu.memory_space<vmem>>, vector<16x16x32xf32>
    tpu.vector_store %arg8[%c1_80, %c2_81, %c0_82], %46 {strides = array<i32>} : memref<18x18x32xf32, #tpu.memory_space<vmem>>, vector<16x16x32xf32>,
    %c0_83 = arith.constant 0 : index
    %c0_84 = arith.constant 0 : index
    %c0_85 = arith.constant 0 : index
    %c0_86 = arith.constant 0 : index
    %c0_87 = arith.constant 0 : index
    %c0_88 = arith.constant 0 : index
    %c0_89 = arith.constant 0 : index
    %48 = vector.load %arg2[%c0_83, %c0_84, %c0_85, %c0_86, %c0_87, %c0_88, %c0_89] : memref<1x1x1x1x16x16x32xbf16, #tpu.memory_space<vmem>>, vector<1x1x1x1x16x16x32xbf16>
    %49 = vector.shape_cast %48 : vector<1x1x1x1x16x16x32xbf16> to vector<16x16x32xbf16>
    %50 = vector.shape_cast %49 : vector<16x16x32xbf16> to vector<256x32xbf16>
    %c1_90 = arith.constant 1 : index
    %c2_91 = arith.constant 2 : index
    %c0_92 = arith.constant 0 : index
    %c0_93 = arith.constant 0 : index
    %51 = vector.load %arg3[%c1_90, %c2_91, %c0_92, %c0_93] : memref<3x3x32x32xbf16, #tpu.memory_space<vmem>>, vector<1x1x32x32xbf16>
    %52 = vector.shape_cast %51 : vector<1x1x32x32xbf16> to vector<32x32xbf16>
    %cst_94 = arith.constant dense<0.000000e+00> : vector<256x32xf32>
    %53 = tpu.matmul %50, %52, %cst_94 {dimension_numbers = #tpu.dot_dimension_numbers<[1], [0], [0], [1], [0, 0, 1, 1], [], []>} : vector<256x32xbf16>, vector<32x32xbf16>, vector<256x32xf32> -> vector<256x32xf32>
    %54 = vector.shape_cast %53 : vector<256x32xf32> to vector<16x16x32xf32>
    %c1_95 = arith.constant 1 : index
    %c0_96 = arith.constant 0 : index
    %c0_97 = arith.constant 0 : index
    %55 = vector.load %arg8[%c1_95, %c0_96, %c0_97] : memref<18x18x32xf32, #tpu.memory_space<vmem>>, vector<16x16x32xf32>
    %56 = arith.addf %55, %54 : vector<16x16x32xf32>
    %c1_98 = arith.constant 1 : index
    %c0_99 = arith.constant 0 : index
    %c0_100 = arith.constant 0 : index
    %57 = vector.load %arg8[%c1_98, %c0_99, %c0_100] : memref<18x18x32xf32, #tpu.memory_space<vmem>>, vector<16x16x32xf32>
    tpu.vector_store %arg8[%c1_98, %c0_99, %c0_100], %56 {strides = array<i32>} : memref<18x18x32xf32, #tpu.memory_space<vmem>>, vector<16x16x32xf32>,
    %c0_101 = arith.constant 0 : index
    %c0_102 = arith.constant 0 : index
    %c0_103 = arith.constant 0 : index
    %c0_104 = arith.constant 0 : index
    %c0_105 = arith.constant 0 : index
    %c0_106 = arith.constant 0 : index
    %c0_107 = arith.constant 0 : index
    %58 = vector.load %arg2[%c0_101, %c0_102, %c0_103, %c0_104, %c0_105, %c0_106, %c0_107] : memref<1x1x1x1x16x16x32xbf16, #tpu.memory_space<vmem>>, vector<1x1x1x1x16x16x32xbf16>
    %59 = vector.shape_cast %58 : vector<1x1x1x1x16x16x32xbf16> to vector<16x16x32xbf16>
    %60 = vector.shape_cast %59 : vector<16x16x32xbf16> to vector<256x32xbf16>
    %c2_108 = arith.constant 2 : index
    %c0_109 = arith.constant 0 : index
    %c0_110 = arith.constant 0 : index
    %c0_111 = arith.constant 0 : index
    %61 = vector.load %arg3[%c2_108, %c0_109, %c0_110, %c0_111] : memref<3x3x32x32xbf16, #tpu.memory_space<vmem>>, vector<1x1x32x32xbf16>
    %62 = vector.shape_cast %61 : vector<1x1x32x32xbf16> to vector<32x32xbf16>
    %cst_112 = arith.constant dense<0.000000e+00> : vector<256x32xf32>
    %63 = tpu.matmul %60, %62, %cst_112 {dimension_numbers = #tpu.dot_dimension_numbers<[1], [0], [0], [1], [0, 0, 1, 1], [], []>} : vector<256x32xbf16>, vector<32x32xbf16>, vector<256x32xf32> -> vector<256x32xf32>
    %64 = vector.shape_cast %63 : vector<256x32xf32> to vector<16x16x32xf32>
    %c0_113 = arith.constant 0 : index
    %c2_114 = arith.constant 2 : index
    %c0_115 = arith.constant 0 : index
    %65 = vector.load %arg8[%c0_113, %c2_114, %c0_115] : memref<18x18x32xf32, #tpu.memory_space<vmem>>, vector<16x16x32xf32>
    %66 = arith.addf %65, %64 : vector<16x16x32xf32>
    %c0_116 = arith.constant 0 : index
    %c2_117 = arith.constant 2 : index
    %c0_118 = arith.constant 0 : index
    %67 = vector.load %arg8[%c0_116, %c2_117, %c0_118] : memref<18x18x32xf32, #tpu.memory_space<vmem>>, vector<16x16x32xf32>
    tpu.vector_store %arg8[%c0_116, %c2_117, %c0_118], %66 {strides = array<i32>} : memref<18x18x32xf32, #tpu.memory_space<vmem>>, vector<16x16x32xf32>,
    %c0_119 = arith.constant 0 : index
    %c0_120 = arith.constant 0 : index
    %c0_121 = arith.constant 0 : index
    %c0_122 = arith.constant 0 : index
    %c0_123 = arith.constant 0 : index
    %c0_124 = arith.constant 0 : index
    %c0_125 = arith.constant 0 : index
    %68 = vector.load %arg2[%c0_119, %c0_120, %c0_121, %c0_122, %c0_123, %c0_124, %c0_125] : memref<1x1x1x1x16x16x32xbf16, #tpu.memory_space<vmem>>, vector<1x1x1x1x16x16x32xbf16>
    %69 = vector.shape_cast %68 : vector<1x1x1x1x16x16x32xbf16> to vector<16x16x32xbf16>
    %70 = vector.shape_cast %69 : vector<16x16x32xbf16> to vector<256x32xbf16>
    %c2_126 = arith.constant 2 : index
    %c1_127 = arith.constant 1 : index
    %c0_128 = arith.constant 0 : index
    %c0_129 = arith.constant 0 : index
    %71 = vector.load %arg3[%c2_126, %c1_127, %c0_128, %c0_129] : memref<3x3x32x32xbf16, #tpu.memory_space<vmem>>, vector<1x1x32x32xbf16>
    %72 = vector.shape_cast %71 : vector<1x1x32x32xbf16> to vector<32x32xbf16>
    %cst_130 = arith.constant dense<0.000000e+00> : vector<256x32xf32>
    %73 = tpu.matmul %70, %72, %cst_130 {dimension_numbers = #tpu.dot_dimension_numbers<[1], [0], [0], [1], [0, 0, 1, 1], [], []>} : vector<256x32xbf16>, vector<32x32xbf16>, vector<256x32xf32> -> vector<256x32xf32>
    %74 = vector.shape_cast %73 : vector<256x32xf32> to vector<16x16x32xf32>
    %c0_131 = arith.constant 0 : index
    %c1_132 = arith.constant 1 : index
    %c0_133 = arith.constant 0 : index
    %75 = vector.load %arg8[%c0_131, %c1_132, %c0_133] : memref<18x18x32xf32, #tpu.memory_space<vmem>>, vector<16x16x32xf32>
    %76 = arith.addf %75, %74 : vector<16x16x32xf32>
    %c0_134 = arith.constant 0 : index
    %c1_135 = arith.constant 1 : index
    %c0_136 = arith.constant 0 : index
    %77 = vector.load %arg8[%c0_134, %c1_135, %c0_136] : memref<18x18x32xf32, #tpu.memory_space<vmem>>, vector<16x16x32xf32>
    tpu.vector_store %arg8[%c0_134, %c1_135, %c0_136], %76 {strides = array<i32>} : memref<18x18x32xf32, #tpu.memory_space<vmem>>, vector<16x16x32xf32>,
    %c0_137 = arith.constant 0 : index
    %c0_138 = arith.constant 0 : index
    %c0_139 = arith.constant 0 : index
    %c0_140 = arith.constant 0 : index
    %c0_141 = arith.constant 0 : index
    %c0_142 = arith.constant 0 : index
    %c0_143 = arith.constant 0 : index
    %78 = vector.load %arg2[%c0_137, %c0_138, %c0_139, %c0_140, %c0_141, %c0_142, %c0_143] : memref<1x1x1x1x16x16x32xbf16, #tpu.memory_space<vmem>>, vector<1x1x1x1x16x16x32xbf16>
    %79 = vector.shape_cast %78 : vector<1x1x1x1x16x16x32xbf16> to vector<16x16x32xbf16>
    %80 = vector.shape_cast %79 : vector<16x16x32xbf16> to vector<256x32xbf16>
    %c2_144 = arith.constant 2 : index
    %c2_145 = arith.constant 2 : index
    %c0_146 = arith.constant 0 : index
    %c0_147 = arith.constant 0 : index
    %81 = vector.load %arg3[%c2_144, %c2_145, %c0_146, %c0_147] : memref<3x3x32x32xbf16, #tpu.memory_space<vmem>>, vector<1x1x32x32xbf16>
    %82 = vector.shape_cast %81 : vector<1x1x32x32xbf16> to vector<32x32xbf16>
    %cst_148 = arith.constant dense<0.000000e+00> : vector<256x32xf32>
    %83 = tpu.matmul %80, %82, %cst_148 {dimension_numbers = #tpu.dot_dimension_numbers<[1], [0], [0], [1], [0, 0, 1, 1], [], []>} : vector<256x32xbf16>, vector<32x32xbf16>, vector<256x32xf32> -> vector<256x32xf32>
    %84 = vector.shape_cast %83 : vector<256x32xf32> to vector<16x16x32xf32>
    %c0_149 = arith.constant 0 : index
    %c0_150 = arith.constant 0 : index
    %c0_151 = arith.constant 0 : index
    %85 = vector.load %arg8[%c0_149, %c0_150, %c0_151] : memref<18x18x32xf32, #tpu.memory_space<vmem>>, vector<16x16x32xf32>
    %86 = arith.addf %85, %84 : vector<16x16x32xf32>
    %c0_152 = arith.constant 0 : index
    %c0_153 = arith.constant 0 : index
    %c0_154 = arith.constant 0 : index
    %87 = vector.load %arg8[%c0_152, %c0_153, %c0_154] : memref<18x18x32xf32, #tpu.memory_space<vmem>>, vector<16x16x32xf32>
    tpu.vector_store %arg8[%c0_152, %c0_153, %c0_154], %86 {strides = array<i32>} : memref<18x18x32xf32, #tpu.memory_space<vmem>>, vector<16x16x32xf32>,
    %c1_155 = arith.constant 1 : index
    %c1_156 = arith.constant 1 : index
    %c0_157 = arith.constant 0 : index
    %88 = vector.load %arg8[%c1_155, %c1_156, %c0_157] : memref<18x18x32xf32, #tpu.memory_space<vmem>>, vector<16x16x32xf32>
    %c0_158 = arith.constant 0 : index
    %c0_159 = arith.constant 0 : index
    %89 = vector.load %arg4[%c0_158, %c0_159] : memref<1x32xf32, #tpu.memory_space<vmem>>, vector<1x32xf32>
    %90 = vector.shape_cast %89 : vector<1x32xf32> to vector<1x1x32xf32>
    %91 = vector.broadcast %90 : vector<1x1x32xf32> to vector<16x16x32xf32>
    %92 = arith.addf %88, %91 : vector<16x16x32xf32>
    %cst_160 = arith.constant 0.000000e+00 : f32
    %93 = vector.broadcast %cst_160 : f32 to vector<16x16x32xf32>
    %94 = arith.maximumf %92, %93 : vector<16x16x32xf32>
    %95 = arith.truncf %94 : vector<16x16x32xf32> to vector<16x16x32xbf16>
    %96 = vector.shape_cast %95 : vector<16x16x32xbf16> to vector<256x32xbf16>
    %c0_161 = arith.constant 0 : index
    %c0_162 = arith.constant 0 : index
    %97 = vector.load %arg5[%c0_161, %c0_162] : memref<32x128xbf16, #tpu.memory_space<vmem>>, vector<32x128xbf16>
    %cst_163 = arith.constant dense<0.000000e+00> : vector<256x128xf32>
    %98 = tpu.matmul %96, %97, %cst_163 {dimension_numbers = #tpu.dot_dimension_numbers<[1], [0], [0], [1], [0, 0, 1, 1], [], []>} : vector<256x32xbf16>, vector<32x128xbf16>, vector<256x128xf32> -> vector<256x128xf32>
    %c0_164 = arith.constant 0 : index
    %c0_165 = arith.constant 0 : index
    %99 = vector.load %arg6[%c0_164, %c0_165] : memref<1x128xf32, #tpu.memory_space<vmem>>, vector<1x128xf32>
    %100 = vector.broadcast %99 : vector<1x128xf32> to vector<256x128xf32>
    %101 = arith.addf %98, %100 : vector<256x128xf32>
    %102 = arith.truncf %101 : vector<256x128xf32> to vector<256x128xbf16>
    %c0_166 = arith.constant 0 : index
    %c0_167 = arith.constant 0 : index
    %c0_168 = arith.constant 0 : index
    %c0_169 = arith.constant 0 : index
    %103 = vector.load %arg7[%c0_166, %c0_167, %c0_168, %c0_169] : memref<1x1x256x128xbf16, #tpu.memory_space<vmem>>, vector<1x1x256x128xbf16>
    %104 = vector.shape_cast %103 : vector<1x1x256x128xbf16> to vector<256x128xbf16>
    %105 = vector.shape_cast %102 : vector<256x128xbf16> to vector<1x1x256x128xbf16>
    tpu.vector_store %arg7[%c0_166, %c0_167, %c0_168, %c0_169], %105 {strides = array<i32>} : memref<1x1x256x128xbf16, #tpu.memory_space<vmem>>, vector<1x1x256x128xbf16>,
    return
  }
  func.func @transform_0(%arg0: i32, %arg1: i32) -> (i32, i32, i32, i32, i32, i32, i32) {
    %c0_i32 = arith.constant 0 : i32
    %c0_i32_0 = arith.constant 0 : i32
    %c0_i32_1 = arith.constant 0 : i32
    %c0_i32_2 = arith.constant 0 : i32
    %c0_i32_3 = arith.constant 0 : i32
    %c0_i32_4 = arith.constant 0 : i32
    return %arg0, %arg1, %c0_i32, %c0_i32_0, %c0_i32_1, %c0_i32_2, %c0_i32_3 : i32, i32, i32, i32, i32, i32, i32
  }
  func.func @transform_1(%arg0: i32, %arg1: i32) -> (i32, i32, i32, i32) {
    %c0_i32 = arith.constant 0 : i32
    %c0_i32_0 = arith.constant 0 : i32
    %c0_i32_1 = arith.constant 0 : i32
    %c0_i32_2 = arith.constant 0 : i32
    %c0_i32_3 = arith.constant 0 : i32
    return %c0_i32, %c0_i32_0, %c0_i32_1, %c0_i32_2 : i32, i32, i32, i32
  }
  func.func @transform_2(%arg0: i32, %arg1: i32) -> (i32, i32) {
    %c0_i32 = arith.constant 0 : i32
    %c0_i32_0 = arith.constant 0 : i32
    %c0_i32_1 = arith.constant 0 : i32
    return %c0_i32, %c0_i32_0 : i32, i32
  }
  func.func @transform_3(%arg0: i32, %arg1: i32) -> (i32, i32) {
    %c0_i32 = arith.constant 0 : i32
    %c0_i32_0 = arith.constant 0 : i32
    %c0_i32_1 = arith.constant 0 : i32
    return %c0_i32, %c0_i32_0 : i32, i32
  }
  func.func @transform_4(%arg0: i32, %arg1: i32) -> (i32, i32) {
    %c0_i32 = arith.constant 0 : i32
    %c0_i32_0 = arith.constant 0 : i32
    %c0_i32_1 = arith.constant 0 : i32
    return %c0_i32, %c0_i32_0 : i32, i32
  }
  func.func @transform_5(%arg0: i32, %arg1: i32) -> (i32, i32, i32, i32) {
    %c0_i32 = arith.constant 0 : i32
    %c0_i32_0 = arith.constant 0 : i32
    %c0_i32_1 = arith.constant 0 : i32
    return %arg0, %arg1, %c0_i32, %c0_i32_0 : i32, i32, i32, i32
  }
}

</mosaic_0001>

<bundles_post_ra>
// kernel: bottleneck_transform_forward.3
= control target key start
LH: loop header
LB: loop body
LE: loop exit
PB: predicated region body
PF: predicated region fallthrough
CT: control target
= control target key end

     0   :  { %10 = vsyncpa [#allocation4], 0  ;;  %s6250_s0 = inlined_call_operand.vmem [shape: bf16[2,4,1,1,16,16,32], index: 0, kind: input, shape index: {}]   ;;  %s6251_s1 = inlined_call_operand.vmem [shape: bf16[3,3,32,32], index: 1, kind: input, shape index: {}]   ;;  %s6252_s2 = inlined_call_operand.vmem [shape: f32[1,32], index: 2, kind: input, shape index: {}]   ;;  %s6253_s3 = inlined_call_operand.vmem [shape: bf16[32,128], index: 3, kind: input, shape index: {}]   ;;  %s6254_s4 = inlined_call_operand.vmem [shape: f32[1,128], index: 4, kind: input, shape index: {}]   ;;  %s6255_s5 = inlined_call_operand.hbm [shape: bf16[2,4,256,128], index: 5, kind: output, shape index: {}]  }
   0x1   :  { %12 = vsyncpa [#allocation4 + $0x1], 0  ;;  %s5314_s18 = smov 0   ;;  %s5316_s19 = smov 0  }
   0x2   :  { %s5318_s20 = smov 0   ;;  %s5320_s21 = smov 0  }
   0x3   :  { %s5322_s22 = smov 0   ;;  %s5324_s23 = smov 0  }
   0x4   :  { %s5326_s24 = smov 0   ;;  %s5328_s25 = smov 0  }
   0x5 LB: > { %s3984_s26 = sadd.s32 4294967295, %s5280_s25   ;;  %s3985_s27 = sadd.s32 4294967294, %s5280_s25   ;;  %s5280_s25 = sphi %s5328_s25, %s18_s25   ;;  %s5276_s24 = sphi %s5326_s24, %s6267_s24   ;;  %s5272_s23 = sphi %s5324_s23, %s6266_s23   ;;  %s5268_s22 = sphi %s5322_s22, %s6265_s22   ;;  %s5264_s21 = sphi %s5320_s21, %s6264_s21   ;;  %s5260_s20 = sphi %s5318_s20, %s6263_s20   ;;  %s5256_s19 = sphi %s5316_s19, %s6262_s19   ;;  %s5252_s18 = sphi %s5314_s18, %s6261_s18  }
   0x6   : > { %s27_s28 = sadd.s32 1, %s5272_s23  ;;  %s30_s29 = sadd.s32 1, %s5276_s24 }
   0x7   : > { %p28_p0 = scmp.ge.s32.totalorder %s27_s28, 4  ;;  %p161_p1 = scmp.ne.s32.totalorder %s5260_s20, %s5256_s19 }
   0x8   : > { %p162_p2 = scmp.eq.s32.totalorder %s3984_s26, 7  ;;  %p167_p5 = scmp.ne.s32.totalorder %s5256_s19, %s5252_s18 }
   0x9   : > { %s6269_s28 = smov (%p28_p0, %s27_s28), 0  ;;  %s6271_s29 = smov (!%p28_p0, %s30_s29), %s5276_s24 }
   0xa   : > { %s147_s30 = ssub.s32 %s5272_s23, %s6269_s28  ;;  %p5365_p3 = por %p162_p2, %p161_p1 }
   0xb   : > { %p32_p4 = scmp.ge.s32.totalorder %s6271_s29, 2  ;;  %p168_p6 = scmp.eq.s32.totalorder %s3985_s27, 7 }
   0xc   : > { %p3988_p7 = scmp.ge.s32.totalorder %s5280_s25, 1  ;;  %p210_p9 = scmp.lt.s32.totalorder %s5280_s25, 9 }
   0xd   : > { %s6273_s29 = smov (%p32_p4, %s6271_s29), 0  ;;  %p5374_p8 = por %p168_p6, %p167_p5 }
   0xe   : > { %6258 = sst [smem:[#allocation6_spill]] %s6273_s29  ;;  %s146_s8 = ssub.s32 %s5276_s24, %s6273_s29 }
   0xf   : > { %s151_s9 = sadd.s32 1, %s5260_s20  ;;  %s148_s10 = sor.u32 %s147_s30, %s146_s8 }
  0x10   : > { %p211_p10 = pnand %p3988_p7, %p210_p9  ;;  %p149_p11 = scmp.eq.s32.totalorder %s148_s10, 0 }
  0x11   : > { %p242_p12 = scmp.lt.s32.totalorder (!%p211_p10), %s5268_s22, 1  ;;  %p244_p13 = scmp.lt.s32.totalorder (!%p211_p10), %s5264_s21, 3 }
  0x12   : > { %s5383_s11 = scalar_select %p149_p11, %s5260_s20, %s151_s9  }
  0x13   : > { %214 = sbr.rel (%p211_p10) target bundleno = 997 (0x3e5), region = 40  ;;  %s4843_s30 = sshll.u32 (!%p211_p10), %s5268_s22, 7 }
  0x18   : > { %v4864_v0 = vld [vmem:[%s6251_s1 + $0x48] sm:$0xff]  ;;  %v4863_v2 = vld [vmem:[%s6251_s1 + $0x40] sm:$0xff]  ;;  %s243_s26 = scalar_select %p242_p12, %s5268_s22, 1  ;;  %v4900_v4 = vld [vmem:[%s6251_s1 + $0x18] sm:$0xff]  ;;  %vm381_vm0 = vcmask 261120  }
  0x19   : > { %v4882_v1 = vld [vmem:[%s6251_s1 + $0x8] sm:$0xff]  ;;  %436 = vmatpush.bf16.msra.mxu0 %v4864_v0  ;;  %5106 = vmatpush.bf16.msra.mxu2 %v4864_v0  ;;  %v4881_v3 = vld [vmem:[%s6251_s1] sm:$0xff]  ;;  %s245_s8 = scalar_select %p244_p13, %s5264_s21, 3  ;;  %v4936_v6 = vld [vmem:[%s6251_s1 + $0x38] sm:$0xff] }
  0x1a   : > { %734 = vmatpush.bf16.msra.mxu1 %v4882_v1  ;;  %5108 = vmatpush.bf16.msra.mxu3 %v4882_v1  ;;  %s3991_s9 = sshll.u32 %s243_s26, 7  ;;  %v4918_v5 = vld [vmem:[%s6251_s1 + $0x28] sm:$0xff]  ;;  %v4899_v19 = vld [vmem:[%s6251_s1 + $0x10] sm:$0xff]  ;;  %v4917_v20 = vld [vmem:[%s6251_s1 + $0x20] sm:$0xff]  ;;  %s4842_s26 = sshll.u32 %s5264_s21, 5 }
  0x1b   : > { %s3990_s15 = sshll.u32 %s245_s8, 5  ;;  %v4935_v25 = vld [vmem:[%s6251_s1 + $0x30] sm:$0xff]  ;;  %v4972_v38 = vld [vmem:[%s6251_s1 + $0x68] sm:$0xff]  ;;  %v4954_v39 = vld [vmem:[%s6251_s1 + $0x58] sm:$0xff] }
  0x1c   : > { %s248_s29 = sadd.s32 %s3991_s9, %s3990_s15  ;;  %v4953_v40 = vld [vmem:[%s6251_s1 + $0x50] sm:$0xff]  ;;  %v4990_v41 = vld [vmem:[%s6251_s1 + $0x78] sm:$0xff]  ;;  %v5008_v52 = vld [vmem:[%s6251_s1 + $0x88] sm:$0xff] }
  0x1d   : > { %437 = vmatpush.bf16.msra.mxu0 %v4863_v2  ;;  %5107 = vmatpush.bf16.msra.mxu2 %v4863_v2  ;;  %s3992_s27 = sshll.u32 %s248_s29, 2  ;;  %s3893_s29 = sadd.s32 %s4843_s30, %s4842_s26 }
  0x1e   : > { %735 = vmatpush.bf16.msra.mxu1 %v4881_v3  ;;  %5109 = vmatpush.bf16.msra.mxu3 %v4881_v3  ;;  %s5413_s10 = scalar_lea.vmem %s6250_s0, %s3992_s27  ;;  %s4844_s8 = sshll.u32 %s3893_s29, 2 }
  0x1f   : > { %v4847_v7 = vld [vmem:[%s5413_s10] sm:$0xff]  ;;  %v4848_v11 = vld [vmem:[%s5413_s10 + $0x8] sm:$0xff]  ;;  %v4849_v15 = vld [vmem:[%s5413_s10 + $0x10] sm:$0xff]  ;;  %s3895_s13 = scalar_lea.hbm %s6255_s5, %s4844_s8  ;;  %s5206_s30 = scalar_lea.hbm %s6255_s5, 1024 }
  0x20   : > { %v4855_v8 = vld [vmem:[%s5413_s10 + $0x40] sm:$0xff]  ;;  %4069 = vmatmul.msk.bf16.vlgmr.msra.gmra.mxu0 %vm381_vm0, %v4847_v7  ;;  %v4856_v12 = vld [vmem:[%s5413_s10 + $0x48] sm:$0xff]  ;;  %v4857_v16 = vld [vmem:[%s5413_s10 + $0x50] sm:$0xff] }
  0x21   : > { %1097 = vmatpush.bf16.msrb.mxu2 %v4900_v4  ;;  %v4865_v9 = vld [vmem:[%s5413_s10] sm:$0xff]  ;;  %1821 = vmatpush.bf16.msrb.mxu0 %v4936_v6  ;;  %v4866_v13 = vld [vmem:[%s5413_s10 + $0x8] sm:$0xff]  ;;  %v4867_v17 = vld [vmem:[%s5413_s10 + $0x10] sm:$0xff] }
  0x22   : > { %1459 = vmatpush.bf16.msrb.mxu3 %v4918_v5  ;;  %v4873_v10 = vld [vmem:[%s5413_s10 + $0x40] sm:$0xff]  ;;  %4077 = vmatmul.msk.bf16.vlgmr.msra.gmra.mxu2 %vm381_vm0, %v4855_v8  ;;  %v4874_v14 = vld [vmem:[%s5413_s10 + $0x48] sm:$0xff]  ;;  %v4875_v18 = vld [vmem:[%s5413_s10 + $0x50] sm:$0xff] }
  0x23   : > { %4157 = vmatmul.msk.bf16.vlgmr.msra.gmra.mxu1 %vm381_vm0, %v4865_v9  ;;  %4165 = vmatmul.msk.bf16.vlgmr.msra.gmra.mxu3 %vm381_vm0, %v4873_v10  ;;  %v4850_v21 = vld [vmem:[%s5413_s10 + $0x18] sm:$0xff]  ;;  %v4851_v26 = vld [vmem:[%s5413_s10 + $0x20] sm:$0xff]  ;;  %v4852_v30 = vld [vmem:[%s5413_s10 + $0x28] sm:$0xff] }
  0x24   : > { %v4858_v22 = vld [vmem:[%s5413_s10 + $0x58] sm:$0xff]  ;;  %v4859_v27 = vld [vmem:[%s5413_s10 + $0x60] sm:$0xff]  ;;  %v4860_v31 = vld [vmem:[%s5413_s10 + $0x68] sm:$0xff]  ;;  %2183 = vmatpush.bf16.msrb.mxu1 %v4954_v39 }
  0x25   : > { %1098 = vmatpush.bf16.msrb.mxu2 %v4899_v19  ;;  %v4868_v23 = vld [vmem:[%s5413_s10 + $0x18] sm:$0xff]  ;;  %1822 = vmatpush.bf16.msrb.mxu0 %v4935_v25  ;;  %v4869_v28 = vld [vmem:[%s5413_s10 + $0x20] sm:$0xff]  ;;  %v4870_v32 = vld [vmem:[%s5413_s10 + $0x28] sm:$0xff] }
  0x26   : > { %1460 = vmatpush.bf16.msrb.mxu3 %v4917_v20  ;;  %v4876_v24 = vld [vmem:[%s5413_s10 + $0x58] sm:$0xff]  ;;  %v4877_v29 = vld [vmem:[%s5413_s10 + $0x60] sm:$0xff]  ;;  %v4878_v33 = vld [vmem:[%s5413_s10 + $0x68] sm:$0xff] }
  0x27   : > { %v4853_v34 = vld [vmem:[%s5413_s10 + $0x30] sm:$0xff]  ;;  %v4854_v42 = vld [vmem:[%s5413_s10 + $0x38] sm:$0xff]  ;;  %v4883_v46 = vld [vmem:[%s5413_s10] sm:$0xff] }
  0x28   : > { %v4861_v35 = vld [vmem:[%s5413_s10 + $0x70] sm:$0xff]  ;;  %2184 = vmatpush.bf16.msrb.mxu1 %v4953_v40  ;;  %v4862_v43 = vld [vmem:[%s5413_s10 + $0x78] sm:$0xff]  ;;  %v4919_v47 = vld [vmem:[%s5413_s10] sm:$0xff] }
  0x29   : > { %v4871_v36 = vld [vmem:[%s5413_s10 + $0x30] sm:$0xff]  ;;  %2545 = vmatpush.bf16.msra.mxu2 %v4972_v38  ;;  %v4872_v44 = vld [vmem:[%s5413_s10 + $0x38] sm:$0xff]  ;;  %v4901_v49 = vld [vmem:[%s5413_s10] sm:$0xff]  ;;  %3269 = vmatpush.bf16.msra.mxu0 %v5008_v52 }
  0x2a   : > { %v4879_v37 = vld [vmem:[%s5413_s10 + $0x70] sm:$0xff]  ;;  %2907 = vmatpush.bf16.msra.mxu3 %v4990_v41  ;;  %v4880_v45 = vld [vmem:[%s5413_s10 + $0x78] sm:$0xff]  ;;  %v4937_v50 = vld [vmem:[%s5413_s10] sm:$0xff] }
  0x2b   : > { %v4884_v59 = vld [vmem:[%s5413_s10 + $0x8] sm:$0xff]  ;;  %v4885_v7 = vld [vmem:[%s5413_s10 + $0x10] sm:$0xff] }
  0x2c   : > { %v4920_v60 = vld [vmem:[%s5413_s10 + $0x8] sm:$0xff]  ;;  %v4903_v8 = vld [vmem:[%s5413_s10 + $0x10] sm:$0xff] }
  0x2d   : > { %v4902_v62 = vld [vmem:[%s5413_s10 + $0x8] sm:$0xff]  ;;  %v4921_v9 = vld [vmem:[%s5413_s10 + $0x10] sm:$0xff] }
  0x2e   : > { %v4938_v63 = vld [vmem:[%s5413_s10 + $0x8] sm:$0xff] }
  0x30   : > { %4070 = vmatmul.msk.bf16.gmra.mxu0 %vm381_vm0, %v4848_v11 }
  0x32   : > { %4078 = vmatmul.msk.bf16.gmra.mxu2 %vm381_vm0, %v4856_v12 }
  0x33   : > { %4158 = vmatmul.msk.bf16.gmra.mxu1 %vm381_vm0, %v4866_v13  ;;  %4166 = vmatmul.msk.bf16.gmra.mxu3 %vm381_vm0, %v4874_v14  ;;  %v4939_v13 = vld [vmem:[%s5413_s10 + $0x10] sm:$0xff] }
  0x40   : > { %4071 = vmatmul.msk.bf16.gmra.mxu0 %vm381_vm0, %v4849_v15 }
  0x42   : > { %4079 = vmatmul.msk.bf16.gmra.mxu2 %vm381_vm0, %v4857_v16 }
  0x43   : > { %4159 = vmatmul.msk.bf16.gmra.mxu1 %vm381_vm0, %v4867_v17  ;;  %4167 = vmatmul.msk.bf16.gmra.mxu3 %vm381_vm0, %v4875_v18 }
  0x50   : > { %4072 = vmatmul.msk.bf16.gmra.mxu0 %vm381_vm0, %v4850_v21 }
  0x52   : > { %4080 = vmatmul.msk.bf16.gmra.mxu2 %vm381_vm0, %v4858_v22 }
  0x53   : > { %4160 = vmatmul.msk.bf16.gmra.mxu1 %vm381_vm0, %v4868_v23  ;;  %4168 = vmatmul.msk.bf16.gmra.mxu3 %vm381_vm0, %v4876_v24 }
  0x60   : > { %4073 = vmatmul.msk.bf16.gmra.mxu0 %vm381_vm0, %v4851_v26 }
  0x62   : > { %4081 = vmatmul.msk.bf16.gmra.mxu2 %vm381_vm0, %v4859_v27  ;;  %v4886_v27 = vld [vmem:[%s5413_s10 + $0x18] sm:$0xff] }
  0x63   : > { %4161 = vmatmul.msk.bf16.gmra.mxu1 %vm381_vm0, %v4869_v28  ;;  %4169 = vmatmul.msk.bf16.gmra.mxu3 %vm381_vm0, %v4877_v29  ;;  %v4922_v28 = vld [vmem:[%s5413_s10 + $0x18] sm:$0xff] }
  0x70   : > { %4074 = vmatmul.msk.bf16.gmra.mxu0 %vm381_vm0, %v4852_v30  ;;  %v4904_v30 = vld [vmem:[%s5413_s10 + $0x18] sm:$0xff] }
  0x72   : > { %4082 = vmatmul.msk.bf16.gmra.mxu2 %vm381_vm0, %v4860_v31  ;;  %v4940_v31 = vld [vmem:[%s5413_s10 + $0x18] sm:$0xff] }
  0x73   : > { %4162 = vmatmul.msk.bf16.gmra.mxu1 %vm381_vm0, %v4870_v32  ;;  %4170 = vmatmul.msk.bf16.gmra.mxu3 %vm381_vm0, %v4878_v33 }
  0x80   : > { %4075 = vmatmul.msk.bf16.gmra.mxu0 %vm381_vm0, %v4853_v34 }
  0x82   : > { %4083 = vmatmul.msk.bf16.gmra.mxu2 %vm381_vm0, %v4861_v35 }
  0x83   : > { %4163 = vmatmul.msk.bf16.gmra.mxu1 %vm381_vm0, %v4871_v36  ;;  %4171 = vmatmul.msk.bf16.gmra.mxu3 %vm381_vm0, %v4879_v37 }
  0x90   : > { %4076 = vmatmul.msk.bf16.gmra.mxu0 %vm381_vm0, %v4854_v42 }
  0x92   : > { %4084 = vmatmul.msk.bf16.gmra.mxu2 %vm381_vm0, %v4862_v43 }
  0x93   : > { %4164 = vmatmul.msk.bf16.gmra.mxu1 %vm381_vm0, %v4872_v44  ;;  %4172 = vmatmul.msk.bf16.gmra.mxu3 %vm381_vm0, %v4880_v45 }
  0x9d   : > { %v439_v48 = vpop.f32.mrf.mxu0 }
  0x9e   : > { %520 = vst.msk [vmem:[#allocation2 + $0x19] sm:$0xff] %vm381_vm0, %v439_v48  ;;  %v4923_v48 = vld [vmem:[%s5413_s10 + $0x20] sm:$0xff] }
  0xa0   : > { %v737_v51 = vpop.f32.mrf.mxu1  ;;  %4433 = vmatmul.msk.bf16.vlgmr.msrb.gmra.mxu0 %vm381_vm0, %v4919_v47  ;;  %v4887_v47 = vld [vmem:[%s5413_s10 + $0x20] sm:$0xff] }
  0xa2   : > { %4249 = vmatmul.msk.bf16.vlgmr.msrb.gmra.mxu2 %vm381_vm0, %v4883_v46 }
  0xa3   : > { %4341 = vmatmul.msk.bf16.vlgmr.msrb.gmra.mxu3 %vm381_vm0, %v4901_v49  ;;  %4525 = vmatmul.msk.bf16.vlgmr.msrb.gmra.mxu1 %vm381_vm0, %v4937_v50  ;;  %v4905_v50 = vld [vmem:[%s5413_s10 + $0x20] sm:$0xff] }
  0xa5   : > { %v479_v53 = vpop.f32.mrf.mxu2  ;;  %v441_v55 = vpop.f32.mrf.mxu0 }
  0xa6   : > { %536 = vst.msk [vmem:[#allocation2 + $0xd9] sm:$0xff] %vm381_vm0, %v479_v53  ;;  %v777_v54 = vpop.f32.mrf.mxu3 }
  0xa7   : > { %521 = vst.msk [vmem:[#allocation2 + $0x21] sm:$0xff] %vm381_vm0, %v441_v55 }
  0xa8   : > { %v739_v56 = vpop.f32.mrf.mxu1 }
  0xad   : > { %v481_v57 = vpop.f32.mrf.mxu2  ;;  %v444_v61 = vpop.f32.mrf.mxu0 }
  0xae   : > { %537 = vst.msk [vmem:[#allocation2 + $0xe1] sm:$0xff] %vm381_vm0, %v481_v57  ;;  %v779_v58 = vpop.f32.mrf.mxu3 }
  0xaf   : > { %522 = vst.msk [vmem:[#allocation2 + $0x31] sm:$0xff] %vm381_vm0, %v444_v61 }
  0xb0   : > { %v742_v0 = vpop.f32.mrf.mxu1  ;;  %4434 = vmatmul.msk.bf16.gmra.mxu0 %vm381_vm0, %v4920_v60 }
  0xb2   : > { %4250 = vmatmul.msk.bf16.gmra.mxu2 %vm381_vm0, %v4884_v59 }
  0xb3   : > { %4342 = vmatmul.msk.bf16.gmra.mxu3 %vm381_vm0, %v4902_v62  ;;  %4526 = vmatmul.msk.bf16.gmra.mxu1 %vm381_vm0, %v4938_v63 }
  0xb5   : > { %v484_v1 = vpop.f32.mrf.mxu2  ;;  %v446_v3 = vpop.f32.mrf.mxu0 }
  0xb6   : > { %538 = vst.msk [vmem:[#allocation2 + $0xf1] sm:$0xff] %vm381_vm0, %v484_v1  ;;  %v782_v2 = vpop.f32.mrf.mxu3 }
  0xb7   : > { %523 = vst.msk [vmem:[#allocation2 + $0x39] sm:$0xff] %vm381_vm0, %v446_v3  ;;  %v4888_v3 = vld [vmem:[%s5413_s10 + $0x28] sm:$0xff] }
  0xb8   : > { %v744_v4 = vpop.f32.mrf.mxu1 }
  0xbd   : > { %v486_v5 = vpop.f32.mrf.mxu2  ;;  %v449_v12 = vpop.f32.mrf.mxu0 }
  0xbe   : > { %539 = vst.msk [vmem:[#allocation2 + $0xf9] sm:$0xff] %vm381_vm0, %v486_v5  ;;  %v784_v6 = vpop.f32.mrf.mxu3  ;;  %v818_v10 = vld [vmem:[#allocation2 + $0x32] sm:$0xff]  ;;  %v819_v11 = vld [vmem:[#allocation2 + $0x3a] sm:$0xff] }
  0xbf   : > { %v850_v14 = vadd.f32 %v818_v10, %v737_v51  ;;  %v851_v15 = vadd.f32 %v819_v11, %v739_v56  ;;  %524 = vst.msk [vmem:[#allocation2 + $0x49] sm:$0xff] %vm381_vm0, %v449_v12  ;;  %v4941_v51 = vld [vmem:[%s5413_s10 + $0x20] sm:$0xff] }
  0xc0   : > { %v5532_v16 = vpop.f32.mrf.mxu1  ;;  %4435 = vmatmul.msk.bf16.gmra.mxu0 %vm381_vm0, %v4921_v9 }
  0xc1   : > { %882 = vst.msk [vmem:[#allocation2 + $0x32] sm:$0xff] %vm381_vm0, %v850_v14 }
  0xc2   : > { %4251 = vmatmul.msk.bf16.gmra.mxu2 %vm381_vm0, %v4885_v7  ;;  %883 = vst.msk [vmem:[#allocation2 + $0x3a] sm:$0xff] %vm381_vm0, %v851_v15  ;;  %v4942_v7 = vld [vmem:[%s5413_s10 + $0x28] sm:$0xff] }
  0xc3   : > { %4343 = vmatmul.msk.bf16.gmra.mxu3 %vm381_vm0, %v4903_v8  ;;  %4527 = vmatmul.msk.bf16.gmra.mxu1 %vm381_vm0, %v4939_v13 }
  0xc5   : > { %v834_v17 = vld [vmem:[#allocation2 + $0xf2] sm:$0xff]  ;;  %v835_v18 = vld [vmem:[#allocation2 + $0xfa] sm:$0xff]  ;;  %v489_v19 = vpop.f32.mrf.mxu2  ;;  %v451_v23 = vpop.f32.mrf.mxu0 }
  0xc6   : > { %v866_v20 = vadd.f32 %v834_v17, %v777_v54  ;;  %v867_v21 = vadd.f32 %v835_v18, %v779_v58  ;;  %540 = vst.msk [vmem:[#allocation2 + $0x109] sm:$0xff] %vm381_vm0, %v489_v19  ;;  %v787_v22 = vpop.f32.mrf.mxu3 }
  0xc7   : > { %525 = vst.msk [vmem:[#allocation2 + $0x51] sm:$0xff] %vm381_vm0, %v451_v23  ;;  %v4889_v23 = vld [vmem:[%s5413_s10 + $0x30] sm:$0xff] }
  0xc8   : > { %898 = vst.msk [vmem:[#allocation2 + $0xf2] sm:$0xff] %vm381_vm0, %v866_v20  ;;  %v749_v24 = vpop.f32.mrf.mxu1 }
  0xc9   : > { %899 = vst.msk [vmem:[#allocation2 + $0xfa] sm:$0xff] %vm381_vm0, %v867_v21 }
  0xcd   : > { %v491_v25 = vpop.f32.mrf.mxu2  ;;  %v454_v29 = vpop.f32.mrf.mxu0 }
  0xce   : > { %541 = vst.msk [vmem:[#allocation2 + $0x111] sm:$0xff] %vm381_vm0, %v491_v25  ;;  %v789_v26 = vpop.f32.mrf.mxu3  ;;  %v820_v33 = vld [vmem:[#allocation2 + $0x4a] sm:$0xff]  ;;  %v821_v34 = vld [vmem:[#allocation2 + $0x52] sm:$0xff] }
  0xcf   : > { %526 = vst.msk [vmem:[#allocation2 + $0x61] sm:$0xff] %vm381_vm0, %v454_v29  ;;  %v852_v35 = vadd.f32 %v820_v33, %v742_v0  ;;  %v853_v36 = vadd.f32 %v821_v34, %v744_v4  ;;  %v4924_v4 = vld [vmem:[%s5413_s10 + $0x28] sm:$0xff] }
  0xd0   : > { %v5550_v32 = vpop.f32.mrf.mxu1  ;;  %4436 = vmatmul.msk.bf16.gmra.mxu0 %vm381_vm0, %v4922_v28 }
  0xd1   : > { %884 = vst.msk [vmem:[#allocation2 + $0x4a] sm:$0xff] %vm381_vm0, %v852_v35 }
  0xd2   : > { %4252 = vmatmul.msk.bf16.gmra.mxu2 %vm381_vm0, %v4886_v27  ;;  %885 = vst.msk [vmem:[#allocation2 + $0x52] sm:$0xff] %vm381_vm0, %v853_v36  ;;  %v4943_v27 = vld [vmem:[%s5413_s10 + $0x30] sm:$0xff] }
  0xd3   : > { %4344 = vmatmul.msk.bf16.gmra.mxu3 %vm381_vm0, %v4904_v30  ;;  %4528 = vmatmul.msk.bf16.gmra.mxu1 %vm381_vm0, %v4940_v31 }
  0xd5   : > { %v836_v37 = vld [vmem:[#allocation2 + $0x10a] sm:$0xff]  ;;  %v837_v38 = vld [vmem:[#allocation2 + $0x112] sm:$0xff]  ;;  %v494_v39 = vpop.f32.mrf.mxu2  ;;  %v456_v43 = vpop.f32.mrf.mxu0 }
  0xd6   : > { %v868_v40 = vadd.f32 %v836_v37, %v782_v2  ;;  %v869_v41 = vadd.f32 %v837_v38, %v784_v6  ;;  %542 = vst.msk [vmem:[#allocation2 + $0x121] sm:$0xff] %vm381_vm0, %v494_v39  ;;  %v792_v42 = vpop.f32.mrf.mxu3  ;;  %v4906_v6 = vld [vmem:[%s5413_s10 + $0x28] sm:$0xff] }
  0xd7   : > { %527 = vst.msk [vmem:[#allocation2 + $0x69] sm:$0xff] %vm381_vm0, %v456_v43 }
  0xd8   : > { %900 = vst.msk [vmem:[#allocation2 + $0x10a] sm:$0xff] %vm381_vm0, %v868_v40  ;;  %v754_v44 = vpop.f32.mrf.mxu1 }
  0xd9   : > { %901 = vst.msk [vmem:[#allocation2 + $0x112] sm:$0xff] %vm381_vm0, %v869_v41  ;;  %v4971_v41 = vld [vmem:[%s6251_s1 + $0x60] sm:$0xff] }
  0xda   : > { %2546 = vmatpush.bf16.msra.mxu2 %v4971_v41  ;;  %v4928_v41 = vld [vmem:[%s5413_s10 + $0x48] sm:$0xff] }
  0xdd   : > { %v496_v45 = vpop.f32.mrf.mxu2  ;;  %v459_v49 = vpop.f32.mrf.mxu0 }
  0xde   : > { %543 = vst.msk [vmem:[#allocation2 + $0x129] sm:$0xff] %vm381_vm0, %v496_v45  ;;  %v794_v46 = vpop.f32.mrf.mxu3  ;;  %v822_v53 = vld [vmem:[#allocation2 + $0x62] sm:$0xff]  ;;  %v823_v54 = vld [vmem:[#allocation2 + $0x6a] sm:$0xff]  ;;  %v4926_v45 = vld [vmem:[%s5413_s10 + $0x38] sm:$0xff] }
  0xdf   : > { %528 = vst.msk [vmem:[#allocation2 + $0x79] sm:$0xff] %vm381_vm0, %v459_v49  ;;  %v854_v55 = vadd.f32 %v822_v53, %v5532_v16  ;;  %v855_v56 = vadd.f32 %v823_v54, %v749_v24  ;;  %v4925_v24 = vld [vmem:[%s5413_s10 + $0x30] sm:$0xff] }
  0xe0   : > { %v5568_v52 = vpop.f32.mrf.mxu1  ;;  %4437 = vmatmul.msk.bf16.gmra.mxu0 %vm381_vm0, %v4923_v48  ;;  %v4944_v48 = vld [vmem:[%s5413_s10 + $0x38] sm:$0xff] }
  0xe1   : > { %886 = vst.msk [vmem:[#allocation2 + $0x62] sm:$0xff] %vm381_vm0, %v854_v55 }
  0xe2   : > { %4253 = vmatmul.msk.bf16.gmra.mxu2 %vm381_vm0, %v4887_v47  ;;  %887 = vst.msk [vmem:[#allocation2 + $0x6a] sm:$0xff] %vm381_vm0, %v855_v56  ;;  %v4908_v47 = vld [vmem:[%s5413_s10 + $0x38] sm:$0xff]  ;;  %v4989_v56 = vld [vmem:[%s6251_s1 + $0x70] sm:$0xff] }
  0xe3   : > { %4345 = vmatmul.msk.bf16.gmra.mxu3 %vm381_vm0, %v4905_v50  ;;  %4529 = vmatmul.msk.bf16.gmra.mxu1 %vm381_vm0, %v4941_v51  ;;  %v832_v50 = vld [vmem:[#allocation2 + $0xda] sm:$0xff] }
  0xe4   : > { %2908 = vmatpush.bf16.msra.mxu3 %v4989_v56 }
  0xe5   : > { %v838_v57 = vld [vmem:[#allocation2 + $0x122] sm:$0xff]  ;;  %v839_v58 = vld [vmem:[#allocation2 + $0x12a] sm:$0xff]  ;;  %v499_v59 = vpop.f32.mrf.mxu2  ;;  %v461_v63 = vpop.f32.mrf.mxu0 }
  0xe6   : > { %v870_v60 = vadd.f32 %v838_v57, %v787_v22  ;;  %v871_v61 = vadd.f32 %v839_v58, %v789_v26  ;;  %544 = vst.msk [vmem:[#allocation2 + $0x139] sm:$0xff] %vm381_vm0, %v499_v59  ;;  %v797_v62 = vpop.f32.mrf.mxu3  ;;  %v4907_v26 = vld [vmem:[%s5413_s10 + $0x30] sm:$0xff] }
  0xe7   : > { %529 = vst.msk [vmem:[#allocation2 + $0x81] sm:$0xff] %vm381_vm0, %v461_v63 }
  0xe8   : > { %902 = vst.msk [vmem:[#allocation2 + $0x122] sm:$0xff] %vm381_vm0, %v870_v60  ;;  %v759_v0 = vpop.f32.mrf.mxu1  ;;  %v848_v60 = vld [vmem:[#allocation2 + $0x19a] sm:$0xff] }
  0xe9   : > { %903 = vst.msk [vmem:[#allocation2 + $0x12a] sm:$0xff] %vm381_vm0, %v871_v61 }
  0xed   : > { %v501_v1 = vpop.f32.mrf.mxu2  ;;  %v464_v5 = vpop.f32.mrf.mxu0 }
  0xee   : > { %545 = vst.msk [vmem:[#allocation2 + $0x141] sm:$0xff] %vm381_vm0, %v501_v1  ;;  %v799_v2 = vpop.f32.mrf.mxu3  ;;  %v824_v9 = vld [vmem:[#allocation2 + $0x7a] sm:$0xff]  ;;  %v825_v10 = vld [vmem:[#allocation2 + $0x82] sm:$0xff] }
  0xef   : > { %530 = vst.msk [vmem:[#allocation2 + $0x91] sm:$0xff] %vm381_vm0, %v464_v5  ;;  %v856_v11 = vadd.f32 %v824_v9, %v5550_v32  ;;  %v857_v12 = vadd.f32 %v825_v10, %v754_v44  ;;  %v4890_v44 = vld [vmem:[%s5413_s10 + $0x38] sm:$0xff]  ;;  %v849_v5 = vld [vmem:[#allocation2 + $0x1a2] sm:$0xff] }
  0xf0   : > { %v5587_v8 = vpop.f32.mrf.mxu1  ;;  %4438 = vmatmul.msk.bf16.gmra.mxu0 %vm381_vm0, %v4924_v4  ;;  %v4927_v9 = vld [vmem:[%s5413_s10 + $0x40] sm:$0xff] }
  0xf1   : > { %888 = vst.msk [vmem:[#allocation2 + $0x7a] sm:$0xff] %vm381_vm0, %v856_v11 }
  0xf2   : > { %4254 = vmatmul.msk.bf16.gmra.mxu2 %vm381_vm0, %v4888_v3  ;;  %889 = vst.msk [vmem:[#allocation2 + $0x82] sm:$0xff] %vm381_vm0, %v857_v12  ;;  %v1904_v12 = vld [vmem:[#allocation2 + $0x1a] sm:$0xff] }
  0xf3   : > { %4346 = vmatmul.msk.bf16.gmra.mxu3 %vm381_vm0, %v4906_v6  ;;  %4530 = vmatmul.msk.bf16.gmra.mxu1 %vm381_vm0, %v4942_v7 }
  0xf5   : > { %v840_v13 = vld [vmem:[#allocation2 + $0x13a] sm:$0xff]  ;;  %v841_v14 = vld [vmem:[#allocation2 + $0x142] sm:$0xff]  ;;  %v504_v15 = vpop.f32.mrf.mxu2  ;;  %v466_v19 = vpop.f32.mrf.mxu0 }
  0xf6   : > { %v872_v16 = vadd.f32 %v840_v13, %v792_v42  ;;  %v873_v17 = vadd.f32 %v841_v14, %v794_v46  ;;  %546 = vst.msk [vmem:[#allocation2 + $0x151] sm:$0xff] %vm381_vm0, %v504_v15  ;;  %v5597_v18 = vpop.f32.mrf.mxu3  ;;  %v4909_v13 = vld [vmem:[%s5413_s10 + $0x40] sm:$0xff] }
  0xf7   : > { %531 = vst.msk [vmem:[#allocation2 + $0x99] sm:$0xff] %vm381_vm0, %v466_v19  ;;  %v4945_v14 = vld [vmem:[%s5413_s10 + $0x40] sm:$0xff] }
  0xf8   : > { %904 = vst.msk [vmem:[#allocation2 + $0x13a] sm:$0xff] %vm381_vm0, %v872_v16  ;;  %v764_v20 = vpop.f32.mrf.mxu1 }
  0xf9   : > { %905 = vst.msk [vmem:[#allocation2 + $0x142] sm:$0xff] %vm381_vm0, %v873_v17 }
  0xfd   : > { %v506_v21 = vpop.f32.mrf.mxu2  ;;  %v469_v25 = vpop.f32.mrf.mxu0 }
  0xfe   : > { %547 = vst.msk [vmem:[#allocation2 + $0x159] sm:$0xff] %vm381_vm0, %v506_v21  ;;  %v804_v22 = vpop.f32.mrf.mxu3  ;;  %v826_v29 = vld [vmem:[#allocation2 + $0x92] sm:$0xff]  ;;  %v827_v30 = vld [vmem:[#allocation2 + $0x9a] sm:$0xff] }
  0xff   : > { %532 = vst.msk [vmem:[#allocation2 + $0xa9] sm:$0xff] %vm381_vm0, %v469_v25  ;;  %v858_v31 = vadd.f32 %v826_v29, %v5568_v52  ;;  %v859_v32 = vadd.f32 %v827_v30, %v759_v0  ;;  %v5007_v21 = vld [vmem:[%s6251_s1 + $0x80] sm:$0xff]  ;;  %v1180_v25 = vld [vmem:[#allocation2 + $0x31] sm:$0xff] }
 0x100   : > { %v5608_v28 = vpop.f32.mrf.mxu1  ;;  %4439 = vmatmul.msk.bf16.gmra.mxu0 %vm381_vm0, %v4925_v24 }
 0x101   : > { %890 = vst.msk [vmem:[#allocation2 + $0x92] sm:$0xff] %vm381_vm0, %v858_v31  ;;  %3270 = vmatpush.bf16.msra.mxu0 %v5007_v21  ;;  %v1905_v31 = vld [vmem:[#allocation2 + $0x22] sm:$0xff] }
 0x102   : > { %4255 = vmatmul.msk.bf16.gmra.mxu2 %vm381_vm0, %v4889_v23  ;;  %891 = vst.msk [vmem:[#allocation2 + $0x9a] sm:$0xff] %vm381_vm0, %v859_v32 }
 0x103   : > { %4347 = vmatmul.msk.bf16.gmra.mxu3 %vm381_vm0, %v4907_v26  ;;  %4531 = vmatmul.msk.bf16.gmra.mxu1 %vm381_vm0, %v4943_v27 }
 0x105   : > { %v842_v33 = vld [vmem:[#allocation2 + $0x152] sm:$0xff]  ;;  %v843_v34 = vld [vmem:[#allocation2 + $0x15a] sm:$0xff]  ;;  %v509_v35 = vpop.f32.mrf.mxu2  ;;  %v471_v39 = vpop.f32.mrf.mxu0 }
 0x106   : > { %v874_v36 = vadd.f32 %v842_v33, %v797_v62  ;;  %v875_v37 = vadd.f32 %v843_v34, %v799_v2  ;;  %548 = vst.msk [vmem:[#allocation2 + $0x169] sm:$0xff] %vm381_vm0, %v509_v35  ;;  %v5618_v38 = vpop.f32.mrf.mxu3  ;;  %v833_v2 = vld [vmem:[#allocation2 + $0xe2] sm:$0xff] }
 0x107   : > { %533 = vst.msk [vmem:[#allocation2 + $0xb1] sm:$0xff] %vm381_vm0, %v471_v39 }
 0x108   : > { %906 = vst.msk [vmem:[#allocation2 + $0x152] sm:$0xff] %vm381_vm0, %v874_v36  ;;  %v5621_v40 = vpop.f32.mrf.mxu1 }
 0x109   : > { %907 = vst.msk [vmem:[#allocation2 + $0x15a] sm:$0xff] %vm381_vm0, %v875_v37  ;;  %v1181_v37 = vld [vmem:[#allocation2 + $0x39] sm:$0xff] }
 0x10d   : > { %v511_v42 = vpop.f32.mrf.mxu2  ;;  %v474_v46 = vpop.f32.mrf.mxu0 }
 0x10e   : > { %549 = vst.msk [vmem:[#allocation2 + $0x171] sm:$0xff] %vm381_vm0, %v511_v42  ;;  %v5629_v43 = vpop.f32.mrf.mxu3  ;;  %v828_v51 = vld [vmem:[#allocation2 + $0xaa] sm:$0xff]  ;;  %v829_v52 = vld [vmem:[#allocation2 + $0xb2] sm:$0xff] }
 0x10f   : > { %534 = vst.msk [vmem:[#allocation2 + $0xc1] sm:$0xff] %vm381_vm0, %v474_v46  ;;  %v860_v54 = vadd.f32 %v828_v51, %v5587_v8  ;;  %v861_v55 = vadd.f32 %v829_v52, %v764_v20  ;;  %v4891_v8 = vld [vmem:[%s5413_s10 + $0x40] sm:$0xff]  ;;  %v4910_v42 = vld [vmem:[%s5413_s10 + $0x48] sm:$0xff] }
 0x110   : > { %v772_v49 = vpop.f32.mrf.mxu1  ;;  %4440 = vmatmul.msk.bf16.gmra.mxu0 %vm381_vm0, %v4926_v45  ;;  %v1182_v51 = vld [vmem:[#allocation2 + $0x49] sm:$0xff] }
 0x111   : > { %v864_v53 = vadd.f32 %v832_v50, %v772_v49  ;;  %892 = vst.msk [vmem:[#allocation2 + $0xaa] sm:$0xff] %vm381_vm0, %v860_v54 }
 0x112   : > { %4256 = vmatmul.msk.bf16.gmra.mxu2 %vm381_vm0, %v4890_v44  ;;  %893 = vst.msk [vmem:[#allocation2 + $0xb2] sm:$0xff] %vm381_vm0, %v861_v55  ;;  %v4946_v44 = vld [vmem:[%s5413_s10 + $0x48] sm:$0xff] }
 0x113   : > { %896 = vst.msk [vmem:[#allocation2 + $0xda] sm:$0xff] %vm381_vm0, %v864_v53  ;;  %4348 = vmatmul.msk.bf16.gmra.mxu3 %vm381_vm0, %v4908_v47  ;;  %4532 = vmatmul.msk.bf16.gmra.mxu1 %vm381_vm0, %v4944_v48 }
 0x115   : > { %v844_v57 = vld [vmem:[#allocation2 + $0x16a] sm:$0xff]  ;;  %v845_v58 = vld [vmem:[#allocation2 + $0x172] sm:$0xff]  ;;  %v514_v59 = vpop.f32.mrf.mxu2  ;;  %v476_v0 = vpop.f32.mrf.mxu0 }
 0x116   : > { %v876_v61 = vadd.f32 %v844_v57, %v5597_v18  ;;  %v877_v62 = vadd.f32 %v845_v58, %v804_v22  ;;  %550 = vst.msk [vmem:[#allocation2 + $0x181] sm:$0xff] %vm381_vm0, %v514_v59  ;;  %v812_v63 = vpop.f32.mrf.mxu3  ;;  %v1183_v59 = vld [vmem:[#allocation2 + $0x51] sm:$0xff] }
 0x117   : > { %v880_v3 = vadd.f32 %v848_v60, %v812_v63  ;;  %535 = vst.msk [vmem:[#allocation2 + $0xc9] sm:$0xff] %vm381_vm0, %v476_v0  ;;  %v4929_v63 = vld [vmem:[%s5413_s10 + $0x50] sm:$0xff] }
 0x118   : > { %908 = vst.msk [vmem:[#allocation2 + $0x16a] sm:$0xff] %vm381_vm0, %v876_v61  ;;  %v774_v1 = vpop.f32.mrf.mxu1 }
 0x119   : > { %909 = vst.msk [vmem:[#allocation2 + $0x172] sm:$0xff] %vm381_vm0, %v877_v62  ;;  %v865_v4 = vadd.f32 %v833_v2, %v774_v1  ;;  %v4893_v62 = vld [vmem:[%s5413_s10 + $0x50] sm:$0xff] }
 0x11a   : > { %912 = vst.msk [vmem:[#allocation2 + $0x19a] sm:$0xff] %vm381_vm0, %v880_v3  ;;  %v4911_v1 = vld [vmem:[%s5413_s10 + $0x50] sm:$0xff] }
 0x11b   : > { %897 = vst.msk [vmem:[#allocation2 + $0xe2] sm:$0xff] %vm381_vm0, %v865_v4  ;;  %v4947_v3 = vld [vmem:[%s5413_s10 + $0x50] sm:$0xff] }
 0x11d   : > { %v516_v6 = vpop.f32.mrf.mxu2  ;;  %v1824_v11 = vpop.f32.mrf.mxu0 }
 0x11e   : > { %551 = vst.msk [vmem:[#allocation2 + $0x189] sm:$0xff] %vm381_vm0, %v516_v6  ;;  %v814_v7 = vpop.f32.mrf.mxu3  ;;  %v1936_v15 = vadd.f32 %v1904_v12, %v1824_v11  ;;  %v830_v17 = vld [vmem:[#allocation2 + $0xc2] sm:$0xff]  ;;  %v831_v18 = vld [vmem:[#allocation2 + $0xca] sm:$0xff] }
 0x11f   : > { %v881_v10 = vadd.f32 %v849_v5, %v814_v7  ;;  %v862_v19 = vadd.f32 %v830_v17, %v5608_v28  ;;  %v863_v20 = vadd.f32 %v831_v18, %v5621_v40  ;;  %v4892_v40 = vld [vmem:[%s5413_s10 + $0x48] sm:$0xff] }
 0x120   : > { %v2186_v16 = vpop.f32.mrf.mxu1  ;;  %1968 = vst.msk [vmem:[#allocation2 + $0x1a] sm:$0xff] %vm381_vm0, %v1936_v15  ;;  %4441 = vmatmul.msk.bf16.gmra.mxu0 %vm381_vm0, %v4927_v9  ;;  %v1184_v11 = vld [vmem:[#allocation2 + $0x61] sm:$0xff] }
 0x121   : > { %913 = vst.msk [vmem:[#allocation2 + $0x1a2] sm:$0xff] %vm381_vm0, %v881_v10 }
 0x122   : > { %4257 = vmatmul.msk.bf16.gmra.mxu2 %vm381_vm0, %v4891_v8  ;;  %894 = vst.msk [vmem:[#allocation2 + $0xc2] sm:$0xff] %vm381_vm0, %v862_v19 }
 0x123   : > { %4349 = vmatmul.msk.bf16.gmra.mxu3 %vm381_vm0, %v4909_v13  ;;  %4533 = vmatmul.msk.bf16.gmra.mxu1 %vm381_vm0, %v4945_v14  ;;  %895 = vst.msk [vmem:[#allocation2 + $0xca] sm:$0xff] %vm381_vm0, %v863_v20 }
 0x125   : > { %v846_v22 = vld [vmem:[#allocation2 + $0x182] sm:$0xff]  ;;  %v847_v23 = vld [vmem:[#allocation2 + $0x18a] sm:$0xff]  ;;  %v1100_v24 = vpop.f32.mrf.mxu2  ;;  %v1826_v30 = vpop.f32.mrf.mxu0 }
 0x126   : > { %v878_v26 = vadd.f32 %v846_v22, %v5618_v38  ;;  %v879_v27 = vadd.f32 %v847_v23, %v5629_v43  ;;  %v1212_v28 = vadd.f32 %v1180_v25, %v1100_v24  ;;  %v1462_v29 = vpop.f32.mrf.mxu3  ;;  %v1937_v32 = vadd.f32 %v1905_v31, %v1826_v30  ;;  %v1185_v23 = vld [vmem:[#allocation2 + $0x69] sm:$0xff]  ;;  %v4912_v30 = vld [vmem:[%s5413_s10 + $0x58] sm:$0xff] }
 0x127   : > { %v2266_v34 = vld [vmem:[#allocation2 + $0x18] sm:$0xff] }
 0x128   : > { %910 = vst.msk [vmem:[#allocation2 + $0x182] sm:$0xff] %vm381_vm0, %v878_v26  ;;  %v2188_v33 = vpop.f32.mrf.mxu1  ;;  %v2298_v35 = vadd.f32 %v2266_v34, %v2186_v16  ;;  %v4894_v26 = vld [vmem:[%s5413_s10 + $0x58] sm:$0xff] }
 0x129   : > { %911 = vst.msk [vmem:[#allocation2 + $0x18a] sm:$0xff] %vm381_vm0, %v879_v27  ;;  %v4930_v27 = vld [vmem:[%s5413_s10 + $0x58] sm:$0xff] }
 0x12a   : > { %1244 = vst.msk [vmem:[#allocation2 + $0x31] sm:$0xff] %vm381_vm0, %v1212_v28  ;;  %v5010_v28 = vld [vmem:[%s6253_s3 + $0x8] sm:$0xff] }
 0x12b   : > { %1969 = vst.msk [vmem:[#allocation2 + $0x22] sm:$0xff] %vm381_vm0, %v1937_v32  ;;  %v4948_v32 = vld [vmem:[%s5413_s10 + $0x58] sm:$0xff]  ;;  %3734 = vmatpush.bf16.msra.mxu1 %v5010_v28 }
 0x12c   : > { %2330 = vst.msk [vmem:[#allocation2 + $0x18] sm:$0xff] %vm381_vm0, %v2298_v35 }
 0x12d   : > { %v1102_v36 = vpop.f32.mrf.mxu2  ;;  %v1829_v43 = vpop.f32.mrf.mxu0 }
 0x12e   : > { %v1213_v38 = vadd.f32 %v1181_v37, %v1102_v36  ;;  %v1464_v39 = vpop.f32.mrf.mxu3 }
 0x130   : > { %1245 = vst.msk [vmem:[#allocation2 + $0x39] sm:$0xff] %vm381_vm0, %v1213_v38  ;;  %v2191_v45 = vpop.f32.mrf.mxu1  ;;  %4442 = vmatmul.msk.bf16.gmra.mxu0 %vm381_vm0, %v4928_v41 }
 0x131   : > { %v1542_v46 = vld [vmem:[#allocation2 + $0x30] sm:$0xff] }
 0x132   : > { %v1574_v47 = vadd.f32 %v1542_v46, %v1462_v29  ;;  %v2267_v48 = vld [vmem:[#allocation2 + $0x20] sm:$0xff]  ;;  %4258 = vmatmul.msk.bf16.gmra.mxu2 %vm381_vm0, %v4892_v40 }
 0x133   : > { %v2299_v49 = vadd.f32 %v2267_v48, %v2188_v33  ;;  %4350 = vmatmul.msk.bf16.gmra.mxu3 %vm381_vm0, %v4910_v42  ;;  %4534 = vmatmul.msk.bf16.gmra.mxu1 %vm381_vm0, %v4946_v44  ;;  %v1186_v40 = vld [vmem:[#allocation2 + $0x79] sm:$0xff] }
 0x134   : > { %1606 = vst.msk [vmem:[#allocation2 + $0x30] sm:$0xff] %vm381_vm0, %v1574_v47 }
 0x135   : > { %2331 = vst.msk [vmem:[#allocation2 + $0x20] sm:$0xff] %vm381_vm0, %v2299_v49  ;;  %v1105_v50 = vpop.f32.mrf.mxu2  ;;  %v1831_v55 = vpop.f32.mrf.mxu0 }
 0x136   : > { %v1214_v52 = vadd.f32 %v1182_v51, %v1105_v50  ;;  %v1467_v53 = vpop.f32.mrf.mxu3 }
 0x137   : > { %v1543_v54 = vld [vmem:[#allocation2 + $0x38] sm:$0xff] }
 0x138   : > { %v1575_v56 = vadd.f32 %v1543_v54, %v1464_v39  ;;  %1246 = vst.msk [vmem:[#allocation2 + $0x49] sm:$0xff] %vm381_vm0, %v1214_v52  ;;  %v2193_v57 = vpop.f32.mrf.mxu1  ;;  %v1187_v52 = vld [vmem:[#allocation2 + $0x81] sm:$0xff] }
 0x13a   : > { %1607 = vst.msk [vmem:[#allocation2 + $0x38] sm:$0xff] %vm381_vm0, %v1575_v56  ;;  %v4931_v56 = vld [vmem:[%s5413_s10 + $0x60] sm:$0xff] }
 0x13d   : > { %v1107_v58 = vpop.f32.mrf.mxu2  ;;  %v1834_v2 = vpop.f32.mrf.mxu0 }
 0x13e   : > { %v1215_v60 = vadd.f32 %v1183_v59, %v1107_v58  ;;  %v1469_v61 = vpop.f32.mrf.mxu3  ;;  %v4913_v58 = vld [vmem:[%s5413_s10 + $0x60] sm:$0xff] }
 0x13f   : > { %v1544_v0 = vld [vmem:[#allocation2 + $0x48] sm:$0xff] }
 0x140   : > { %v1576_v4 = vadd.f32 %v1544_v0, %v1467_v53  ;;  %1247 = vst.msk [vmem:[#allocation2 + $0x51] sm:$0xff] %vm381_vm0, %v1215_v60  ;;  %v5697_v5 = vpop.f32.mrf.mxu1  ;;  %4443 = vmatmul.msk.bf16.gmra.mxu0 %vm381_vm0, %v4929_v63  ;;  %v4949_v60 = vld [vmem:[%s5413_s10 + $0x60] sm:$0xff] }
 0x141   : > { %v1906_v6 = vld [vmem:[#allocation2 + $0x32] sm:$0xff]  ;;  %v1907_v7 = vld [vmem:[#allocation2 + $0x3a] sm:$0xff] }
 0x142   : > { %1608 = vst.msk [vmem:[#allocation2 + $0x48] sm:$0xff] %vm381_vm0, %v1576_v4  ;;  %v1938_v8 = vadd.f32 %v1906_v6, %v1829_v43  ;;  %v1939_v9 = vadd.f32 %v1907_v7, %v1831_v55  ;;  %4259 = vmatmul.msk.bf16.gmra.mxu2 %vm381_vm0, %v4893_v62  ;;  %v4895_v55 = vld [vmem:[%s5413_s10 + $0x60] sm:$0xff]  ;;  %v1188_v4 = vld [vmem:[#allocation2 + $0x91] sm:$0xff] }
 0x143   : > { %4351 = vmatmul.msk.bf16.gmra.mxu3 %vm381_vm0, %v4911_v1  ;;  %4535 = vmatmul.msk.bf16.gmra.mxu1 %vm381_vm0, %v4947_v3 }
 0x144   : > { %1970 = vst.msk [vmem:[#allocation2 + $0x32] sm:$0xff] %vm381_vm0, %v1938_v8 }
 0x145   : > { %1971 = vst.msk [vmem:[#allocation2 + $0x3a] sm:$0xff] %vm381_vm0, %v1939_v9  ;;  %v1110_v10 = vpop.f32.mrf.mxu2  ;;  %v1836_v15 = vpop.f32.mrf.mxu0 }
 0x146   : > { %v1216_v12 = vadd.f32 %v1184_v11, %v1110_v10  ;;  %v1472_v13 = vpop.f32.mrf.mxu3 }
 0x147   : > { %v1545_v14 = vld [vmem:[#allocation2 + $0x50] sm:$0xff] }
 0x148   : > { %v1577_v16 = vadd.f32 %v1545_v14, %v1469_v61  ;;  %1248 = vst.msk [vmem:[#allocation2 + $0x61] sm:$0xff] %vm381_vm0, %v1216_v12  ;;  %v2198_v17 = vpop.f32.mrf.mxu1 }
 0x14a   : > { %1609 = vst.msk [vmem:[#allocation2 + $0x50] sm:$0xff] %vm381_vm0, %v1577_v16  ;;  %v1189_v16 = vld [vmem:[#allocation2 + $0x99] sm:$0xff] }
 0x14b   : > { %v2268_v18 = vld [vmem:[#allocation2 + $0x30] sm:$0xff] }
 0x14c   : > { %v2300_v19 = vadd.f32 %v2268_v18, %v2191_v45  ;;  %v2269_v20 = vld [vmem:[#allocation2 + $0x38] sm:$0xff] }
 0x14d   : > { %v2301_v21 = vadd.f32 %v2269_v20, %v2193_v57  ;;  %v1112_v22 = vpop.f32.mrf.mxu2  ;;  %v1839_v31 = vpop.f32.mrf.mxu0  ;;  %v4932_v20 = vld [vmem:[%s5413_s10 + $0x68] sm:$0xff] }
 0x14e   : > { %2332 = vst.msk [vmem:[#allocation2 + $0x30] sm:$0xff] %vm381_vm0, %v2300_v19  ;;  %v1217_v24 = vadd.f32 %v1185_v23, %v1112_v22  ;;  %v1474_v25 = vpop.f32.mrf.mxu3  ;;  %v4896_v19 = vld [vmem:[%s5413_s10 + $0x68] sm:$0xff] }
 0x14f   : > { %v1546_v29 = vld [vmem:[#allocation2 + $0x60] sm:$0xff]  ;;  %2333 = vst.msk [vmem:[#allocation2 + $0x38] sm:$0xff] %vm381_vm0, %v2301_v21  ;;  %v4914_v22 = vld [vmem:[%s5413_s10 + $0x68] sm:$0xff] }
 0x150   : > { %v1578_v33 = vadd.f32 %v1546_v29, %v1472_v13  ;;  %1249 = vst.msk [vmem:[#allocation2 + $0x69] sm:$0xff] %vm381_vm0, %v1217_v24  ;;  %v5718_v34 = vpop.f32.mrf.mxu1  ;;  %4444 = vmatmul.msk.bf16.gmra.mxu0 %vm381_vm0, %v4930_v27  ;;  %v4950_v24 = vld [vmem:[%s5413_s10 + $0x68] sm:$0xff] }
 0x151   : > { %v1908_v35 = vld [vmem:[#allocation2 + $0x4a] sm:$0xff]  ;;  %v1909_v36 = vld [vmem:[#allocation2 + $0x52] sm:$0xff] }
 0x152   : > { %1610 = vst.msk [vmem:[#allocation2 + $0x60] sm:$0xff] %vm381_vm0, %v1578_v33  ;;  %v1940_v37 = vadd.f32 %v1908_v35, %v1834_v2  ;;  %v1941_v38 = vadd.f32 %v1909_v36, %v1836_v15  ;;  %4260 = vmatmul.msk.bf16.gmra.mxu2 %vm381_vm0, %v4894_v26 }
 0x153   : > { %4352 = vmatmul.msk.bf16.gmra.mxu3 %vm381_vm0, %v4912_v30  ;;  %4536 = vmatmul.msk.bf16.gmra.mxu1 %vm381_vm0, %v4948_v32  ;;  %v1190_v32 = vld [vmem:[#allocation2 + $0xa9] sm:$0xff] }
 0x154   : > { %1972 = vst.msk [vmem:[#allocation2 + $0x4a] sm:$0xff] %vm381_vm0, %v1940_v37 }
 0x155   : > { %1973 = vst.msk [vmem:[#allocation2 + $0x52] sm:$0xff] %vm381_vm0, %v1941_v38  ;;  %v1115_v39 = vpop.f32.mrf.mxu2  ;;  %v1841_v44 = vpop.f32.mrf.mxu0 }
 0x156   : > { %v1218_v41 = vadd.f32 %v1186_v40, %v1115_v39  ;;  %v1477_v42 = vpop.f32.mrf.mxu3 }
 0x157   : > { %v1547_v43 = vld [vmem:[#allocation2 + $0x68] sm:$0xff] }
 0x158   : > { %v1579_v45 = vadd.f32 %v1547_v43, %v1474_v25  ;;  %1250 = vst.msk [vmem:[#allocation2 + $0x79] sm:$0xff] %vm381_vm0, %v1218_v41  ;;  %v2203_v46 = vpop.f32.mrf.mxu1 }
 0x15a   : > { %1611 = vst.msk [vmem:[#allocation2 + $0x68] sm:$0xff] %vm381_vm0, %v1579_v45 }
 0x15b   : > { %v2270_v47 = vld [vmem:[#allocation2 + $0x48] sm:$0xff] }
 0x15c   : > { %v2302_v48 = vadd.f32 %v2270_v47, %v5697_v5  ;;  %v2271_v49 = vld [vmem:[#allocation2 + $0x50] sm:$0xff] }
 0x15d   : > { %v2303_v50 = vadd.f32 %v2271_v49, %v2198_v17  ;;  %v1117_v51 = vpop.f32.mrf.mxu2  ;;  %v1844_v59 = vpop.f32.mrf.mxu0  ;;  %v4897_v47 = vld [vmem:[%s5413_s10 + $0x70] sm:$0xff] }
 0x15e   : > { %2334 = vst.msk [vmem:[#allocation2 + $0x48] sm:$0xff] %vm381_vm0, %v2302_v48  ;;  %v1219_v53 = vadd.f32 %v1187_v52, %v1117_v51  ;;  %v1479_v54 = vpop.f32.mrf.mxu3  ;;  %v4933_v48 = vld [vmem:[%s5413_s10 + $0x70] sm:$0xff] }
 0x15f   : > { %v1548_v57 = vld [vmem:[#allocation2 + $0x78] sm:$0xff]  ;;  %2335 = vst.msk [vmem:[#allocation2 + $0x50] sm:$0xff] %vm381_vm0, %v2303_v50  ;;  %v4915_v50 = vld [vmem:[%s5413_s10 + $0x70] sm:$0xff] }
 0x160   : > { %v1580_v61 = vadd.f32 %v1548_v57, %v1477_v42  ;;  %1251 = vst.msk [vmem:[#allocation2 + $0x81] sm:$0xff] %vm381_vm0, %v1219_v53  ;;  %v5737_v62 = vpop.f32.mrf.mxu1  ;;  %4445 = vmatmul.msk.bf16.gmra.mxu0 %vm381_vm0, %v4931_v56  ;;  %v4951_v52 = vld [vmem:[%s5413_s10 + $0x70] sm:$0xff] }
 0x161   : > { %v1910_v63 = vld [vmem:[#allocation2 + $0x62] sm:$0xff]  ;;  %v1911_v0 = vld [vmem:[#allocation2 + $0x6a] sm:$0xff] }
 0x162   : > { %1612 = vst.msk [vmem:[#allocation2 + $0x78] sm:$0xff] %vm381_vm0, %v1580_v61  ;;  %v1942_v1 = vadd.f32 %v1910_v63, %v1839_v31  ;;  %v1943_v2 = vadd.f32 %v1911_v0, %v1841_v44  ;;  %4261 = vmatmul.msk.bf16.gmra.mxu2 %vm381_vm0, %v4895_v55  ;;  %v1191_v44 = vld [vmem:[#allocation2 + $0xb1] sm:$0xff] }
 0x163   : > { %4353 = vmatmul.msk.bf16.gmra.mxu3 %vm381_vm0, %v4913_v58  ;;  %4537 = vmatmul.msk.bf16.gmra.mxu1 %vm381_vm0, %v4949_v60  ;;  %v1192_v60 = vld [vmem:[#allocation2 + $0xc1] sm:$0xff] }
 0x164   : > { %1974 = vst.msk [vmem:[#allocation2 + $0x62] sm:$0xff] %vm381_vm0, %v1942_v1 }
 0x165   : > { %1975 = vst.msk [vmem:[#allocation2 + $0x6a] sm:$0xff] %vm381_vm0, %v1943_v2  ;;  %v1120_v3 = vpop.f32.mrf.mxu2  ;;  %v1846_v8 = vpop.f32.mrf.mxu0 }
 0x166   : > { %v1220_v5 = vadd.f32 %v1188_v4, %v1120_v3  ;;  %v1482_v6 = vpop.f32.mrf.mxu3 }
 0x167   : > { %v1549_v7 = vld [vmem:[#allocation2 + $0x80] sm:$0xff] }
 0x168   : > { %v1581_v9 = vadd.f32 %v1549_v7, %v1479_v54  ;;  %1252 = vst.msk [vmem:[#allocation2 + $0x91] sm:$0xff] %vm381_vm0, %v1220_v5  ;;  %v2208_v10 = vpop.f32.mrf.mxu1 }
 0x16a   : > { %1613 = vst.msk [vmem:[#allocation2 + $0x80] sm:$0xff] %vm381_vm0, %v1581_v9 }
 0x16b   : > { %v2272_v11 = vld [vmem:[#allocation2 + $0x60] sm:$0xff] }
 0x16c   : > { %v2304_v12 = vadd.f32 %v2272_v11, %v5718_v34  ;;  %v2273_v13 = vld [vmem:[#allocation2 + $0x68] sm:$0xff]  ;;  %v4898_v11 = vld [vmem:[%s5413_s10 + $0x78] sm:$0xff] }
 0x16d   : > { %v2305_v14 = vadd.f32 %v2273_v13, %v2203_v46  ;;  %v1122_v15 = vpop.f32.mrf.mxu2  ;;  %v1849_v23 = vpop.f32.mrf.mxu0 }
 0x16e   : > { %2336 = vst.msk [vmem:[#allocation2 + $0x60] sm:$0xff] %vm381_vm0, %v2304_v12  ;;  %v1221_v17 = vadd.f32 %v1189_v16, %v1122_v15  ;;  %v1484_v18 = vpop.f32.mrf.mxu3  ;;  %v4934_v12 = vld [vmem:[%s5413_s10 + $0x78] sm:$0xff] }
 0x16f   : > { %v1550_v21 = vld [vmem:[#allocation2 + $0x90] sm:$0xff]  ;;  %2337 = vst.msk [vmem:[#allocation2 + $0x68] sm:$0xff] %vm381_vm0, %v2305_v14  ;;  %v4916_v14 = vld [vmem:[%s5413_s10 + $0x78] sm:$0xff] }
 0x170   : > { %v1582_v25 = vadd.f32 %v1550_v21, %v1482_v6  ;;  %1253 = vst.msk [vmem:[#allocation2 + $0x99] sm:$0xff] %vm381_vm0, %v1221_v17  ;;  %v5756_v26 = vpop.f32.mrf.mxu1  ;;  %4446 = vmatmul.msk.bf16.gmra.mxu0 %vm381_vm0, %v4932_v20  ;;  %v4952_v16 = vld [vmem:[%s5413_s10 + $0x78] sm:$0xff] }
 0x171   : > { %v1912_v27 = vld [vmem:[#allocation2 + $0x7a] sm:$0xff]  ;;  %v1913_v28 = vld [vmem:[#allocation2 + $0x82] sm:$0xff] }
 0x172   : > { %1614 = vst.msk [vmem:[#allocation2 + $0x90] sm:$0xff] %vm381_vm0, %v1582_v25  ;;  %v1944_v29 = vadd.f32 %v1912_v27, %v1844_v59  ;;  %v1945_v30 = vadd.f32 %v1913_v28, %v1846_v8  ;;  %4262 = vmatmul.msk.bf16.gmra.mxu2 %vm381_vm0, %v4896_v19  ;;  %v1193_v8 = vld [vmem:[#allocation2 + $0xc9] sm:$0xff] }
 0x173   : > { %4354 = vmatmul.msk.bf16.gmra.mxu3 %vm381_vm0, %v4914_v22  ;;  %4538 = vmatmul.msk.bf16.gmra.mxu1 %vm381_vm0, %v4950_v24  ;;  %v1194_v24 = vld [vmem:[#allocation2 + $0xd9] sm:$0xff] }
 0x174   : > { %1976 = vst.msk [vmem:[#allocation2 + $0x7a] sm:$0xff] %vm381_vm0, %v1944_v29 }
 0x175   : > { %1977 = vst.msk [vmem:[#allocation2 + $0x82] sm:$0xff] %vm381_vm0, %v1945_v30  ;;  %v1125_v31 = vpop.f32.mrf.mxu2  ;;  %v1851_v36 = vpop.f32.mrf.mxu0 }
 0x176   : > { %v1222_v33 = vadd.f32 %v1190_v32, %v1125_v31  ;;  %v1487_v34 = vpop.f32.mrf.mxu3 }
 0x177   : > { %v1551_v35 = vld [vmem:[#allocation2 + $0x98] sm:$0xff] }
 0x178   : > { %v1583_v37 = vadd.f32 %v1551_v35, %v1484_v18  ;;  %1254 = vst.msk [vmem:[#allocation2 + $0xa9] sm:$0xff] %vm381_vm0, %v1222_v33  ;;  %v2213_v38 = vpop.f32.mrf.mxu1 }
 0x17a   : > { %1615 = vst.msk [vmem:[#allocation2 + $0x98] sm:$0xff] %vm381_vm0, %v1583_v37 }
 0x17b   : > { %v2274_v39 = vld [vmem:[#allocation2 + $0x78] sm:$0xff] }
 0x17c   : > { %v2306_v40 = vadd.f32 %v2274_v39, %v5737_v62  ;;  %v2275_v41 = vld [vmem:[#allocation2 + $0x80] sm:$0xff] }
 0x17d   : > { %v2307_v42 = vadd.f32 %v2275_v41, %v2208_v10  ;;  %v1127_v43 = vpop.f32.mrf.mxu2  ;;  %v1854_v51 = vpop.f32.mrf.mxu0  ;;  %v4955_v39 = vld [vmem:[%s5413_s10] sm:$0xff] }
 0x17e   : > { %2338 = vst.msk [vmem:[#allocation2 + $0x78] sm:$0xff] %vm381_vm0, %v2306_v40  ;;  %v1223_v45 = vadd.f32 %v1191_v44, %v1127_v43  ;;  %v1489_v46 = vpop.f32.mrf.mxu3  ;;  %v4991_v40 = vld [vmem:[%s5413_s10] sm:$0xff] }
 0x17f   : > { %v1552_v49 = vld [vmem:[#allocation2 + $0xa8] sm:$0xff]  ;;  %2339 = vst.msk [vmem:[#allocation2 + $0x80] sm:$0xff] %vm381_vm0, %v2307_v42  ;;  %v4973_v42 = vld [vmem:[%s5413_s10] sm:$0xff] }
 0x180   : > { %v1584_v53 = vadd.f32 %v1552_v49, %v1487_v34  ;;  %1255 = vst.msk [vmem:[#allocation2 + $0xb1] sm:$0xff] %vm381_vm0, %v1223_v45  ;;  %v5775_v54 = vpop.f32.mrf.mxu1  ;;  %4447 = vmatmul.msk.bf16.gmra.mxu0 %vm381_vm0, %v4933_v48 }
 0x181   : > { %v1914_v55 = vld [vmem:[#allocation2 + $0x92] sm:$0xff]  ;;  %v1915_v56 = vld [vmem:[#allocation2 + $0x9a] sm:$0xff] }
 0x182   : > { %1616 = vst.msk [vmem:[#allocation2 + $0xa8] sm:$0xff] %vm381_vm0, %v1584_v53  ;;  %v1946_v57 = vadd.f32 %v1914_v55, %v1849_v23  ;;  %v1947_v58 = vadd.f32 %v1915_v56, %v1851_v36  ;;  %4263 = vmatmul.msk.bf16.gmra.mxu2 %vm381_vm0, %v4897_v47  ;;  %v1195_v36 = vld [vmem:[#allocation2 + $0xe1] sm:$0xff] }
 0x183   : > { %4355 = vmatmul.msk.bf16.gmra.mxu3 %vm381_vm0, %v4915_v50  ;;  %4539 = vmatmul.msk.bf16.gmra.mxu1 %vm381_vm0, %v4951_v52 }
 0x184   : > { %1978 = vst.msk [vmem:[#allocation2 + $0x92] sm:$0xff] %vm381_vm0, %v1946_v57 }
 0x185   : > { %1979 = vst.msk [vmem:[#allocation2 + $0x9a] sm:$0xff] %vm381_vm0, %v1947_v58  ;;  %v1130_v59 = vpop.f32.mrf.mxu2  ;;  %v1856_v0 = vpop.f32.mrf.mxu0 }
 0x186   : > { %v1224_v61 = vadd.f32 %v1192_v60, %v1130_v59  ;;  %v1492_v62 = vpop.f32.mrf.mxu3 }
 0x187   : > { %v1553_v63 = vld [vmem:[#allocation2 + $0xb0] sm:$0xff] }
 0x188   : > { %v1585_v1 = vadd.f32 %v1553_v63, %v1489_v46  ;;  %1256 = vst.msk [vmem:[#allocation2 + $0xc1] sm:$0xff] %vm381_vm0, %v1224_v61  ;;  %v2218_v2 = vpop.f32.mrf.mxu1  ;;  %v1197_v63 = vld [vmem:[#allocation2 + $0xf9] sm:$0xff] }
 0x18a   : > { %1617 = vst.msk [vmem:[#allocation2 + $0xb0] sm:$0xff] %vm381_vm0, %v1585_v1 }
 0x18b   : > { %v2276_v3 = vld [vmem:[#allocation2 + $0x90] sm:$0xff] }
 0x18c   : > { %v2308_v4 = vadd.f32 %v2276_v3, %v5756_v26  ;;  %v2277_v5 = vld [vmem:[#allocation2 + $0x98] sm:$0xff]  ;;  %v4992_v3 = vld [vmem:[%s5413_s10 + $0x8] sm:$0xff] }
 0x18d   : > { %v2309_v6 = vadd.f32 %v2277_v5, %v2213_v38  ;;  %v1132_v7 = vpop.f32.mrf.mxu2  ;;  %v1859_v15 = vpop.f32.mrf.mxu0  ;;  %v4974_v5 = vld [vmem:[%s5413_s10 + $0x8] sm:$0xff] }
 0x18e   : > { %2340 = vst.msk [vmem:[#allocation2 + $0x90] sm:$0xff] %vm381_vm0, %v2308_v4  ;;  %v1225_v9 = vadd.f32 %v1193_v8, %v1132_v7  ;;  %v1494_v10 = vpop.f32.mrf.mxu3 }
 0x18f   : > { %v1554_v13 = vld [vmem:[#allocation2 + $0xc0] sm:$0xff]  ;;  %2341 = vst.msk [vmem:[#allocation2 + $0x98] sm:$0xff] %vm381_vm0, %v2309_v6 }
 0x190   : > { %v1586_v17 = vadd.f32 %v1554_v13, %v1492_v62  ;;  %1257 = vst.msk [vmem:[#allocation2 + $0xc9] sm:$0xff] %vm381_vm0, %v1225_v9  ;;  %v2221_v18 = vpop.f32.mrf.mxu1  ;;  %4448 = vmatmul.msk.bf16.gmra.mxu0 %vm381_vm0, %v4934_v12 }
 0x191   : > { %v1916_v19 = vld [vmem:[#allocation2 + $0xaa] sm:$0xff]  ;;  %v1917_v20 = vld [vmem:[#allocation2 + $0xb2] sm:$0xff] }
 0x192   : > { %1618 = vst.msk [vmem:[#allocation2 + $0xc0] sm:$0xff] %vm381_vm0, %v1586_v17  ;;  %v1948_v21 = vadd.f32 %v1916_v19, %v1854_v51  ;;  %v1949_v22 = vadd.f32 %v1917_v20, %v1856_v0  ;;  %4264 = vmatmul.msk.bf16.gmra.mxu2 %vm381_vm0, %v4898_v11  ;;  %v1196_v51 = vld [vmem:[#allocation2 + $0xf1] sm:$0xff] }
 0x193   : > { %4356 = vmatmul.msk.bf16.gmra.mxu3 %vm381_vm0, %v4916_v14  ;;  %4540 = vmatmul.msk.bf16.gmra.mxu1 %vm381_vm0, %v4952_v16  ;;  %v1198_v14 = vld [vmem:[#allocation2 + $0x109] sm:$0xff] }
 0x194   : > { %1980 = vst.msk [vmem:[#allocation2 + $0xaa] sm:$0xff] %vm381_vm0, %v1948_v21 }
 0x195   : > { %1981 = vst.msk [vmem:[#allocation2 + $0xb2] sm:$0xff] %vm381_vm0, %v1949_v22  ;;  %v1135_v23 = vpop.f32.mrf.mxu2  ;;  %v1861_v28 = vpop.f32.mrf.mxu0 }
 0x196   : > { %v1226_v25 = vadd.f32 %v1194_v24, %v1135_v23  ;;  %v1497_v26 = vpop.f32.mrf.mxu3 }
 0x197   : > { %v1555_v27 = vld [vmem:[#allocation2 + $0xc8] sm:$0xff] }
 0x198   : > { %v1587_v29 = vadd.f32 %v1555_v27, %v1494_v10  ;;  %1258 = vst.msk [vmem:[#allocation2 + $0xd9] sm:$0xff] %vm381_vm0, %v1226_v25  ;;  %v2223_v30 = vpop.f32.mrf.mxu1 }
 0x19a   : > { %1619 = vst.msk [vmem:[#allocation2 + $0xc8] sm:$0xff] %vm381_vm0, %v1587_v29  ;;  %v4957_v29 = vld [vmem:[%s5413_s10 + $0x10] sm:$0xff] }
 0x19b   : > { %v2278_v31 = vld [vmem:[#allocation2 + $0xa8] sm:$0xff] }
 0x19c   : > { %v2310_v32 = vadd.f32 %v2278_v31, %v5775_v54  ;;  %v2279_v33 = vld [vmem:[#allocation2 + $0xb0] sm:$0xff] }
 0x19d   : > { %v2311_v34 = vadd.f32 %v2279_v33, %v2218_v2  ;;  %v1137_v35 = vpop.f32.mrf.mxu2  ;;  %v1864_v43 = vpop.f32.mrf.mxu0  ;;  %v4956_v2 = vld [vmem:[%s5413_s10 + $0x8] sm:$0xff] }
 0x19e   : > { %2342 = vst.msk [vmem:[#allocation2 + $0xa8] sm:$0xff] %vm381_vm0, %v2310_v32  ;;  %v1227_v37 = vadd.f32 %v1195_v36, %v1137_v35  ;;  %v1499_v38 = vpop.f32.mrf.mxu3  ;;  %v4975_v32 = vld [vmem:[%s5413_s10 + $0x10] sm:$0xff] }
 0x19f   : > { %v1556_v41 = vld [vmem:[#allocation2 + $0xd8] sm:$0xff]  ;;  %2343 = vst.msk [vmem:[#allocation2 + $0xb0] sm:$0xff] %vm381_vm0, %v2311_v34 }
 0x1a0   : > { %v1588_v44 = vadd.f32 %v1556_v41, %v1497_v26  ;;  %1259 = vst.msk [vmem:[#allocation2 + $0xe1] sm:$0xff] %vm381_vm0, %v1227_v37  ;;  %v2226_v45 = vpop.f32.mrf.mxu1  ;;  %4801 = vmatmul.msk.bf16.vlgmr.msra.gmra.mxu0 %vm381_vm0, %v4991_v40  ;;  %v1199_v26 = vld [vmem:[#allocation2 + $0x111] sm:$0xff]  ;;  %v1200_v41 = vld [vmem:[#allocation2 + $0x121] sm:$0xff] }
 0x1a1   : > { %v1918_v46 = vld [vmem:[#allocation2 + $0xc2] sm:$0xff]  ;;  %v1919_v47 = vld [vmem:[#allocation2 + $0xca] sm:$0xff] }
 0x1a2   : > { %1620 = vst.msk [vmem:[#allocation2 + $0xd8] sm:$0xff] %vm381_vm0, %v1588_v44  ;;  %v1950_v48 = vadd.f32 %v1918_v46, %v1859_v15  ;;  %v1951_v49 = vadd.f32 %v1919_v47, %v1861_v28  ;;  %4617 = vmatmul.msk.bf16.vlgmr.msra.gmra.mxu2 %vm381_vm0, %v4955_v39 }
 0x1a3   : > { %4709 = vmatmul.msk.bf16.vlgmr.msra.gmra.mxu3 %vm381_vm0, %v4973_v42 }
 0x1a4   : > { %1982 = vst.msk [vmem:[#allocation2 + $0xc2] sm:$0xff] %vm381_vm0, %v1950_v48 }
 0x1a5   : > { %1983 = vst.msk [vmem:[#allocation2 + $0xca] sm:$0xff] %vm381_vm0, %v1951_v49  ;;  %v1140_v50 = vpop.f32.mrf.mxu2  ;;  %v1866_v55 = vpop.f32.mrf.mxu0 }
 0x1a6   : > { %v1228_v52 = vadd.f32 %v1196_v51, %v1140_v50  ;;  %v1502_v53 = vpop.f32.mrf.mxu3 }
 0x1a7   : > { %v1557_v54 = vld [vmem:[#allocation2 + $0xe0] sm:$0xff] }
 0x1a8   : > { %v1589_v56 = vadd.f32 %v1557_v54, %v1499_v38  ;;  %1260 = vst.msk [vmem:[#allocation2 + $0xf1] sm:$0xff] %vm381_vm0, %v1228_v52  ;;  %v2228_v57 = vpop.f32.mrf.mxu1 }
 0x1aa   : > { %1621 = vst.msk [vmem:[#allocation2 + $0xe0] sm:$0xff] %vm381_vm0, %v1589_v56  ;;  %v4958_v56 = vld [vmem:[%s5413_s10 + $0x18] sm:$0xff] }
 0x1ab   : > { %v2280_v58 = vld [vmem:[#allocation2 + $0xc0] sm:$0xff] }
 0x1ac   : > { %v2312_v59 = vadd.f32 %v2280_v58, %v2221_v18  ;;  %v2281_v60 = vld [vmem:[#allocation2 + $0xc8] sm:$0xff]  ;;  %v5009_v58 = vld [vmem:[%s6253_s3] sm:$0xff] }
 0x1ad   : > { %v2313_v61 = vadd.f32 %v2281_v60, %v2223_v30  ;;  %v1142_v62 = vpop.f32.mrf.mxu2  ;;  %v1869_v6 = vpop.f32.mrf.mxu0  ;;  %v4993_v30 = vld [vmem:[%s5413_s10 + $0x10] sm:$0xff]  ;;  %v4976_v60 = vld [vmem:[%s5413_s10 + $0x18] sm:$0xff]  ;;  %3735 = vmatpush.bf16.msra.mxu1 %v5009_v58 }
 0x1ae   : > { %2344 = vst.msk [vmem:[#allocation2 + $0xc0] sm:$0xff] %vm381_vm0, %v2312_v59  ;;  %v1229_v0 = vadd.f32 %v1197_v63, %v1142_v62  ;;  %v1504_v1 = vpop.f32.mrf.mxu3  ;;  %v1206_v58 = vld [vmem:[#allocation2 + $0x169] sm:$0xff] }
 0x1af   : > { %v1558_v4 = vld [vmem:[#allocation2 + $0xf0] sm:$0xff]  ;;  %2345 = vst.msk [vmem:[#allocation2 + $0xc8] sm:$0xff] %vm381_vm0, %v2313_v61 }
 0x1b0   : > { %v1590_v7 = vadd.f32 %v1558_v4, %v1502_v53  ;;  %1261 = vst.msk [vmem:[#allocation2 + $0xf9] sm:$0xff] %vm381_vm0, %v1229_v0  ;;  %v2231_v8 = vpop.f32.mrf.mxu1  ;;  %4802 = vmatmul.msk.bf16.gmra.mxu0 %vm381_vm0, %v4992_v3  ;;  %v1201_v53 = vld [vmem:[#allocation2 + $0x129] sm:$0xff] }
 0x1b1   : > { %v1920_v9 = vld [vmem:[#allocation2 + $0xda] sm:$0xff]  ;;  %v1921_v10 = vld [vmem:[#allocation2 + $0xe2] sm:$0xff] }
 0x1b2   : > { %1622 = vst.msk [vmem:[#allocation2 + $0xf0] sm:$0xff] %vm381_vm0, %v1590_v7  ;;  %v1952_v11 = vadd.f32 %v1920_v9, %v1864_v43  ;;  %v1953_v12 = vadd.f32 %v1921_v10, %v1866_v55  ;;  %4618 = vmatmul.msk.bf16.gmra.mxu2 %vm381_vm0, %v4956_v2 }
 0x1b3   : > { %4710 = vmatmul.msk.bf16.gmra.mxu3 %vm381_vm0, %v4974_v5  ;;  %v1202_v5 = vld [vmem:[#allocation2 + $0x139] sm:$0xff] }
 0x1b4   : > { %1984 = vst.msk [vmem:[#allocation2 + $0xda] sm:$0xff] %vm381_vm0, %v1952_v11 }
 0x1b5   : > { %1985 = vst.msk [vmem:[#allocation2 + $0xe2] sm:$0xff] %vm381_vm0, %v1953_v12  ;;  %v1145_v13 = vpop.f32.mrf.mxu2  ;;  %v1871_v18 = vpop.f32.mrf.mxu0 }
 0x1b6   : > { %v1230_v15 = vadd.f32 %v1198_v14, %v1145_v13  ;;  %v1507_v16 = vpop.f32.mrf.mxu3 }
 0x1b7   : > { %v1559_v17 = vld [vmem:[#allocation2 + $0xf8] sm:$0xff] }
 0x1b8   : > { %v1591_v19 = vadd.f32 %v1559_v17, %v1504_v1  ;;  %1262 = vst.msk [vmem:[#allocation2 + $0x109] sm:$0xff] %vm381_vm0, %v1230_v15  ;;  %v2233_v20 = vpop.f32.mrf.mxu1  ;;  %v1203_v17 = vld [vmem:[#allocation2 + $0x141] sm:$0xff] }
 0x1ba   : > { %1623 = vst.msk [vmem:[#allocation2 + $0xf8] sm:$0xff] %vm381_vm0, %v1591_v19 }
 0x1bb   : > { %v2282_v21 = vld [vmem:[#allocation2 + $0xd8] sm:$0xff] }
 0x1bc   : > { %v2314_v22 = vadd.f32 %v2282_v21, %v2226_v45  ;;  %v2283_v23 = vld [vmem:[#allocation2 + $0xe0] sm:$0xff] }
 0x1bd   : > { %v2315_v24 = vadd.f32 %v2283_v23, %v2228_v57  ;;  %v1147_v25 = vpop.f32.mrf.mxu2  ;;  %v1874_v33 = vpop.f32.mrf.mxu0  ;;  %v4994_v57 = vld [vmem:[%s5413_s10 + $0x18] sm:$0xff]  ;;  %v4995_v21 = vld [vmem:[%s5413_s10 + $0x20] sm:$0xff] }
 0x1be   : > { %2346 = vst.msk [vmem:[#allocation2 + $0xd8] sm:$0xff] %vm381_vm0, %v2314_v22  ;;  %v1231_v27 = vadd.f32 %v1199_v26, %v1147_v25  ;;  %v1509_v28 = vpop.f32.mrf.mxu3  ;;  %v4977_v23 = vld [vmem:[%s5413_s10 + $0x20] sm:$0xff] }
 0x1bf   : > { %v1560_v31 = vld [vmem:[#allocation2 + $0x108] sm:$0xff]  ;;  %2347 = vst.msk [vmem:[#allocation2 + $0xe0] sm:$0xff] %vm381_vm0, %v2315_v24 }
 0x1c0   : > { %v1592_v34 = vadd.f32 %v1560_v31, %v1507_v16  ;;  %1263 = vst.msk [vmem:[#allocation2 + $0x111] sm:$0xff] %vm381_vm0, %v1231_v27  ;;  %v2236_v35 = vpop.f32.mrf.mxu1  ;;  %4803 = vmatmul.msk.bf16.gmra.mxu0 %vm381_vm0, %v4993_v30 }
 0x1c1   : > { %v1922_v36 = vld [vmem:[#allocation2 + $0xf2] sm:$0xff]  ;;  %v1923_v37 = vld [vmem:[#allocation2 + $0xfa] sm:$0xff] }
 0x1c2   : > { %1624 = vst.msk [vmem:[#allocation2 + $0x108] sm:$0xff] %vm381_vm0, %v1592_v34  ;;  %v1954_v38 = vadd.f32 %v1922_v36, %v1869_v6  ;;  %v1955_v39 = vadd.f32 %v1923_v37, %v1871_v18  ;;  %4619 = vmatmul.msk.bf16.gmra.mxu2 %vm381_vm0, %v4957_v29 }
 0x1c3   : > { %4711 = vmatmul.msk.bf16.gmra.mxu3 %vm381_vm0, %v4975_v32  ;;  %v1204_v32 = vld [vmem:[#allocation2 + $0x151] sm:$0xff] }
 0x1c4   : > { %1986 = vst.msk [vmem:[#allocation2 + $0xf2] sm:$0xff] %vm381_vm0, %v1954_v38 }
 0x1c5   : > { %1987 = vst.msk [vmem:[#allocation2 + $0xfa] sm:$0xff] %vm381_vm0, %v1955_v39  ;;  %v1150_v40 = vpop.f32.mrf.mxu2  ;;  %v1876_v45 = vpop.f32.mrf.mxu0 }
 0x1c6   : > { %v1232_v42 = vadd.f32 %v1200_v41, %v1150_v40  ;;  %v1512_v43 = vpop.f32.mrf.mxu3 }
 0x1c7   : > { %v1561_v44 = vld [vmem:[#allocation2 + $0x110] sm:$0xff] }
 0x1c8   : > { %v1593_v46 = vadd.f32 %v1561_v44, %v1509_v28  ;;  %1264 = vst.msk [vmem:[#allocation2 + $0x121] sm:$0xff] %vm381_vm0, %v1232_v42  ;;  %v2238_v47 = vpop.f32.mrf.mxu1 }
 0x1ca   : > { %1625 = vst.msk [vmem:[#allocation2 + $0x110] sm:$0xff] %vm381_vm0, %v1593_v46  ;;  %v4960_v46 = vld [vmem:[%s5413_s10 + $0x28] sm:$0xff] }
 0x1cb   : > { %v2284_v48 = vld [vmem:[#allocation2 + $0xf0] sm:$0xff] }
 0x1cc   : > { %v2316_v49 = vadd.f32 %v2284_v48, %v2231_v8  ;;  %v2285_v50 = vld [vmem:[#allocation2 + $0xf8] sm:$0xff]  ;;  %v4996_v48 = vld [vmem:[%s5413_s10 + $0x28] sm:$0xff] }
 0x1cd   : > { %v2317_v51 = vadd.f32 %v2285_v50, %v2233_v20  ;;  %v1152_v52 = vpop.f32.mrf.mxu2  ;;  %v1879_v61 = vpop.f32.mrf.mxu0  ;;  %v4959_v20 = vld [vmem:[%s5413_s10 + $0x20] sm:$0xff]  ;;  %v4978_v50 = vld [vmem:[%s5413_s10 + $0x28] sm:$0xff] }
 0x1ce   : > { %2348 = vst.msk [vmem:[#allocation2 + $0xf0] sm:$0xff] %vm381_vm0, %v2316_v49  ;;  %v1233_v54 = vadd.f32 %v1201_v53, %v1152_v52  ;;  %v1514_v55 = vpop.f32.mrf.mxu3 }
 0x1cf   : > { %v1562_v59 = vld [vmem:[#allocation2 + $0x120] sm:$0xff]  ;;  %2349 = vst.msk [vmem:[#allocation2 + $0xf8] sm:$0xff] %vm381_vm0, %v2317_v51 }
 0x1d0   : > { %v1594_v62 = vadd.f32 %v1562_v59, %v1512_v43  ;;  %1265 = vst.msk [vmem:[#allocation2 + $0x129] sm:$0xff] %vm381_vm0, %v1233_v54  ;;  %v2241_v63 = vpop.f32.mrf.mxu1  ;;  %4804 = vmatmul.msk.bf16.gmra.mxu0 %vm381_vm0, %v4994_v57  ;;  %v1205_v43 = vld [vmem:[#allocation2 + $0x159] sm:$0xff] }
 0x1d1   : > { %v1924_v0 = vld [vmem:[#allocation2 + $0x10a] sm:$0xff]  ;;  %v1925_v1 = vld [vmem:[#allocation2 + $0x112] sm:$0xff] }
 0x1d2   : > { %1626 = vst.msk [vmem:[#allocation2 + $0x120] sm:$0xff] %vm381_vm0, %v1594_v62  ;;  %v1956_v2 = vadd.f32 %v1924_v0, %v1874_v33  ;;  %v1957_v3 = vadd.f32 %v1925_v1, %v1876_v45  ;;  %4620 = vmatmul.msk.bf16.gmra.mxu2 %vm381_vm0, %v4958_v56 }
 0x1d3   : > { %4712 = vmatmul.msk.bf16.gmra.mxu3 %vm381_vm0, %v4976_v60 }
 0x1d4   : > { %1988 = vst.msk [vmem:[#allocation2 + $0x10a] sm:$0xff] %vm381_vm0, %v1956_v2 }
 0x1d5   : > { %1989 = vst.msk [vmem:[#allocation2 + $0x112] sm:$0xff] %vm381_vm0, %v1957_v3  ;;  %v1155_v4 = vpop.f32.mrf.mxu2  ;;  %v1881_v9 = vpop.f32.mrf.mxu0 }
 0x1d6   : > { %v1234_v6 = vadd.f32 %v1202_v5, %v1155_v4  ;;  %v1517_v7 = vpop.f32.mrf.mxu3 }
 0x1d7   : > { %v1563_v8 = vld [vmem:[#allocation2 + $0x128] sm:$0xff] }
 0x1d8   : > { %v1595_v10 = vadd.f32 %v1563_v8, %v1514_v55  ;;  %1266 = vst.msk [vmem:[#allocation2 + $0x139] sm:$0xff] %vm381_vm0, %v1234_v6  ;;  %v2243_v11 = vpop.f32.mrf.mxu1  ;;  %v1207_v6 = vld [vmem:[#allocation2 + $0x171] sm:$0xff] }
 0x1da   : > { %1627 = vst.msk [vmem:[#allocation2 + $0x128] sm:$0xff] %vm381_vm0, %v1595_v10  ;;  %v4997_v10 = vld [vmem:[%s5413_s10 + $0x30] sm:$0xff] }
 0x1db   : > { %v2286_v12 = vld [vmem:[#allocation2 + $0x108] sm:$0xff] }
 0x1dc   : > { %v2318_v13 = vadd.f32 %v2286_v12, %v2236_v35  ;;  %v2287_v14 = vld [vmem:[#allocation2 + $0x110] sm:$0xff] }
 0x1dd   : > { %v2319_v15 = vadd.f32 %v2287_v14, %v2238_v47  ;;  %v1157_v16 = vpop.f32.mrf.mxu2  ;;  %v1884_v24 = vpop.f32.mrf.mxu0  ;;  %v4979_v12 = vld [vmem:[%s5413_s10 + $0x30] sm:$0xff] }
 0x1de   : > { %2350 = vst.msk [vmem:[#allocation2 + $0x108] sm:$0xff] %vm381_vm0, %v2318_v13  ;;  %v1235_v18 = vadd.f32 %v1203_v17, %v1157_v16  ;;  %v1519_v19 = vpop.f32.mrf.mxu3 }
 0x1df   : > { %v1564_v22 = vld [vmem:[#allocation2 + $0x138] sm:$0xff]  ;;  %2351 = vst.msk [vmem:[#allocation2 + $0x110] sm:$0xff] %vm381_vm0, %v2319_v15 }
 0x1e0   : > { %v1596_v25 = vadd.f32 %v1564_v22, %v1517_v7  ;;  %1267 = vst.msk [vmem:[#allocation2 + $0x141] sm:$0xff] %vm381_vm0, %v1235_v18  ;;  %4805 = vmatmul.msk.bf16.gmra.mxu0 %vm381_vm0, %v4995_v21  ;;  %v2246_v30 = vpop.f32.mrf.mxu1  ;;  %v1208_v21 = vld [vmem:[#allocation2 + $0x181] sm:$0xff] }
 0x1e1   : > { %v1926_v26 = vld [vmem:[#allocation2 + $0x122] sm:$0xff]  ;;  %v1927_v27 = vld [vmem:[#allocation2 + $0x12a] sm:$0xff] }
 0x1e2   : > { %1628 = vst.msk [vmem:[#allocation2 + $0x138] sm:$0xff] %vm381_vm0, %v1596_v25  ;;  %v1958_v28 = vadd.f32 %v1926_v26, %v1879_v61  ;;  %v1959_v29 = vadd.f32 %v1927_v27, %v1881_v9  ;;  %4621 = vmatmul.msk.bf16.gmra.mxu2 %vm381_vm0, %v4959_v20  ;;  %v4961_v9 = vld [vmem:[%s5413_s10 + $0x30] sm:$0xff] }
 0x1e3   : > { %4713 = vmatmul.msk.bf16.gmra.mxu3 %vm381_vm0, %v4977_v23 }
 0x1e4   : > { %1990 = vst.msk [vmem:[#allocation2 + $0x122] sm:$0xff] %vm381_vm0, %v1958_v28 }
 0x1e5   : > { %1991 = vst.msk [vmem:[#allocation2 + $0x12a] sm:$0xff] %vm381_vm0, %v1959_v29  ;;  %v1160_v31 = vpop.f32.mrf.mxu2  ;;  %v1886_v36 = vpop.f32.mrf.mxu0 }
 0x1e6   : > { %v1236_v33 = vadd.f32 %v1204_v32, %v1160_v31  ;;  %v1522_v34 = vpop.f32.mrf.mxu3 }
 0x1e7   : > { %v1565_v35 = vld [vmem:[#allocation2 + $0x140] sm:$0xff] }
 0x1e8   : > { %v1597_v37 = vadd.f32 %v1565_v35, %v1519_v19  ;;  %1268 = vst.msk [vmem:[#allocation2 + $0x151] sm:$0xff] %vm381_vm0, %v1236_v33  ;;  %v2248_v47 = vpop.f32.mrf.mxu1  ;;  %v1209_v33 = vld [vmem:[#allocation2 + $0x189] sm:$0xff] }
 0x1ea   : > { %1629 = vst.msk [vmem:[#allocation2 + $0x140] sm:$0xff] %vm381_vm0, %v1597_v37  ;;  %v4998_v37 = vld [vmem:[%s5413_s10 + $0x38] sm:$0xff] }
 0x1eb   : > { %v2288_v38 = vld [vmem:[#allocation2 + $0x120] sm:$0xff] }
 0x1ec   : > { %v2320_v39 = vadd.f32 %v2288_v38, %v2241_v63  ;;  %v2289_v40 = vld [vmem:[#allocation2 + $0x128] sm:$0xff] }
 0x1ed   : > { %v2321_v41 = vadd.f32 %v2289_v40, %v2243_v11  ;;  %v1162_v42 = vpop.f32.mrf.mxu2  ;;  %v1889_v51 = vpop.f32.mrf.mxu0 }
 0x1ee   : > { %2352 = vst.msk [vmem:[#allocation2 + $0x120] sm:$0xff] %vm381_vm0, %v2320_v39  ;;  %v1237_v44 = vadd.f32 %v1205_v43, %v1162_v42  ;;  %v1524_v45 = vpop.f32.mrf.mxu3  ;;  %v4980_v39 = vld [vmem:[%s5413_s10 + $0x38] sm:$0xff] }
 0x1ef   : > { %v1566_v49 = vld [vmem:[#allocation2 + $0x150] sm:$0xff]  ;;  %2353 = vst.msk [vmem:[#allocation2 + $0x128] sm:$0xff] %vm381_vm0, %v2321_v41 }
 0x1f0   : > { %v1598_v52 = vadd.f32 %v1566_v49, %v1522_v34  ;;  %1269 = vst.msk [vmem:[#allocation2 + $0x159] sm:$0xff] %vm381_vm0, %v1237_v44  ;;  %4806 = vmatmul.msk.bf16.gmra.mxu0 %vm381_vm0, %v4996_v48  ;;  %v2251_v0 = vpop.f32.mrf.mxu1 }
 0x1f1   : > { %v1928_v53 = vld [vmem:[#allocation2 + $0x13a] sm:$0xff]  ;;  %v1929_v54 = vld [vmem:[#allocation2 + $0x142] sm:$0xff] }
 0x1f2   : > { %1630 = vst.msk [vmem:[#allocation2 + $0x150] sm:$0xff] %vm381_vm0, %v1598_v52  ;;  %v1960_v55 = vadd.f32 %v1928_v53, %v1884_v24  ;;  %v1961_v56 = vadd.f32 %v1929_v54, %v1886_v36  ;;  %4622 = vmatmul.msk.bf16.gmra.mxu2 %vm381_vm0, %v4960_v46  ;;  %v4962_v36 = vld [vmem:[%s5413_s10 + $0x38] sm:$0xff] }
 0x1f3   : > { %4714 = vmatmul.msk.bf16.gmra.mxu3 %vm381_vm0, %v4978_v50 }
 0x1f4   : > { %1992 = vst.msk [vmem:[#allocation2 + $0x13a] sm:$0xff] %vm381_vm0, %v1960_v55 }
 0x1f5   : > { %1993 = vst.msk [vmem:[#allocation2 + $0x142] sm:$0xff] %vm381_vm0, %v1961_v56  ;;  %v1165_v57 = vpop.f32.mrf.mxu2  ;;  %v1891_v62 = vpop.f32.mrf.mxu0 }
 0x1f6   : > { %v1238_v59 = vadd.f32 %v1206_v58, %v1165_v57  ;;  %v1527_v60 = vpop.f32.mrf.mxu3 }
 0x1f7   : > { %v1567_v61 = vld [vmem:[#allocation2 + $0x158] sm:$0xff] }
 0x1f8   : > { %v1599_v63 = vadd.f32 %v1567_v61, %v1524_v45  ;;  %1270 = vst.msk [vmem:[#allocation2 + $0x169] sm:$0xff] %vm381_vm0, %v1238_v59  ;;  %v2253_v19 = vpop.f32.mrf.mxu1  ;;  %v1211_v59 = vld [vmem:[#allocation2 + $0x1a1] sm:$0xff] }
 0x1fa   : > { %1631 = vst.msk [vmem:[#allocation2 + $0x158] sm:$0xff] %vm381_vm0, %v1599_v63  ;;  %v4999_v63 = vld [vmem:[%s5413_s10 + $0x40] sm:$0xff] }
 0x1fb   : > { %v2290_v1 = vld [vmem:[#allocation2 + $0x138] sm:$0xff] }
 0x1fc   : > { %v2322_v2 = vadd.f32 %v2290_v1, %v2246_v30  ;;  %v2291_v3 = vld [vmem:[#allocation2 + $0x140] sm:$0xff] }
 0x1fd   : > { %v2323_v4 = vadd.f32 %v2291_v3, %v2248_v47  ;;  %v1167_v5 = vpop.f32.mrf.mxu2  ;;  %v1894_v13 = vpop.f32.mrf.mxu0  ;;  %v1210_v47 = vld [vmem:[#allocation2 + $0x199] sm:$0xff] }
 0x1fe   : > { %2354 = vst.msk [vmem:[#allocation2 + $0x138] sm:$0xff] %vm381_vm0, %v2322_v2  ;;  %v1239_v7 = vadd.f32 %v1207_v6, %v1167_v5  ;;  %v1529_v8 = vpop.f32.mrf.mxu3  ;;  %v4981_v1 = vld [vmem:[%s5413_s10 + $0x40] sm:$0xff] }
 0x1ff   : > { %v1568_v11 = vld [vmem:[#allocation2 + $0x168] sm:$0xff]  ;;  %2355 = vst.msk [vmem:[#allocation2 + $0x140] sm:$0xff] %vm381_vm0, %v2323_v4 }
 0x200   : > { %v1600_v14 = vadd.f32 %v1568_v11, %v1527_v60  ;;  %1271 = vst.msk [vmem:[#allocation2 + $0x171] sm:$0xff] %vm381_vm0, %v1239_v7  ;;  %4807 = vmatmul.msk.bf16.gmra.mxu0 %vm381_vm0, %v4997_v10  ;;  %v2256_v30 = vpop.f32.mrf.mxu1 }
 0x201   : > { %v1930_v15 = vld [vmem:[#allocation2 + $0x152] sm:$0xff]  ;;  %v1931_v16 = vld [vmem:[#allocation2 + $0x15a] sm:$0xff] }
 0x202   : > { %1632 = vst.msk [vmem:[#allocation2 + $0x168] sm:$0xff] %vm381_vm0, %v1600_v14  ;;  %v1962_v17 = vadd.f32 %v1930_v15, %v1889_v51  ;;  %v1963_v18 = vadd.f32 %v1931_v16, %v1891_v62  ;;  %4623 = vmatmul.msk.bf16.gmra.mxu2 %vm381_vm0, %v4961_v9  ;;  %v4963_v62 = vld [vmem:[%s5413_s10 + $0x40] sm:$0xff] }
 0x203   : > { %4715 = vmatmul.msk.bf16.gmra.mxu3 %vm381_vm0, %v4979_v12  ;;  %v2628_v9 = vld [vmem:[#allocation2 + $0x2] sm:$0xff] }
 0x204   : > { %1994 = vst.msk [vmem:[#allocation2 + $0x152] sm:$0xff] %vm381_vm0, %v1962_v17 }
 0x205   : > { %1995 = vst.msk [vmem:[#allocation2 + $0x15a] sm:$0xff] %vm381_vm0, %v1963_v18  ;;  %v1170_v20 = vpop.f32.mrf.mxu2  ;;  %v1896_v25 = vpop.f32.mrf.mxu0  ;;  %v2629_v18 = vld [vmem:[#allocation2 + $0xa] sm:$0xff] }
 0x206   : > { %v1240_v22 = vadd.f32 %v1208_v21, %v1170_v20  ;;  %v1532_v23 = vpop.f32.mrf.mxu3 }
 0x207   : > { %v1569_v24 = vld [vmem:[#allocation2 + $0x170] sm:$0xff] }
 0x208   : > { %v1601_v26 = vadd.f32 %v1569_v24, %v1529_v8  ;;  %1272 = vst.msk [vmem:[#allocation2 + $0x181] sm:$0xff] %vm381_vm0, %v1240_v22  ;;  %v2258_v50 = vpop.f32.mrf.mxu1 }
 0x20a   : > { %1633 = vst.msk [vmem:[#allocation2 + $0x170] sm:$0xff] %vm381_vm0, %v1601_v26  ;;  %v5000_v26 = vld [vmem:[%s5413_s10 + $0x48] sm:$0xff] }
 0x20b   : > { %v2292_v27 = vld [vmem:[#allocation2 + $0x150] sm:$0xff] }
 0x20c   : > { %v2324_v28 = vadd.f32 %v2292_v27, %v2251_v0  ;;  %v2293_v29 = vld [vmem:[#allocation2 + $0x158] sm:$0xff] }
 0x20d   : > { %v2325_v31 = vadd.f32 %v2293_v29, %v2253_v19  ;;  %v1172_v32 = vpop.f32.mrf.mxu2  ;;  %v1899_v40 = vpop.f32.mrf.mxu0 }
 0x20e   : > { %2356 = vst.msk [vmem:[#allocation2 + $0x150] sm:$0xff] %vm381_vm0, %v2324_v28  ;;  %v1241_v34 = vadd.f32 %v1209_v33, %v1172_v32  ;;  %v1534_v35 = vpop.f32.mrf.mxu3  ;;  %v4982_v28 = vld [vmem:[%s5413_s10 + $0x48] sm:$0xff]  ;;  %v2630_v32 = vld [vmem:[#allocation2 + $0x1a] sm:$0xff] }
 0x20f   : > { %v1570_v38 = vld [vmem:[#allocation2 + $0x180] sm:$0xff]  ;;  %2357 = vst.msk [vmem:[#allocation2 + $0x158] sm:$0xff] %vm381_vm0, %v2325_v31 }
 0x210   : > { %v1602_v41 = vadd.f32 %v1570_v38, %v1532_v23  ;;  %1273 = vst.msk [vmem:[#allocation2 + $0x189] sm:$0xff] %vm381_vm0, %v1241_v34  ;;  %4808 = vmatmul.msk.bf16.gmra.mxu0 %vm381_vm0, %v4998_v37  ;;  %v2261_v4 = vpop.f32.mrf.mxu1 }
 0x211   : > { %v1932_v42 = vld [vmem:[#allocation2 + $0x16a] sm:$0xff]  ;;  %v1933_v43 = vld [vmem:[#allocation2 + $0x172] sm:$0xff] }
 0x212   : > { %1634 = vst.msk [vmem:[#allocation2 + $0x180] sm:$0xff] %vm381_vm0, %v1602_v41  ;;  %v1964_v44 = vadd.f32 %v1932_v42, %v1894_v13  ;;  %v1965_v45 = vadd.f32 %v1933_v43, %v1896_v25  ;;  %4624 = vmatmul.msk.bf16.gmra.mxu2 %vm381_vm0, %v4962_v36  ;;  %v4964_v25 = vld [vmem:[%s5413_s10 + $0x48] sm:$0xff] }
 0x213   : > { %4716 = vmatmul.msk.bf16.gmra.mxu3 %vm381_vm0, %v4980_v39  ;;  %v2631_v41 = vld [vmem:[#allocation2 + $0x22] sm:$0xff] }
 0x214   : > { %1996 = vst.msk [vmem:[#allocation2 + $0x16a] sm:$0xff] %vm381_vm0, %v1964_v44  ;;  %v4965_v44 = vld [vmem:[%s5413_s10 + $0x50] sm:$0xff] }
 0x215   : > { %1997 = vst.msk [vmem:[#allocation2 + $0x172] sm:$0xff] %vm381_vm0, %v1965_v45  ;;  %v1175_v46 = vpop.f32.mrf.mxu2  ;;  %v1901_v52 = vpop.f32.mrf.mxu0  ;;  %v5001_v45 = vld [vmem:[%s5413_s10 + $0x50] sm:$0xff] }
 0x216   : > { %v1242_v48 = vadd.f32 %v1210_v47, %v1175_v46  ;;  %v1537_v49 = vpop.f32.mrf.mxu3  ;;  %v4983_v47 = vld [vmem:[%s5413_s10 + $0x50] sm:$0xff] }
 0x217   : > { %v1571_v51 = vld [vmem:[#allocation2 + $0x188] sm:$0xff] }
 0x218   : > { %v1603_v53 = vadd.f32 %v1571_v51, %v1534_v35  ;;  %1274 = vst.msk [vmem:[#allocation2 + $0x199] sm:$0xff] %vm381_vm0, %v1242_v48  ;;  %v2263_v16 = vpop.f32.mrf.mxu1 }
 0x21a   : > { %1635 = vst.msk [vmem:[#allocation2 + $0x188] sm:$0xff] %vm381_vm0, %v1603_v53  ;;  %v2632_v53 = vld [vmem:[#allocation2 + $0x32] sm:$0xff] }
 0x21b   : > { %v2294_v54 = vld [vmem:[#allocation2 + $0x168] sm:$0xff] }
 0x21c   : > { %v2326_v55 = vadd.f32 %v2294_v54, %v2256_v30  ;;  %v2295_v56 = vld [vmem:[#allocation2 + $0x170] sm:$0xff] }
 0x21d   : > { %v2327_v57 = vadd.f32 %v2295_v56, %v2258_v50  ;;  %v1177_v58 = vpop.f32.mrf.mxu2  ;;  %v3272_v2 = vpop.f32.mrf.mxu0 }
 0x21e   : > { %2358 = vst.msk [vmem:[#allocation2 + $0x168] sm:$0xff] %vm381_vm0, %v2326_v55  ;;  %v1243_v60 = vadd.f32 %v1211_v59, %v1177_v58  ;;  %v1539_v61 = vpop.f32.mrf.mxu3 }
 0x21f   : > { %v1572_v0 = vld [vmem:[#allocation2 + $0x198] sm:$0xff]  ;;  %2359 = vst.msk [vmem:[#allocation2 + $0x170] sm:$0xff] %vm381_vm0, %v2327_v57 }
 0x220   : > { %v1604_v3 = vadd.f32 %v1572_v0, %v1537_v49  ;;  %1275 = vst.msk [vmem:[#allocation2 + $0x1a1] sm:$0xff] %vm381_vm0, %v1243_v60  ;;  %4809 = vmatmul.msk.bf16.gmra.mxu0 %vm381_vm0, %v4999_v63 }
 0x221   : > { %v1934_v5 = vld [vmem:[#allocation2 + $0x182] sm:$0xff]  ;;  %v1935_v6 = vld [vmem:[#allocation2 + $0x18a] sm:$0xff] }
 0x222   : > { %1636 = vst.msk [vmem:[#allocation2 + $0x198] sm:$0xff] %vm381_vm0, %v1604_v3  ;;  %v1966_v7 = vadd.f32 %v1934_v5, %v1899_v40  ;;  %v1967_v8 = vadd.f32 %v1935_v6, %v1901_v52  ;;  %4625 = vmatmul.msk.bf16.gmra.mxu2 %vm381_vm0, %v4963_v62  ;;  %v2633_v62 = vld [vmem:[#allocation2 + $0x3a] sm:$0xff] }
 0x223   : > { %4717 = vmatmul.msk.bf16.gmra.mxu3 %vm381_vm0, %v4981_v1  ;;  %v4966_v1 = vld [vmem:[%s5413_s10 + $0x58] sm:$0xff] }
 0x224   : > { %1998 = vst.msk [vmem:[#allocation2 + $0x182] sm:$0xff] %vm381_vm0, %v1966_v7 }
 0x225   : > { %1999 = vst.msk [vmem:[#allocation2 + $0x18a] sm:$0xff] %vm381_vm0, %v1967_v8  ;;  %v2548_v10 = vpop.f32.mrf.mxu2  ;;  %v3274_v14 = vpop.f32.mrf.mxu0 }
 0x226   : > { %v2660_v11 = vadd.f32 %v2628_v9, %v2548_v10  ;;  %v2910_v12 = vpop.f32.mrf.mxu3  ;;  %v2634_v10 = vld [vmem:[#allocation2 + $0x4a] sm:$0xff] }
 0x227   : > { %v1573_v13 = vld [vmem:[#allocation2 + $0x1a0] sm:$0xff] }
 0x228   : > { %v1605_v15 = vadd.f32 %v1573_v13, %v1539_v61  ;;  %2692 = vst.msk [vmem:[#allocation2 + $0x2] sm:$0xff] %vm381_vm0, %v2660_v11 }
 0x22a   : > { %1637 = vst.msk [vmem:[#allocation2 + $0x1a0] sm:$0xff] %vm381_vm0, %v1605_v15 }
 0x22b   : > { %v2296_v17 = vld [vmem:[#allocation2 + $0x180] sm:$0xff] }
 0x22c   : > { %v2328_v19 = vadd.f32 %v2296_v17, %v2261_v4  ;;  %v2297_v20 = vld [vmem:[#allocation2 + $0x188] sm:$0xff]  ;;  %v4984_v4 = vld [vmem:[%s5413_s10 + $0x58] sm:$0xff] }
 0x22d   : > { %v2329_v21 = vadd.f32 %v2297_v20, %v2263_v16  ;;  %v2550_v22 = vpop.f32.mrf.mxu2  ;;  %v3277_v29 = vpop.f32.mrf.mxu0 }
 0x22e   : > { %2360 = vst.msk [vmem:[#allocation2 + $0x180] sm:$0xff] %vm381_vm0, %v2328_v19  ;;  %v2661_v23 = vadd.f32 %v2629_v18, %v2550_v22  ;;  %v2912_v24 = vpop.f32.mrf.mxu3  ;;  %v5976_v18 = vld [vmem:[%s6252_s2] ss:$0 sm:$0xff] }
 0x22f   : > { %v2990_v27 = vld [vmem:[#allocation2 + $0x1] sm:$0xff]  ;;  %2361 = vst.msk [vmem:[#allocation2 + $0x188] sm:$0xff] %vm381_vm0, %v2329_v21 }
 0x230   : > { %v3022_v30 = vadd.f32 %v2990_v27, %v2910_v12  ;;  %2693 = vst.msk [vmem:[#allocation2 + $0xa] sm:$0xff] %vm381_vm0, %v2661_v23  ;;  %4810 = vmatmul.msk.bf16.gmra.mxu0 %vm381_vm0, %v5000_v26  ;;  %v4967_v27 = vld [vmem:[%s5413_s10 + $0x60] sm:$0xff] }
 0x232   : > { %3054 = vst.msk [vmem:[#allocation2 + $0x1] sm:$0xff] %vm381_vm0, %v3022_v30  ;;  %4626 = vmatmul.msk.bf16.gmra.mxu2 %vm381_vm0, %v4964_v25  ;;  %v5003_v30 = vld [vmem:[%s5413_s10 + $0x60] sm:$0xff] }
 0x233   : > { %4718 = vmatmul.msk.bf16.gmra.mxu3 %vm381_vm0, %v4982_v28 }
 0x235   : > { %v2553_v31 = vpop.f32.mrf.mxu2  ;;  %v3279_v36 = vpop.f32.mrf.mxu0 }
 0x236   : > { %v2662_v33 = vadd.f32 %v2630_v32, %v2553_v31  ;;  %v2915_v34 = vpop.f32.mrf.mxu3  ;;  %v4985_v32 = vld [vmem:[%s5413_s10 + $0x60] sm:$0xff] }
 0x237   : > { %v2991_v35 = vld [vmem:[#allocation2 + $0x9] sm:$0xff] }
 0x238   : > { %v3023_v37 = vadd.f32 %v2991_v35, %v2912_v24  ;;  %2694 = vst.msk [vmem:[#allocation2 + $0x1a] sm:$0xff] %vm381_vm0, %v2662_v33  ;;  %v2635_v24 = vld [vmem:[#allocation2 + $0x52] sm:$0xff] }
 0x239   : > { %v3352_v38 = vld [vmem:[#allocation2] sm:$0xff] }
 0x23a   : > { %3055 = vst.msk [vmem:[#allocation2 + $0x9] sm:$0xff] %vm381_vm0, %v3023_v37  ;;  %v3384_v39 = vadd.f32 %v3352_v38, %v3272_v2  ;;  %v5002_v2 = vld [vmem:[%s5413_s10 + $0x58] sm:$0xff] }
 0x23c   : > { %3416 = vst.msk [vmem:[#allocation2] sm:$0xff] %vm381_vm0, %v3384_v39 }
 0x23d   : > { %v2555_v40 = vpop.f32.mrf.mxu2  ;;  %v3282_v48 = vpop.f32.mrf.mxu0 }
 0x23e   : > { %v2663_v42 = vadd.f32 %v2631_v41, %v2555_v40  ;;  %v2917_v43 = vpop.f32.mrf.mxu3 }
 0x23f   : > { %v2992_v46 = vld [vmem:[#allocation2 + $0x19] sm:$0xff] }
 0x240   : > { %v3024_v49 = vadd.f32 %v2992_v46, %v2915_v34  ;;  %2695 = vst.msk [vmem:[#allocation2 + $0x22] sm:$0xff] %vm381_vm0, %v2663_v42  ;;  %4811 = vmatmul.msk.bf16.gmra.mxu0 %vm381_vm0, %v5001_v45 }
 0x241   : > { %v3353_v50 = vld [vmem:[#allocation2 + $0x8] sm:$0xff] }
 0x242   : > { %3056 = vst.msk [vmem:[#allocation2 + $0x19] sm:$0xff] %vm381_vm0, %v3024_v49  ;;  %v3385_v51 = vadd.f32 %v3353_v50, %v3274_v14  ;;  %4627 = vmatmul.msk.bf16.gmra.mxu2 %vm381_vm0, %v4965_v44 }
 0x243   : > { %4719 = vmatmul.msk.bf16.gmra.mxu3 %vm381_vm0, %v4983_v47 }
 0x244   : > { %3417 = vst.msk [vmem:[#allocation2 + $0x8] sm:$0xff] %vm381_vm0, %v3385_v51 }
 0x245   : > { %v2558_v52 = vpop.f32.mrf.mxu2  ;;  %v3284_v57 = vpop.f32.mrf.mxu0 }
 0x246   : > { %v2664_v54 = vadd.f32 %v2632_v53, %v2558_v52  ;;  %v2920_v55 = vpop.f32.mrf.mxu3 }
 0x247   : > { %v2993_v56 = vld [vmem:[#allocation2 + $0x21] sm:$0xff] }
 0x248   : > { %v3025_v58 = vadd.f32 %v2993_v56, %v2917_v43  ;;  %2696 = vst.msk [vmem:[#allocation2 + $0x32] sm:$0xff] %vm381_vm0, %v2664_v54  ;;  %v2636_v43 = vld [vmem:[#allocation2 + $0x62] sm:$0xff]  ;;  %v2637_v56 = vld [vmem:[#allocation2 + $0x6a] sm:$0xff] }
 0x249   : > { %v3354_v59 = vld [vmem:[#allocation2 + $0x18] sm:$0xff] }
 0x24a   : > { %3057 = vst.msk [vmem:[#allocation2 + $0x21] sm:$0xff] %vm381_vm0, %v3025_v58  ;;  %v3386_v60 = vadd.f32 %v3354_v59, %v3277_v29  ;;  %v4968_v59 = vld [vmem:[%s5413_s10 + $0x68] sm:$0xff] }
 0x24c   : > { %3418 = vst.msk [vmem:[#allocation2 + $0x18] sm:$0xff] %vm381_vm0, %v3386_v60 }
 0x24d   : > { %v2560_v61 = vpop.f32.mrf.mxu2  ;;  %v5961_v5 = vpop.f32.mrf.mxu0 }
 0x24e   : > { %v2665_v63 = vadd.f32 %v2633_v62, %v2560_v61  ;;  %v2922_v0 = vpop.f32.mrf.mxu3  ;;  %v5004_v62 = vld [vmem:[%s5413_s10 + $0x68] sm:$0xff] }
 0x24f   : > { %v2994_v3 = vld [vmem:[#allocation2 + $0x31] sm:$0xff] }
 0x250   : > { %v3026_v6 = vadd.f32 %v2994_v3, %v2920_v55  ;;  %2697 = vst.msk [vmem:[#allocation2 + $0x3a] sm:$0xff] %vm381_vm0, %v2665_v63  ;;  %4812 = vmatmul.msk.bf16.gmra.mxu0 %vm381_vm0, %v5002_v2 }
 0x251   : > { %v3355_v7 = vld [vmem:[#allocation2 + $0x20] sm:$0xff] }
 0x252   : > { %3058 = vst.msk [vmem:[#allocation2 + $0x31] sm:$0xff] %vm381_vm0, %v3026_v6  ;;  %v3387_v8 = vadd.f32 %v3355_v7, %v3279_v36  ;;  %4628 = vmatmul.msk.bf16.gmra.mxu2 %vm381_vm0, %v4966_v1 }
 0x253   : > { %4720 = vmatmul.msk.bf16.gmra.mxu3 %vm381_vm0, %v4984_v4 }
 0x254   : > { %3419 = vst.msk [vmem:[#allocation2 + $0x20] sm:$0xff] %vm381_vm0, %v3387_v8 }
 0x255   : > { %v2563_v9 = vpop.f32.mrf.mxu2  ;;  %v5969_v14 = vpop.f32.mrf.mxu0 }
 0x256   : > { %v2666_v11 = vadd.f32 %v2634_v10, %v2563_v9  ;;  %v2925_v12 = vpop.f32.mrf.mxu3 }
 0x257   : > { %v2995_v13 = vld [vmem:[#allocation2 + $0x39] sm:$0xff] }
 0x258   : > { %v3027_v15 = vadd.f32 %v2995_v13, %v2922_v0  ;;  %2698 = vst.msk [vmem:[#allocation2 + $0x4a] sm:$0xff] %vm381_vm0, %v2666_v11  ;;  %v4986_v0 = vld [vmem:[%s5413_s10 + $0x68] sm:$0xff]  ;;  %v2638_v11 = vld [vmem:[#allocation2 + $0x7a] sm:$0xff] }
 0x259   : > { %v3356_v16 = vld [vmem:[#allocation2 + $0x30] sm:$0xff] }
 0x25a   : > { %3059 = vst.msk [vmem:[#allocation2 + $0x39] sm:$0xff] %vm381_vm0, %v3027_v15  ;;  %v3388_v17 = vadd.f32 %v3356_v16, %v3282_v48 }
 0x25b   : > { %v3448_v19 = vld [vmem:[#allocation2 + $0x19] sm:$0xff]  ;;  %v3449_v20 = vld [vmem:[#allocation2 + $0x21] sm:$0xff] }
 0x25c   : > { %3420 = vst.msk [vmem:[#allocation2 + $0x30] sm:$0xff] %vm381_vm0, %v3388_v17  ;;  %v3484_v21 = vadd.f32 %v5976_v18, %v3448_v19  ;;  %v3485_v22 = vadd.f32 %v5976_v18, %v3449_v20 }
 0x25d   : > { %v2565_v23 = vpop.f32.mrf.mxu2  ;;  %v5984_v33 = vpop.f32.mrf.mxu0 }
 0x25e   : > { %v2667_v25 = vadd.f32 %v2635_v24, %v2565_v23  ;;  %v2927_v26 = vpop.f32.mrf.mxu3  ;;  %v3516_v28 = vmax.f32 %v3484_v21, 0.0  ;;  %v3517_v29 = vmax.f32 %v3485_v22, 0.0 }
 0x25f   : > { %v2996_v31 = vld [vmem:[#allocation2 + $0x49] sm:$0xff] }
 0x260   : > { %v3028_v34 = vadd.f32 %v2996_v31, %v2925_v12  ;;  %2699 = vst.msk [vmem:[#allocation2 + $0x52] sm:$0xff] %vm381_vm0, %v2667_v25  ;;  %v3548_v35 = vpack.c.bf16 %v3516_v28, %v3516_v28  ;;  %v3549_v36 = vpack.c.bf16 %v3517_v29, %v3517_v29  ;;  %4813 = vmatmul.msk.bf16.gmra.mxu0 %vm381_vm0, %v5003_v30  ;;  %v2639_v25 = vld [vmem:[#allocation2 + $0x82] sm:$0xff]  ;;  %v4969_v28 = vld [vmem:[%s5413_s10 + $0x70] sm:$0xff] }
 0x261   : > { %v3357_v37 = vld [vmem:[#allocation2 + $0x38] sm:$0xff]  ;;  %v5005_v31 = vld [vmem:[%s5413_s10 + $0x70] sm:$0xff] }
 0x262   : > { %3060 = vst.msk [vmem:[#allocation2 + $0x49] sm:$0xff] %vm381_vm0, %v3028_v34  ;;  %v3389_v38 = vadd.f32 %v3357_v37, %v3284_v57  ;;  %4629 = vmatmul.msk.bf16.gmra.mxu2 %vm381_vm0, %v4967_v27  ;;  %v3620_v39 = vunpack.c.l.b16 %v3548_v35  ;;  %v3621_v40 = vunpack.c.l.b16 %v3549_v36  ;;  %v4987_v34 = vld [vmem:[%s5413_s10 + $0x70] sm:$0xff] }
 0x263   : > { %4721 = vmatmul.msk.bf16.gmra.mxu3 %vm381_vm0, %v4985_v32 }
 0x264   : > { %3421 = vst.msk [vmem:[#allocation2 + $0x38] sm:$0xff] %vm381_vm0, %v3389_v38  ;;  %v3652_v41 = vpack.c.b16 %v3621_v40, %v3620_v39 }
 0x265   : > { %v2568_v42 = vpop.f32.mrf.mxu2  ;;  %v5993_v47 = vpop.f32.mrf.mxu0 }
 0x266   : > { %v2668_v44 = vadd.f32 %v2636_v43, %v2568_v42  ;;  %4825 = vmatmul.msk.bf16.vlgmr.msra.gmra.mxu1 %vm381_vm0, %v3652_v41  ;;  %v2930_v45 = vpop.f32.mrf.mxu3 }
 0x267   : > { %v2997_v46 = vld [vmem:[#allocation2 + $0x51] sm:$0xff] }
 0x268   : > { %v3029_v48 = vadd.f32 %v2997_v46, %v2927_v26  ;;  %2700 = vst.msk [vmem:[#allocation2 + $0x62] sm:$0xff] %vm381_vm0, %v2668_v44  ;;  %v2640_v44 = vld [vmem:[#allocation2 + $0x92] sm:$0xff] }
 0x269   : > { %v3358_v49 = vld [vmem:[#allocation2 + $0x48] sm:$0xff] }
 0x26a   : > { %3061 = vst.msk [vmem:[#allocation2 + $0x51] sm:$0xff] %vm381_vm0, %v3029_v48  ;;  %v3390_v50 = vadd.f32 %v3358_v49, %v5961_v5 }
 0x26b   : > { %v3450_v51 = vld [vmem:[#allocation2 + $0x31] sm:$0xff]  ;;  %v3451_v52 = vld [vmem:[#allocation2 + $0x39] sm:$0xff] }
 0x26c   : > { %3422 = vst.msk [vmem:[#allocation2 + $0x48] sm:$0xff] %vm381_vm0, %v3390_v50  ;;  %v3486_v53 = vadd.f32 %v5976_v18, %v3450_v51  ;;  %v3487_v54 = vadd.f32 %v5976_v18, %v3451_v52 }
 0x26d   : > { %v2570_v55 = vpop.f32.mrf.mxu2  ;;  %v6004_v1 = vpop.f32.mrf.mxu0 }
 0x26e   : > { %v2669_v57 = vadd.f32 %v2637_v56, %v2570_v55  ;;  %v2932_v58 = vpop.f32.mrf.mxu3  ;;  %v3518_v60 = vmax.f32 %v3486_v53, 0.0  ;;  %v3519_v61 = vmax.f32 %v3487_v54, 0.0 }
 0x26f   : > { %v2998_v63 = vld [vmem:[#allocation2 + $0x61] sm:$0xff] }
 0x270   : > { %v3030_v2 = vadd.f32 %v2998_v63, %v2930_v45  ;;  %2701 = vst.msk [vmem:[#allocation2 + $0x6a] sm:$0xff] %vm381_vm0, %v2669_v57  ;;  %v3550_v3 = vpack.c.bf16 %v3518_v60, %v3518_v60  ;;  %v3551_v4 = vpack.c.bf16 %v3519_v61, %v3519_v61  ;;  %4814 = vmatmul.msk.bf16.gmra.mxu0 %vm381_vm0, %v5004_v62  ;;  %v2641_v57 = vld [vmem:[#allocation2 + $0x9a] sm:$0xff] }
 0x271   : > { %v3359_v5 = vld [vmem:[#allocation2 + $0x50] sm:$0xff]  ;;  %v4970_v60 = vld [vmem:[%s5413_s10 + $0x78] sm:$0xff] }
 0x272   : > { %3062 = vst.msk [vmem:[#allocation2 + $0x61] sm:$0xff] %vm381_vm0, %v3030_v2  ;;  %v3391_v6 = vadd.f32 %v3359_v5, %v5969_v14  ;;  %4630 = vmatmul.msk.bf16.gmra.mxu2 %vm381_vm0, %v4968_v59  ;;  %v3622_v7 = vunpack.c.l.b16 %v3550_v3  ;;  %v3623_v8 = vunpack.c.l.b16 %v3551_v4  ;;  %v5006_v63 = vld [vmem:[%s5413_s10 + $0x78] sm:$0xff] }
 0x273   : > { %4722 = vmatmul.msk.bf16.gmra.mxu3 %vm381_vm0, %v4986_v0  ;;  %v4988_v2 = vld [vmem:[%s5413_s10 + $0x78] sm:$0xff]  ;;  %s239_s10 = sand.u32 1, %s5256_s19  }
 0x274   : > { %3423 = vst.msk [vmem:[#allocation2 + $0x50] sm:$0xff] %vm381_vm0, %v3391_v6  ;;  %v3653_v9 = vpack.c.b16 %v3623_v8, %v3622_v7  ;;  %s3989_s15 = sshll.u32 %s239_s10, 7  ;;  %s3882_s21 = scalar_lea.sflag [#allocation4], %s239_s10 }
 0x275   : > { %v2573_v10 = vpop.f32.mrf.mxu2  ;;  %v6014_v14 = vpop.f32.mrf.mxu0  ;;  %s6116_s16 = scalar_lea.vmem [#allocation3], %s3989_s15  ;;  %s3898_s15 = sshll.u32 %s3895_s13, 4  ;;  %s3899_s15 = int_to_ptr.hbm [resolvable:$true] %s3898_s15 }
 0x276   : > { %v2670_v12 = vadd.f32 %v2638_v11, %v2573_v10  ;;  %4826 = vmatmul.msk.bf16.gmra.mxu1 %vm381_vm0, %v3653_v9  ;;  %v2935_v13 = vpop.f32.mrf.mxu3  ;;  %s3896_s14 = sshll.u32 %s6116_s16, 4  ;;  %s5200_s22 = sshra.s32 %s3899_s15, 4  ;;  %s3897_s14 = int_to_ptr.vmem [resolvable:$true] %s3896_s14  ;;  %s5201_s22 = int_to_ptr.hbm [resolvable:$true] %s5200_s22 }
 0x277   : > { %v2999_v15 = vld [vmem:[#allocation2 + $0x69] sm:$0xff]  ;;  %s5202_s17 = scalar_lea.hbm %s5201_s22, 128  ;;  %p5207_p4 = scmp.lt.s32.totalorder %s5201_s22, %s6255_s5 }
 0x278   : > { %v3031_v16 = vadd.f32 %v2999_v15, %v2932_v58  ;;  %2702 = vst.msk [vmem:[#allocation2 + $0x7a] sm:$0xff] %vm381_vm0, %v2670_v12  ;;  %v2642_v12 = vld [vmem:[#allocation2 + $0xaa] sm:$0xff]  ;;  %p5203_p0 = scmp.ne.s32.totalorder %s5201_s22, %s5202_s17  ;;  %p5208_p5 = scmp.lt.s32.totalorder %s5206_s30, %s5202_s17 }
 0x279   : > { %v3360_v17 = vld [vmem:[#allocation2 + $0x60] sm:$0xff] }
 0x27a   : > { %3063 = vst.msk [vmem:[#allocation2 + $0x69] sm:$0xff] %vm381_vm0, %v3031_v16  ;;  %v3392_v19 = vadd.f32 %v3360_v17, %v5984_v33  ;;  %p5204_p1 = pnand %p5203_p0, %p5365_p3  ;;  %p5209_p6 = por %p5208_p5, %p5207_p4 }
 0x27b   : > { %v3452_v20 = vld [vmem:[#allocation2 + $0x49] sm:$0xff]  ;;  %v3453_v21 = vld [vmem:[#allocation2 + $0x51] sm:$0xff] }
 0x27c   : > { %3424 = vst.msk [vmem:[#allocation2 + $0x60] sm:$0xff] %vm381_vm0, %v3392_v19  ;;  %v3488_v22 = vadd.f32 %v5976_v18, %v3452_v20  ;;  %v3489_v23 = vadd.f32 %v5976_v18, %v3453_v21  ;;  %p5205_p2 = pneg %p5204_p1 }
 0x27d   : > { %v2575_v24 = vpop.f32.mrf.mxu2  ;;  %v6025_v35 = vpop.f32.mrf.mxu0 }
 0x27e   : > { %v2671_v26 = vadd.f32 %v2639_v25, %v2575_v24  ;;  %v2937_v27 = vpop.f32.mrf.mxu3  ;;  %v3520_v29 = vmax.f32 %v3488_v22, 0.0  ;;  %v3521_v30 = vmax.f32 %v3489_v23, 0.0  ;;  %p5210_p7 = pnand %p5209_p6, %p5205_p2 }
 0x27f   : > { %v3000_v32 = vld [vmem:[#allocation2 + $0x79] sm:$0xff] }
 0x280   : > { %v3032_v33 = vadd.f32 %v3000_v32, %v2935_v13  ;;  %2703 = vst.msk [vmem:[#allocation2 + $0x82] sm:$0xff] %vm381_vm0, %v2671_v26  ;;  %v3552_v36 = vpack.c.bf16 %v3520_v29, %v3520_v29  ;;  %v3553_v37 = vpack.c.bf16 %v3521_v30, %v3521_v30  ;;  %4815 = vmatmul.msk.bf16.gmra.mxu0 %vm381_vm0, %v5005_v31  ;;  %v2643_v26 = vld [vmem:[#allocation2 + $0xb2] sm:$0xff] }
 0x281   : > { %v3361_v38 = vld [vmem:[#allocation2 + $0x68] sm:$0xff] }
 0x282   : > { %3064 = vst.msk [vmem:[#allocation2 + $0x79] sm:$0xff] %vm381_vm0, %v3032_v33  ;;  %v3393_v39 = vadd.f32 %v3361_v38, %v5993_v47  ;;  %4631 = vmatmul.msk.bf16.gmra.mxu2 %vm381_vm0, %v4969_v28  ;;  %v3624_v40 = vunpack.c.l.b16 %v3552_v36  ;;  %v3625_v41 = vunpack.c.l.b16 %v3553_v37 }
 0x283   : > { %4723 = vmatmul.msk.bf16.gmra.mxu3 %vm381_vm0, %v4987_v34 }
 0x284   : > { %3425 = vst.msk [vmem:[#allocation2 + $0x68] sm:$0xff] %vm381_vm0, %v3393_v39  ;;  %v3654_v42 = vpack.c.b16 %v3625_v41, %v3624_v40 }
 0x285   : > { %v2578_v43 = vpop.f32.mrf.mxu2  ;;  %v6035_v47 = vpop.f32.mrf.mxu0 }
 0x286   : > { %v2672_v45 = vadd.f32 %v2640_v44, %v2578_v43  ;;  %4827 = vmatmul.msk.bf16.gmra.mxu1 %vm381_vm0, %v3654_v42  ;;  %v2940_v46 = vpop.f32.mrf.mxu3  ;;  %v2644_v42 = vld [vmem:[#allocation2 + $0xc2] sm:$0xff] }
 0x287   : > { %v3001_v48 = vld [vmem:[#allocation2 + $0x81] sm:$0xff] }
 0x288   : > { %v3033_v49 = vadd.f32 %v3001_v48, %v2937_v27  ;;  %2704 = vst.msk [vmem:[#allocation2 + $0x92] sm:$0xff] %vm381_vm0, %v2672_v45 }
 0x289   : > { %v3362_v50 = vld [vmem:[#allocation2 + $0x78] sm:$0xff] }
 0x28a   : > { %3065 = vst.msk [vmem:[#allocation2 + $0x81] sm:$0xff] %vm381_vm0, %v3033_v49  ;;  %v3394_v51 = vadd.f32 %v3362_v50, %v6004_v1 }
 0x28b   : > { %v3454_v52 = vld [vmem:[#allocation2 + $0x61] sm:$0xff]  ;;  %v3455_v53 = vld [vmem:[#allocation2 + $0x69] sm:$0xff] }
 0x28c   : > { %3426 = vst.msk [vmem:[#allocation2 + $0x78] sm:$0xff] %vm381_vm0, %v3394_v51  ;;  %v3490_v54 = vadd.f32 %v5976_v18, %v3454_v52  ;;  %v3491_v55 = vadd.f32 %v5976_v18, %v3455_v53 }
 0x28d   : > { %v2580_v56 = vpop.f32.mrf.mxu2  ;;  %v3307_v3 = vpop.f32.mrf.mxu0 }
 0x28e   : > { %v2673_v58 = vadd.f32 %v2641_v57, %v2580_v56  ;;  %v2942_v59 = vpop.f32.mrf.mxu3  ;;  %v3522_v61 = vmax.f32 %v3490_v54, 0.0  ;;  %v3523_v62 = vmax.f32 %v3491_v55, 0.0  ;;  %v2645_v55 = vld [vmem:[#allocation2 + $0xca] sm:$0xff] }
 0x28f   : > { %v3002_v0 = vld [vmem:[#allocation2 + $0x91] sm:$0xff] }
 0x290   : > { %v3034_v1 = vadd.f32 %v3002_v0, %v2940_v46  ;;  %2705 = vst.msk [vmem:[#allocation2 + $0x9a] sm:$0xff] %vm381_vm0, %v2673_v58  ;;  %v3554_v4 = vpack.c.bf16 %v3522_v61, %v3522_v61  ;;  %v3555_v5 = vpack.c.bf16 %v3523_v62, %v3523_v62  ;;  %4816 = vmatmul.msk.bf16.gmra.mxu0 %vm381_vm0, %v5006_v63 }
 0x291   : > { %v3363_v6 = vld [vmem:[#allocation2 + $0x80] sm:$0xff] }
 0x292   : > { %3066 = vst.msk [vmem:[#allocation2 + $0x91] sm:$0xff] %vm381_vm0, %v3034_v1  ;;  %v3395_v7 = vadd.f32 %v3363_v6, %v6014_v14  ;;  %4632 = vmatmul.msk.bf16.gmra.mxu2 %vm381_vm0, %v4970_v60  ;;  %v3626_v8 = vunpack.c.l.b16 %v3554_v4  ;;  %v3627_v9 = vunpack.c.l.b16 %v3555_v5 }
 0x293   : > { %4724 = vmatmul.msk.bf16.gmra.mxu3 %vm381_vm0, %v4988_v2 }
 0x294   : > { %3427 = vst.msk [vmem:[#allocation2 + $0x80] sm:$0xff] %vm381_vm0, %v3395_v7  ;;  %v3655_v10 = vpack.c.b16 %v3627_v9, %v3626_v8  ;;  %v2646_v7 = vld [vmem:[#allocation2 + $0xda] sm:$0xff] }
 0x295   : > { %v2583_v11 = vpop.f32.mrf.mxu2  ;;  %v3309_v17 = vpop.f32.mrf.mxu0 }
 0x296   : > { %v2674_v13 = vadd.f32 %v2642_v12, %v2583_v11  ;;  %4828 = vmatmul.msk.bf16.gmra.mxu1 %vm381_vm0, %v3655_v10  ;;  %v2945_v15 = vpop.f32.mrf.mxu3 }
 0x297   : > { %v3003_v16 = vld [vmem:[#allocation2 + $0x99] sm:$0xff] }
 0x298   : > { %v3035_v14 = vadd.f32 %v3003_v16, %v2942_v59  ;;  %2706 = vst.msk [vmem:[#allocation2 + $0xaa] sm:$0xff] %vm381_vm0, %v2674_v13 }
 0x299   : > { %v3364_v19 = vld [vmem:[#allocation2 + $0x90] sm:$0xff] }
 0x29a   : > { %3067 = vst.msk [vmem:[#allocation2 + $0x99] sm:$0xff] %vm381_vm0, %v3035_v14  ;;  %v3396_v20 = vadd.f32 %v3364_v19, %v6025_v35 }
 0x29b   : > { %v3456_v21 = vld [vmem:[#allocation2 + $0x79] sm:$0xff]  ;;  %v3457_v22 = vld [vmem:[#allocation2 + $0x81] sm:$0xff] }
 0x29c   : > { %3428 = vst.msk [vmem:[#allocation2 + $0x90] sm:$0xff] %vm381_vm0, %v3396_v20  ;;  %v3492_v23 = vadd.f32 %v5976_v18, %v3456_v21  ;;  %v3493_v24 = vadd.f32 %v5976_v18, %v3457_v22  ;;  %v2647_v21 = vld [vmem:[#allocation2 + $0xe2] sm:$0xff] }
 0x29d   : > { %v2585_v25 = vpop.f32.mrf.mxu2  ;;  %v3312_v32 = vpop.f32.mrf.mxu0 }
 0x29e   : > { %v2675_v27 = vadd.f32 %v2643_v26, %v2585_v25  ;;  %v2947_v28 = vpop.f32.mrf.mxu3  ;;  %v3524_v29 = vmax.f32 %v3492_v23, 0.0  ;;  %v3525_v30 = vmax.f32 %v3493_v24, 0.0 }
 0x29f   : > { %v3004_v31 = vld [vmem:[#allocation2 + $0xa9] sm:$0xff] }
 0x2a0   : > { %v3036_v34 = vadd.f32 %v3004_v31, %v2945_v15  ;;  %2707 = vst.msk [vmem:[#allocation2 + $0xb2] sm:$0xff] %vm381_vm0, %v2675_v27  ;;  %v3556_v35 = vpack.c.bf16 %v3524_v29, %v3524_v29  ;;  %v3557_v33 = vpack.c.bf16 %v3525_v30, %v3525_v30 }
 0x2a1   : > { %v3365_v36 = vld [vmem:[#allocation2 + $0x98] sm:$0xff] }
 0x2a2   : > { %3068 = vst.msk [vmem:[#allocation2 + $0xa9] sm:$0xff] %vm381_vm0, %v3036_v34  ;;  %v3397_v37 = vadd.f32 %v3365_v36, %v6035_v47  ;;  %v3628_v38 = vunpack.c.l.b16 %v3556_v35  ;;  %v3629_v39 = vunpack.c.l.b16 %v3557_v33 }
 0x2a4   : > { %3429 = vst.msk [vmem:[#allocation2 + $0x98] sm:$0xff] %vm381_vm0, %v3397_v37  ;;  %v3656_v40 = vpack.c.b16 %v3629_v39, %v3628_v38  ;;  %v2648_v37 = vld [vmem:[#allocation2 + $0xf2] sm:$0xff] }
 0x2a5   : > { %v2588_v41 = vpop.f32.mrf.mxu2  ;;  %v3314_v46 = vpop.f32.mrf.mxu0 }
 0x2a6   : > { %v2676_v43 = vadd.f32 %v2644_v42, %v2588_v41  ;;  %4829 = vmatmul.msk.bf16.gmra.mxu1 %vm381_vm0, %v3656_v40  ;;  %v2950_v44 = vpop.f32.mrf.mxu3 }
 0x2a7   : > { %v3005_v45 = vld [vmem:[#allocation2 + $0xb1] sm:$0xff] }
 0x2a8   : > { %v3037_v48 = vadd.f32 %v3005_v45, %v2947_v28  ;;  %2708 = vst.msk [vmem:[#allocation2 + $0xc2] sm:$0xff] %vm381_vm0, %v2676_v43 }
 0x2a9   : > { %v3366_v49 = vld [vmem:[#allocation2 + $0xa8] sm:$0xff] }
 0x2aa   : > { %3069 = vst.msk [vmem:[#allocation2 + $0xb1] sm:$0xff] %vm381_vm0, %v3037_v48  ;;  %v3398_v47 = vadd.f32 %v3366_v49, %v3307_v3 }
 0x2ab   : > { %v3458_v50 = vld [vmem:[#allocation2 + $0x91] sm:$0xff]  ;;  %v3459_v51 = vld [vmem:[#allocation2 + $0x99] sm:$0xff] }
 0x2ac   : > { %3430 = vst.msk [vmem:[#allocation2 + $0xa8] sm:$0xff] %vm381_vm0, %v3398_v47  ;;  %v3494_v52 = vadd.f32 %v5976_v18, %v3458_v50  ;;  %v3495_v53 = vadd.f32 %v5976_v18, %v3459_v51  ;;  %v2649_v47 = vld [vmem:[#allocation2 + $0xfa] sm:$0xff] }
 0x2ad   : > { %v2590_v54 = vpop.f32.mrf.mxu2  ;;  %v3317_v0 = vpop.f32.mrf.mxu0 }
 0x2ae   : > { %v2677_v56 = vadd.f32 %v2645_v55, %v2590_v54  ;;  %v2952_v57 = vpop.f32.mrf.mxu3  ;;  %v3526_v58 = vmax.f32 %v3494_v52, 0.0  ;;  %v3527_v59 = vmax.f32 %v3495_v53, 0.0 }
 0x2af   : > { %v3006_v60 = vld [vmem:[#allocation2 + $0xc1] sm:$0xff] }
 0x2b0   : > { %v3038_v61 = vadd.f32 %v3006_v60, %v2950_v44  ;;  %2709 = vst.msk [vmem:[#allocation2 + $0xca] sm:$0xff] %vm381_vm0, %v2677_v56  ;;  %v3558_v62 = vpack.c.bf16 %v3526_v58, %v3526_v58  ;;  %v3559_v63 = vpack.c.bf16 %v3527_v59, %v3527_v59 }
 0x2b1   : > { %v3367_v2 = vld [vmem:[#allocation2 + $0xb0] sm:$0xff] }
 0x2b2   : > { %3070 = vst.msk [vmem:[#allocation2 + $0xc1] sm:$0xff] %vm381_vm0, %v3038_v61  ;;  %v3399_v3 = vadd.f32 %v3367_v2, %v3309_v17  ;;  %v3630_v1 = vunpack.c.l.b16 %v3558_v62  ;;  %v3631_v4 = vunpack.c.l.b16 %v3559_v63  ;;  %v2650_v2 = vld [vmem:[#allocation2 + $0x10a] sm:$0xff] }
 0x2b4   : > { %3431 = vst.msk [vmem:[#allocation2 + $0xb0] sm:$0xff] %vm381_vm0, %v3399_v3  ;;  %v3657_v5 = vpack.c.b16 %v3631_v4, %v3630_v1 }
 0x2b5   : > { %v2593_v6 = vpop.f32.mrf.mxu2  ;;  %v3319_v15 = vpop.f32.mrf.mxu0 }
 0x2b6   : > { %v2678_v8 = vadd.f32 %v2646_v7, %v2593_v6  ;;  %4830 = vmatmul.msk.bf16.gmra.mxu1 %vm381_vm0, %v3657_v5  ;;  %v2955_v9 = vpop.f32.mrf.mxu3 }
 0x2b7   : > { %v3007_v10 = vld [vmem:[#allocation2 + $0xc9] sm:$0xff] }
 0x2b8   : > { %v3039_v11 = vadd.f32 %v3007_v10, %v2952_v57  ;;  %2710 = vst.msk [vmem:[#allocation2 + $0xda] sm:$0xff] %vm381_vm0, %v2678_v8 }
 0x2b9   : > { %v3368_v12 = vld [vmem:[#allocation2 + $0xc0] sm:$0xff] }
 0x2ba   : > { %3071 = vst.msk [vmem:[#allocation2 + $0xc9] sm:$0xff] %vm381_vm0, %v3039_v11  ;;  %v3400_v13 = vadd.f32 %v3368_v12, %v3312_v32 }
 0x2bb   : > { %v3460_v16 = vld [vmem:[#allocation2 + $0xa9] sm:$0xff]  ;;  %v3461_v17 = vld [vmem:[#allocation2 + $0xb1] sm:$0xff] }
 0x2bc   : > { %3432 = vst.msk [vmem:[#allocation2 + $0xc0] sm:$0xff] %vm381_vm0, %v3400_v13  ;;  %v3496_v14 = vadd.f32 %v5976_v18, %v3460_v16  ;;  %v3497_v19 = vadd.f32 %v5976_v18, %v3461_v17 }
 0x2bd   : > { %v2595_v20 = vpop.f32.mrf.mxu2  ;;  %v3322_v33 = vpop.f32.mrf.mxu0 }
 0x2be   : > { %v2679_v22 = vadd.f32 %v2647_v21, %v2595_v20  ;;  %v2957_v23 = vpop.f32.mrf.mxu3  ;;  %v3528_v24 = vmax.f32 %v3496_v14, 0.0  ;;  %v3529_v25 = vmax.f32 %v3497_v19, 0.0 }
 0x2bf   : > { %v3008_v26 = vld [vmem:[#allocation2 + $0xd9] sm:$0xff] }
 0x2c0   : > { %v3040_v27 = vadd.f32 %v3008_v26, %v2955_v9  ;;  %2711 = vst.msk [vmem:[#allocation2 + $0xe2] sm:$0xff] %vm381_vm0, %v2679_v22  ;;  %v3560_v28 = vpack.c.bf16 %v3528_v24, %v3528_v24  ;;  %v3561_v29 = vpack.c.bf16 %v3529_v25, %v3529_v25 }
 0x2c1   : > { %v3369_v30 = vld [vmem:[#allocation2 + $0xc8] sm:$0xff] }
 0x2c2   : > { %3072 = vst.msk [vmem:[#allocation2 + $0xd9] sm:$0xff] %vm381_vm0, %v3040_v27  ;;  %v3401_v31 = vadd.f32 %v3369_v30, %v3314_v46  ;;  %v3632_v32 = vunpack.c.l.b16 %v3560_v28  ;;  %v3633_v34 = vunpack.c.l.b16 %v3561_v29 }
 0x2c4   : > { %3433 = vst.msk [vmem:[#allocation2 + $0xc8] sm:$0xff] %vm381_vm0, %v3401_v31  ;;  %v3658_v35 = vpack.c.b16 %v3633_v34, %v3632_v32  ;;  %v2652_v32 = vld [vmem:[#allocation2 + $0x122] sm:$0xff] }
 0x2c5   : > { %v2598_v36 = vpop.f32.mrf.mxu2  ;;  %v3324_v54 = vpop.f32.mrf.mxu0 }
 0x2c6   : > { %v2680_v38 = vadd.f32 %v2648_v37, %v2598_v36  ;;  %4831 = vmatmul.msk.bf16.gmra.mxu1 %vm381_vm0, %v3658_v35  ;;  %v2960_v39 = vpop.f32.mrf.mxu3  ;;  %v6105_v37 = vld [vmem:[%s6254_s4] ss:$0 sm:$0xff] }
 0x2c7   : > { %v3009_v40 = vld [vmem:[#allocation2 + $0xe1] sm:$0xff] }
 0x2c8   : > { %v3041_v41 = vadd.f32 %v3009_v40, %v2957_v23  ;;  %2712 = vst.msk [vmem:[#allocation2 + $0xf2] sm:$0xff] %vm381_vm0, %v2680_v38 }
 0x2c9   : > { %v3370_v42 = vld [vmem:[#allocation2 + $0xd8] sm:$0xff] }
 0x2ca   : > { %3073 = vst.msk [vmem:[#allocation2 + $0xe1] sm:$0xff] %vm381_vm0, %v3041_v41  ;;  %v3402_v43 = vadd.f32 %v3370_v42, %v3317_v0 }
 0x2cb   : > { %v3462_v44 = vld [vmem:[#allocation2 + $0xc1] sm:$0xff]  ;;  %v3463_v45 = vld [vmem:[#allocation2 + $0xc9] sm:$0xff] }
 0x2cc   : > { %3434 = vst.msk [vmem:[#allocation2 + $0xd8] sm:$0xff] %vm381_vm0, %v3402_v43  ;;  %v3498_v46 = vadd.f32 %v5976_v18, %v3462_v44  ;;  %v3499_v48 = vadd.f32 %v5976_v18, %v3463_v45 }
 0x2cd   : > { %v2600_v49 = vpop.f32.mrf.mxu2  ;;  %v3327_v6 = vpop.f32.mrf.mxu0 }
 0x2ce   : > { %v2681_v50 = vadd.f32 %v2649_v47, %v2600_v49  ;;  %v2962_v51 = vpop.f32.mrf.mxu3  ;;  %v3530_v52 = vmax.f32 %v3498_v46, 0.0  ;;  %v3531_v53 = vmax.f32 %v3499_v48, 0.0  ;;  %v2653_v47 = vld [vmem:[#allocation2 + $0x12a] sm:$0xff] }
 0x2cf   : > { %v3010_v55 = vld [vmem:[#allocation2 + $0xf1] sm:$0xff] }
 0x2d0   : > { %v3042_v56 = vadd.f32 %v3010_v55, %v2960_v39  ;;  %2713 = vst.msk [vmem:[#allocation2 + $0xfa] sm:$0xff] %vm381_vm0, %v2681_v50  ;;  %v3562_v57 = vpack.c.bf16 %v3530_v52, %v3530_v52  ;;  %v3563_v58 = vpack.c.bf16 %v3531_v53, %v3531_v53 }
 0x2d1   : > { %v3371_v59 = vld [vmem:[#allocation2 + $0xe0] sm:$0xff] }
 0x2d2   : > { %3074 = vst.msk [vmem:[#allocation2 + $0xf1] sm:$0xff] %vm381_vm0, %v3042_v56  ;;  %v3403_v60 = vadd.f32 %v3371_v59, %v3319_v15  ;;  %v3634_v61 = vunpack.c.l.b16 %v3562_v57  ;;  %v3635_v62 = vunpack.c.l.b16 %v3563_v58  ;;  %v2651_v15 = vld [vmem:[#allocation2 + $0x112] sm:$0xff] }
 0x2d4   : > { %3435 = vst.msk [vmem:[#allocation2 + $0xe0] sm:$0xff] %vm381_vm0, %v3403_v60  ;;  %v3659_v63 = vpack.c.b16 %v3635_v62, %v3634_v61 }
 0x2d5   : > { %v2603_v0 = vpop.f32.mrf.mxu2  ;;  %v3329_v28 = vpop.f32.mrf.mxu0 }
 0x2d6   : > { %v2682_v3 = vadd.f32 %v2650_v2, %v2603_v0  ;;  %4832 = vmatmul.msk.bf16.gmra.mxu1 %vm381_vm0, %v3659_v63  ;;  %v2965_v1 = vpop.f32.mrf.mxu3 }
 0x2d7   : > { %v3011_v4 = vld [vmem:[#allocation2 + $0xf9] sm:$0xff] }
 0x2d8   : > { %v3043_v5 = vadd.f32 %v3011_v4, %v2962_v51  ;;  %2714 = vst.msk [vmem:[#allocation2 + $0x10a] sm:$0xff] %vm381_vm0, %v2682_v3  ;;  %v2654_v3 = vld [vmem:[#allocation2 + $0x13a] sm:$0xff] }
 0x2d9   : > { %v3372_v7 = vld [vmem:[#allocation2 + $0xf0] sm:$0xff] }
 0x2da   : > { %3075 = vst.msk [vmem:[#allocation2 + $0xf9] sm:$0xff] %vm381_vm0, %v3043_v5  ;;  %v3404_v8 = vadd.f32 %v3372_v7, %v3322_v33 }
 0x2db   : > { %v3464_v9 = vld [vmem:[#allocation2 + $0xd9] sm:$0xff]  ;;  %v3465_v10 = vld [vmem:[#allocation2 + $0xe1] sm:$0xff] }
 0x2dc   : > { %3436 = vst.msk [vmem:[#allocation2 + $0xf0] sm:$0xff] %vm381_vm0, %v3404_v8  ;;  %v3500_v11 = vadd.f32 %v5976_v18, %v3464_v9  ;;  %v3501_v12 = vadd.f32 %v5976_v18, %v3465_v10 }
 0x2dd   : > { %v2605_v13 = vpop.f32.mrf.mxu2  ;;  %v3332_v45 = vpop.f32.mrf.mxu0 }
 0x2de   : > { %v2683_v16 = vadd.f32 %v2651_v15, %v2605_v13  ;;  %v2967_v17 = vpop.f32.mrf.mxu3  ;;  %v3532_v14 = vmax.f32 %v3500_v11, 0.0  ;;  %v3533_v19 = vmax.f32 %v3501_v12, 0.0 }
 0x2df   : > { %v3012_v20 = vld [vmem:[#allocation2 + $0x109] sm:$0xff] }
 0x2e0   : > { %v3044_v21 = vadd.f32 %v3012_v20, %v2965_v1  ;;  %2715 = vst.msk [vmem:[#allocation2 + $0x112] sm:$0xff] %vm381_vm0, %v2683_v16  ;;  %v3564_v22 = vpack.c.bf16 %v3532_v14, %v3532_v14  ;;  %v3565_v23 = vpack.c.bf16 %v3533_v19, %v3533_v19  ;;  %v2655_v19 = vld [vmem:[#allocation2 + $0x142] sm:$0xff] }
 0x2e1   : > { %v3373_v24 = vld [vmem:[#allocation2 + $0xf8] sm:$0xff] }
 0x2e2   : > { %3076 = vst.msk [vmem:[#allocation2 + $0x109] sm:$0xff] %vm381_vm0, %v3044_v21  ;;  %v3405_v25 = vadd.f32 %v3373_v24, %v3324_v54  ;;  %v3636_v26 = vunpack.c.l.b16 %v3564_v22  ;;  %v3637_v27 = vunpack.c.l.b16 %v3565_v23 }
 0x2e3   : > { %v3737_v29 = vpop.f32.mrf.mxu1 }
 0x2e4   : > { %3437 = vst.msk [vmem:[#allocation2 + $0xf8] sm:$0xff] %vm381_vm0, %v3405_v25  ;;  %v3660_v30 = vpack.c.b16 %v3637_v27, %v3636_v26  ;;  %v3738_v43 = vadd.f32 %v6105_v37, %v3737_v29 }
 0x2e5   : > { %v2608_v31 = vpop.f32.mrf.mxu2  ;;  %v3334_v5 = vpop.f32.mrf.mxu0 }
 0x2e6   : > { %v2684_v34 = vadd.f32 %v2652_v32, %v2608_v31  ;;  %4833 = vmatmul.msk.bf16.gmra.mxu1 %vm381_vm0, %v3660_v30  ;;  %v2970_v35 = vpop.f32.mrf.mxu3 }
 0x2e7   : > { %v3013_v33 = vld [vmem:[#allocation2 + $0x111] sm:$0xff] }
 0x2e8   : > { %v3045_v36 = vadd.f32 %v3013_v33, %v2967_v17  ;;  %2716 = vst.msk [vmem:[#allocation2 + $0x122] sm:$0xff] %vm381_vm0, %v2684_v34 }
 0x2e9   : > { %v3374_v38 = vld [vmem:[#allocation2 + $0x108] sm:$0xff] }
 0x2ea   : > { %3077 = vst.msk [vmem:[#allocation2 + $0x111] sm:$0xff] %vm381_vm0, %v3045_v36  ;;  %v3406_v39 = vadd.f32 %v3374_v38, %v3327_v6  ;;  %v2656_v38 = vld [vmem:[#allocation2 + $0x152] sm:$0xff] }
 0x2eb   : > { %v3739_v40 = vpop.f32.mrf.mxu1  ;;  %v3466_v41 = vld [vmem:[#allocation2 + $0xf1] sm:$0xff]  ;;  %v3467_v42 = vld [vmem:[#allocation2 + $0xf9] sm:$0xff] }
 0x2ec   : > { %3438 = vst.msk [vmem:[#allocation2 + $0x108] sm:$0xff] %vm381_vm0, %v3406_v39  ;;  %v3740_v44 = vadd.f32 %v6105_v37, %v3739_v40  ;;  %v3502_v46 = vadd.f32 %v5976_v18, %v3466_v41  ;;  %v3503_v48 = vadd.f32 %v5976_v18, %v3467_v42 }
 0x2ed   : > { %v2610_v49 = vpop.f32.mrf.mxu2  ;;  %v3337_v27 = vpop.f32.mrf.mxu0 }
 0x2ee   : > { %v5014_v50 = vpack.c.bf16 %v3740_v44, %v3738_v43  ;;  %v2685_v51 = vadd.f32 %v2653_v47, %v2610_v49  ;;  %v2972_v52 = vpop.f32.mrf.mxu3  ;;  %v3534_v53 = vmax.f32 %v3502_v46, 0.0  ;;  %v3535_v54 = vmax.f32 %v3503_v48, 0.0 }
 0x2ef   : > { %v3014_v55 = vld [vmem:[#allocation2 + $0x121] sm:$0xff] }
 0x2f0   : > { %v3046_v56 = vadd.f32 %v3014_v55, %v2970_v35  ;;  %5015 = vst [vmem:[%s6116_s16] sm:$0xff] %v5014_v50   ;;  %v3566_v57 = vpack.c.bf16 %v3534_v53, %v3534_v53  ;;  %v3567_v58 = vpack.c.bf16 %v3535_v54, %v3535_v54 }
 0x2f1   : > { %v3375_v59 = vld [vmem:[#allocation2 + $0x110] sm:$0xff]  ;;  %2717 = vst.msk [vmem:[#allocation2 + $0x12a] sm:$0xff] %vm381_vm0, %v2685_v51 }
 0x2f2   : > { %3078 = vst.msk [vmem:[#allocation2 + $0x121] sm:$0xff] %vm381_vm0, %v3046_v56  ;;  %v3407_v60 = vadd.f32 %v3375_v59, %v3329_v28  ;;  %v3638_v61 = vunpack.c.l.b16 %v3566_v57  ;;  %v3639_v62 = vunpack.c.l.b16 %v3567_v58 }
 0x2f3   : > { %v3742_v63 = vpop.f32.mrf.mxu1 }
 0x2f4   : > { %3439 = vst.msk [vmem:[#allocation2 + $0x110] sm:$0xff] %vm381_vm0, %v3407_v60  ;;  %v3661_v0 = vpack.c.b16 %v3639_v62, %v3638_v61  ;;  %v3743_v13 = vadd.f32 %v6105_v37, %v3742_v63 }
 0x2f5   : > { %v2613_v2 = vpop.f32.mrf.mxu2 }
 0x2f6   : > { %v2686_v1 = vadd.f32 %v2654_v3, %v2613_v2  ;;  %4834 = vmatmul.msk.bf16.gmra.mxu1 %vm381_vm0, %v3661_v0  ;;  %v2975_v4 = vpop.f32.mrf.mxu3 }
 0x2f8   : > { %v3015_v6 = vld [vmem:[#allocation2 + $0x129] sm:$0xff]  ;;  %2718 = vst.msk [vmem:[#allocation2 + $0x13a] sm:$0xff] %vm381_vm0, %v2686_v1 }
 0x2f9   : > { %v3047_v7 = vadd.f32 %v3015_v6, %v2972_v52  ;;  %v3376_v8 = vld [vmem:[#allocation2 + $0x120] sm:$0xff] }
 0x2fa   : > { %v3408_v9 = vadd.f32 %v3376_v8, %v3332_v45  ;;  %v3339_v45 = vpop.f32.mrf.mxu0  ;;  %v2657_v52 = vld [vmem:[#allocation2 + $0x15a] sm:$0xff] }
 0x2fb   : > { %3079 = vst.msk [vmem:[#allocation2 + $0x129] sm:$0xff] %vm381_vm0, %v3047_v7  ;;  %v3744_v10 = vpop.f32.mrf.mxu1  ;;  %v3468_v11 = vld [vmem:[#allocation2 + $0x109] sm:$0xff]  ;;  %v3469_v12 = vld [vmem:[#allocation2 + $0x111] sm:$0xff] }
 0x2fc   : > { %3440 = vst.msk [vmem:[#allocation2 + $0x120] sm:$0xff] %vm381_vm0, %v3408_v9  ;;  %v3745_v15 = vadd.f32 %v6105_v37, %v3744_v10  ;;  %v3504_v16 = vadd.f32 %v5976_v18, %v3468_v11  ;;  %v3505_v17 = vadd.f32 %v5976_v18, %v3469_v12  ;;  %v2658_v7 = vld [vmem:[#allocation2 + $0x16a] sm:$0xff] }
 0x2fd   : > { %v2615_v14 = vpop.f32.mrf.mxu2 }
 0x2fe   : > { %v5019_v20 = vpack.c.bf16 %v3745_v15, %v3743_v13  ;;  %v2687_v21 = vadd.f32 %v2655_v19, %v2615_v14  ;;  %v3536_v22 = vmax.f32 %v3504_v16, 0.0  ;;  %v3537_v23 = vmax.f32 %v3505_v17, 0.0  ;;  %v2977_v26 = vpop.f32.mrf.mxu3 }
 0x2ff   : > { %v3016_v24 = vld [vmem:[#allocation2 + $0x139] sm:$0xff] }
 0x300   : > { %v3048_v25 = vadd.f32 %v3016_v24, %v2975_v4  ;;  %5091 = vst [vmem:[%s6116_s16 + $0x8] sm:$0xff] %v5019_v20   ;;  %v3568_v28 = vpack.c.bf16 %v3536_v22, %v3536_v22  ;;  %v3569_v29 = vpack.c.bf16 %v3537_v23, %v3537_v23 }
 0x301   : > { %2719 = vst.msk [vmem:[#allocation2 + $0x142] sm:$0xff] %vm381_vm0, %v2687_v21  ;;  %v2659_v21 = vld [vmem:[#allocation2 + $0x172] sm:$0xff] }
 0x302   : > { %3080 = vst.msk [vmem:[#allocation2 + $0x139] sm:$0xff] %vm381_vm0, %v3048_v25  ;;  %v3377_v30 = vld [vmem:[#allocation2 + $0x128] sm:$0xff]  ;;  %v3640_v31 = vunpack.c.l.b16 %v3568_v28  ;;  %v3641_v32 = vunpack.c.l.b16 %v3569_v29 }
 0x303   : > { %v3409_v34 = vadd.f32 %v3377_v30, %v3334_v5  ;;  %v3747_v35 = vpop.f32.mrf.mxu1  ;;  %v3342_v5 = vpop.f32.mrf.mxu0 }
 0x304   : > { %v3662_v33 = vpack.c.b16 %v3641_v32, %v3640_v31  ;;  %v3748_v48 = vadd.f32 %v6105_v37, %v3747_v35 }
 0x305   : > { %3441 = vst.msk [vmem:[#allocation2 + $0x128] sm:$0xff] %vm381_vm0, %v3409_v34  ;;  %v2618_v36 = vpop.f32.mrf.mxu2 }
 0x306   : > { %v2688_v39 = vadd.f32 %v2656_v38, %v2618_v36  ;;  %4835 = vmatmul.msk.bf16.gmra.mxu1 %vm381_vm0, %v3662_v33  ;;  %v2980_v44 = vpop.f32.mrf.mxu3 }
 0x308   : > { %v3017_v40 = vld [vmem:[#allocation2 + $0x141] sm:$0xff]  ;;  %2720 = vst.msk [vmem:[#allocation2 + $0x152] sm:$0xff] %vm381_vm0, %v2688_v39 }
 0x309   : > { %v3049_v41 = vadd.f32 %v3017_v40, %v2977_v26  ;;  %v3378_v42 = vld [vmem:[#allocation2 + $0x138] sm:$0xff] }
 0x30a   : > { %v3410_v43 = vadd.f32 %v3378_v42, %v3337_v27 }
 0x30b   : > { %3081 = vst.msk [vmem:[#allocation2 + $0x141] sm:$0xff] %vm381_vm0, %v3049_v41  ;;  %v3749_v46 = vpop.f32.mrf.mxu1  ;;  %v3344_v25 = vpop.f32.mrf.mxu0 }
 0x30c   : > { %3442 = vst.msk [vmem:[#allocation2 + $0x138] sm:$0xff] %vm381_vm0, %v3410_v43  ;;  %v3750_v49 = vadd.f32 %v6105_v37, %v3749_v46  ;;  %v3470_v47 = vld [vmem:[#allocation2 + $0x121] sm:$0xff]  ;;  %v3471_v50 = vld [vmem:[#allocation2 + $0x129] sm:$0xff] }
 0x30d   : > { %v2620_v51 = vpop.f32.mrf.mxu2  ;;  %v3506_v53 = vadd.f32 %v5976_v18, %v3470_v47  ;;  %v3507_v54 = vadd.f32 %v5976_v18, %v3471_v50 }
 0x30e   : > { %v5024_v55 = vpack.c.bf16 %v3750_v49, %v3748_v48  ;;  %v2689_v56 = vadd.f32 %v2657_v52, %v2620_v51  ;;  %v2982_v4 = vpop.f32.mrf.mxu3  ;;  %v5185_v51 = vld [vmem:[%s6252_s2] ss:$0 sm:$0xff] }
 0x30f   : > { %v3018_v57 = vld [vmem:[#allocation2 + $0x151] sm:$0xff]  ;;  %v3538_v58 = vmax.f32 %v3506_v53, 0.0  ;;  %v3539_v59 = vmax.f32 %v3507_v54, 0.0 }
 0x310   : > { %v3050_v60 = vadd.f32 %v3018_v57, %v2980_v44  ;;  %5092 = vst [vmem:[%s6116_s16 + $0x10] sm:$0xff] %v5024_v55  }
 0x311   : > { %2721 = vst.msk [vmem:[#allocation2 + $0x15a] sm:$0xff] %vm381_vm0, %v2689_v56  ;;  %v3570_v61 = vpack.c.bf16 %v3538_v58, %v3538_v58  ;;  %v3571_v62 = vpack.c.bf16 %v3539_v59, %v3539_v59 }
 0x312   : > { %3082 = vst.msk [vmem:[#allocation2 + $0x151] sm:$0xff] %vm381_vm0, %v3050_v60  ;;  %v3379_v63 = vld [vmem:[#allocation2 + $0x140] sm:$0xff] }
 0x313   : > { %v3411_v0 = vadd.f32 %v3379_v63, %v3339_v45  ;;  %v3752_v2 = vpop.f32.mrf.mxu1  ;;  %v3642_v3 = vunpack.c.l.b16 %v3570_v61  ;;  %v3643_v1 = vunpack.c.l.b16 %v3571_v62  ;;  %v3347_v42 = vpop.f32.mrf.mxu0 }
 0x314   : > { %v3753_v16 = vadd.f32 %v6105_v37, %v3752_v2 }
 0x315   : > { %3443 = vst.msk [vmem:[#allocation2 + $0x140] sm:$0xff] %vm381_vm0, %v3411_v0  ;;  %v2623_v6 = vpop.f32.mrf.mxu2  ;;  %v3663_v8 = vpack.c.b16 %v3643_v1, %v3642_v3 }
 0x316   : > { %v2690_v9 = vadd.f32 %v2658_v7, %v2623_v6  ;;  %v2985_v24 = vpop.f32.mrf.mxu3 }
 0x317   : > { %4836 = vmatmul.msk.bf16.gmra.mxu1 %vm381_vm0, %v3663_v8 }
 0x318   : > { %v3019_v10 = vld [vmem:[#allocation2 + $0x159] sm:$0xff]  ;;  %2722 = vst.msk [vmem:[#allocation2 + $0x16a] sm:$0xff] %vm381_vm0, %v2690_v9 }
 0x319   : > { %v3051_v11 = vadd.f32 %v3019_v10, %v2982_v4  ;;  %v3380_v12 = vld [vmem:[#allocation2 + $0x150] sm:$0xff] }
 0x31a   : > { %v3412_v13 = vadd.f32 %v3380_v12, %v3342_v5 }
 0x31b   : > { %3083 = vst.msk [vmem:[#allocation2 + $0x159] sm:$0xff] %vm381_vm0, %v3051_v11  ;;  %v3754_v15 = vpop.f32.mrf.mxu1  ;;  %v3349_v59 = vpop.f32.mrf.mxu0 }
 0x31c   : > { %3444 = vst.msk [vmem:[#allocation2 + $0x150] sm:$0xff] %vm381_vm0, %v3412_v13  ;;  %v3755_v17 = vadd.f32 %v6105_v37, %v3754_v15  ;;  %v3472_v14 = vld [vmem:[#allocation2 + $0x139] sm:$0xff]  ;;  %v3473_v19 = vld [vmem:[#allocation2 + $0x141] sm:$0xff] }
 0x31d   : > { %v2625_v20 = vpop.f32.mrf.mxu2  ;;  %v3508_v22 = vadd.f32 %v5976_v18, %v3472_v14  ;;  %v3509_v23 = vadd.f32 %v5976_v18, %v3473_v19  ;;  %v3478_v15 = vld [vmem:[#allocation2 + $0x181] sm:$0xff] }
 0x31e   : > { %v5029_v26 = vpack.c.bf16 %v3755_v17, %v3753_v16  ;;  %v2691_v27 = vadd.f32 %v2659_v21, %v2625_v20  ;;  %v2987_v40 = vpop.f32.mrf.mxu3  ;;  %v3479_v16 = vld [vmem:[#allocation2 + $0x189] sm:$0xff]  ;;  %v3514_v21 = vadd.f32 %v5185_v51, %v3478_v15 }
 0x31f   : > { %v3020_v28 = vld [vmem:[#allocation2 + $0x169] sm:$0xff]  ;;  %v3540_v29 = vmax.f32 %v3508_v22, 0.0  ;;  %v3541_v30 = vmax.f32 %v3509_v23, 0.0  ;;  %v3515_v22 = vadd.f32 %v5185_v51, %v3479_v16 }
 0x320   : > { %v3052_v31 = vadd.f32 %v3020_v28, %v2985_v24  ;;  %5093 = vst [vmem:[%s6116_s16 + $0x18] sm:$0xff] %v5029_v26   ;;  %v3546_v23 = vmax.f32 %v3514_v21, 0.0 }
 0x321   : > { %2723 = vst.msk [vmem:[#allocation2 + $0x172] sm:$0xff] %vm381_vm0, %v2691_v27  ;;  %v3572_v32 = vpack.c.bf16 %v3540_v29, %v3540_v29  ;;  %v3573_v34 = vpack.c.bf16 %v3541_v30, %v3541_v30  ;;  %v3547_v24 = vmax.f32 %v3515_v22, 0.0 }
 0x322   : > { %3084 = vst.msk [vmem:[#allocation2 + $0x169] sm:$0xff] %vm381_vm0, %v3052_v31  ;;  %v3381_v35 = vld [vmem:[#allocation2 + $0x158] sm:$0xff]  ;;  %v3578_v28 = vpack.c.bf16 %v3546_v23, %v3546_v23 }
 0x323   : > { %v3413_v33 = vadd.f32 %v3381_v35, %v3344_v25  ;;  %v3757_v36 = vpop.f32.mrf.mxu1  ;;  %v3644_v38 = vunpack.c.l.b16 %v3572_v32  ;;  %v3645_v18 = vunpack.c.l.b16 %v3573_v34  ;;  %v3579_v29 = vpack.c.bf16 %v3547_v24, %v3547_v24 }
 0x324   : > { %v3758_v48 = vadd.f32 %v6105_v37, %v3757_v36  ;;  %v3650_v31 = vunpack.c.l.b16 %v3578_v28 }
 0x325   : > { %3445 = vst.msk [vmem:[#allocation2 + $0x158] sm:$0xff] %vm381_vm0, %v3413_v33  ;;  %v3664_v39 = vpack.c.b16 %v3645_v18, %v3644_v38  ;;  %v3651_v32 = vunpack.c.l.b16 %v3579_v29 }
 0x327   : > { %4837 = vmatmul.msk.bf16.gmra.mxu1 %vm381_vm0, %v3664_v39  ;;  %v3667_v35 = vpack.c.b16 %v3651_v32, %v3650_v31 }
 0x328   : > { %v3021_v41 = vld [vmem:[#allocation2 + $0x171] sm:$0xff] }
 0x329   : > { %v3053_v43 = vadd.f32 %v3021_v41, %v2987_v40  ;;  %v3382_v44 = vld [vmem:[#allocation2 + $0x168] sm:$0xff] }
 0x32a   : > { %v3414_v45 = vadd.f32 %v3382_v44, %v3347_v42 }
 0x32b   : > { %3085 = vst.msk [vmem:[#allocation2 + $0x171] sm:$0xff] %vm381_vm0, %v3053_v43  ;;  %v3759_v46 = vpop.f32.mrf.mxu1 }
 0x32c   : > { %3446 = vst.msk [vmem:[#allocation2 + $0x168] sm:$0xff] %vm381_vm0, %v3414_v45  ;;  %v3760_v49 = vadd.f32 %v6105_v37, %v3759_v46  ;;  %v3474_v47 = vld [vmem:[#allocation2 + $0x151] sm:$0xff]  ;;  %v3475_v50 = vld [vmem:[#allocation2 + $0x159] sm:$0xff] }
 0x32d   : > { %v3510_v52 = vadd.f32 %v5185_v51, %v3474_v47  ;;  %v3511_v53 = vadd.f32 %v5185_v51, %v3475_v50 }
 0x32e   : > { %v5034_v54 = vpack.c.bf16 %v3760_v49, %v3758_v48 }
 0x32f   : > { %v3542_v55 = vmax.f32 %v3510_v52, 0.0  ;;  %v3543_v56 = vmax.f32 %v3511_v53, 0.0 }
 0x330   : > { %5094 = vst [vmem:[%s6116_s16 + $0x20] sm:$0xff] %v5034_v54  }
 0x331   : > { %v3574_v57 = vpack.c.bf16 %v3542_v55, %v3542_v55  ;;  %v3575_v58 = vpack.c.bf16 %v3543_v56, %v3543_v56 }
 0x332   : > { %v3383_v60 = vld [vmem:[#allocation2 + $0x170] sm:$0xff] }
 0x333   : > { %v3415_v61 = vadd.f32 %v3383_v60, %v3349_v59  ;;  %v3762_v62 = vpop.f32.mrf.mxu1  ;;  %v3646_v63 = vunpack.c.l.b16 %v3574_v57  ;;  %v3647_v0 = vunpack.c.l.b16 %v3575_v58 }
 0x334   : > { %v3763_v1 = vadd.f32 %v6105_v37, %v3762_v62 }
 0x335   : > { %3447 = vst.msk [vmem:[#allocation2 + $0x170] sm:$0xff] %vm381_vm0, %v3415_v61  ;;  %v3665_v2 = vpack.c.b16 %v3647_v0, %v3646_v63 }
 0x337   : > { %4838 = vmatmul.msk.bf16.gmra.mxu1 %vm381_vm0, %v3665_v2 }
 0x33b   : > { %v3764_v3 = vpop.f32.mrf.mxu1 }
 0x33c   : > { %v3765_v4 = vadd.f32 %v6105_v37, %v3764_v3  ;;  %v3476_v5 = vld [vmem:[#allocation2 + $0x169] sm:$0xff]  ;;  %v3477_v6 = vld [vmem:[#allocation2 + $0x171] sm:$0xff] }
 0x33d   : > { %v3512_v7 = vadd.f32 %v5185_v51, %v3476_v5  ;;  %v3513_v8 = vadd.f32 %v5185_v51, %v3477_v6 }
 0x33e   : > { %v5039_v9 = vpack.c.bf16 %v3765_v4, %v3763_v1 }
 0x33f   : > { %v3544_v10 = vmax.f32 %v3512_v7, 0.0  ;;  %v3545_v11 = vmax.f32 %v3513_v8, 0.0 }
 0x340   : > { %5095 = vst [vmem:[%s6116_s16 + $0x28] sm:$0xff] %v5039_v9  }
 0x341   : > { %v3576_v12 = vpack.c.bf16 %v3544_v10, %v3544_v10  ;;  %v3577_v13 = vpack.c.bf16 %v3545_v11, %v3545_v11 }
 0x343   : > { %v3767_v17 = vpop.f32.mrf.mxu1  ;;  %v3648_v14 = vunpack.c.l.b16 %v3576_v12  ;;  %v3649_v19 = vunpack.c.l.b16 %v3577_v13 }
 0x344   : > { %v3768_v26 = vadd.f32 %v6105_v37, %v3767_v17 }
 0x345   : > { %v3666_v20 = vpack.c.b16 %v3649_v19, %v3648_v14 }
 0x347   : > { %4839 = vmatmul.msk.bf16.gmra.mxu1 %vm381_vm0, %v3666_v20 }
 0x34b   : > { %v3769_v25 = vpop.f32.mrf.mxu1 }
 0x34c   : > { %v3770_v27 = vadd.f32 %v6105_v37, %v3769_v25 }
 0x34e   : > { %v5044_v30 = vpack.c.bf16 %v3770_v27, %v3768_v26 }
 0x350   : > { %5096 = vst [vmem:[%s6116_s16 + $0x30] sm:$0xff] %v5044_v30  }
 0x353   : > { %v3772_v34 = vpop.f32.mrf.mxu1 }
 0x354   : > { %v3773_v36 = vadd.f32 %v6105_v37, %v3772_v34 }
 0x357   : > { %4840 = vmatmul.msk.bf16.gmra.mxu1 %vm381_vm0, %v3667_v35 }
 0x35b   : > { %v3774_v33 = vpop.f32.mrf.mxu1 }
 0x35c   : > { %v3775_v38 = vadd.f32 %v6105_v37, %v3774_v33 }
 0x35e   : > { %v5049_v18 = vpack.c.bf16 %v3775_v38, %v3773_v36 }
 0x360   : > { %5097 = vst [vmem:[%s6116_s16 + $0x38] sm:$0xff] %v5049_v18  }
 0x363   : > { %v3777_v39 = vpop.f32.mrf.mxu1 }
 0x364   : > { %v3778_v41 = vadd.f32 %v6105_v37, %v3777_v39 }
 0x36b   : > { %v3779_v40 = vpop.f32.mrf.mxu1 }
 0x36c   : > { %v3780_v42 = vadd.f32 %v6105_v37, %v3779_v40 }
 0x36e   : > { %v5054_v43 = vpack.c.bf16 %v3780_v42, %v3778_v41 }
 0x370   : > { %5098 = vst [vmem:[%s6116_s16 + $0x40] sm:$0xff] %v5054_v43  }
 0x373   : > { %v3782_v44 = vpop.f32.mrf.mxu1 }
 0x374   : > { %v3783_v46 = vadd.f32 %v6105_v37, %v3782_v44 }
 0x37b   : > { %v3784_v45 = vpop.f32.mrf.mxu1 }
 0x37c   : > { %v3785_v48 = vadd.f32 %v6105_v37, %v3784_v45 }
 0x37e   : > { %v5059_v49 = vpack.c.bf16 %v3785_v48, %v3783_v46 }
 0x380   : > { %5099 = vst [vmem:[%s6116_s16 + $0x48] sm:$0xff] %v5059_v49  }
 0x383   : > { %v3787_v47 = vpop.f32.mrf.mxu1 }
 0x384   : > { %v3788_v51 = vadd.f32 %v6105_v37, %v3787_v47 }
 0x38b   : > { %v3789_v50 = vpop.f32.mrf.mxu1 }
 0x38c   : > { %v3790_v52 = vadd.f32 %v6105_v37, %v3789_v50 }
 0x38e   : > { %v5064_v53 = vpack.c.bf16 %v3790_v52, %v3788_v51 }
 0x390   : > { %5100 = vst [vmem:[%s6116_s16 + $0x50] sm:$0xff] %v5064_v53  }
 0x394   : > { %v3792_v54 = vpop.f32.mrf.mxu1 }
 0x395   : > { %v3793_v56 = vadd.f32 %v6105_v37, %v3792_v54 }
 0x39c   : > { %v3794_v55 = vpop.f32.mrf.mxu1 }
 0x39d   : > { %v3795_v57 = vadd.f32 %v6105_v37, %v3794_v55 }
 0x39f   : > { %v5069_v58 = vpack.c.bf16 %v3795_v57, %v3793_v56 }
 0x3a1   : > { %5101 = vst [vmem:[%s6116_s16 + $0x58] sm:$0xff] %v5069_v58  }
 0x3a4   : > { %v3797_v59 = vpop.f32.mrf.mxu1 }
 0x3a5   : > { %v3798_v61 = vadd.f32 %v6105_v37, %v3797_v59 }
 0x3ac   : > { %v3799_v60 = vpop.f32.mrf.mxu1 }
 0x3ad   : > { %v3800_v62 = vadd.f32 %v6105_v37, %v3799_v60 }
 0x3af   : > { %v5074_v63 = vpack.c.bf16 %v3800_v62, %v3798_v61 }
 0x3b1   : > { %5102 = vst [vmem:[%s6116_s16 + $0x60] sm:$0xff] %v5074_v63  }
 0x3b4   : > { %v3802_v0 = vpop.f32.mrf.mxu1 }
 0x3b5   : > { %v3803_v3 = vadd.f32 %v6105_v37, %v3802_v0 }
 0x3bc   : > { %v3804_v2 = vpop.f32.mrf.mxu1 }
 0x3bd   : > { %v3805_v1 = vadd.f32 %v6105_v37, %v3804_v2 }
 0x3bf   : > { %v5079_v4 = vpack.c.bf16 %v3805_v1, %v3803_v3 }
 0x3c1   : > { %5103 = vst [vmem:[%s6116_s16 + $0x68] sm:$0xff] %v5079_v4  }
 0x3c4   : > { %v3807_v5 = vpop.f32.mrf.mxu1 }
 0x3c5   : > { %v3808_v7 = vadd.f32 %v6105_v37, %v3807_v5 }
 0x3cc   : > { %v3809_v6 = vpop.f32.mrf.mxu1 }
 0x3cd   : > { %v3810_v8 = vadd.f32 %v6105_v37, %v3809_v6 }
 0x3cf   : > { %v5084_v9 = vpack.c.bf16 %v3810_v8, %v3808_v7 }
 0x3d1   : > { %5104 = vst [vmem:[%s6116_s16 + $0x70] sm:$0xff] %v5084_v9  }
 0x3d4   : > { %v3812_v10 = vpop.f32.mrf.mxu1 }
 0x3d5   : > { %v3813_v12 = vadd.f32 %v6105_v37, %v3812_v10 }
 0x3dc   : > { %v3814_v11 = vpop.f32.mrf.mxu1 }
 0x3dd   : > { %v3815_v13 = vadd.f32 %v6105_v37, %v3814_v11 }
 0x3df   : > { %v5089_v15 = vpack.c.bf16 %v3815_v13, %v3813_v12 }
 0x3e1   : > { %5105 = vst [vmem:[%s6116_s16 + $0x78] sm:$0xff] %v5089_v15  }
 0x3e2   : > { %5213 = shalt.err (!%p5210_p7)
}
 0x3e3   : > { %s5282_s10 = smov 64   ;;  %s5283_s16 = smov 4  }
 0x3e4   : > { %5110 = dma.vmem_to_hbm [thread:$0]  (%p5365_p3), %s3897_s14, 2048, %s3899_s15, %s3882_s21, %s5282_s10, %s5282_s10, %s5283_s16  }
 0x3e5 PF: > { %p5116_p9 = scmp.ge.s32.totalorder %s5280_s25, 2  ;;  %s3913_s9 = sand.u32 1, %s5252_s18  }
 0x3e6   : > { %s3914_s12 = scalar_lea.sflag [#allocation4], %s3913_s9 }
 0x3e7   : > { %p5113_p10 = pnand %p5116_p9, %p5374_p8 }
 0x3e9   : > { %p5114_p11 = pneg %p5113_p10 }
 0x3eb   : > { %5247 = dma.done.wait (%p5114_p11), %s3914_s12, 2048  }
 0x3ec   : > { %5249 = vsyncadd (%p5114_p11), %s3914_s12, 4294965248  ;;  %s18_s25 = sadd.s32 1, %s5280_s25   ;;  %s6260_s6 = sld [smem:[#allocation6_spill]] }
 0x3ed   : > { %p15_p12 = scmp.ge.s32.totalorder %s18_s25, 10   ;;  %s6261_s18 = smov %s5256_s19 }
 0x3ee   : > { %s6262_s19 = smov %s5260_s20  ;;  %s6263_s20 = smov %s5383_s11 }
 0x3ef   : > { %s6264_s21 = smov %s5272_s23  ;;  %s6265_s22 = smov %s5276_s24 }
 0x3f0   : > { %s6266_s23 = smov %s6269_s28  ;;  %17 = sbr.rel (!%p15_p12) target bundleno = 5 (0x5), region = 85 }
 0x3f2   : > { %s6267_s24 = smov %s6260_s6 }
 0x3f5   :  { %3920 = vsyncpa [#allocation4], 1 }
 0x3f6   :  { %3922 = vsyncpa [#allocation4 + $0x1], 1 }

// kernel: bottleneck_transform_forward.2
= control target key start
LH: loop header
LB: loop body
LE: loop exit
PB: predicated region body
PF: predicated region fallthrough
CT: control target
= control target key end

     0   :  { %s5404_s12 = smov 0   ;;  %s5406_s13 = smov 0   ;;  %s6672_s0 = inlined_call_operand.vmem [shape: bf16[2,4,256,64], index: 0, kind: input, shape index: {}]   ;;  %s6673_s1 = inlined_call_operand.vmem [shape: bf16[3,64,32], index: 1, kind: input, shape index: {}]   ;;  %s6674_s2 = inlined_call_operand.vmem [shape: f32[1,32], index: 2, kind: input, shape index: {}]   ;;  %s6675_s3 = inlined_call_operand.vmem [shape: bf16[2,4,256,32], index: 3, kind: output, shape index: {}]  }
   0x1   :  { %s5408_s14 = smov 0  }
   0x2 LB: > { %s25_s15 = sadd.s32 1, %s5378_s13  ;;  %p4179_p0 = scmp.ge.s32.totalorder %s5382_s14, 1  ;;  %s5382_s14 = sphi %s5408_s14, %s13_s14   ;;  %s5378_s13 = sphi %s5406_s13, %s6677_s13   ;;  %s5374_s12 = sphi %s5404_s12, %s6676_s12  }
   0x3   : > { %p27_p1 = scmp.ge.s32.totalorder %s25_s15, 2  ;;  %p158_p2 = scmp.lt.s32.totalorder %s5382_s14, 3 }
   0x5   : > { %s6679_s15 = smov (%p27_p1, %s25_s15), 0  ;;  %p159_p3 = pnand %p4179_p0, %p158_p2 }
   0x6   : > { %p191_p4 = scmp.lt.s32.totalorder (!%p159_p3), %s5374_s12, 1 }
   0x7   : > { %162 = sbr.rel (%p159_p3) target bundleno = 824 (0x338), region = 32 }
   0xc   : > { %v5215_v0 = vld [vmem:[%s6673_s1 + $0x38] sm:$0xff]  ;;  %v5214_v3 = vld [vmem:[%s6673_s1 + $0x30] sm:$0xff]  ;;  %s6681_s12 = smov (!%p191_p4, %s5374_s12), 1  ;;  %v5213_v6 = vld [vmem:[%s6673_s1 + $0x28] sm:$0xff]  ;;  %vm692_vm0 = vcmask 523264   ;;  %vm1214_vm1 = vcmask 261120  }
   0xd   : > { %v5267_v1 = vld [vmem:[%s6673_s1 + $0x18] sm:$0xff]  ;;  %889 = vmatpush.bf16.msra.mxu0 %v5215_v0  ;;  %5320 = vmatpush.bf16.msra.mxu3 %v5215_v0  ;;  %v5266_v4 = vld [vmem:[%s6673_s1 + $0x10] sm:$0xff]  ;;  %v5265_v7 = vld [vmem:[%s6673_s1 + $0x8] sm:$0xff]  ;;  %s5146_s7 = sshll.u32 %s6681_s12, 9  ;;  %vm3959_vm2 = vcmask 257024  }
   0xe   : > { %v5319_v2 = vld [vmem:[%s6673_s1 + $0x58] sm:$0xff]  ;;  %1859 = vmatpush.bf16.msra.mxu1 %v5267_v1  ;;  %v5318_v5 = vld [vmem:[%s6673_s1 + $0x50] sm:$0xff]  ;;  %v5317_v8 = vld [vmem:[%s6673_s1 + $0x48] sm:$0xff]  ;;  %s5460_s16 = scalar_lea.vmem %s6672_s0, %s5146_s7  ;;  %s5572_s25 = scalar_lea.vmem %s6675_s3, %s5146_s7 }
   0xf   : > { %2910 = vmatpush.bf16.msra.mxu2 %v5319_v2  ;;  %v5212_v9 = vld [vmem:[%s6673_s1 + $0x20] sm:$0xff]  ;;  %v5149_v16 = vld [vmem:[%s5460_s16 + $0x8] sm:$0xff]  ;;  %v5150_v20 = vld [vmem:[%s5460_s16 + $0x10] sm:$0xff] }
  0x10   : > { %v5264_v10 = vld [vmem:[%s6673_s1] sm:$0xff]  ;;  %v5189_v17 = vld [vmem:[%s5460_s16 + $0x148] sm:$0xff]  ;;  %v5190_v21 = vld [vmem:[%s5460_s16 + $0x150] sm:$0xff] }
  0x11   : > { %890 = vmatpush.bf16.msra.mxu0 %v5214_v3  ;;  %5321 = vmatpush.bf16.msra.mxu3 %v5214_v3  ;;  %v5316_v11 = vld [vmem:[%s6673_s1 + $0x40] sm:$0xff]  ;;  %v5217_v18 = vld [vmem:[%s5460_s16 + $0x8] sm:$0xff]  ;;  %v5218_v22 = vld [vmem:[%s5460_s16 + $0x10] sm:$0xff] }
  0x12   : > { %1860 = vmatpush.bf16.msra.mxu1 %v5266_v4  ;;  %v5148_v12 = vld [vmem:[%s5460_s16] sm:$0xff]  ;;  %v5269_v19 = vld [vmem:[%s5460_s16 + $0x88] sm:$0xff]  ;;  %v5270_v23 = vld [vmem:[%s5460_s16 + $0x90] sm:$0xff] }
  0x13   : > { %2911 = vmatpush.bf16.msra.mxu2 %v5318_v5  ;;  %v5188_v13 = vld [vmem:[%s5460_s16 + $0x140] sm:$0xff]  ;;  %v5151_v24 = vld [vmem:[%s5460_s16 + $0x18] sm:$0xff]  ;;  %v5153_v32 = vld [vmem:[%s5460_s16 + $0x28] sm:$0xff] }
  0x14   : > { %v5216_v14 = vld [vmem:[%s5460_s16] sm:$0xff]  ;;  %v5191_v25 = vld [vmem:[%s5460_s16 + $0x158] sm:$0xff]  ;;  %v5193_v33 = vld [vmem:[%s5460_s16 + $0x168] sm:$0xff] }
  0x15   : > { %891 = vmatpush.bf16.msra.mxu0 %v5213_v6  ;;  %5322 = vmatpush.bf16.msra.mxu3 %v5213_v6  ;;  %v5268_v15 = vld [vmem:[%s5460_s16 + $0x80] sm:$0xff]  ;;  %v5219_v26 = vld [vmem:[%s5460_s16 + $0x18] sm:$0xff]  ;;  %v5221_v34 = vld [vmem:[%s5460_s16 + $0x28] sm:$0xff] }
  0x16   : > { %1861 = vmatpush.bf16.msra.mxu1 %v5265_v7  ;;  %v5271_v27 = vld [vmem:[%s5460_s16 + $0x98] sm:$0xff]  ;;  %v5152_v28 = vld [vmem:[%s5460_s16 + $0x20] sm:$0xff]  ;;  %v5273_v35 = vld [vmem:[%s5460_s16 + $0xa8] sm:$0xff] }
  0x17   : > { %2912 = vmatpush.bf16.msra.mxu2 %v5317_v8  ;;  %v5192_v29 = vld [vmem:[%s5460_s16 + $0x160] sm:$0xff]  ;;  %v5154_v36 = vld [vmem:[%s5460_s16 + $0x30] sm:$0xff]  ;;  %v5155_v40 = vld [vmem:[%s5460_s16 + $0x38] sm:$0xff] }
  0x18   : > { %v5220_v30 = vld [vmem:[%s5460_s16 + $0x20] sm:$0xff]  ;;  %v5194_v37 = vld [vmem:[%s5460_s16 + $0x170] sm:$0xff]  ;;  %v5195_v41 = vld [vmem:[%s5460_s16 + $0x178] sm:$0xff] }
  0x19   : > { %892 = vmatpush.bf16.msra.mxu0 %v5212_v9  ;;  %5323 = vmatpush.bf16.msra.mxu3 %v5212_v9  ;;  %v5272_v31 = vld [vmem:[%s5460_s16 + $0xa0] sm:$0xff]  ;;  %v5222_v38 = vld [vmem:[%s5460_s16 + $0x30] sm:$0xff]  ;;  %v5223_v42 = vld [vmem:[%s5460_s16 + $0x38] sm:$0xff] }
  0x1a   : > { %1862 = vmatpush.bf16.msra.mxu1 %v5264_v10  ;;  %v5274_v39 = vld [vmem:[%s5460_s16 + $0xb0] sm:$0xff]  ;;  %v5275_v43 = vld [vmem:[%s5460_s16 + $0xb8] sm:$0xff]  ;;  %v5156_v44 = vld [vmem:[%s5460_s16 + $0x40] sm:$0xff] }
  0x1b   : > { %2913 = vmatpush.bf16.msra.mxu2 %v5316_v11  ;;  %v5196_v45 = vld [vmem:[%s5460_s16 + $0x180] sm:$0xff]  ;;  %v5157_v59 = vld [vmem:[%s5460_s16 + $0x48] sm:$0xff] }
  0x1c   : > { %4464 = vmatmul.msk.bf16.vlgmr.msra.gmra.mxu0 %vm692_vm0, %v5148_v12  ;;  %4504 = vmatmul.msk.bf16.vlgmr.msra.gmra.mxu3 %vm692_vm0, %v5188_v13  ;;  %v5224_v47 = vld [vmem:[%s5460_s16 + $0x40] sm:$0xff]  ;;  %v5197_v60 = vld [vmem:[%s5460_s16 + $0x188] sm:$0xff] }
  0x1d   : > { %5324 = vmatpush.bf16.msrb.mxu3 %v5267_v1  ;;  %4736 = vmatmul.msk.bf16.vlgmr.msra.gmra.mxu1 %vm692_vm0, %v5216_v14  ;;  %v5276_v48 = vld [vmem:[%s5460_s16 + $0xc0] sm:$0xff]  ;;  %v5225_v63 = vld [vmem:[%s5460_s16 + $0x48] sm:$0xff] }
  0x1e   : > { %5096 = vmatmul.msk.bf16.vlgmr.msra.gmra.mxu2 %vm692_vm0, %v5268_v15  ;;  %v5551_v57 = vld [vmem:[%s6674_s2] ss:$0 sm:$0xff]  ;;  %v5277_v0 = vld [vmem:[%s5460_s16 + $0xc8] sm:$0xff] }
  0x21   : > { %5325 = vmatpush.bf16.msrb.mxu3 %v5266_v4 }
  0x25   : > { %5326 = vmatpush.bf16.msrb.mxu3 %v5265_v7 }
  0x29   : > { %5327 = vmatpush.bf16.msrb.mxu3 %v5264_v10 }
  0x2c   : > { %4465 = vmatmul.msk.bf16.gmra.mxu0 %vm692_vm0, %v5149_v16  ;;  %4505 = vmatmul.msk.bf16.gmra.mxu3 %vm692_vm0, %v5189_v17 }
  0x2d   : > { %5328 = vmatpush.bf16.msra.mxu3 %v5319_v2  ;;  %4737 = vmatmul.msk.bf16.gmra.mxu1 %vm692_vm0, %v5217_v18 }
  0x2e   : > { %5097 = vmatmul.msk.bf16.gmra.mxu2 %vm692_vm0, %v5269_v19  ;;  %v5158_v19 = vld [vmem:[%s5460_s16 + $0x50] sm:$0xff] }
  0x31   : > { %5329 = vmatpush.bf16.msra.mxu3 %v5318_v5 }
  0x35   : > { %5330 = vmatpush.bf16.msra.mxu3 %v5317_v8 }
  0x39   : > { %5331 = vmatpush.bf16.msra.mxu3 %v5316_v11 }
  0x3c   : > { %4466 = vmatmul.msk.bf16.gmra.mxu0 %vm692_vm0, %v5150_v20  ;;  %4506 = vmatmul.msk.bf16.gmra.mxu3 %vm692_vm0, %v5190_v21  ;;  %v5198_v20 = vld [vmem:[%s5460_s16 + $0x190] sm:$0xff] }
  0x3d   : > { %4738 = vmatmul.msk.bf16.gmra.mxu1 %vm692_vm0, %v5218_v22  ;;  %v5226_v22 = vld [vmem:[%s5460_s16 + $0x50] sm:$0xff] }
  0x3e   : > { %5098 = vmatmul.msk.bf16.gmra.mxu2 %vm692_vm0, %v5270_v23  ;;  %v5278_v23 = vld [vmem:[%s5460_s16 + $0xd0] sm:$0xff] }
  0x4c   : > { %4467 = vmatmul.msk.bf16.gmra.mxu0 %vm692_vm0, %v5151_v24  ;;  %4507 = vmatmul.msk.bf16.gmra.mxu3 %vm692_vm0, %v5191_v25 }
  0x4d   : > { %4739 = vmatmul.msk.bf16.gmra.mxu1 %vm692_vm0, %v5219_v26 }
  0x4e   : > { %5099 = vmatmul.msk.bf16.gmra.mxu2 %vm692_vm0, %v5271_v27 }
  0x5c   : > { %4468 = vmatmul.msk.bf16.gmra.mxu0 %vm692_vm0, %v5152_v28  ;;  %4508 = vmatmul.msk.bf16.gmra.mxu3 %vm692_vm0, %v5192_v29 }
  0x5d   : > { %4740 = vmatmul.msk.bf16.gmra.mxu1 %vm692_vm0, %v5220_v30 }
  0x5e   : > { %5100 = vmatmul.msk.bf16.gmra.mxu2 %vm692_vm0, %v5272_v31 }
  0x6c   : > { %4469 = vmatmul.msk.bf16.gmra.mxu0 %vm692_vm0, %v5153_v32  ;;  %4509 = vmatmul.msk.bf16.gmra.mxu3 %vm692_vm0, %v5193_v33 }
  0x6d   : > { %4741 = vmatmul.msk.bf16.gmra.mxu1 %vm692_vm0, %v5221_v34 }
  0x6e   : > { %5101 = vmatmul.msk.bf16.gmra.mxu2 %vm692_vm0, %v5273_v35 }
  0x7c   : > { %4470 = vmatmul.msk.bf16.gmra.mxu0 %vm692_vm0, %v5154_v36  ;;  %4510 = vmatmul.msk.bf16.gmra.mxu3 %vm692_vm0, %v5194_v37 }
  0x7d   : > { %4742 = vmatmul.msk.bf16.gmra.mxu1 %vm692_vm0, %v5222_v38 }
  0x7e   : > { %5102 = vmatmul.msk.bf16.gmra.mxu2 %vm692_vm0, %v5274_v39 }
  0x8c   : > { %4471 = vmatmul.msk.bf16.gmra.mxu0 %vm692_vm0, %v5155_v40  ;;  %4511 = vmatmul.msk.bf16.gmra.mxu3 %vm692_vm0, %v5195_v41 }
  0x8d   : > { %4743 = vmatmul.msk.bf16.gmra.mxu1 %vm692_vm0, %v5223_v42  ;;  %v5159_v42 = vld [vmem:[%s5460_s16 + $0x58] sm:$0xff] }
  0x8e   : > { %5103 = vmatmul.msk.bf16.gmra.mxu2 %vm692_vm0, %v5275_v43  ;;  %v5199_v43 = vld [vmem:[%s5460_s16 + $0x198] sm:$0xff] }
  0x99   : > { %v894_v46 = vpop.f32.mrf.mxu0 }
  0x9a   : > { %1215 = vst.msk [vmem:[#allocation2] sm:$0xff] %vm1214_vm1, %v894_v46  ;;  %v5537_v49 = vpop.f32.mrf.mxu1  ;;  %v5227_v46 = vld [vmem:[%s5460_s16 + $0x58] sm:$0xff] }
  0x9c   : > { %4472 = vmatmul.msk.bf16.gmra.mxu0 %vm692_vm0, %v5156_v44  ;;  %4512 = vmatmul.msk.bf16.gmra.mxu3 %vm692_vm0, %v5196_v45 }
  0x9d   : > { %4744 = vmatmul.msk.bf16.gmra.mxu1 %vm692_vm0, %v5224_v47  ;;  %v5279_v47 = vld [vmem:[%s5460_s16 + $0xd8] sm:$0xff] }
  0x9e   : > { %5104 = vmatmul.msk.bf16.gmra.mxu2 %vm692_vm0, %v5276_v48 }
  0x9f   : > { %v1094_v50 = vpop.f32.mrf.mxu3 }
  0xa0   : > { %1295 = vst.msk [vmem:[#allocation2 + $0x280] sm:$0xff] %vm1214_vm1, %v1094_v50 }
  0xa1   : > { %v2915_v51 = vpop.f32.mrf.mxu2  ;;  %v896_v52 = vpop.f32.mrf.mxu0  ;;  %v3155_v53 = vld [vmem:[#allocation2] sm:$0xff] }
  0xa2   : > { %1216 = vst.msk [vmem:[#allocation2 + $0x8] sm:$0xff] %vm1214_vm1, %v896_v52  ;;  %v5545_v54 = vpop.f32.mrf.mxu1  ;;  %v3251_v55 = vadd.f32 %v3155_v53, %v2915_v51 }
  0xa4   : > { %3347 = vst.msk [vmem:[#allocation2] sm:$0xff] %vm1214_vm1, %v3251_v55 }
  0xa7   : > { %v1096_v56 = vpop.f32.mrf.mxu3 }
  0xa8   : > { %1296 = vst.msk [vmem:[#allocation2 + $0x288] sm:$0xff] %vm1214_vm1, %v1096_v56 }
  0xa9   : > { %v2917_v58 = vpop.f32.mrf.mxu2  ;;  %v899_v61 = vpop.f32.mrf.mxu0  ;;  %v3156_v62 = vld [vmem:[#allocation2 + $0x8] sm:$0xff] }
  0xaa   : > { %1217 = vst.msk [vmem:[#allocation2 + $0x10] sm:$0xff] %vm1214_vm1, %v899_v61  ;;  %v5559_v1 = vpop.f32.mrf.mxu1  ;;  %v3252_v2 = vadd.f32 %v3156_v62, %v2917_v58 }
  0xab   : > { %v3443_v3 = vld [vmem:[#allocation2] sm:$0xff] }
  0xac   : > { %v3575_v4 = vadd.f32 %v5551_v57, %v3443_v3  ;;  %3348 = vst.msk [vmem:[#allocation2 + $0x8] sm:$0xff] %vm1214_vm1, %v3252_v2  ;;  %4473 = vmatmul.msk.bf16.gmra.mxu0 %vm692_vm0, %v5157_v59  ;;  %4513 = vmatmul.msk.bf16.gmra.mxu3 %vm692_vm0, %v5197_v60 }
  0xad   : > { %4745 = vmatmul.msk.bf16.gmra.mxu1 %vm692_vm0, %v5225_v63 }
  0xae   : > { %5105 = vmatmul.msk.bf16.gmra.mxu2 %vm692_vm0, %v5277_v0  ;;  %v3703_v5 = vmax.f32 %v3575_v4, 0.0 }
  0xaf   : > { %v1099_v6 = vpop.f32.mrf.mxu3 }
  0xb0   : > { %v3831_v7 = vpack.c.bf16 %v3703_v5, %v3703_v5  ;;  %1297 = vst.msk [vmem:[#allocation2 + $0x290] sm:$0xff] %vm1214_vm1, %v1099_v6  ;;  %v5160_v6 = vld [vmem:[%s5460_s16 + $0x60] sm:$0xff] }
  0xb1   : > { %v2920_v8 = vpop.f32.mrf.mxu2  ;;  %v901_v9 = vpop.f32.mrf.mxu0  ;;  %v3157_v10 = vld [vmem:[#allocation2 + $0x10] sm:$0xff] }
  0xb2   : > { %3960 = vst.msk [vmem:[%s5572_s25] sm:$0xf] %vm3959_vm2, %v3831_v7  ;;  %v5577_v11 = vpop.f32.mrf.mxu1  ;;  %v3253_v12 = vadd.f32 %v3157_v10, %v2920_v8  ;;  %v5200_v7 = vld [vmem:[%s5460_s16 + $0x1a0] sm:$0xff] }
  0xb3   : > { %v3444_v13 = vld [vmem:[#allocation2 + $0x8] sm:$0xff]  ;;  %1218 = vst.msk [vmem:[#allocation2 + $0x18] sm:$0xff] %vm1214_vm1, %v901_v9 }
  0xb4   : > { %v3576_v14 = vadd.f32 %v5551_v57, %v3444_v13  ;;  %3349 = vst.msk [vmem:[#allocation2 + $0x10] sm:$0xff] %vm1214_vm1, %v3253_v12  ;;  %v5228_v12 = vld [vmem:[%s5460_s16 + $0x60] sm:$0xff] }
  0xb5   : > { %v5280_v13 = vld [vmem:[%s5460_s16 + $0xe0] sm:$0xff] }
  0xb6   : > { %v3704_v15 = vmax.f32 %v3576_v14, 0.0 }
  0xb7   : > { %v1101_v16 = vpop.f32.mrf.mxu3 }
  0xb8   : > { %v3832_v17 = vpack.c.bf16 %v3704_v15, %v3704_v15  ;;  %1298 = vst.msk [vmem:[#allocation2 + $0x298] sm:$0xff] %vm1214_vm1, %v1101_v16 }
  0xb9   : > { %v2922_v18 = vpop.f32.mrf.mxu2  ;;  %v904_v21 = vpop.f32.mrf.mxu0 }
  0xba   : > { %3961 = vst.msk [vmem:[%s5572_s25 + $0x4] sm:$0xf] %vm3959_vm2, %v3832_v17  ;;  %v5589_v24 = vpop.f32.mrf.mxu1  ;;  %v3158_v25 = vld [vmem:[#allocation2 + $0x18] sm:$0xff] }
  0xbb   : > { %v3445_v26 = vld [vmem:[#allocation2 + $0x10] sm:$0xff]  ;;  %1219 = vst.msk [vmem:[#allocation2 + $0x20] sm:$0xff] %vm1214_vm1, %v904_v21  ;;  %v3254_v27 = vadd.f32 %v3158_v25, %v2922_v18 }
  0xbc   : > { %v3577_v28 = vadd.f32 %v5551_v57, %v3445_v26  ;;  %4474 = vmatmul.msk.bf16.gmra.mxu0 %vm692_vm0, %v5158_v19  ;;  %4514 = vmatmul.msk.bf16.gmra.mxu3 %vm692_vm0, %v5198_v20 }
  0xbd   : > { %3350 = vst.msk [vmem:[#allocation2 + $0x18] sm:$0xff] %vm1214_vm1, %v3254_v27  ;;  %4746 = vmatmul.msk.bf16.gmra.mxu1 %vm692_vm0, %v5226_v22 }
  0xbe   : > { %5106 = vmatmul.msk.bf16.gmra.mxu2 %vm692_vm0, %v5278_v23  ;;  %v3705_v29 = vmax.f32 %v3577_v28, 0.0 }
  0xbf   : > { %v1104_v30 = vpop.f32.mrf.mxu3 }
  0xc0   : > { %v3833_v31 = vpack.c.bf16 %v3705_v29, %v3705_v29  ;;  %1299 = vst.msk [vmem:[#allocation2 + $0x2a0] sm:$0xff] %vm1214_vm1, %v1104_v30 }
  0xc1   : > { %v2925_v32 = vpop.f32.mrf.mxu2  ;;  %v906_v33 = vpop.f32.mrf.mxu0 }
  0xc2   : > { %3962 = vst.msk [vmem:[%s5572_s25 + $0x8] sm:$0xf] %vm3959_vm2, %v3833_v31  ;;  %v5601_v34 = vpop.f32.mrf.mxu1  ;;  %v3159_v35 = vld [vmem:[#allocation2 + $0x20] sm:$0xff] }
  0xc3   : > { %1220 = vst.msk [vmem:[#allocation2 + $0x28] sm:$0xff] %vm1214_vm1, %v906_v33  ;;  %v3255_v36 = vadd.f32 %v3159_v35, %v2925_v32  ;;  %v5161_v33 = vld [vmem:[%s5460_s16 + $0x68] sm:$0xff] }
  0xc4   : > { %v3446_v37 = vld [vmem:[#allocation2 + $0x18] sm:$0xff]  ;;  %v5201_v35 = vld [vmem:[%s5460_s16 + $0x1a8] sm:$0xff] }
  0xc5   : > { %v3578_v38 = vadd.f32 %v5551_v57, %v3446_v37  ;;  %3351 = vst.msk [vmem:[#allocation2 + $0x20] sm:$0xff] %vm1214_vm1, %v3255_v36  ;;  %v5229_v37 = vld [vmem:[%s5460_s16 + $0x68] sm:$0xff] }
  0xc7   : > { %v3706_v39 = vmax.f32 %v3578_v38, 0.0  ;;  %v1106_v40 = vpop.f32.mrf.mxu3  ;;  %v5281_v38 = vld [vmem:[%s5460_s16 + $0xe8] sm:$0xff] }
  0xc8   : > { %1300 = vst.msk [vmem:[#allocation2 + $0x2a8] sm:$0xff] %vm1214_vm1, %v1106_v40 }
  0xc9   : > { %v2927_v41 = vpop.f32.mrf.mxu2  ;;  %v3834_v44 = vpack.c.bf16 %v3706_v39, %v3706_v39  ;;  %v909_v45 = vpop.f32.mrf.mxu0 }
  0xca   : > { %1221 = vst.msk [vmem:[#allocation2 + $0x30] sm:$0xff] %vm1214_vm1, %v909_v45  ;;  %v5612_v48 = vpop.f32.mrf.mxu1  ;;  %v3160_v50 = vld [vmem:[#allocation2 + $0x28] sm:$0xff] }
  0xcb   : > { %3963 = vst.msk [vmem:[%s5572_s25 + $0xc] sm:$0xf] %vm3959_vm2, %v3834_v44  ;;  %v3256_v51 = vadd.f32 %v3160_v50, %v2927_v41 }
  0xcc   : > { %v3447_v52 = vld [vmem:[#allocation2 + $0x20] sm:$0xff]  ;;  %4475 = vmatmul.msk.bf16.gmra.mxu0 %vm692_vm0, %v5159_v42  ;;  %4515 = vmatmul.msk.bf16.gmra.mxu3 %vm692_vm0, %v5199_v43 }
  0xcd   : > { %v3579_v53 = vadd.f32 %v5551_v57, %v3447_v52  ;;  %3352 = vst.msk [vmem:[#allocation2 + $0x28] sm:$0xff] %vm1214_vm1, %v3256_v51  ;;  %4747 = vmatmul.msk.bf16.gmra.mxu1 %vm692_vm0, %v5227_v46 }
  0xce   : > { %5107 = vmatmul.msk.bf16.gmra.mxu2 %vm692_vm0, %v5279_v47 }
  0xcf   : > { %v3707_v55 = vmax.f32 %v3579_v53, 0.0  ;;  %v1109_v56 = vpop.f32.mrf.mxu3 }
  0xd0   : > { %1301 = vst.msk [vmem:[#allocation2 + $0x2b0] sm:$0xff] %vm1214_vm1, %v1109_v56 }
  0xd1   : > { %v2930_v58 = vpop.f32.mrf.mxu2  ;;  %v3835_v59 = vpack.c.bf16 %v3707_v55, %v3707_v55  ;;  %v911_v60 = vpop.f32.mrf.mxu0  ;;  %v3161_v61 = vld [vmem:[#allocation2 + $0x30] sm:$0xff] }
  0xd2   : > { %1222 = vst.msk [vmem:[#allocation2 + $0x38] sm:$0xff] %vm1214_vm1, %v911_v60  ;;  %v5624_v62 = vpop.f32.mrf.mxu1  ;;  %v3257_v63 = vadd.f32 %v3161_v61, %v2930_v58  ;;  %v5162_v61 = vld [vmem:[%s5460_s16 + $0x70] sm:$0xff] }
  0xd3   : > { %3964 = vst.msk [vmem:[%s5572_s25 + $0x10] sm:$0xf] %vm3959_vm2, %v3835_v59 }
  0xd4   : > { %v3448_v0 = vld [vmem:[#allocation2 + $0x28] sm:$0xff]  ;;  %3353 = vst.msk [vmem:[#allocation2 + $0x30] sm:$0xff] %vm1214_vm1, %v3257_v63  ;;  %v5202_v63 = vld [vmem:[%s5460_s16 + $0x1b0] sm:$0xff] }
  0xd5   : > { %v3580_v2 = vadd.f32 %v5551_v57, %v3448_v0 }
  0xd7   : > { %v3708_v3 = vmax.f32 %v3580_v2, 0.0  ;;  %v1111_v4 = vpop.f32.mrf.mxu3 }
  0xd8   : > { %1302 = vst.msk [vmem:[#allocation2 + $0x2b8] sm:$0xff] %vm1214_vm1, %v1111_v4  ;;  %v5282_v4 = vld [vmem:[%s5460_s16 + $0xf0] sm:$0xff] }
  0xd9   : > { %v2932_v5 = vpop.f32.mrf.mxu2  ;;  %v3836_v8 = vpack.c.bf16 %v3708_v3, %v3708_v3  ;;  %v914_v9 = vpop.f32.mrf.mxu0  ;;  %v3162_v10 = vld [vmem:[#allocation2 + $0x38] sm:$0xff]  ;;  %v5230_v3 = vld [vmem:[%s5460_s16 + $0x70] sm:$0xff] }
  0xda   : > { %1223 = vst.msk [vmem:[#allocation2 + $0x40] sm:$0xff] %vm1214_vm1, %v914_v9  ;;  %v5636_v14 = vpop.f32.mrf.mxu1  ;;  %v3258_v15 = vadd.f32 %v3162_v10, %v2932_v5 }
  0xdb   : > { %3965 = vst.msk [vmem:[%s5572_s25 + $0x14] sm:$0xf] %vm3959_vm2, %v3836_v8  ;;  %v3449_v16 = vld [vmem:[#allocation2 + $0x30] sm:$0xff] }
  0xdc   : > { %v3581_v17 = vadd.f32 %v5551_v57, %v3449_v16  ;;  %3354 = vst.msk [vmem:[#allocation2 + $0x38] sm:$0xff] %vm1214_vm1, %v3258_v15  ;;  %4476 = vmatmul.msk.bf16.gmra.mxu0 %vm692_vm0, %v5160_v6  ;;  %4516 = vmatmul.msk.bf16.gmra.mxu3 %vm692_vm0, %v5200_v7 }
  0xdd   : > { %4748 = vmatmul.msk.bf16.gmra.mxu1 %vm692_vm0, %v5228_v12 }
  0xde   : > { %5108 = vmatmul.msk.bf16.gmra.mxu2 %vm692_vm0, %v5280_v13  ;;  %v3709_v18 = vmax.f32 %v3581_v17, 0.0 }
  0xdf   : > { %v1114_v19 = vpop.f32.mrf.mxu3 }
  0xe0   : > { %v3837_v20 = vpack.c.bf16 %v3709_v18, %v3709_v18  ;;  %1303 = vst.msk [vmem:[#allocation2 + $0x2c0] sm:$0xff] %vm1214_vm1, %v1114_v19 }
  0xe1   : > { %v2935_v21 = vpop.f32.mrf.mxu2  ;;  %v916_v22 = vpop.f32.mrf.mxu0  ;;  %v3163_v23 = vld [vmem:[#allocation2 + $0x40] sm:$0xff] }
  0xe2   : > { %3966 = vst.msk [vmem:[%s5572_s25 + $0x18] sm:$0xf] %vm3959_vm2, %v3837_v20  ;;  %v5649_v25 = vpop.f32.mrf.mxu1  ;;  %v3259_v26 = vadd.f32 %v3163_v23, %v2935_v21 }
  0xe3   : > { %v3450_v27 = vld [vmem:[#allocation2 + $0x38] sm:$0xff]  ;;  %1224 = vst.msk [vmem:[#allocation2 + $0x48] sm:$0xff] %vm1214_vm1, %v916_v22 }
  0xe4   : > { %v3582_v28 = vadd.f32 %v5551_v57, %v3450_v27  ;;  %3355 = vst.msk [vmem:[#allocation2 + $0x40] sm:$0xff] %vm1214_vm1, %v3259_v26  ;;  %v5163_v27 = vld [vmem:[%s5460_s16 + $0x78] sm:$0xff] }
  0xe6   : > { %v3710_v29 = vmax.f32 %v3582_v28, 0.0  ;;  %v5203_v28 = vld [vmem:[%s5460_s16 + $0x1b8] sm:$0xff] }
  0xe7   : > { %v1116_v30 = vpop.f32.mrf.mxu3 }
  0xe8   : > { %v3838_v31 = vpack.c.bf16 %v3710_v29, %v3710_v29  ;;  %1304 = vst.msk [vmem:[#allocation2 + $0x2c8] sm:$0xff] %vm1214_vm1, %v1116_v30 }
  0xe9   : > { %v2937_v32 = vpop.f32.mrf.mxu2  ;;  %v919_v36 = vpop.f32.mrf.mxu0 }
  0xea   : > { %3967 = vst.msk [vmem:[%s5572_s25 + $0x1c] sm:$0xf] %vm3959_vm2, %v3838_v31  ;;  %v5661_v39 = vpop.f32.mrf.mxu1  ;;  %v3164_v40 = vld [vmem:[#allocation2 + $0x48] sm:$0xff] }
  0xeb   : > { %v3451_v41 = vld [vmem:[#allocation2 + $0x40] sm:$0xff]  ;;  %1225 = vst.msk [vmem:[#allocation2 + $0x50] sm:$0xff] %vm1214_vm1, %v919_v36  ;;  %v3260_v42 = vadd.f32 %v3164_v40, %v2937_v32  ;;  %v5231_v32 = vld [vmem:[%s5460_s16 + $0x78] sm:$0xff] }
  0xec   : > { %v3583_v43 = vadd.f32 %v5551_v57, %v3451_v41  ;;  %4477 = vmatmul.msk.bf16.gmra.mxu0 %vm692_vm0, %v5161_v33  ;;  %4517 = vmatmul.msk.bf16.gmra.mxu3 %vm692_vm0, %v5201_v35  ;;  %v5283_v33 = vld [vmem:[%s5460_s16 + $0xf8] sm:$0xff] }
  0xed   : > { %3356 = vst.msk [vmem:[#allocation2 + $0x48] sm:$0xff] %vm1214_vm1, %v3260_v42  ;;  %4749 = vmatmul.msk.bf16.gmra.mxu1 %vm692_vm0, %v5229_v37 }
  0xee   : > { %5109 = vmatmul.msk.bf16.gmra.mxu2 %vm692_vm0, %v5281_v38  ;;  %v3711_v44 = vmax.f32 %v3583_v43, 0.0 }
  0xef   : > { %v1119_v45 = vpop.f32.mrf.mxu3 }
  0xf0   : > { %v3839_v46 = vpack.c.bf16 %v3711_v44, %v3711_v44  ;;  %1305 = vst.msk [vmem:[#allocation2 + $0x2d0] sm:$0xff] %vm1214_vm1, %v1119_v45 }
  0xf1   : > { %v2940_v47 = vpop.f32.mrf.mxu2  ;;  %v921_v50 = vpop.f32.mrf.mxu0 }
  0xf2   : > { %3968 = vst.msk [vmem:[%s5572_s25 + $0x20] sm:$0xf] %vm3959_vm2, %v3839_v46  ;;  %v5673_v51 = vpop.f32.mrf.mxu1  ;;  %v3165_v52 = vld [vmem:[#allocation2 + $0x50] sm:$0xff] }
  0xf3   : > { %1226 = vst.msk [vmem:[#allocation2 + $0x58] sm:$0xff] %vm1214_vm1, %v921_v50  ;;  %v3261_v53 = vadd.f32 %v3165_v52, %v2940_v47 }
  0xf4   : > { %v3452_v55 = vld [vmem:[#allocation2 + $0x48] sm:$0xff] }
  0xf5   : > { %v3584_v56 = vadd.f32 %v5551_v57, %v3452_v55  ;;  %3357 = vst.msk [vmem:[#allocation2 + $0x50] sm:$0xff] %vm1214_vm1, %v3261_v53 }
  0xf7   : > { %v3712_v58 = vmax.f32 %v3584_v56, 0.0  ;;  %v1121_v59 = vpop.f32.mrf.mxu3 }
  0xf8   : > { %1306 = vst.msk [vmem:[#allocation2 + $0x2d8] sm:$0xff] %vm1214_vm1, %v1121_v59  ;;  %v5164_v59 = vld [vmem:[%s5460_s16 + $0x80] sm:$0xff] }
  0xf9   : > { %v2942_v60 = vpop.f32.mrf.mxu2  ;;  %v3840_v0 = vpack.c.bf16 %v3712_v58, %v3712_v58  ;;  %v924_v2 = vpop.f32.mrf.mxu0 }
  0xfa   : > { %1227 = vst.msk [vmem:[#allocation2 + $0x60] sm:$0xff] %vm1214_vm1, %v924_v2  ;;  %v5684_v5 = vpop.f32.mrf.mxu1  ;;  %v3166_v6 = vld [vmem:[#allocation2 + $0x58] sm:$0xff] }
  0xfb   : > { %3969 = vst.msk [vmem:[%s5572_s25 + $0x24] sm:$0xf] %vm3959_vm2, %v3840_v0  ;;  %v3262_v7 = vadd.f32 %v3166_v6, %v2942_v60  ;;  %v5204_v60 = vld [vmem:[%s5460_s16 + $0x1c0] sm:$0xff] }
  0xfc   : > { %v3453_v8 = vld [vmem:[#allocation2 + $0x50] sm:$0xff]  ;;  %4478 = vmatmul.msk.bf16.gmra.mxu0 %vm692_vm0, %v5162_v61  ;;  %4518 = vmatmul.msk.bf16.gmra.mxu3 %vm692_vm0, %v5202_v63  ;;  %v5232_v63 = vld [vmem:[%s5460_s16 + $0x80] sm:$0xff] }
  0xfd   : > { %v3585_v9 = vadd.f32 %v5551_v57, %v3453_v8  ;;  %3358 = vst.msk [vmem:[#allocation2 + $0x58] sm:$0xff] %vm1214_vm1, %v3262_v7  ;;  %4750 = vmatmul.msk.bf16.gmra.mxu1 %vm692_vm0, %v5230_v3  ;;  %v5284_v0 = vld [vmem:[%s5460_s16 + $0x100] sm:$0xff] }
  0xfe   : > { %5110 = vmatmul.msk.bf16.gmra.mxu2 %vm692_vm0, %v5282_v4 }
  0xff   : > { %v3713_v10 = vmax.f32 %v3585_v9, 0.0  ;;  %v1124_v12 = vpop.f32.mrf.mxu3 }
 0x100   : > { %1307 = vst.msk [vmem:[#allocation2 + $0x2e0] sm:$0xff] %vm1214_vm1, %v1124_v12 }
 0x101   : > { %v2945_v13 = vpop.f32.mrf.mxu2  ;;  %v3841_v15 = vpack.c.bf16 %v3713_v10, %v3713_v10  ;;  %v926_v16 = vpop.f32.mrf.mxu0  ;;  %v3167_v17 = vld [vmem:[#allocation2 + $0x60] sm:$0xff] }
 0x102   : > { %1228 = vst.msk [vmem:[#allocation2 + $0x68] sm:$0xff] %vm1214_vm1, %v926_v16  ;;  %v5696_v18 = vpop.f32.mrf.mxu1  ;;  %v3263_v19 = vadd.f32 %v3167_v17, %v2945_v13 }
 0x103   : > { %3970 = vst.msk [vmem:[%s5572_s25 + $0x28] sm:$0xf] %vm3959_vm2, %v3841_v15 }
 0x104   : > { %v3454_v20 = vld [vmem:[#allocation2 + $0x58] sm:$0xff]  ;;  %3359 = vst.msk [vmem:[#allocation2 + $0x60] sm:$0xff] %vm1214_vm1, %v3263_v19 }
 0x105   : > { %v3586_v21 = vadd.f32 %v5551_v57, %v3454_v20 }
 0x107   : > { %v3714_v22 = vmax.f32 %v3586_v21, 0.0  ;;  %v1126_v23 = vpop.f32.mrf.mxu3 }
 0x108   : > { %1308 = vst.msk [vmem:[#allocation2 + $0x2e8] sm:$0xff] %vm1214_vm1, %v1126_v23 }
 0x109   : > { %v2947_v26 = vpop.f32.mrf.mxu2  ;;  %v3842_v29 = vpack.c.bf16 %v3714_v22, %v3714_v22  ;;  %v929_v30 = vpop.f32.mrf.mxu0  ;;  %v3168_v31 = vld [vmem:[#allocation2 + $0x68] sm:$0xff] }
 0x10a   : > { %1229 = vst.msk [vmem:[#allocation2 + $0x70] sm:$0xff] %vm1214_vm1, %v929_v30  ;;  %v5708_v35 = vpop.f32.mrf.mxu1  ;;  %v3264_v36 = vadd.f32 %v3168_v31, %v2947_v26  ;;  %v5165_v26 = vld [vmem:[%s5460_s16 + $0x88] sm:$0xff] }
 0x10b   : > { %3971 = vst.msk [vmem:[%s5572_s25 + $0x2c] sm:$0xf] %vm3959_vm2, %v3842_v29  ;;  %v3455_v37 = vld [vmem:[#allocation2 + $0x60] sm:$0xff]  ;;  %v5233_v30 = vld [vmem:[%s5460_s16 + $0x88] sm:$0xff] }
 0x10c   : > { %v3587_v38 = vadd.f32 %v5551_v57, %v3455_v37  ;;  %3360 = vst.msk [vmem:[#allocation2 + $0x68] sm:$0xff] %vm1214_vm1, %v3264_v36  ;;  %4479 = vmatmul.msk.bf16.gmra.mxu0 %vm692_vm0, %v5163_v27  ;;  %4519 = vmatmul.msk.bf16.gmra.mxu3 %vm692_vm0, %v5203_v28  ;;  %v5205_v27 = vld [vmem:[%s5460_s16 + $0x1c8] sm:$0xff] }
 0x10d   : > { %4751 = vmatmul.msk.bf16.gmra.mxu1 %vm692_vm0, %v5231_v32  ;;  %v5285_v31 = vld [vmem:[%s5460_s16 + $0x108] sm:$0xff] }
 0x10e   : > { %5111 = vmatmul.msk.bf16.gmra.mxu2 %vm692_vm0, %v5283_v33  ;;  %v3715_v40 = vmax.f32 %v3587_v38, 0.0 }
 0x10f   : > { %v1129_v41 = vpop.f32.mrf.mxu3 }
 0x110   : > { %v3843_v42 = vpack.c.bf16 %v3715_v40, %v3715_v40  ;;  %1309 = vst.msk [vmem:[#allocation2 + $0x2f0] sm:$0xff] %vm1214_vm1, %v1129_v41 }
 0x111   : > { %v2950_v43 = vpop.f32.mrf.mxu2  ;;  %v931_v44 = vpop.f32.mrf.mxu0  ;;  %v3169_v45 = vld [vmem:[#allocation2 + $0x70] sm:$0xff] }
 0x112   : > { %3972 = vst.msk [vmem:[%s5572_s25 + $0x30] sm:$0xf] %vm3959_vm2, %v3843_v42  ;;  %v5721_v46 = vpop.f32.mrf.mxu1  ;;  %v3265_v47 = vadd.f32 %v3169_v45, %v2950_v43 }
 0x113   : > { %v3456_v50 = vld [vmem:[#allocation2 + $0x68] sm:$0xff]  ;;  %1230 = vst.msk [vmem:[#allocation2 + $0x78] sm:$0xff] %vm1214_vm1, %v931_v44 }
 0x114   : > { %v3588_v52 = vadd.f32 %v5551_v57, %v3456_v50  ;;  %3361 = vst.msk [vmem:[#allocation2 + $0x70] sm:$0xff] %vm1214_vm1, %v3265_v47 }
 0x116   : > { %v3716_v53 = vmax.f32 %v3588_v52, 0.0 }
 0x117   : > { %v1131_v55 = vpop.f32.mrf.mxu3 }
 0x118   : > { %v3844_v56 = vpack.c.bf16 %v3716_v53, %v3716_v53  ;;  %1310 = vst.msk [vmem:[#allocation2 + $0x2f8] sm:$0xff] %vm1214_vm1, %v1131_v55 }
 0x119   : > { %v2952_v58 = vpop.f32.mrf.mxu2  ;;  %v934_v61 = vpop.f32.mrf.mxu0 }
 0x11a   : > { %3973 = vst.msk [vmem:[%s5572_s25 + $0x34] sm:$0xf] %vm3959_vm2, %v3844_v56  ;;  %v5733_v2 = vpop.f32.mrf.mxu1  ;;  %v3170_v3 = vld [vmem:[#allocation2 + $0x78] sm:$0xff] }
 0x11b   : > { %v3457_v4 = vld [vmem:[#allocation2 + $0x70] sm:$0xff]  ;;  %1231 = vst.msk [vmem:[#allocation2 + $0x80] sm:$0xff] %vm1214_vm1, %v934_v61  ;;  %v3266_v6 = vadd.f32 %v3170_v3, %v2952_v58 }
 0x11c   : > { %v3589_v7 = vadd.f32 %v5551_v57, %v3457_v4  ;;  %4480 = vmatmul.msk.bf16.gmra.mxu0 %vm692_vm0, %v5164_v59  ;;  %4520 = vmatmul.msk.bf16.gmra.mxu3 %vm692_vm0, %v5204_v60  ;;  %v5166_v59 = vld [vmem:[%s5460_s16 + $0x90] sm:$0xff] }
 0x11d   : > { %3362 = vst.msk [vmem:[#allocation2 + $0x78] sm:$0xff] %vm1214_vm1, %v3266_v6  ;;  %4752 = vmatmul.msk.bf16.gmra.mxu1 %vm692_vm0, %v5232_v63  ;;  %v5206_v60 = vld [vmem:[%s5460_s16 + $0x1d0] sm:$0xff] }
 0x11e   : > { %5112 = vmatmul.msk.bf16.gmra.mxu2 %vm692_vm0, %v5284_v0  ;;  %v3717_v8 = vmax.f32 %v3589_v7, 0.0  ;;  %v5234_v3 = vld [vmem:[%s5460_s16 + $0x90] sm:$0xff] }
 0x11f   : > { %v1134_v9 = vpop.f32.mrf.mxu3  ;;  %v5286_v4 = vld [vmem:[%s5460_s16 + $0x110] sm:$0xff] }
 0x120   : > { %v3845_v10 = vpack.c.bf16 %v3717_v8, %v3717_v8  ;;  %1311 = vst.msk [vmem:[#allocation2 + $0x300] sm:$0xff] %vm1214_vm1, %v1134_v9 }
 0x121   : > { %v2955_v12 = vpop.f32.mrf.mxu2  ;;  %v936_v13 = vpop.f32.mrf.mxu0 }
 0x122   : > { %3974 = vst.msk [vmem:[%s5572_s25 + $0x38] sm:$0xf] %vm3959_vm2, %v3845_v10  ;;  %v5745_v15 = vpop.f32.mrf.mxu1  ;;  %v3171_v16 = vld [vmem:[#allocation2 + $0x80] sm:$0xff] }
 0x123   : > { %1232 = vst.msk [vmem:[#allocation2 + $0x88] sm:$0xff] %vm1214_vm1, %v936_v13  ;;  %v3267_v17 = vadd.f32 %v3171_v16, %v2955_v12 }
 0x124   : > { %v3458_v19 = vld [vmem:[#allocation2 + $0x78] sm:$0xff] }
 0x125   : > { %v3590_v20 = vadd.f32 %v5551_v57, %v3458_v19  ;;  %3363 = vst.msk [vmem:[#allocation2 + $0x80] sm:$0xff] %vm1214_vm1, %v3267_v17 }
 0x127   : > { %v3718_v21 = vmax.f32 %v3590_v20, 0.0  ;;  %v1136_v22 = vpop.f32.mrf.mxu3 }
 0x128   : > { %1312 = vst.msk [vmem:[#allocation2 + $0x308] sm:$0xff] %vm1214_vm1, %v1136_v22 }
 0x129   : > { %v2957_v23 = vpop.f32.mrf.mxu2  ;;  %v3846_v28 = vpack.c.bf16 %v3718_v21, %v3718_v21  ;;  %v939_v29 = vpop.f32.mrf.mxu0 }
 0x12a   : > { %1233 = vst.msk [vmem:[#allocation2 + $0x90] sm:$0xff] %vm1214_vm1, %v939_v29  ;;  %v5756_v32 = vpop.f32.mrf.mxu1  ;;  %v3172_v33 = vld [vmem:[#allocation2 + $0x88] sm:$0xff] }
 0x12b   : > { %3975 = vst.msk [vmem:[%s5572_s25 + $0x3c] sm:$0xf] %vm3959_vm2, %v3846_v28  ;;  %v3268_v36 = vadd.f32 %v3172_v33, %v2957_v23 }
 0x12c   : > { %v3459_v37 = vld [vmem:[#allocation2 + $0x80] sm:$0xff]  ;;  %4481 = vmatmul.msk.bf16.gmra.mxu0 %vm692_vm0, %v5165_v26  ;;  %4521 = vmatmul.msk.bf16.gmra.mxu3 %vm692_vm0, %v5205_v27 }
 0x12d   : > { %v3591_v38 = vadd.f32 %v5551_v57, %v3459_v37  ;;  %3364 = vst.msk [vmem:[#allocation2 + $0x88] sm:$0xff] %vm1214_vm1, %v3268_v36  ;;  %4753 = vmatmul.msk.bf16.gmra.mxu1 %vm692_vm0, %v5233_v30  ;;  %v5167_v30 = vld [vmem:[%s5460_s16 + $0x98] sm:$0xff] }
 0x12e   : > { %5113 = vmatmul.msk.bf16.gmra.mxu2 %vm692_vm0, %v5285_v31  ;;  %v5207_v31 = vld [vmem:[%s5460_s16 + $0x1d8] sm:$0xff] }
 0x12f   : > { %v3719_v40 = vmax.f32 %v3591_v38, 0.0  ;;  %v1139_v41 = vpop.f32.mrf.mxu3  ;;  %v5235_v36 = vld [vmem:[%s5460_s16 + $0x98] sm:$0xff] }
 0x130   : > { %1313 = vst.msk [vmem:[#allocation2 + $0x310] sm:$0xff] %vm1214_vm1, %v1139_v41  ;;  %v5287_v37 = vld [vmem:[%s5460_s16 + $0x118] sm:$0xff] }
 0x131   : > { %v2960_v42 = vpop.f32.mrf.mxu2  ;;  %v3847_v43 = vpack.c.bf16 %v3719_v40, %v3719_v40  ;;  %v941_v44 = vpop.f32.mrf.mxu0  ;;  %v3173_v45 = vld [vmem:[#allocation2 + $0x90] sm:$0xff] }
 0x132   : > { %1234 = vst.msk [vmem:[#allocation2 + $0x98] sm:$0xff] %vm1214_vm1, %v941_v44  ;;  %v5768_v47 = vpop.f32.mrf.mxu1  ;;  %v3269_v50 = vadd.f32 %v3173_v45, %v2960_v42 }
 0x133   : > { %3976 = vst.msk [vmem:[%s5572_s25 + $0x40] sm:$0xf] %vm3959_vm2, %v3847_v43 }
 0x134   : > { %v3460_v52 = vld [vmem:[#allocation2 + $0x88] sm:$0xff]  ;;  %3365 = vst.msk [vmem:[#allocation2 + $0x90] sm:$0xff] %vm1214_vm1, %v3269_v50 }
 0x135   : > { %v3592_v53 = vadd.f32 %v5551_v57, %v3460_v52 }
 0x137   : > { %v3720_v55 = vmax.f32 %v3592_v53, 0.0  ;;  %v1141_v56 = vpop.f32.mrf.mxu3 }
 0x138   : > { %1314 = vst.msk [vmem:[#allocation2 + $0x318] sm:$0xff] %vm1214_vm1, %v1141_v56 }
 0x139   : > { %v2962_v58 = vpop.f32.mrf.mxu2  ;;  %v3848_v61 = vpack.c.bf16 %v3720_v55, %v3720_v55  ;;  %v944_v63 = vpop.f32.mrf.mxu0  ;;  %v3174_v0 = vld [vmem:[#allocation2 + $0x98] sm:$0xff] }
 0x13a   : > { %1235 = vst.msk [vmem:[#allocation2 + $0xa0] sm:$0xff] %vm1214_vm1, %v944_v63  ;;  %v5780_v6 = vpop.f32.mrf.mxu1  ;;  %v3270_v7 = vadd.f32 %v3174_v0, %v2962_v58 }
 0x13b   : > { %3977 = vst.msk [vmem:[%s5572_s25 + $0x44] sm:$0xf] %vm3959_vm2, %v3848_v61  ;;  %v3461_v8 = vld [vmem:[#allocation2 + $0x90] sm:$0xff] }
 0x13c   : > { %v3593_v9 = vadd.f32 %v5551_v57, %v3461_v8  ;;  %3366 = vst.msk [vmem:[#allocation2 + $0x98] sm:$0xff] %vm1214_vm1, %v3270_v7  ;;  %4482 = vmatmul.msk.bf16.gmra.mxu0 %vm692_vm0, %v5166_v59  ;;  %4522 = vmatmul.msk.bf16.gmra.mxu3 %vm692_vm0, %v5206_v60 }
 0x13d   : > { %4754 = vmatmul.msk.bf16.gmra.mxu1 %vm692_vm0, %v5234_v3  ;;  %v5168_v3 = vld [vmem:[%s5460_s16 + $0xa0] sm:$0xff] }
 0x13e   : > { %5114 = vmatmul.msk.bf16.gmra.mxu2 %vm692_vm0, %v5286_v4  ;;  %v3721_v10 = vmax.f32 %v3593_v9, 0.0  ;;  %v5208_v4 = vld [vmem:[%s5460_s16 + $0x1e0] sm:$0xff] }
 0x13f   : > { %v1144_v12 = vpop.f32.mrf.mxu3  ;;  %v5236_v9 = vld [vmem:[%s5460_s16 + $0xa0] sm:$0xff] }
 0x140   : > { %v3849_v13 = vpack.c.bf16 %v3721_v10, %v3721_v10  ;;  %1315 = vst.msk [vmem:[#allocation2 + $0x320] sm:$0xff] %vm1214_vm1, %v1144_v12  ;;  %v5288_v10 = vld [vmem:[%s5460_s16 + $0x120] sm:$0xff] }
 0x141   : > { %v2965_v16 = vpop.f32.mrf.mxu2  ;;  %v946_v17 = vpop.f32.mrf.mxu0  ;;  %v3175_v19 = vld [vmem:[#allocation2 + $0xa0] sm:$0xff] }
 0x142   : > { %3978 = vst.msk [vmem:[%s5572_s25 + $0x48] sm:$0xf] %vm3959_vm2, %v3849_v13  ;;  %v5793_v20 = vpop.f32.mrf.mxu1  ;;  %v3271_v21 = vadd.f32 %v3175_v19, %v2965_v16 }
 0x143   : > { %v3462_v22 = vld [vmem:[#allocation2 + $0x98] sm:$0xff]  ;;  %1236 = vst.msk [vmem:[#allocation2 + $0xa8] sm:$0xff] %vm1214_vm1, %v946_v17 }
 0x144   : > { %v3594_v23 = vadd.f32 %v5551_v57, %v3462_v22  ;;  %3367 = vst.msk [vmem:[#allocation2 + $0xa0] sm:$0xff] %vm1214_vm1, %v3271_v21 }
 0x146   : > { %v3722_v26 = vmax.f32 %v3594_v23, 0.0 }
 0x147   : > { %v1146_v27 = vpop.f32.mrf.mxu3 }
 0x148   : > { %v3850_v28 = vpack.c.bf16 %v3722_v26, %v3722_v26  ;;  %1316 = vst.msk [vmem:[#allocation2 + $0x328] sm:$0xff] %vm1214_vm1, %v1146_v27 }
 0x149   : > { %v2967_v29 = vpop.f32.mrf.mxu2  ;;  %v949_v33 = vpop.f32.mrf.mxu0 }
 0x14a   : > { %3979 = vst.msk [vmem:[%s5572_s25 + $0x4c] sm:$0xf] %vm3959_vm2, %v3850_v28  ;;  %v5805_v38 = vpop.f32.mrf.mxu1  ;;  %v3176_v40 = vld [vmem:[#allocation2 + $0xa8] sm:$0xff] }
 0x14b   : > { %v3463_v41 = vld [vmem:[#allocation2 + $0xa0] sm:$0xff]  ;;  %1237 = vst.msk [vmem:[#allocation2 + $0xb0] sm:$0xff] %vm1214_vm1, %v949_v33  ;;  %v3272_v42 = vadd.f32 %v3176_v40, %v2967_v29 }
 0x14c   : > { %v3595_v43 = vadd.f32 %v5551_v57, %v3463_v41  ;;  %4483 = vmatmul.msk.bf16.gmra.mxu0 %vm692_vm0, %v5167_v30  ;;  %4523 = vmatmul.msk.bf16.gmra.mxu3 %vm692_vm0, %v5207_v31  ;;  %v5169_v41 = vld [vmem:[%s5460_s16 + $0xa8] sm:$0xff] }
 0x14d   : > { %3368 = vst.msk [vmem:[#allocation2 + $0xa8] sm:$0xff] %vm1214_vm1, %v3272_v42  ;;  %4755 = vmatmul.msk.bf16.gmra.mxu1 %vm692_vm0, %v5235_v36  ;;  %v5209_v42 = vld [vmem:[%s5460_s16 + $0x1e8] sm:$0xff] }
 0x14e   : > { %5115 = vmatmul.msk.bf16.gmra.mxu2 %vm692_vm0, %v5287_v37  ;;  %v3723_v44 = vmax.f32 %v3595_v43, 0.0 }
 0x14f   : > { %v1149_v45 = vpop.f32.mrf.mxu3 }
 0x150   : > { %v3851_v50 = vpack.c.bf16 %v3723_v44, %v3723_v44  ;;  %1317 = vst.msk [vmem:[#allocation2 + $0x330] sm:$0xff] %vm1214_vm1, %v1149_v45 }
 0x151   : > { %v2970_v52 = vpop.f32.mrf.mxu2  ;;  %v951_v53 = vpop.f32.mrf.mxu0 }
 0x152   : > { %3980 = vst.msk [vmem:[%s5572_s25 + $0x50] sm:$0xf] %vm3959_vm2, %v3851_v50  ;;  %v5817_v55 = vpop.f32.mrf.mxu1  ;;  %v3177_v56 = vld [vmem:[#allocation2 + $0xb0] sm:$0xff]  ;;  %v5237_v50 = vld [vmem:[%s5460_s16 + $0xa8] sm:$0xff] }
 0x153   : > { %1238 = vst.msk [vmem:[#allocation2 + $0xb8] sm:$0xff] %vm1214_vm1, %v951_v53  ;;  %v3273_v58 = vadd.f32 %v3177_v56, %v2970_v52  ;;  %v5289_v52 = vld [vmem:[%s5460_s16 + $0x128] sm:$0xff] }
 0x154   : > { %v3464_v59 = vld [vmem:[#allocation2 + $0xa8] sm:$0xff] }
 0x155   : > { %v3596_v60 = vadd.f32 %v5551_v57, %v3464_v59  ;;  %3369 = vst.msk [vmem:[#allocation2 + $0xb0] sm:$0xff] %vm1214_vm1, %v3273_v58 }
 0x157   : > { %v3724_v61 = vmax.f32 %v3596_v60, 0.0  ;;  %v1151_v63 = vpop.f32.mrf.mxu3 }
 0x158   : > { %1318 = vst.msk [vmem:[#allocation2 + $0x338] sm:$0xff] %vm1214_vm1, %v1151_v63 }
 0x159   : > { %v2972_v0 = vpop.f32.mrf.mxu2  ;;  %v3852_v7 = vpack.c.bf16 %v3724_v61, %v3724_v61  ;;  %v954_v8 = vpop.f32.mrf.mxu0 }
 0x15a   : > { %1239 = vst.msk [vmem:[#allocation2 + $0xc0] sm:$0xff] %vm1214_vm1, %v954_v8  ;;  %v5828_v12 = vpop.f32.mrf.mxu1  ;;  %v3178_v13 = vld [vmem:[#allocation2 + $0xb8] sm:$0xff] }
 0x15b   : > { %3981 = vst.msk [vmem:[%s5572_s25 + $0x54] sm:$0xf] %vm3959_vm2, %v3852_v7  ;;  %v3274_v16 = vadd.f32 %v3178_v13, %v2972_v0 }
 0x15c   : > { %v3465_v17 = vld [vmem:[#allocation2 + $0xb0] sm:$0xff]  ;;  %4484 = vmatmul.msk.bf16.gmra.mxu0 %vm692_vm0, %v5168_v3  ;;  %4524 = vmatmul.msk.bf16.gmra.mxu3 %vm692_vm0, %v5208_v4 }
 0x15d   : > { %v3597_v19 = vadd.f32 %v5551_v57, %v3465_v17  ;;  %3370 = vst.msk [vmem:[#allocation2 + $0xb8] sm:$0xff] %vm1214_vm1, %v3274_v16  ;;  %4756 = vmatmul.msk.bf16.gmra.mxu1 %vm692_vm0, %v5236_v9 }
 0x15e   : > { %5116 = vmatmul.msk.bf16.gmra.mxu2 %vm692_vm0, %v5288_v10 }
 0x15f   : > { %v3725_v21 = vmax.f32 %v3597_v19, 0.0  ;;  %v1154_v22 = vpop.f32.mrf.mxu3 }
 0x160   : > { %1319 = vst.msk [vmem:[#allocation2 + $0x340] sm:$0xff] %vm1214_vm1, %v1154_v22  ;;  %v5210_v22 = vld [vmem:[%s5460_s16 + $0x1f0] sm:$0xff] }
 0x161   : > { %v2975_v23 = vpop.f32.mrf.mxu2  ;;  %v3853_v26 = vpack.c.bf16 %v3725_v21, %v3725_v21  ;;  %v956_v27 = vpop.f32.mrf.mxu0  ;;  %v3179_v28 = vld [vmem:[#allocation2 + $0xc0] sm:$0xff]  ;;  %v5170_v21 = vld [vmem:[%s5460_s16 + $0xb0] sm:$0xff] }
 0x162   : > { %1240 = vst.msk [vmem:[#allocation2 + $0xc8] sm:$0xff] %vm1214_vm1, %v956_v27  ;;  %v5840_v29 = vpop.f32.mrf.mxu1  ;;  %v3275_v30 = vadd.f32 %v3179_v28, %v2975_v23  ;;  %v5290_v27 = vld [vmem:[%s5460_s16 + $0x130] sm:$0xff] }
 0x163   : > { %3982 = vst.msk [vmem:[%s5572_s25 + $0x58] sm:$0xf] %vm3959_vm2, %v3853_v26  ;;  %v5238_v26 = vld [vmem:[%s5460_s16 + $0xb0] sm:$0xff] }
 0x164   : > { %v3466_v31 = vld [vmem:[#allocation2 + $0xb8] sm:$0xff]  ;;  %3371 = vst.msk [vmem:[#allocation2 + $0xc0] sm:$0xff] %vm1214_vm1, %v3275_v30 }
 0x165   : > { %v3598_v33 = vadd.f32 %v5551_v57, %v3466_v31 }
 0x167   : > { %v3726_v36 = vmax.f32 %v3598_v33, 0.0  ;;  %v1156_v37 = vpop.f32.mrf.mxu3 }
 0x168   : > { %1320 = vst.msk [vmem:[#allocation2 + $0x348] sm:$0xff] %vm1214_vm1, %v1156_v37 }
 0x169   : > { %v2977_v40 = vpop.f32.mrf.mxu2  ;;  %v3854_v43 = vpack.c.bf16 %v3726_v36, %v3726_v36  ;;  %v959_v44 = vpop.f32.mrf.mxu0  ;;  %v3180_v45 = vld [vmem:[#allocation2 + $0xc8] sm:$0xff] }
 0x16a   : > { %1241 = vst.msk [vmem:[#allocation2 + $0xd0] sm:$0xff] %vm1214_vm1, %v959_v44  ;;  %v5852_v53 = vpop.f32.mrf.mxu1  ;;  %v3276_v56 = vadd.f32 %v3180_v45, %v2977_v40 }
 0x16b   : > { %3983 = vst.msk [vmem:[%s5572_s25 + $0x5c] sm:$0xf] %vm3959_vm2, %v3854_v43  ;;  %v3467_v58 = vld [vmem:[#allocation2 + $0xc0] sm:$0xff] }
 0x16c   : > { %v3599_v59 = vadd.f32 %v5551_v57, %v3467_v58  ;;  %3372 = vst.msk [vmem:[#allocation2 + $0xc8] sm:$0xff] %vm1214_vm1, %v3276_v56  ;;  %4485 = vmatmul.msk.bf16.gmra.mxu0 %vm692_vm0, %v5169_v41  ;;  %4525 = vmatmul.msk.bf16.gmra.mxu3 %vm692_vm0, %v5209_v42 }
 0x16d   : > { %4757 = vmatmul.msk.bf16.gmra.mxu1 %vm692_vm0, %v5237_v50 }
 0x16e   : > { %5117 = vmatmul.msk.bf16.gmra.mxu2 %vm692_vm0, %v5289_v52  ;;  %v3727_v60 = vmax.f32 %v3599_v59, 0.0 }
 0x16f   : > { %v1159_v61 = vpop.f32.mrf.mxu3 }
 0x170   : > { %v3855_v63 = vpack.c.bf16 %v3727_v60, %v3727_v60  ;;  %1321 = vst.msk [vmem:[#allocation2 + $0x350] sm:$0xff] %vm1214_vm1, %v1159_v61  ;;  %v5171_v61 = vld [vmem:[%s5460_s16 + $0xb8] sm:$0xff] }
 0x171   : > { %v2980_v0 = vpop.f32.mrf.mxu2  ;;  %v961_v3 = vpop.f32.mrf.mxu0  ;;  %v3181_v4 = vld [vmem:[#allocation2 + $0xd0] sm:$0xff] }
 0x172   : > { %3984 = vst.msk [vmem:[%s5572_s25 + $0x60] sm:$0xf] %vm3959_vm2, %v3855_v63  ;;  %v5865_v7 = vpop.f32.mrf.mxu1  ;;  %v3277_v8 = vadd.f32 %v3181_v4, %v2980_v0  ;;  %v5211_v63 = vld [vmem:[%s5460_s16 + $0x1f8] sm:$0xff] }
 0x173   : > { %v3468_v9 = vld [vmem:[#allocation2 + $0xc8] sm:$0xff]  ;;  %1242 = vst.msk [vmem:[#allocation2 + $0xd8] sm:$0xff] %vm1214_vm1, %v961_v3  ;;  %v5239_v4 = vld [vmem:[%s5460_s16 + $0xb8] sm:$0xff] }
 0x174   : > { %v3600_v10 = vadd.f32 %v5551_v57, %v3468_v9  ;;  %3373 = vst.msk [vmem:[#allocation2 + $0xd0] sm:$0xff] %vm1214_vm1, %v3277_v8  ;;  %v5291_v8 = vld [vmem:[%s5460_s16 + $0x138] sm:$0xff] }
 0x176   : > { %v3728_v13 = vmax.f32 %v3600_v10, 0.0 }
 0x177   : > { %v1161_v16 = vpop.f32.mrf.mxu3 }
 0x178   : > { %v3856_v17 = vpack.c.bf16 %v3728_v13, %v3728_v13  ;;  %1322 = vst.msk [vmem:[#allocation2 + $0x358] sm:$0xff] %vm1214_vm1, %v1161_v16  ;;  %v5909_v16 = vld [vmem:[%s6674_s2] ss:$0 sm:$0xff] }
 0x179   : > { %v2982_v19 = vpop.f32.mrf.mxu2  ;;  %v964_v23 = vpop.f32.mrf.mxu0 }
 0x17a   : > { %3985 = vst.msk [vmem:[%s5572_s25 + $0x64] sm:$0xf] %vm3959_vm2, %v3856_v17  ;;  %v5877_v28 = vpop.f32.mrf.mxu1  ;;  %v3182_v30 = vld [vmem:[#allocation2 + $0xd8] sm:$0xff] }
 0x17b   : > { %v3469_v31 = vld [vmem:[#allocation2 + $0xd0] sm:$0xff]  ;;  %1243 = vst.msk [vmem:[#allocation2 + $0xe0] sm:$0xff] %vm1214_vm1, %v964_v23  ;;  %v3278_v33 = vadd.f32 %v3182_v30, %v2982_v19 }
 0x17c   : > { %v3601_v36 = vadd.f32 %v5551_v57, %v3469_v31  ;;  %4486 = vmatmul.msk.bf16.gmra.mxu0 %vm692_vm0, %v5170_v21  ;;  %4526 = vmatmul.msk.bf16.gmra.mxu3 %vm692_vm0, %v5210_v22 }
 0x17d   : > { %3374 = vst.msk [vmem:[#allocation2 + $0xd8] sm:$0xff] %vm1214_vm1, %v3278_v33  ;;  %4758 = vmatmul.msk.bf16.gmra.mxu1 %vm692_vm0, %v5238_v26 }
 0x17e   : > { %5118 = vmatmul.msk.bf16.gmra.mxu2 %vm692_vm0, %v5290_v27  ;;  %v3729_v37 = vmax.f32 %v3601_v36, 0.0 }
 0x17f   : > { %v1164_v40 = vpop.f32.mrf.mxu3 }
 0x180   : > { %v3857_v41 = vpack.c.bf16 %v3729_v37, %v3729_v37  ;;  %1323 = vst.msk [vmem:[#allocation2 + $0x360] sm:$0xff] %vm1214_vm1, %v1164_v40 }
 0x181   : > { %v2985_v42 = vpop.f32.mrf.mxu2  ;;  %v966_v43 = vpop.f32.mrf.mxu0 }
 0x182   : > { %3986 = vst.msk [vmem:[%s5572_s25 + $0x68] sm:$0xf] %vm3959_vm2, %v3857_v41  ;;  %v5889_v44 = vpop.f32.mrf.mxu1  ;;  %v3183_v45 = vld [vmem:[#allocation2 + $0xe0] sm:$0xff] }
 0x183   : > { %1244 = vst.msk [vmem:[#allocation2 + $0xe8] sm:$0xff] %vm1214_vm1, %v966_v43  ;;  %v3279_v50 = vadd.f32 %v3183_v45, %v2985_v42  ;;  %v5172_v42 = vld [vmem:[%s5460_s16 + $0xc0] sm:$0xff] }
 0x184   : > { %v3470_v52 = vld [vmem:[#allocation2 + $0xd8] sm:$0xff]  ;;  %v5256_v43 = vld [vmem:[%s5460_s16 + $0x140] sm:$0xff] }
 0x185   : > { %v3602_v56 = vadd.f32 %v5551_v57, %v3470_v52  ;;  %3375 = vst.msk [vmem:[#allocation2 + $0xe0] sm:$0xff] %vm1214_vm1, %v3279_v50 }
 0x187   : > { %v3730_v58 = vmax.f32 %v3602_v56, 0.0  ;;  %v1166_v59 = vpop.f32.mrf.mxu3  ;;  %v5240_v56 = vld [vmem:[%s5460_s16 + $0xc0] sm:$0xff] }
 0x188   : > { %1324 = vst.msk [vmem:[#allocation2 + $0x368] sm:$0xff] %vm1214_vm1, %v1166_v59 }
 0x189   : > { %v2987_v60 = vpop.f32.mrf.mxu2  ;;  %v3858_v0 = vpack.c.bf16 %v3730_v58, %v3730_v58  ;;  %v969_v3 = vpop.f32.mrf.mxu0  ;;  %v5292_v58 = vld [vmem:[%s5460_s16 + $0x140] sm:$0xff] }
 0x18a   : > { %1245 = vst.msk [vmem:[#allocation2 + $0xf0] sm:$0xff] %vm1214_vm1, %v969_v3  ;;  %v5900_v9 = vpop.f32.mrf.mxu1  ;;  %v3184_v10 = vld [vmem:[#allocation2 + $0xe8] sm:$0xff] }
 0x18b   : > { %3987 = vst.msk [vmem:[%s5572_s25 + $0x6c] sm:$0xf] %vm3959_vm2, %v3858_v0  ;;  %v3280_v57 = vadd.f32 %v3184_v10, %v2987_v60 }
 0x18c   : > { %v3471_v13 = vld [vmem:[#allocation2 + $0xe0] sm:$0xff]  ;;  %4487 = vmatmul.msk.bf16.gmra.mxu0 %vm692_vm0, %v5171_v61  ;;  %4527 = vmatmul.msk.bf16.gmra.mxu3 %vm692_vm0, %v5211_v63 }
 0x18d   : > { %v3603_v17 = vadd.f32 %v5909_v16, %v3471_v13  ;;  %3376 = vst.msk [vmem:[#allocation2 + $0xe8] sm:$0xff] %vm1214_vm1, %v3280_v57  ;;  %4759 = vmatmul.msk.bf16.gmra.mxu1 %vm692_vm0, %v5239_v4 }
 0x18e   : > { %5119 = vmatmul.msk.bf16.gmra.mxu2 %vm692_vm0, %v5291_v8 }
 0x18f   : > { %v3731_v19 = vmax.f32 %v3603_v17, 0.0  ;;  %v1169_v21 = vpop.f32.mrf.mxu3 }
 0x190   : > { %1325 = vst.msk [vmem:[#allocation2 + $0x370] sm:$0xff] %vm1214_vm1, %v1169_v21 }
 0x191   : > { %v2990_v22 = vpop.f32.mrf.mxu2  ;;  %v3859_v23 = vpack.c.bf16 %v3731_v19, %v3731_v19  ;;  %v971_v26 = vpop.f32.mrf.mxu0  ;;  %v3185_v27 = vld [vmem:[#allocation2 + $0xf0] sm:$0xff] }
 0x192   : > { %1246 = vst.msk [vmem:[#allocation2 + $0xf8] sm:$0xff] %vm1214_vm1, %v971_v26  ;;  %v5917_v30 = vpop.f32.mrf.mxu1  ;;  %v3281_v31 = vadd.f32 %v3185_v27, %v2990_v22 }
 0x193   : > { %3988 = vst.msk [vmem:[%s5572_s25 + $0x70] sm:$0xf] %vm3959_vm2, %v3859_v23 }
 0x194   : > { %v3472_v33 = vld [vmem:[#allocation2 + $0xe8] sm:$0xff]  ;;  %3377 = vst.msk [vmem:[#allocation2 + $0xf0] sm:$0xff] %vm1214_vm1, %v3281_v31 }
 0x195   : > { %v3604_v36 = vadd.f32 %v5909_v16, %v3472_v33  ;;  %v5173_v31 = vld [vmem:[%s5460_s16 + $0xc8] sm:$0xff] }
 0x196   : > { %v5257_v33 = vld [vmem:[%s5460_s16 + $0x148] sm:$0xff] }
 0x197   : > { %v3732_v37 = vmax.f32 %v3604_v36, 0.0  ;;  %v1171_v40 = vpop.f32.mrf.mxu3 }
 0x198   : > { %1326 = vst.msk [vmem:[#allocation2 + $0x378] sm:$0xff] %vm1214_vm1, %v1171_v40 }
 0x199   : > { %v2992_v41 = vpop.f32.mrf.mxu2  ;;  %v3860_v45 = vpack.c.bf16 %v3732_v37, %v3732_v37  ;;  %v974_v50 = vpop.f32.mrf.mxu0  ;;  %v3186_v52 = vld [vmem:[#allocation2 + $0xf8] sm:$0xff]  ;;  %v5293_v37 = vld [vmem:[%s5460_s16 + $0x148] sm:$0xff] }
 0x19a   : > { %1247 = vst.msk [vmem:[#allocation2 + $0x100] sm:$0xff] %vm1214_vm1, %v974_v50  ;;  %v5929_v59 = vpop.f32.mrf.mxu1  ;;  %v3282_v60 = vadd.f32 %v3186_v52, %v2992_v41 }
 0x19b   : > { %3989 = vst.msk [vmem:[%s5572_s25 + $0x74] sm:$0xf] %vm3959_vm2, %v3860_v45  ;;  %v3473_v61 = vld [vmem:[#allocation2 + $0xf0] sm:$0xff] }
 0x19c   : > { %v3605_v63 = vadd.f32 %v5909_v16, %v3473_v61  ;;  %3378 = vst.msk [vmem:[#allocation2 + $0xf8] sm:$0xff] %vm1214_vm1, %v3282_v60  ;;  %4488 = vmatmul.msk.bf16.gmra.mxu0 %vm692_vm0, %v5172_v42  ;;  %4776 = vmatmul.msk.bf16.vlgmr.msrb.gmra.mxu3 %vm692_vm0, %v5256_v43 }
 0x19d   : > { %4760 = vmatmul.msk.bf16.gmra.mxu1 %vm692_vm0, %v5240_v56 }
 0x19e   : > { %5120 = vmatmul.msk.bf16.gmra.mxu2 %vm692_vm0, %v5292_v58  ;;  %v3733_v0 = vmax.f32 %v3605_v63, 0.0 }
 0x19f   : > { %v1174_v3 = vpop.f32.mrf.mxu3 }
 0x1a0   : > { %v3861_v4 = vpack.c.bf16 %v3733_v0, %v3733_v0  ;;  %1327 = vst.msk [vmem:[#allocation2 + $0x380] sm:$0xff] %vm1214_vm1, %v1174_v3 }
 0x1a1   : > { %v2995_v8 = vpop.f32.mrf.mxu2  ;;  %v2104_v10 = vld [vmem:[#allocation2 + $0x100] sm:$0xff]  ;;  %v976_v57 = vpop.f32.mrf.mxu0 }
 0x1a2   : > { %3990 = vst.msk [vmem:[%s5572_s25 + $0x78] sm:$0xf] %vm3959_vm2, %v3861_v4  ;;  %v2200_v13 = vadd.f32 %v2104_v10, %v5537_v49  ;;  %v5943_v17 = vpop.f32.mrf.mxu1  ;;  %v5241_v49 = vld [vmem:[%s5460_s16 + $0xc8] sm:$0xff] }
 0x1a3   : > { %v3474_v19 = vld [vmem:[#allocation2 + $0xf8] sm:$0xff]  ;;  %1248 = vst.msk [vmem:[#allocation2 + $0x108] sm:$0xff] %vm1214_vm1, %v976_v57  ;;  %v5174_v57 = vld [vmem:[%s5460_s16 + $0xd0] sm:$0xff] }
 0x1a4   : > { %2296 = vst.msk [vmem:[#allocation2 + $0x100] sm:$0xff] %vm1214_vm1, %v2200_v13  ;;  %v3606_v21 = vadd.f32 %v5909_v16, %v3474_v19  ;;  %v5258_v13 = vld [vmem:[%s5460_s16 + $0x150] sm:$0xff] }
 0x1a6   : > { %v3734_v22 = vmax.f32 %v3606_v21, 0.0  ;;  %v5242_v21 = vld [vmem:[%s5460_s16 + $0xd0] sm:$0xff] }
 0x1a7   : > { %v1176_v23 = vpop.f32.mrf.mxu3 }
 0x1a8   : > { %v3862_v26 = vpack.c.bf16 %v3734_v22, %v3734_v22  ;;  %1328 = vst.msk [vmem:[#allocation2 + $0x388] sm:$0xff] %vm1214_vm1, %v1176_v23  ;;  %v5294_v22 = vld [vmem:[%s5460_s16 + $0x150] sm:$0xff] }
 0x1a9   : > { %v2997_v27 = vpop.f32.mrf.mxu2  ;;  %v979_v36 = vpop.f32.mrf.mxu0 }
 0x1aa   : > { %3991 = vst.msk [vmem:[%s5572_s25 + $0x7c] sm:$0xf] %vm3959_vm2, %v3862_v26  ;;  %v2105_v40 = vld [vmem:[#allocation2 + $0x108] sm:$0xff]  ;;  %v5955_v41 = vpop.f32.mrf.mxu1 }
 0x1ab   : > { %v2201_v42 = vadd.f32 %v2105_v40, %v5545_v54  ;;  %v3187_v43 = vld [vmem:[#allocation2 + $0x100] sm:$0xff]  ;;  %1249 = vst.msk [vmem:[#allocation2 + $0x110] sm:$0xff] %vm1214_vm1, %v979_v36 }
 0x1ac   : > { %v3283_v45 = vadd.f32 %v3187_v43, %v2995_v8  ;;  %4489 = vmatmul.msk.bf16.gmra.mxu0 %vm692_vm0, %v5173_v31  ;;  %4777 = vmatmul.msk.bf16.gmra.mxu3 %vm692_vm0, %v5257_v33 }
 0x1ad   : > { %2297 = vst.msk [vmem:[#allocation2 + $0x108] sm:$0xff] %vm1214_vm1, %v2201_v42  ;;  %4761 = vmatmul.msk.bf16.gmra.mxu1 %vm692_vm0, %v5241_v49 }
 0x1ae   : > { %5121 = vmatmul.msk.bf16.gmra.mxu2 %vm692_vm0, %v5293_v37  ;;  %3379 = vst.msk [vmem:[#allocation2 + $0x100] sm:$0xff] %vm1214_vm1, %v3283_v45 }
 0x1af   : > { %v1179_v50 = vpop.f32.mrf.mxu3 }
 0x1b0   : > { %1329 = vst.msk [vmem:[#allocation2 + $0x390] sm:$0xff] %vm1214_vm1, %v1179_v50 }
 0x1b1   : > { %v3000_v54 = vpop.f32.mrf.mxu2  ;;  %v981_v52 = vpop.f32.mrf.mxu0 }
 0x1b2   : > { %v2106_v56 = vld [vmem:[#allocation2 + $0x110] sm:$0xff]  ;;  %1250 = vst.msk [vmem:[#allocation2 + $0x118] sm:$0xff] %vm1214_vm1, %v981_v52  ;;  %v5967_v58 = vpop.f32.mrf.mxu1 }
 0x1b3   : > { %v2202_v60 = vadd.f32 %v2106_v56, %v5559_v1 }
 0x1b4   : > { %v3188_v61 = vld [vmem:[#allocation2 + $0x108] sm:$0xff] }
 0x1b5   : > { %v3475_v63 = vld [vmem:[#allocation2 + $0x100] sm:$0xff]  ;;  %2298 = vst.msk [vmem:[#allocation2 + $0x110] sm:$0xff] %vm1214_vm1, %v2202_v60  ;;  %v3284_v0 = vadd.f32 %v3188_v61, %v2997_v27 }
 0x1b6   : > { %v3607_v3 = vadd.f32 %v5909_v16, %v3475_v63 }
 0x1b7   : > { %3380 = vst.msk [vmem:[#allocation2 + $0x108] sm:$0xff] %vm1214_vm1, %v3284_v0  ;;  %v1181_v4 = vpop.f32.mrf.mxu3  ;;  %v5175_v0 = vld [vmem:[%s5460_s16 + $0xd8] sm:$0xff] }
 0x1b8   : > { %v3735_v8 = vmax.f32 %v3607_v3, 0.0  ;;  %1330 = vst.msk [vmem:[#allocation2 + $0x398] sm:$0xff] %vm1214_vm1, %v1181_v4  ;;  %v5259_v3 = vld [vmem:[%s5460_s16 + $0x158] sm:$0xff] }
 0x1b9   : > { %v3002_v10 = vpop.f32.mrf.mxu2  ;;  %v2107_v19 = vld [vmem:[#allocation2 + $0x118] sm:$0xff]  ;;  %v984_v1 = vpop.f32.mrf.mxu0 }
 0x1ba   : > { %v3863_v23 = vpack.c.bf16 %v3735_v8, %v3735_v8  ;;  %v2203_v26 = vadd.f32 %v2107_v19, %v5577_v11  ;;  %1251 = vst.msk [vmem:[#allocation2 + $0x120] sm:$0xff] %vm1214_vm1, %v984_v1  ;;  %v5980_v27 = vpop.f32.mrf.mxu1  ;;  %v5295_v19 = vld [vmem:[%s5460_s16 + $0x158] sm:$0xff] }
 0x1bc   : > { %3992 = vst.msk [vmem:[%s5572_s25 + $0x80] sm:$0xf] %vm3959_vm2, %v3863_v23  ;;  %v3189_v31 = vld [vmem:[#allocation2 + $0x110] sm:$0xff]  ;;  %4490 = vmatmul.msk.bf16.gmra.mxu0 %vm692_vm0, %v5174_v57  ;;  %4778 = vmatmul.msk.bf16.gmra.mxu3 %vm692_vm0, %v5258_v13  ;;  %v5243_v13 = vld [vmem:[%s5460_s16 + $0xd8] sm:$0xff] }
 0x1bd   : > { %2299 = vst.msk [vmem:[#allocation2 + $0x118] sm:$0xff] %vm1214_vm1, %v2203_v26  ;;  %v3285_v33 = vadd.f32 %v3189_v31, %v3000_v54  ;;  %4762 = vmatmul.msk.bf16.gmra.mxu1 %vm692_vm0, %v5242_v21 }
 0x1be   : > { %5122 = vmatmul.msk.bf16.gmra.mxu2 %vm692_vm0, %v5294_v22  ;;  %v3476_v11 = vld [vmem:[#allocation2 + $0x108] sm:$0xff] }
 0x1bf   : > { %v3608_v36 = vadd.f32 %v5909_v16, %v3476_v11  ;;  %3381 = vst.msk [vmem:[#allocation2 + $0x110] sm:$0xff] %vm1214_vm1, %v3285_v33  ;;  %v1184_v49 = vpop.f32.mrf.mxu3 }
 0x1c0   : > { %1331 = vst.msk [vmem:[#allocation2 + $0x3a0] sm:$0xff] %vm1214_vm1, %v1184_v49 }
 0x1c1   : > { %v3005_v37 = vpop.f32.mrf.mxu2  ;;  %v3736_v40 = vmax.f32 %v3608_v36, 0.0  ;;  %v2108_v42 = vld [vmem:[#allocation2 + $0x120] sm:$0xff]  ;;  %v986_v43 = vpop.f32.mrf.mxu0 }
 0x1c2   : > { %v2204_v45 = vadd.f32 %v2108_v42, %v5589_v24  ;;  %1252 = vst.msk [vmem:[#allocation2 + $0x128] sm:$0xff] %vm1214_vm1, %v986_v43  ;;  %v5994_v50 = vpop.f32.mrf.mxu1 }
 0x1c3   : > { %v3864_v54 = vpack.c.bf16 %v3736_v40, %v3736_v40 }
 0x1c4   : > { %2300 = vst.msk [vmem:[#allocation2 + $0x120] sm:$0xff] %vm1214_vm1, %v2204_v45  ;;  %v3190_v52 = vld [vmem:[#allocation2 + $0x118] sm:$0xff] }
 0x1c5   : > { %3993 = vst.msk [vmem:[%s5572_s25 + $0x84] sm:$0xf] %vm3959_vm2, %v3864_v54  ;;  %v3286_v56 = vadd.f32 %v3190_v52, %v3002_v10 }
 0x1c6   : > { %v3477_v60 = vld [vmem:[#allocation2 + $0x110] sm:$0xff] }
 0x1c7   : > { %v3609_v61 = vadd.f32 %v5909_v16, %v3477_v60  ;;  %3382 = vst.msk [vmem:[#allocation2 + $0x118] sm:$0xff] %vm1214_vm1, %v3286_v56  ;;  %v1186_v63 = vpop.f32.mrf.mxu3 }
 0x1c8   : > { %1332 = vst.msk [vmem:[#allocation2 + $0x3a8] sm:$0xff] %vm1214_vm1, %v1186_v63  ;;  %v5260_v63 = vld [vmem:[%s5460_s16 + $0x160] sm:$0xff] }
 0x1c9   : > { %v3007_v24 = vpop.f32.mrf.mxu2  ;;  %v3737_v4 = vmax.f32 %v3609_v61, 0.0  ;;  %v2109_v8 = vld [vmem:[#allocation2 + $0x128] sm:$0xff]  ;;  %v989_v57 = vpop.f32.mrf.mxu0  ;;  %v5176_v61 = vld [vmem:[%s5460_s16 + $0xe0] sm:$0xff] }
 0x1ca   : > { %v2205_v1 = vadd.f32 %v2109_v8, %v5601_v34  ;;  %1253 = vst.msk [vmem:[#allocation2 + $0x130] sm:$0xff] %vm1214_vm1, %v989_v57  ;;  %v6008_v10 = vpop.f32.mrf.mxu1  ;;  %v5296_v8 = vld [vmem:[%s5460_s16 + $0x160] sm:$0xff] }
 0x1cb   : > { %v3865_v21 = vpack.c.bf16 %v3737_v4, %v3737_v4  ;;  %v3191_v22 = vld [vmem:[#allocation2 + $0x120] sm:$0xff] }
 0x1cc   : > { %2301 = vst.msk [vmem:[#allocation2 + $0x128] sm:$0xff] %vm1214_vm1, %v2205_v1  ;;  %v3287_v23 = vadd.f32 %v3191_v22, %v3005_v37  ;;  %4491 = vmatmul.msk.bf16.gmra.mxu0 %vm692_vm0, %v5175_v0  ;;  %4779 = vmatmul.msk.bf16.gmra.mxu3 %vm692_vm0, %v5259_v3  ;;  %v5244_v4 = vld [vmem:[%s5460_s16 + $0xe0] sm:$0xff] }
 0x1cd   : > { %3994 = vst.msk [vmem:[%s5572_s25 + $0x88] sm:$0xf] %vm3959_vm2, %v3865_v21  ;;  %4763 = vmatmul.msk.bf16.gmra.mxu1 %vm692_vm0, %v5243_v13 }
 0x1ce   : > { %5123 = vmatmul.msk.bf16.gmra.mxu2 %vm692_vm0, %v5295_v19  ;;  %v3478_v34 = vld [vmem:[#allocation2 + $0x118] sm:$0xff]  ;;  %3383 = vst.msk [vmem:[#allocation2 + $0x120] sm:$0xff] %vm1214_vm1, %v3287_v23 }
 0x1cf   : > { %v3610_v26 = vadd.f32 %v5909_v16, %v3478_v34  ;;  %v1189_v31 = vpop.f32.mrf.mxu3 }
 0x1d0   : > { %1333 = vst.msk [vmem:[#allocation2 + $0x3b0] sm:$0xff] %vm1214_vm1, %v1189_v31 }
 0x1d1   : > { %v3010_v33 = vpop.f32.mrf.mxu2  ;;  %v3738_v11 = vmax.f32 %v3610_v26, 0.0  ;;  %v2110_v36 = vld [vmem:[#allocation2 + $0x130] sm:$0xff]  ;;  %v991_v49 = vpop.f32.mrf.mxu0 }
 0x1d2   : > { %v2206_v37 = vadd.f32 %v2110_v36, %v5612_v48  ;;  %1254 = vst.msk [vmem:[#allocation2 + $0x138] sm:$0xff] %vm1214_vm1, %v991_v49  ;;  %v6022_v40 = vpop.f32.mrf.mxu1 }
 0x1d3   : > { %v3866_v42 = vpack.c.bf16 %v3738_v11, %v3738_v11  ;;  %v3192_v43 = vld [vmem:[#allocation2 + $0x128] sm:$0xff] }
 0x1d4   : > { %2302 = vst.msk [vmem:[#allocation2 + $0x130] sm:$0xff] %vm1214_vm1, %v2206_v37  ;;  %v3288_v45 = vadd.f32 %v3192_v43, %v3007_v24 }
 0x1d5   : > { %3995 = vst.msk [vmem:[%s5572_s25 + $0x8c] sm:$0xf] %vm3959_vm2, %v3866_v42  ;;  %v3479_v54 = vld [vmem:[#allocation2 + $0x120] sm:$0xff] }
 0x1d6   : > { %v3611_v52 = vadd.f32 %v5909_v16, %v3479_v54  ;;  %3384 = vst.msk [vmem:[#allocation2 + $0x128] sm:$0xff] %vm1214_vm1, %v3288_v45 }
 0x1d7   : > { %v1191_v48 = vpop.f32.mrf.mxu3 }
 0x1d8   : > { %v3739_v56 = vmax.f32 %v3611_v52, 0.0  ;;  %1334 = vst.msk [vmem:[#allocation2 + $0x3b8] sm:$0xff] %vm1214_vm1, %v1191_v48  ;;  %v5177_v52 = vld [vmem:[%s5460_s16 + $0xe8] sm:$0xff] }
 0x1d9   : > { %v3012_v60 = vpop.f32.mrf.mxu2  ;;  %v2111_v0 = vld [vmem:[#allocation2 + $0x138] sm:$0xff]  ;;  %v994_v3 = vpop.f32.mrf.mxu0  ;;  %v5261_v48 = vld [vmem:[%s5460_s16 + $0x168] sm:$0xff] }
 0x1da   : > { %v3867_v24 = vpack.c.bf16 %v3739_v56, %v3739_v56  ;;  %v2207_v57 = vadd.f32 %v2111_v0, %v5624_v62  ;;  %1255 = vst.msk [vmem:[#allocation2 + $0x140] sm:$0xff] %vm1214_vm1, %v994_v3  ;;  %v6036_v13 = vpop.f32.mrf.mxu1  ;;  %v5297_v0 = vld [vmem:[%s5460_s16 + $0x168] sm:$0xff] }
 0x1db   : > { %v3193_v19 = vld [vmem:[#allocation2 + $0x130] sm:$0xff] }
 0x1dc   : > { %3996 = vst.msk [vmem:[%s5572_s25 + $0x90] sm:$0xf] %vm3959_vm2, %v3867_v24  ;;  %v3289_v1 = vadd.f32 %v3193_v19, %v3010_v33  ;;  %4492 = vmatmul.msk.bf16.gmra.mxu0 %vm692_vm0, %v5176_v61  ;;  %4780 = vmatmul.msk.bf16.gmra.mxu3 %vm692_vm0, %v5260_v63  ;;  %v5245_v63 = vld [vmem:[%s5460_s16 + $0xe8] sm:$0xff] }
 0x1dd   : > { %v3480_v21 = vld [vmem:[#allocation2 + $0x128] sm:$0xff]  ;;  %2303 = vst.msk [vmem:[#allocation2 + $0x138] sm:$0xff] %vm1214_vm1, %v2207_v57  ;;  %4764 = vmatmul.msk.bf16.gmra.mxu1 %vm692_vm0, %v5244_v4 }
 0x1de   : > { %5124 = vmatmul.msk.bf16.gmra.mxu2 %vm692_vm0, %v5296_v8  ;;  %v3612_v62 = vadd.f32 %v5909_v16, %v3480_v21  ;;  %3385 = vst.msk [vmem:[#allocation2 + $0x130] sm:$0xff] %vm1214_vm1, %v3289_v1 }
 0x1df   : > { %v1194_v22 = vpop.f32.mrf.mxu3 }
 0x1e0   : > { %v3740_v23 = vmax.f32 %v3612_v62, 0.0  ;;  %1335 = vst.msk [vmem:[#allocation2 + $0x3c0] sm:$0xff] %vm1214_vm1, %v1194_v22 }
 0x1e1   : > { %v3015_v34 = vpop.f32.mrf.mxu2  ;;  %v2112_v26 = vld [vmem:[#allocation2 + $0x140] sm:$0xff]  ;;  %v996_v31 = vpop.f32.mrf.mxu0 }
 0x1e2   : > { %v3868_v33 = vpack.c.bf16 %v3740_v23, %v3740_v23  ;;  %v2208_v11 = vadd.f32 %v2112_v26, %v5636_v14  ;;  %1256 = vst.msk [vmem:[#allocation2 + $0x148] sm:$0xff] %vm1214_vm1, %v996_v31  ;;  %v6050_v36 = vpop.f32.mrf.mxu1 }
 0x1e4   : > { %3997 = vst.msk [vmem:[%s5572_s25 + $0x94] sm:$0xf] %vm3959_vm2, %v3868_v33  ;;  %v3194_v49 = vld [vmem:[#allocation2 + $0x138] sm:$0xff] }
 0x1e5   : > { %v3481_v37 = vld [vmem:[#allocation2 + $0x130] sm:$0xff]  ;;  %2304 = vst.msk [vmem:[#allocation2 + $0x140] sm:$0xff] %vm1214_vm1, %v2208_v11  ;;  %v3290_v42 = vadd.f32 %v3194_v49, %v3012_v60 }
 0x1e6   : > { %v3613_v43 = vadd.f32 %v5909_v16, %v3481_v37 }
 0x1e7   : > { %3386 = vst.msk [vmem:[#allocation2 + $0x138] sm:$0xff] %vm1214_vm1, %v3290_v42  ;;  %v1196_v45 = vpop.f32.mrf.mxu3  ;;  %v5178_v42 = vld [vmem:[%s5460_s16 + $0xf0] sm:$0xff] }
 0x1e8   : > { %v3741_v14 = vmax.f32 %v3613_v43, 0.0  ;;  %1336 = vst.msk [vmem:[#allocation2 + $0x3c8] sm:$0xff] %vm1214_vm1, %v1196_v45  ;;  %v5262_v43 = vld [vmem:[%s5460_s16 + $0x170] sm:$0xff] }
 0x1e9   : > { %v3017_v54 = vpop.f32.mrf.mxu2  ;;  %v2113_v56 = vld [vmem:[#allocation2 + $0x148] sm:$0xff]  ;;  %v999_v61 = vpop.f32.mrf.mxu0 }
 0x1ea   : > { %v3869_v3 = vpack.c.bf16 %v3741_v14, %v3741_v14  ;;  %v2209_v4 = vadd.f32 %v2113_v56, %v5649_v25  ;;  %1257 = vst.msk [vmem:[#allocation2 + $0x150] sm:$0xff] %vm1214_vm1, %v999_v61  ;;  %v6064_v60 = vpop.f32.mrf.mxu1  ;;  %v5298_v56 = vld [vmem:[%s5460_s16 + $0x170] sm:$0xff] }
 0x1ec   : > { %3998 = vst.msk [vmem:[%s5572_s25 + $0x98] sm:$0xf] %vm3959_vm2, %v3869_v3  ;;  %v3195_v8 = vld [vmem:[#allocation2 + $0x140] sm:$0xff]  ;;  %4493 = vmatmul.msk.bf16.gmra.mxu0 %vm692_vm0, %v5177_v52  ;;  %4781 = vmatmul.msk.bf16.gmra.mxu3 %vm692_vm0, %v5261_v48  ;;  %v5246_v48 = vld [vmem:[%s5460_s16 + $0xf0] sm:$0xff] }
 0x1ed   : > { %2305 = vst.msk [vmem:[#allocation2 + $0x148] sm:$0xff] %vm1214_vm1, %v2209_v4  ;;  %v3291_v24 = vadd.f32 %v3195_v8, %v3015_v34  ;;  %4765 = vmatmul.msk.bf16.gmra.mxu1 %vm692_vm0, %v5245_v63 }
 0x1ee   : > { %5125 = vmatmul.msk.bf16.gmra.mxu2 %vm692_vm0, %v5297_v0  ;;  %v3482_v25 = vld [vmem:[#allocation2 + $0x138] sm:$0xff] }
 0x1ef   : > { %v3614_v57 = vadd.f32 %v5909_v16, %v3482_v25  ;;  %3387 = vst.msk [vmem:[#allocation2 + $0x140] sm:$0xff] %vm1214_vm1, %v3291_v24  ;;  %v1199_v19 = vpop.f32.mrf.mxu3 }
 0x1f0   : > { %1337 = vst.msk [vmem:[#allocation2 + $0x3d0] sm:$0xff] %vm1214_vm1, %v1199_v19 }
 0x1f1   : > { %v3020_v1 = vpop.f32.mrf.mxu2  ;;  %v3742_v21 = vmax.f32 %v3614_v57, 0.0  ;;  %v2114_v62 = vld [vmem:[#allocation2 + $0x150] sm:$0xff]  ;;  %v1001_v22 = vpop.f32.mrf.mxu0 }
 0x1f2   : > { %v2210_v23 = vadd.f32 %v2114_v62, %v5661_v39  ;;  %1258 = vst.msk [vmem:[#allocation2 + $0x158] sm:$0xff] %vm1214_vm1, %v1001_v22  ;;  %v6078_v34 = vpop.f32.mrf.mxu1 }
 0x1f3   : > { %v3870_v26 = vpack.c.bf16 %v3742_v21, %v3742_v21 }
 0x1f4   : > { %2306 = vst.msk [vmem:[#allocation2 + $0x150] sm:$0xff] %vm1214_vm1, %v2210_v23  ;;  %v3196_v31 = vld [vmem:[#allocation2 + $0x148] sm:$0xff] }
 0x1f5   : > { %3999 = vst.msk [vmem:[%s5572_s25 + $0x9c] sm:$0xf] %vm3959_vm2, %v3870_v26  ;;  %v3292_v33 = vadd.f32 %v3196_v31, %v3017_v54 }
 0x1f6   : > { %v3483_v11 = vld [vmem:[#allocation2 + $0x140] sm:$0xff] }
 0x1f7   : > { %v3615_v49 = vadd.f32 %v5909_v16, %v3483_v11  ;;  %3388 = vst.msk [vmem:[#allocation2 + $0x148] sm:$0xff] %vm1214_vm1, %v3292_v33  ;;  %v1201_v37 = vpop.f32.mrf.mxu3 }
 0x1f8   : > { %1338 = vst.msk [vmem:[#allocation2 + $0x3d8] sm:$0xff] %vm1214_vm1, %v1201_v37  ;;  %v5263_v37 = vld [vmem:[%s5460_s16 + $0x178] sm:$0xff] }
 0x1f9   : > { %v3022_v39 = vpop.f32.mrf.mxu2  ;;  %v3743_v45 = vmax.f32 %v3615_v49, 0.0  ;;  %v2115_v14 = vld [vmem:[#allocation2 + $0x158] sm:$0xff]  ;;  %v1004_v52 = vpop.f32.mrf.mxu0 }
 0x1fa   : > { %v2211_v61 = vadd.f32 %v2115_v14, %v5673_v51  ;;  %1259 = vst.msk [vmem:[#allocation2 + $0x160] sm:$0xff] %vm1214_vm1, %v1004_v52  ;;  %v6092_v54 = vpop.f32.mrf.mxu1  ;;  %v5179_v49 = vld [vmem:[%s5460_s16 + $0xf8] sm:$0xff] }
 0x1fb   : > { %v3871_v63 = vpack.c.bf16 %v3743_v45, %v3743_v45  ;;  %v3197_v0 = vld [vmem:[#allocation2 + $0x150] sm:$0xff]  ;;  %v5247_v45 = vld [vmem:[%s5460_s16 + $0xf8] sm:$0xff] }
 0x1fc   : > { %2307 = vst.msk [vmem:[#allocation2 + $0x158] sm:$0xff] %vm1214_vm1, %v2211_v61  ;;  %v3293_v3 = vadd.f32 %v3197_v0, %v3020_v1  ;;  %4494 = vmatmul.msk.bf16.gmra.mxu0 %vm692_vm0, %v5178_v42  ;;  %4782 = vmatmul.msk.bf16.gmra.mxu3 %vm692_vm0, %v5262_v43  ;;  %v5299_v14 = vld [vmem:[%s5460_s16 + $0x178] sm:$0xff] }
 0x1fd   : > { %4000 = vst.msk [vmem:[%s5572_s25 + $0xa0] sm:$0xf] %vm3959_vm2, %v3871_v63  ;;  %4766 = vmatmul.msk.bf16.gmra.mxu1 %vm692_vm0, %v5246_v48 }
 0x1fe   : > { %5126 = vmatmul.msk.bf16.gmra.mxu2 %vm692_vm0, %v5298_v56  ;;  %v3484_v51 = vld [vmem:[#allocation2 + $0x148] sm:$0xff]  ;;  %3389 = vst.msk [vmem:[#allocation2 + $0x150] sm:$0xff] %vm1214_vm1, %v3293_v3 }
 0x1ff   : > { %v3616_v4 = vadd.f32 %v5909_v16, %v3484_v51  ;;  %v1204_v8 = vpop.f32.mrf.mxu3 }
 0x200   : > { %1339 = vst.msk [vmem:[#allocation2 + $0x3e0] sm:$0xff] %vm1214_vm1, %v1204_v8 }
 0x201   : > { %v3025_v24 = vpop.f32.mrf.mxu2  ;;  %v3744_v25 = vmax.f32 %v3616_v4, 0.0  ;;  %v2116_v57 = vld [vmem:[#allocation2 + $0x160] sm:$0xff]  ;;  %v1006_v19 = vpop.f32.mrf.mxu0 }
 0x202   : > { %v2212_v1 = vadd.f32 %v2116_v57, %v5684_v5  ;;  %1260 = vst.msk [vmem:[#allocation2 + $0x168] sm:$0xff] %vm1214_vm1, %v1006_v19  ;;  %v6106_v21 = vpop.f32.mrf.mxu1 }
 0x203   : > { %v3872_v62 = vpack.c.bf16 %v3744_v25, %v3744_v25  ;;  %v3198_v22 = vld [vmem:[#allocation2 + $0x158] sm:$0xff] }
 0x204   : > { %2308 = vst.msk [vmem:[#allocation2 + $0x160] sm:$0xff] %vm1214_vm1, %v2212_v1  ;;  %v3294_v23 = vadd.f32 %v3198_v22, %v3022_v39 }
 0x205   : > { %4001 = vst.msk [vmem:[%s5572_s25 + $0xa4] sm:$0xf] %vm3959_vm2, %v3872_v62  ;;  %v3485_v26 = vld [vmem:[#allocation2 + $0x150] sm:$0xff] }
 0x206   : > { %v3617_v31 = vadd.f32 %v5909_v16, %v3485_v26  ;;  %3390 = vst.msk [vmem:[#allocation2 + $0x158] sm:$0xff] %vm1214_vm1, %v3294_v23 }
 0x207   : > { %v1206_v5 = vpop.f32.mrf.mxu3 }
 0x208   : > { %v3745_v33 = vmax.f32 %v3617_v31, 0.0  ;;  %1340 = vst.msk [vmem:[#allocation2 + $0x3e8] sm:$0xff] %vm1214_vm1, %v1206_v5  ;;  %v5180_v31 = vld [vmem:[%s5460_s16 + $0x100] sm:$0xff] }
 0x209   : > { %v3027_v11 = vpop.f32.mrf.mxu2  ;;  %v2117_v42 = vld [vmem:[#allocation2 + $0x168] sm:$0xff]  ;;  %v1009_v43 = vpop.f32.mrf.mxu0  ;;  %v5308_v5 = vld [vmem:[%s5460_s16 + $0x1c0] sm:$0xff] }
 0x20a   : > { %v3873_v39 = vpack.c.bf16 %v3745_v33, %v3745_v33  ;;  %v2213_v52 = vadd.f32 %v2117_v42, %v5696_v18  ;;  %1261 = vst.msk [vmem:[#allocation2 + $0x170] sm:$0xff] %vm1214_vm1, %v1009_v43  ;;  %v6120_v48 = vpop.f32.mrf.mxu1  ;;  %v5300_v42 = vld [vmem:[%s5460_s16 + $0x180] sm:$0xff] }
 0x20b   : > { %v3199_v56 = vld [vmem:[#allocation2 + $0x160] sm:$0xff] }
 0x20c   : > { %4002 = vst.msk [vmem:[%s5572_s25 + $0xa8] sm:$0xf] %vm3959_vm2, %v3873_v39  ;;  %v3295_v61 = vadd.f32 %v3199_v56, %v3025_v24  ;;  %4495 = vmatmul.msk.bf16.gmra.mxu0 %vm692_vm0, %v5179_v49  ;;  %4783 = vmatmul.msk.bf16.gmra.mxu3 %vm692_vm0, %v5263_v37  ;;  %v5248_v37 = vld [vmem:[%s5460_s16 + $0x100] sm:$0xff] }
 0x20d   : > { %v3486_v63 = vld [vmem:[#allocation2 + $0x158] sm:$0xff]  ;;  %2309 = vst.msk [vmem:[#allocation2 + $0x168] sm:$0xff] %vm1214_vm1, %v2213_v52  ;;  %4767 = vmatmul.msk.bf16.gmra.mxu1 %vm692_vm0, %v5247_v45 }
 0x20e   : > { %5127 = vmatmul.msk.bf16.gmra.mxu2 %vm692_vm0, %v5299_v14  ;;  %v3618_v18 = vadd.f32 %v5909_v16, %v3486_v63  ;;  %3391 = vst.msk [vmem:[#allocation2 + $0x160] sm:$0xff] %vm1214_vm1, %v3295_v61  ;;  %v2152_v14 = vld [vmem:[#allocation2 + $0x280] sm:$0xff] }
 0x20f   : > { %v1209_v0 = vpop.f32.mrf.mxu3 }
 0x210   : > { %v3746_v3 = vmax.f32 %v3618_v18, 0.0  ;;  %1341 = vst.msk [vmem:[#allocation2 + $0x3f0] sm:$0xff] %vm1214_vm1, %v1209_v0  ;;  %v2184_v18 = vld [vmem:[#allocation2 + $0x380] sm:$0xff] }
 0x211   : > { %v3030_v51 = vpop.f32.mrf.mxu2  ;;  %v2118_v4 = vld [vmem:[#allocation2 + $0x170] sm:$0xff]  ;;  %v1011_v8 = vpop.f32.mrf.mxu0 }
 0x212   : > { %v3874_v24 = vpack.c.bf16 %v3746_v3, %v3746_v3  ;;  %v2214_v25 = vadd.f32 %v2118_v4, %v5708_v35  ;;  %1262 = vst.msk [vmem:[#allocation2 + $0x178] sm:$0xff] %vm1214_vm1, %v1011_v8  ;;  %v6134_v57 = vpop.f32.mrf.mxu1 }
 0x214   : > { %4003 = vst.msk [vmem:[%s5572_s25 + $0xac] sm:$0xf] %vm3959_vm2, %v3874_v24  ;;  %v3200_v19 = vld [vmem:[#allocation2 + $0x168] sm:$0xff] }
 0x215   : > { %v3487_v1 = vld [vmem:[#allocation2 + $0x160] sm:$0xff]  ;;  %2310 = vst.msk [vmem:[#allocation2 + $0x170] sm:$0xff] %vm1214_vm1, %v2214_v25  ;;  %v3296_v62 = vadd.f32 %v3200_v19, %v3027_v11  ;;  %v2153_v19 = vld [vmem:[#allocation2 + $0x288] sm:$0xff] }
 0x216   : > { %v3619_v22 = vadd.f32 %v5909_v16, %v3487_v1 }
 0x217   : > { %3392 = vst.msk [vmem:[#allocation2 + $0x168] sm:$0xff] %vm1214_vm1, %v3296_v62  ;;  %v1211_v23 = vpop.f32.mrf.mxu3 }
 0x218   : > { %v3747_v35 = vmax.f32 %v3619_v22, 0.0  ;;  %1342 = vst.msk [vmem:[#allocation2 + $0x3f8] sm:$0xff] %vm1214_vm1, %v1211_v23 }
 0x219   : > { %v3032_v26 = vpop.f32.mrf.mxu2  ;;  %v2119_v33 = vld [vmem:[#allocation2 + $0x178] sm:$0xff]  ;;  %v1014_v49 = vpop.f32.mrf.mxu0 }
 0x21a   : > { %v3875_v43 = vpack.c.bf16 %v3747_v35, %v3747_v35  ;;  %v2215_v45 = vadd.f32 %v2119_v33, %v5721_v46  ;;  %1263 = vst.msk [vmem:[#allocation2 + $0x180] sm:$0xff] %vm1214_vm1, %v1014_v49  ;;  %v1984_v11 = vpop.f32.mrf.mxu1 }
 0x21b   : > { %v2248_v39 = vadd.f32 %v2152_v14, %v1984_v11  ;;  %v5249_v14 = vld [vmem:[%s5460_s16 + $0x108] sm:$0xff] }
 0x21c   : > { %4004 = vst.msk [vmem:[%s5572_s25 + $0xb0] sm:$0xf] %vm3959_vm2, %v3875_v43  ;;  %v3201_v52 = vld [vmem:[#allocation2 + $0x170] sm:$0xff]  ;;  %4496 = vmatmul.msk.bf16.gmra.mxu0 %vm692_vm0, %v5180_v31  ;;  %5136 = vmatmul.msk.bf16.vlgmr.msra.gmra.mxu3 %vm692_vm0, %v5308_v5  ;;  %v2185_v5 = vld [vmem:[#allocation2 + $0x388] sm:$0xff] }
 0x21d   : > { %2311 = vst.msk [vmem:[#allocation2 + $0x178] sm:$0xff] %vm1214_vm1, %v2215_v45  ;;  %v3297_v56 = vadd.f32 %v3201_v52, %v3030_v51  ;;  %4768 = vmatmul.msk.bf16.gmra.mxu1 %vm692_vm0, %v5248_v37  ;;  %v5181_v37 = vld [vmem:[%s5460_s16 + $0x108] sm:$0xff] }
 0x21e   : > { %5128 = vmatmul.msk.bf16.gmra.mxu2 %vm692_vm0, %v5300_v42  ;;  %v3488_v46 = vld [vmem:[#allocation2 + $0x168] sm:$0xff]  ;;  %2344 = vst.msk [vmem:[#allocation2 + $0x280] sm:$0xff] %vm1214_vm1, %v2248_v39 }
 0x21f   : > { %v3620_v61 = vadd.f32 %v5909_v16, %v3488_v46  ;;  %3393 = vst.msk [vmem:[#allocation2 + $0x170] sm:$0xff] %vm1214_vm1, %v3297_v56  ;;  %v2064_v63 = vpop.f32.mrf.mxu3  ;;  %v5309_v42 = vld [vmem:[%s5460_s16 + $0x1c8] sm:$0xff] }
 0x220   : > { %v2280_v0 = vadd.f32 %v2184_v18, %v2064_v63  ;;  %v5301_v39 = vld [vmem:[%s5460_s16 + $0x188] sm:$0xff] }
 0x221   : > { %v3035_v3 = vpop.f32.mrf.mxu2  ;;  %v3748_v4 = vmax.f32 %v3620_v61, 0.0  ;;  %v2120_v8 = vld [vmem:[#allocation2 + $0x180] sm:$0xff]  ;;  %v1016_v24 = vpop.f32.mrf.mxu0 }
 0x222   : > { %v2216_v51 = vadd.f32 %v2120_v8, %v5733_v2  ;;  %2376 = vst.msk [vmem:[#allocation2 + $0x380] sm:$0xff] %vm1214_vm1, %v2280_v0  ;;  %v1986_v25 = vpop.f32.mrf.mxu1 }
 0x223   : > { %v3876_v1 = vpack.c.bf16 %v3748_v4, %v3748_v4  ;;  %1264 = vst.msk [vmem:[#allocation2 + $0x188] sm:$0xff] %vm1214_vm1, %v1016_v24  ;;  %v2249_v62 = vadd.f32 %v2153_v19, %v1986_v25  ;;  %v2154_v4 = vld [vmem:[#allocation2 + $0x290] sm:$0xff] }
 0x224   : > { %2312 = vst.msk [vmem:[#allocation2 + $0x180] sm:$0xff] %vm1214_vm1, %v2216_v51  ;;  %v3202_v22 = vld [vmem:[#allocation2 + $0x178] sm:$0xff]  ;;  %v2186_v25 = vld [vmem:[#allocation2 + $0x390] sm:$0xff] }
 0x225   : > { %4005 = vst.msk [vmem:[%s5572_s25 + $0xb4] sm:$0xf] %vm3959_vm2, %v3876_v1  ;;  %v3298_v23 = vadd.f32 %v3202_v22, %v3032_v26 }
 0x226   : > { %v3489_v35 = vld [vmem:[#allocation2 + $0x170] sm:$0xff]  ;;  %2345 = vst.msk [vmem:[#allocation2 + $0x288] sm:$0xff] %vm1214_vm1, %v2249_v62 }
 0x227   : > { %v3621_v2 = vadd.f32 %v5909_v16, %v3489_v35  ;;  %3394 = vst.msk [vmem:[#allocation2 + $0x178] sm:$0xff] %vm1214_vm1, %v3298_v23  ;;  %v2066_v31 = vpop.f32.mrf.mxu3 }
 0x228   : > { %v2281_v33 = vadd.f32 %v2185_v5, %v2066_v31  ;;  %v2155_v5 = vld [vmem:[#allocation2 + $0x298] sm:$0xff] }
 0x229   : > { %v3037_v49 = vpop.f32.mrf.mxu2  ;;  %v3749_v43 = vmax.f32 %v3621_v2, 0.0  ;;  %v3555_v45 = vld [vmem:[#allocation2 + $0x380] sm:$0xff]  ;;  %v1019_v11 = vpop.f32.mrf.mxu0 }
 0x22a   : > { %v3687_v26 = vadd.f32 %v5909_v16, %v3555_v45  ;;  %v2121_v52 = vld [vmem:[#allocation2 + $0x188] sm:$0xff]  ;;  %2377 = vst.msk [vmem:[#allocation2 + $0x388] sm:$0xff] %vm1214_vm1, %v2281_v33  ;;  %v1989_v56 = vpop.f32.mrf.mxu1 }
 0x22b   : > { %v3877_v46 = vpack.c.bf16 %v3749_v43, %v3749_v43  ;;  %v2217_v61 = vadd.f32 %v2121_v52, %v5745_v15  ;;  %v3203_v63 = vld [vmem:[#allocation2 + $0x180] sm:$0xff]  ;;  %1265 = vst.msk [vmem:[#allocation2 + $0x190] sm:$0xff] %vm1214_vm1, %v1019_v11  ;;  %v2250_v8 = vadd.f32 %v2154_v4, %v1989_v56  ;;  %v2187_v52 = vld [vmem:[#allocation2 + $0x398] sm:$0xff] }
 0x22c   : > { %v3815_v18 = vmax.f32 %v3687_v26, 0.0  ;;  %v3299_v0 = vadd.f32 %v3203_v63, %v3035_v3  ;;  %4497 = vmatmul.msk.bf16.gmra.mxu0 %vm692_vm0, %v5181_v37  ;;  %5137 = vmatmul.msk.bf16.gmra.mxu3 %vm692_vm0, %v5309_v42  ;;  %v5310_v63 = vld [vmem:[%s5460_s16 + $0x1d0] sm:$0xff] }
 0x22d   : > { %4006 = vst.msk [vmem:[%s5572_s25 + $0xb8] sm:$0xf] %vm3959_vm2, %v3877_v46  ;;  %4769 = vmatmul.msk.bf16.gmra.mxu1 %vm692_vm0, %v5249_v14 }
 0x22e   : > { %5129 = vmatmul.msk.bf16.gmra.mxu2 %vm692_vm0, %v5301_v39  ;;  %v3490_v24 = vld [vmem:[#allocation2 + $0x178] sm:$0xff]  ;;  %v3943_v15 = vpack.c.bf16 %v3815_v18, %v3815_v18  ;;  %2313 = vst.msk [vmem:[#allocation2 + $0x188] sm:$0xff] %vm1214_vm1, %v2217_v61  ;;  %v5182_v61 = vld [vmem:[%s5460_s16 + $0x110] sm:$0xff] }
 0x22f   : > { %v3622_v51 = vadd.f32 %v5909_v16, %v3490_v24  ;;  %3395 = vst.msk [vmem:[#allocation2 + $0x180] sm:$0xff] %vm1214_vm1, %v3299_v0  ;;  %v2069_v3 = vpop.f32.mrf.mxu3 }
 0x230   : > { %4072 = vst.msk [vmem:[%s5572_s25 + $0x1c0] sm:$0xf] %vm3959_vm2, %v3943_v15  ;;  %v2282_v19 = vadd.f32 %v2186_v25, %v2069_v3  ;;  %v2156_v3 = vld [vmem:[#allocation2 + $0x2a0] sm:$0xff] }
 0x231   : > { %v3040_v1 = vpop.f32.mrf.mxu2  ;;  %v3750_v62 = vmax.f32 %v3622_v51, 0.0  ;;  %v3556_v22 = vld [vmem:[#allocation2 + $0x388] sm:$0xff]  ;;  %2346 = vst.msk [vmem:[#allocation2 + $0x290] sm:$0xff] %vm1214_vm1, %v2250_v8  ;;  %v1021_v23 = vpop.f32.mrf.mxu0  ;;  %v5250_v8 = vld [vmem:[%s5460_s16 + $0x110] sm:$0xff] }
 0x232   : > { %v3688_v35 = vadd.f32 %v5909_v16, %v3556_v22  ;;  %v2122_v2 = vld [vmem:[#allocation2 + $0x190] sm:$0xff]  ;;  %2378 = vst.msk [vmem:[#allocation2 + $0x390] sm:$0xff] %vm1214_vm1, %v2282_v19  ;;  %v1991_v31 = vpop.f32.mrf.mxu1 }
 0x233   : > { %v3878_v33 = vpack.c.bf16 %v3750_v62, %v3750_v62  ;;  %v2218_v37 = vadd.f32 %v2122_v2, %v5756_v32  ;;  %1266 = vst.msk [vmem:[#allocation2 + $0x198] sm:$0xff] %vm1214_vm1, %v1021_v23  ;;  %v2251_v42 = vadd.f32 %v2155_v5, %v1991_v31  ;;  %v2188_v31 = vld [vmem:[#allocation2 + $0x3a0] sm:$0xff] }
 0x234   : > { %v3816_v43 = vmax.f32 %v3688_v35, 0.0 }
 0x235   : > { %4007 = vst.msk [vmem:[%s5572_s25 + $0xbc] sm:$0xf] %vm3959_vm2, %v3878_v33  ;;  %v3204_v45 = vld [vmem:[#allocation2 + $0x188] sm:$0xff] }
 0x236   : > { %v3491_v11 = vld [vmem:[#allocation2 + $0x180] sm:$0xff]  ;;  %v3944_v14 = vpack.c.bf16 %v3816_v43, %v3816_v43  ;;  %2314 = vst.msk [vmem:[#allocation2 + $0x190] sm:$0xff] %vm1214_vm1, %v2218_v37  ;;  %v3300_v39 = vadd.f32 %v3204_v45, %v3037_v49  ;;  %v5302_v49 = vld [vmem:[%s5460_s16 + $0x190] sm:$0xff] }
 0x237   : > { %v3623_v26 = vadd.f32 %v5909_v16, %v3491_v11  ;;  %2347 = vst.msk [vmem:[#allocation2 + $0x298] sm:$0xff] %vm1214_vm1, %v2251_v42  ;;  %v2071_v32 = vpop.f32.mrf.mxu3 }
 0x238   : > { %4073 = vst.msk [vmem:[%s5572_s25 + $0x1c4] sm:$0xf] %vm3959_vm2, %v3944_v14  ;;  %v2283_v56 = vadd.f32 %v2187_v52, %v2071_v32 }
 0x239   : > { %v3042_v46 = vpop.f32.mrf.mxu2  ;;  %v3751_v18 = vmax.f32 %v3623_v26, 0.0  ;;  %3396 = vst.msk [vmem:[#allocation2 + $0x188] sm:$0xff] %vm1214_vm1, %v3300_v39  ;;  %v3557_v0 = vld [vmem:[#allocation2 + $0x390] sm:$0xff]  ;;  %v1024_v4 = vpop.f32.mrf.mxu0  ;;  %v2157_v39 = vld [vmem:[#allocation2 + $0x2a8] sm:$0xff] }
 0x23a   : > { %v3689_v24 = vadd.f32 %v5909_v16, %v3557_v0  ;;  %v2123_v15 = vld [vmem:[#allocation2 + $0x198] sm:$0xff]  ;;  %2379 = vst.msk [vmem:[#allocation2 + $0x398] sm:$0xff] %vm1214_vm1, %v2283_v56  ;;  %v1994_v51 = vpop.f32.mrf.mxu1 }
 0x23b   : > { %v3879_v25 = vpack.c.bf16 %v3751_v18, %v3751_v18  ;;  %v2219_v19 = vadd.f32 %v2123_v15, %v5768_v47  ;;  %1267 = vst.msk [vmem:[#allocation2 + $0x1a0] sm:$0xff] %vm1214_vm1, %v1024_v4  ;;  %v2252_v62 = vadd.f32 %v2156_v3, %v1994_v51  ;;  %v5311_v15 = vld [vmem:[%s5460_s16 + $0x1d8] sm:$0xff]  ;;  %v6234_v51 = vld [vmem:[%s6674_s2] ss:$0 sm:$0xff] }
 0x23c   : > { %v3817_v22 = vmax.f32 %v3689_v24, 0.0  ;;  %4498 = vmatmul.msk.bf16.gmra.mxu0 %vm692_vm0, %v5182_v61  ;;  %5138 = vmatmul.msk.bf16.gmra.mxu3 %vm692_vm0, %v5310_v63  ;;  %v5183_v24 = vld [vmem:[%s5460_s16 + $0x118] sm:$0xff] }
 0x23d   : > { %4008 = vst.msk [vmem:[%s5572_s25 + $0xc0] sm:$0xf] %vm3959_vm2, %v3879_v25  ;;  %v3205_v23 = vld [vmem:[#allocation2 + $0x190] sm:$0xff]  ;;  %4770 = vmatmul.msk.bf16.gmra.mxu1 %vm692_vm0, %v5250_v8 }
 0x23e   : > { %5130 = vmatmul.msk.bf16.gmra.mxu2 %vm692_vm0, %v5302_v49  ;;  %v3945_v35 = vpack.c.bf16 %v3817_v22, %v3817_v22  ;;  %2315 = vst.msk [vmem:[#allocation2 + $0x198] sm:$0xff] %vm1214_vm1, %v2219_v19  ;;  %v3301_v47 = vadd.f32 %v3205_v23, %v3040_v1  ;;  %v5251_v19 = vld [vmem:[%s5460_s16 + $0x118] sm:$0xff] }
 0x23f   : > { %2348 = vst.msk [vmem:[#allocation2 + $0x2a0] sm:$0xff] %vm1214_vm1, %v2252_v62  ;;  %v2074_v2 = vpop.f32.mrf.mxu3  ;;  %v5303_v62 = vld [vmem:[%s5460_s16 + $0x198] sm:$0xff] }
 0x240   : > { %v3492_v5 = vld [vmem:[#allocation2 + $0x188] sm:$0xff]  ;;  %4074 = vst.msk [vmem:[%s5572_s25 + $0x1c8] sm:$0xf] %vm3959_vm2, %v3945_v35  ;;  %v2284_v33 = vadd.f32 %v2188_v31, %v2074_v2 }
 0x241   : > { %v3045_v37 = vpop.f32.mrf.mxu2  ;;  %v3624_v42 = vadd.f32 %v5909_v16, %v3492_v5  ;;  %3397 = vst.msk [vmem:[#allocation2 + $0x190] sm:$0xff] %vm1214_vm1, %v3301_v47  ;;  %v3558_v43 = vld [vmem:[#allocation2 + $0x398] sm:$0xff]  ;;  %v1026_v45 = vpop.f32.mrf.mxu0  ;;  %v2158_v47 = vld [vmem:[#allocation2 + $0x2b0] sm:$0xff] }
 0x242   : > { %v3690_v11 = vadd.f32 %v5909_v16, %v3558_v43  ;;  %v2124_v14 = vld [vmem:[#allocation2 + $0x1a0] sm:$0xff]  ;;  %2380 = vst.msk [vmem:[#allocation2 + $0x3a0] sm:$0xff] %vm1214_vm1, %v2284_v33  ;;  %v1996_v1 = vpop.f32.mrf.mxu1 }
 0x243   : > { %v3752_v26 = vmax.f32 %v3624_v42, 0.0  ;;  %v2220_v32 = vadd.f32 %v2124_v14, %v5780_v6  ;;  %1268 = vst.msk [vmem:[#allocation2 + $0x1a8] sm:$0xff] %vm1214_vm1, %v1026_v45  ;;  %v2253_v52 = vadd.f32 %v2157_v39, %v1996_v1  ;;  %v2189_v6 = vld [vmem:[#allocation2 + $0x3a8] sm:$0xff]  ;;  %v2190_v14 = vld [vmem:[#allocation2 + $0x3b0] sm:$0xff] }
 0x244   : > { %v3818_v56 = vmax.f32 %v3690_v11, 0.0 }
 0x245   : > { %v3880_v61 = vpack.c.bf16 %v3752_v26, %v3752_v26  ;;  %2316 = vst.msk [vmem:[#allocation2 + $0x1a0] sm:$0xff] %vm1214_vm1, %v2220_v32  ;;  %v3206_v16 = vld [vmem:[#allocation2 + $0x198] sm:$0xff] }
 0x246   : > { %v3946_v63 = vpack.c.bf16 %v3818_v56, %v3818_v56  ;;  %v3302_v18 = vadd.f32 %v3206_v16, %v3042_v46  ;;  %2349 = vst.msk [vmem:[#allocation2 + $0x2a8] sm:$0xff] %vm1214_vm1, %v2253_v52 }
 0x247   : > { %4009 = vst.msk [vmem:[%s5572_s25 + $0xc4] sm:$0xf] %vm3959_vm2, %v3880_v61  ;;  %v2076_v0 = vpop.f32.mrf.mxu3 }
 0x248   : > { %v3493_v4 = vld [vmem:[#allocation2 + $0x190] sm:$0xff]  ;;  %4075 = vst.msk [vmem:[%s5572_s25 + $0x1cc] sm:$0xf] %vm3959_vm2, %v3946_v63  ;;  %v2285_v8 = vadd.f32 %v2189_v6, %v2076_v0  ;;  %v2159_v63 = vld [vmem:[#allocation2 + $0x2b8] sm:$0xff] }
 0x249   : > { %v3047_v49 = vpop.f32.mrf.mxu2  ;;  %v3625_v46 = vadd.f32 %v6234_v51, %v3493_v4  ;;  %3398 = vst.msk [vmem:[#allocation2 + $0x198] sm:$0xff] %vm1214_vm1, %v3302_v18  ;;  %v3559_v3 = vld [vmem:[#allocation2 + $0x3a0] sm:$0xff]  ;;  %v1029_v25 = vpop.f32.mrf.mxu0 }
 0x24a   : > { %v3691_v22 = vadd.f32 %v6234_v51, %v3559_v3  ;;  %v2125_v23 = vld [vmem:[#allocation2 + $0x1a8] sm:$0xff]  ;;  %2381 = vst.msk [vmem:[#allocation2 + $0x3a8] sm:$0xff] %vm1214_vm1, %v2285_v8  ;;  %v1999_v35 = vpop.f32.mrf.mxu1 }
 0x24b   : > { %v3753_v2 = vmax.f32 %v3625_v46, 0.0  ;;  %v2221_v31 = vadd.f32 %v2125_v23, %v5793_v20  ;;  %1269 = vst.msk [vmem:[#allocation2 + $0x1b0] sm:$0xff] %vm1214_vm1, %v1029_v25  ;;  %v2254_v5 = vadd.f32 %v2158_v47, %v1999_v35  ;;  %v5312_v23 = vld [vmem:[%s5460_s16 + $0x1e0] sm:$0xff] }
 0x24c   : > { %v3819_v33 = vmax.f32 %v3691_v22, 0.0  ;;  %v3207_v42 = vld [vmem:[#allocation2 + $0x1a0] sm:$0xff]  ;;  %4499 = vmatmul.msk.bf16.gmra.mxu0 %vm692_vm0, %v5183_v24  ;;  %5139 = vmatmul.msk.bf16.gmra.mxu3 %vm692_vm0, %v5311_v15 }
 0x24d   : > { %v3881_v43 = vpack.c.bf16 %v3753_v2, %v3753_v2  ;;  %2317 = vst.msk [vmem:[#allocation2 + $0x1a8] sm:$0xff] %vm1214_vm1, %v2221_v31  ;;  %v3303_v45 = vadd.f32 %v3207_v42, %v3045_v37  ;;  %4771 = vmatmul.msk.bf16.gmra.mxu1 %vm692_vm0, %v5251_v19  ;;  %v5184_v22 = vld [vmem:[%s5460_s16 + $0x120] sm:$0xff] }
 0x24e   : > { %5131 = vmatmul.msk.bf16.gmra.mxu2 %vm692_vm0, %v5303_v62  ;;  %v3947_v11 = vpack.c.bf16 %v3819_v33, %v3819_v33  ;;  %2350 = vst.msk [vmem:[#allocation2 + $0x2b0] sm:$0xff] %vm1214_vm1, %v2254_v5  ;;  %v5252_v2 = vld [vmem:[%s5460_s16 + $0x120] sm:$0xff] }
 0x24f   : > { %4010 = vst.msk [vmem:[%s5572_s25 + $0xc8] sm:$0xf] %vm3959_vm2, %v3881_v43  ;;  %v2079_v20 = vpop.f32.mrf.mxu3  ;;  %v5304_v31 = vld [vmem:[%s5460_s16 + $0x1a0] sm:$0xff] }
 0x250   : > { %v3494_v1 = vld [vmem:[#allocation2 + $0x198] sm:$0xff]  ;;  %4076 = vst.msk [vmem:[%s5572_s25 + $0x1d0] sm:$0xf] %vm3959_vm2, %v3947_v11  ;;  %v2286_v39 = vadd.f32 %v2190_v14, %v2079_v20  ;;  %v2160_v43 = vld [vmem:[#allocation2 + $0x2c0] sm:$0xff] }
 0x251   : > { %v3050_v26 = vpop.f32.mrf.mxu2  ;;  %v3626_v32 = vadd.f32 %v6234_v51, %v3494_v1  ;;  %3399 = vst.msk [vmem:[#allocation2 + $0x1a0] sm:$0xff] %vm1214_vm1, %v3303_v45  ;;  %v3560_v37 = vld [vmem:[#allocation2 + $0x3a8] sm:$0xff]  ;;  %v1031_v52 = vpop.f32.mrf.mxu0 }
 0x252   : > { %v3692_v56 = vadd.f32 %v6234_v51, %v3560_v37  ;;  %v2126_v61 = vld [vmem:[#allocation2 + $0x1b0] sm:$0xff]  ;;  %2382 = vst.msk [vmem:[#allocation2 + $0x3b0] sm:$0xff] %vm1214_vm1, %v2286_v39  ;;  %v2001_v16 = vpop.f32.mrf.mxu1 }
 0x253   : > { %v3754_v18 = vmax.f32 %v3626_v32, 0.0  ;;  %v2222_v0 = vadd.f32 %v2126_v61, %v5805_v38  ;;  %1270 = vst.msk [vmem:[#allocation2 + $0x1b8] sm:$0xff] %vm1214_vm1, %v1031_v52  ;;  %v2255_v6 = vadd.f32 %v2159_v63, %v2001_v16  ;;  %v2191_v38 = vld [vmem:[#allocation2 + $0x3b8] sm:$0xff]  ;;  %v2192_v52 = vld [vmem:[#allocation2 + $0x3c0] sm:$0xff] }
 0x254   : > { %v3820_v4 = vmax.f32 %v3692_v56, 0.0  ;;  %v3208_v8 = vld [vmem:[#allocation2 + $0x1a8] sm:$0xff] }
 0x255   : > { %v3882_v24 = vpack.c.bf16 %v3754_v18, %v3754_v18  ;;  %2318 = vst.msk [vmem:[#allocation2 + $0x1b0] sm:$0xff] %vm1214_vm1, %v2222_v0  ;;  %v3304_v15 = vadd.f32 %v3208_v8, %v3047_v49  ;;  %v2161_v8 = vld [vmem:[#allocation2 + $0x2c8] sm:$0xff] }
 0x256   : > { %v3948_v46 = vpack.c.bf16 %v3820_v4, %v3820_v4  ;;  %2351 = vst.msk [vmem:[#allocation2 + $0x2b8] sm:$0xff] %vm1214_vm1, %v2255_v6 }
 0x257   : > { %4011 = vst.msk [vmem:[%s5572_s25 + $0xcc] sm:$0xf] %vm3959_vm2, %v3882_v24  ;;  %v2081_v3 = vpop.f32.mrf.mxu3 }
 0x258   : > { %v3495_v25 = vld [vmem:[#allocation2 + $0x1a0] sm:$0xff]  ;;  %4077 = vst.msk [vmem:[%s5572_s25 + $0x1d4] sm:$0xf] %vm3959_vm2, %v3948_v46  ;;  %v2287_v19 = vadd.f32 %v2191_v38, %v2081_v3 }
 0x259   : > { %v3052_v62 = vpop.f32.mrf.mxu2  ;;  %v3627_v35 = vadd.f32 %v6234_v51, %v3495_v25  ;;  %3400 = vst.msk [vmem:[#allocation2 + $0x1a8] sm:$0xff] %vm1214_vm1, %v3304_v15  ;;  %v3561_v49 = vld [vmem:[#allocation2 + $0x3b0] sm:$0xff]  ;;  %v1034_v47 = vpop.f32.mrf.mxu0 }
 0x25a   : > { %v3693_v5 = vadd.f32 %v6234_v51, %v3561_v49  ;;  %v2127_v33 = vld [vmem:[#allocation2 + $0x1b8] sm:$0xff]  ;;  %2383 = vst.msk [vmem:[#allocation2 + $0x3b8] sm:$0xff] %vm1214_vm1, %v2287_v19  ;;  %v2004_v42 = vpop.f32.mrf.mxu1 }
 0x25b   : > { %v3755_v45 = vmax.f32 %v3627_v35, 0.0  ;;  %v2223_v11 = vadd.f32 %v2127_v33, %v5817_v55  ;;  %1271 = vst.msk [vmem:[#allocation2 + $0x1c0] sm:$0xff] %vm1214_vm1, %v1034_v47  ;;  %v2256_v20 = vadd.f32 %v2160_v43, %v2004_v42  ;;  %v5253_v42 = vld [vmem:[%s5460_s16 + $0x128] sm:$0xff] }
 0x25c   : > { %v3821_v14 = vmax.f32 %v3693_v5, 0.0  ;;  %v3209_v1 = vld [vmem:[#allocation2 + $0x1b0] sm:$0xff]  ;;  %4500 = vmatmul.msk.bf16.gmra.mxu0 %vm692_vm0, %v5184_v22  ;;  %5140 = vmatmul.msk.bf16.gmra.mxu3 %vm692_vm0, %v5312_v23  ;;  %v5305_v43 = vld [vmem:[%s5460_s16 + $0x1a8] sm:$0xff] }
 0x25d   : > { %v3883_v39 = vpack.c.bf16 %v3755_v45, %v3755_v45  ;;  %2319 = vst.msk [vmem:[#allocation2 + $0x1b8] sm:$0xff] %vm1214_vm1, %v2223_v11  ;;  %v3305_v32 = vadd.f32 %v3209_v1, %v3050_v26  ;;  %4772 = vmatmul.msk.bf16.gmra.mxu1 %vm692_vm0, %v5252_v2  ;;  %v5185_v2 = vld [vmem:[%s5460_s16 + $0x128] sm:$0xff] }
 0x25e   : > { %5132 = vmatmul.msk.bf16.gmra.mxu2 %vm692_vm0, %v5304_v31  ;;  %v3949_v37 = vpack.c.bf16 %v3821_v14, %v3821_v14  ;;  %2352 = vst.msk [vmem:[#allocation2 + $0x2c0] sm:$0xff] %vm1214_vm1, %v2256_v20  ;;  %v5313_v31 = vld [vmem:[%s5460_s16 + $0x1e8] sm:$0xff]  ;;  %v2162_v14 = vld [vmem:[#allocation2 + $0x2d0] sm:$0xff] }
 0x25f   : > { %4012 = vst.msk [vmem:[%s5572_s25 + $0xd0] sm:$0xf] %vm3959_vm2, %v3883_v39  ;;  %v2084_v55 = vpop.f32.mrf.mxu3 }
 0x260   : > { %v3496_v56 = vld [vmem:[#allocation2 + $0x1a8] sm:$0xff]  ;;  %4078 = vst.msk [vmem:[%s5572_s25 + $0x1d8] sm:$0xf] %vm3959_vm2, %v3949_v37  ;;  %v2288_v61 = vadd.f32 %v2192_v52, %v2084_v55 }
 0x261   : > { %v3055_v16 = vpop.f32.mrf.mxu2  ;;  %v3628_v63 = vadd.f32 %v6234_v51, %v3496_v56  ;;  %3401 = vst.msk [vmem:[#allocation2 + $0x1b0] sm:$0xff] %vm1214_vm1, %v3305_v32  ;;  %v3562_v26 = vld [vmem:[#allocation2 + $0x3b8] sm:$0xff]  ;;  %v1036_v18 = vpop.f32.mrf.mxu0 }
 0x262   : > { %v3694_v0 = vadd.f32 %v6234_v51, %v3562_v26  ;;  %v2128_v6 = vld [vmem:[#allocation2 + $0x1c0] sm:$0xff]  ;;  %2384 = vst.msk [vmem:[#allocation2 + $0x3c0] sm:$0xff] %vm1214_vm1, %v2288_v61  ;;  %v2006_v4 = vpop.f32.mrf.mxu1 }
 0x263   : > { %v3756_v24 = vmax.f32 %v3628_v63, 0.0  ;;  %v2224_v15 = vadd.f32 %v2128_v6, %v5828_v12  ;;  %1272 = vst.msk [vmem:[#allocation2 + $0x1c8] sm:$0xff] %vm1214_vm1, %v1036_v18  ;;  %v2257_v46 = vadd.f32 %v2161_v8, %v2006_v4  ;;  %v2193_v12 = vld [vmem:[#allocation2 + $0x3c8] sm:$0xff]  ;;  %v2194_v63 = vld [vmem:[#allocation2 + $0x3d0] sm:$0xff] }
 0x264   : > { %v3822_v3 = vmax.f32 %v3694_v0, 0.0  ;;  %v3210_v38 = vld [vmem:[#allocation2 + $0x1b8] sm:$0xff] }
 0x265   : > { %v3884_v25 = vpack.c.bf16 %v3756_v24, %v3756_v24  ;;  %2320 = vst.msk [vmem:[#allocation2 + $0x1c0] sm:$0xff] %vm1214_vm1, %v2224_v15  ;;  %v3306_v19 = vadd.f32 %v3210_v38, %v3052_v62 }
 0x266   : > { %v3950_v22 = vpack.c.bf16 %v3822_v3, %v3822_v3  ;;  %2353 = vst.msk [vmem:[#allocation2 + $0x2c8] sm:$0xff] %vm1214_vm1, %v2257_v46  ;;  %v2163_v46 = vld [vmem:[#allocation2 + $0x2d8] sm:$0xff] }
 0x267   : > { %4013 = vst.msk [vmem:[%s5572_s25 + $0xd4] sm:$0xf] %vm3959_vm2, %v3884_v25  ;;  %v2086_v23 = vpop.f32.mrf.mxu3 }
 0x268   : > { %v3497_v35 = vld [vmem:[#allocation2 + $0x1b0] sm:$0xff]  ;;  %4079 = vst.msk [vmem:[%s5572_s25 + $0x1dc] sm:$0xf] %vm3959_vm2, %v3950_v22  ;;  %v2289_v49 = vadd.f32 %v2193_v12, %v2086_v23 }
 0x269   : > { %v3057_v47 = vpop.f32.mrf.mxu2  ;;  %v3629_v5 = vadd.f32 %v6234_v51, %v3497_v35  ;;  %3402 = vst.msk [vmem:[#allocation2 + $0x1b8] sm:$0xff] %vm1214_vm1, %v3306_v19  ;;  %v3563_v62 = vld [vmem:[#allocation2 + $0x3c0] sm:$0xff]  ;;  %v1039_v33 = vpop.f32.mrf.mxu0 }
 0x26a   : > { %v3695_v45 = vadd.f32 %v6234_v51, %v3563_v62  ;;  %v2129_v11 = vld [vmem:[#allocation2 + $0x1c8] sm:$0xff]  ;;  %2385 = vst.msk [vmem:[#allocation2 + $0x3c8] sm:$0xff] %vm1214_vm1, %v2289_v49  ;;  %v2009_v20 = vpop.f32.mrf.mxu1  ;;  %v5186_v62 = vld [vmem:[%s5460_s16 + $0x130] sm:$0xff] }
 0x26b   : > { %v3757_v1 = vmax.f32 %v3629_v5, 0.0  ;;  %v2225_v39 = vadd.f32 %v2129_v11, %v5840_v29  ;;  %1273 = vst.msk [vmem:[#allocation2 + $0x1d0] sm:$0xff] %vm1214_vm1, %v1039_v33  ;;  %v2258_v32 = vadd.f32 %v2162_v14, %v2009_v20  ;;  %v5314_v33 = vld [vmem:[%s5460_s16 + $0x1f0] sm:$0xff] }
 0x26c   : > { %v3823_v37 = vmax.f32 %v3695_v45, 0.0  ;;  %v3211_v55 = vld [vmem:[#allocation2 + $0x1c0] sm:$0xff]  ;;  %4501 = vmatmul.msk.bf16.gmra.mxu0 %vm692_vm0, %v5185_v2  ;;  %5141 = vmatmul.msk.bf16.gmra.mxu3 %vm692_vm0, %v5313_v31  ;;  %v5254_v45 = vld [vmem:[%s5460_s16 + $0x130] sm:$0xff] }
 0x26d   : > { %v3885_v52 = vpack.c.bf16 %v3757_v1, %v3757_v1  ;;  %2321 = vst.msk [vmem:[#allocation2 + $0x1c8] sm:$0xff] %vm1214_vm1, %v2225_v39  ;;  %v3307_v56 = vadd.f32 %v3211_v55, %v3055_v16  ;;  %4773 = vmatmul.msk.bf16.gmra.mxu1 %vm692_vm0, %v5253_v42  ;;  %v5306_v11 = vld [vmem:[%s5460_s16 + $0x1b0] sm:$0xff]  ;;  %v2164_v39 = vld [vmem:[#allocation2 + $0x2e0] sm:$0xff] }
 0x26e   : > { %5133 = vmatmul.msk.bf16.gmra.mxu2 %vm692_vm0, %v5305_v43  ;;  %v3951_v61 = vpack.c.bf16 %v3823_v37, %v3823_v37  ;;  %2354 = vst.msk [vmem:[#allocation2 + $0x2d0] sm:$0xff] %vm1214_vm1, %v2258_v32 }
 0x26f   : > { %4014 = vst.msk [vmem:[%s5572_s25 + $0xd8] sm:$0xf] %vm3959_vm2, %v3885_v52  ;;  %v2089_v29 = vpop.f32.mrf.mxu3 }
 0x270   : > { %v3498_v26 = vld [vmem:[#allocation2 + $0x1b8] sm:$0xff]  ;;  %4080 = vst.msk [vmem:[%s5572_s25 + $0x1e0] sm:$0xf] %vm3959_vm2, %v3951_v61  ;;  %v2290_v18 = vadd.f32 %v2194_v63, %v2089_v29 }
 0x271   : > { %v3060_v0 = vpop.f32.mrf.mxu2  ;;  %v3630_v6 = vadd.f32 %v6234_v51, %v3498_v26  ;;  %3403 = vst.msk [vmem:[#allocation2 + $0x1c0] sm:$0xff] %vm1214_vm1, %v3307_v56  ;;  %v3564_v16 = vld [vmem:[#allocation2 + $0x3c8] sm:$0xff]  ;;  %v1041_v4 = vpop.f32.mrf.mxu0  ;;  %v2196_v26 = vld [vmem:[#allocation2 + $0x3e0] sm:$0xff] }
 0x272   : > { %v3696_v8 = vadd.f32 %v6234_v51, %v3564_v16  ;;  %v2130_v24 = vld [vmem:[#allocation2 + $0x1d0] sm:$0xff]  ;;  %2386 = vst.msk [vmem:[#allocation2 + $0x3d0] sm:$0xff] %vm1214_vm1, %v2290_v18  ;;  %v2011_v15 = vpop.f32.mrf.mxu1 }
 0x273   : > { %v3758_v3 = vmax.f32 %v3630_v6, 0.0  ;;  %v2226_v38 = vadd.f32 %v2130_v24, %v5852_v53  ;;  %1274 = vst.msk [vmem:[#allocation2 + $0x1d8] sm:$0xff] %vm1214_vm1, %v1041_v4  ;;  %v2259_v25 = vadd.f32 %v2163_v46, %v2011_v15  ;;  %v2195_v53 = vld [vmem:[#allocation2 + $0x3d8] sm:$0xff] }
 0x274   : > { %v3824_v19 = vmax.f32 %v3696_v8, 0.0  ;;  %v3212_v22 = vld [vmem:[#allocation2 + $0x1c8] sm:$0xff] }
 0x275   : > { %v3886_v23 = vpack.c.bf16 %v3758_v3, %v3758_v3  ;;  %2322 = vst.msk [vmem:[#allocation2 + $0x1d0] sm:$0xff] %vm1214_vm1, %v2226_v38  ;;  %v3308_v12 = vadd.f32 %v3212_v22, %v3057_v47  ;;  %v2165_v3 = vld [vmem:[#allocation2 + $0x2e8] sm:$0xff] }
 0x276   : > { %v3952_v35 = vpack.c.bf16 %v3824_v19, %v3824_v19  ;;  %2355 = vst.msk [vmem:[#allocation2 + $0x2d8] sm:$0xff] %vm1214_vm1, %v2259_v25 }
 0x277   : > { %4015 = vst.msk [vmem:[%s5572_s25 + $0xdc] sm:$0xf] %vm3959_vm2, %v3886_v23  ;;  %v2091_v49 = vpop.f32.mrf.mxu3 }
 0x278   : > { %v3499_v2 = vld [vmem:[#allocation2 + $0x1c0] sm:$0xff]  ;;  %4081 = vst.msk [vmem:[%s5572_s25 + $0x1e4] sm:$0xf] %vm3959_vm2, %v3952_v35  ;;  %v2291_v31 = vadd.f32 %v2195_v53, %v2091_v49 }
 0x279   : > { %v3062_v5 = vpop.f32.mrf.mxu2  ;;  %v3631_v42 = vadd.f32 %v6234_v51, %v3499_v2  ;;  %3404 = vst.msk [vmem:[#allocation2 + $0x1c8] sm:$0xff] %vm1214_vm1, %v3308_v12  ;;  %v3565_v47 = vld [vmem:[#allocation2 + $0x3d0] sm:$0xff]  ;;  %v1044_v43 = vpop.f32.mrf.mxu0 }
 0x27a   : > { %v3697_v20 = vadd.f32 %v6234_v51, %v3565_v47  ;;  %v2131_v14 = vld [vmem:[#allocation2 + $0x1d8] sm:$0xff]  ;;  %2387 = vst.msk [vmem:[#allocation2 + $0x3d8] sm:$0xff] %vm1214_vm1, %v2291_v31  ;;  %v2014_v1 = vpop.f32.mrf.mxu1 }
 0x27b   : > { %v3759_v32 = vmax.f32 %v3631_v42, 0.0  ;;  %v2227_v37 = vadd.f32 %v2131_v14, %v5865_v7  ;;  %1275 = vst.msk [vmem:[#allocation2 + $0x1e0] sm:$0xff] %vm1214_vm1, %v1044_v43  ;;  %v2260_v55 = vadd.f32 %v2164_v39, %v2014_v1  ;;  %v5315_v42 = vld [vmem:[%s5460_s16 + $0x1f8] sm:$0xff]  ;;  %v2166_v39 = vld [vmem:[#allocation2 + $0x2f0] sm:$0xff] }
 0x27c   : > { %v3825_v52 = vmax.f32 %v3697_v20, 0.0  ;;  %v3213_v56 = vld [vmem:[#allocation2 + $0x1d0] sm:$0xff]  ;;  %4502 = vmatmul.msk.bf16.gmra.mxu0 %vm692_vm0, %v5186_v62  ;;  %5142 = vmatmul.msk.bf16.gmra.mxu3 %vm692_vm0, %v5314_v33  ;;  %v5187_v33 = vld [vmem:[%s5460_s16 + $0x138] sm:$0xff] }
 0x27d   : > { %v3887_v61 = vpack.c.bf16 %v3759_v32, %v3759_v32  ;;  %2323 = vst.msk [vmem:[#allocation2 + $0x1d8] sm:$0xff] %vm1214_vm1, %v2227_v37  ;;  %v3309_v29 = vadd.f32 %v3213_v56, %v3060_v0  ;;  %4774 = vmatmul.msk.bf16.gmra.mxu1 %vm692_vm0, %v5254_v45  ;;  %v5255_v45 = vld [vmem:[%s5460_s16 + $0x138] sm:$0xff] }
 0x27e   : > { %5134 = vmatmul.msk.bf16.gmra.mxu2 %vm692_vm0, %v5306_v11  ;;  %v3953_v63 = vpack.c.bf16 %v3825_v52, %v3825_v52  ;;  %2356 = vst.msk [vmem:[#allocation2 + $0x2e0] sm:$0xff] %vm1214_vm1, %v2260_v55  ;;  %v5307_v11 = vld [vmem:[%s5460_s16 + $0x1b8] sm:$0xff] }
 0x27f   : > { %4016 = vst.msk [vmem:[%s5572_s25 + $0xe0] sm:$0xf] %vm3959_vm2, %v3887_v61  ;;  %v2094_v7 = vpop.f32.mrf.mxu3 }
 0x280   : > { %v3500_v18 = vld [vmem:[#allocation2 + $0x1c8] sm:$0xff]  ;;  %4082 = vst.msk [vmem:[%s5572_s25 + $0x1e8] sm:$0xf] %vm3959_vm2, %v3953_v63  ;;  %v2292_v6 = vadd.f32 %v2196_v26, %v2094_v7  ;;  %v2198_v7 = vld [vmem:[#allocation2 + $0x3f0] sm:$0xff] }
 0x281   : > { %v3065_v16 = vpop.f32.mrf.mxu2  ;;  %v3632_v4 = vadd.f32 %v6234_v51, %v3500_v18  ;;  %3405 = vst.msk [vmem:[#allocation2 + $0x1d0] sm:$0xff] %vm1214_vm1, %v3309_v29  ;;  %v3566_v0 = vld [vmem:[#allocation2 + $0x3d8] sm:$0xff]  ;;  %v1046_v8 = vpop.f32.mrf.mxu0 }
 0x282   : > { %v3698_v24 = vadd.f32 %v6234_v51, %v3566_v0  ;;  %v2132_v15 = vld [vmem:[#allocation2 + $0x1e0] sm:$0xff]  ;;  %2388 = vst.msk [vmem:[#allocation2 + $0x3e0] sm:$0xff] %vm1214_vm1, %v2292_v6  ;;  %v2016_v46 = vpop.f32.mrf.mxu1 }
 0x283   : > { %v3760_v38 = vmax.f32 %v3632_v4, 0.0  ;;  %v2228_v25 = vadd.f32 %v2132_v15, %v5877_v28  ;;  %1276 = vst.msk [vmem:[#allocation2 + $0x1e8] sm:$0xff] %vm1214_vm1, %v1046_v8  ;;  %v2261_v19 = vadd.f32 %v2165_v3, %v2016_v46  ;;  %v2197_v28 = vld [vmem:[#allocation2 + $0x3e8] sm:$0xff]  ;;  %v2167_v46 = vld [vmem:[#allocation2 + $0x2f8] sm:$0xff] }
 0x284   : > { %v3826_v22 = vmax.f32 %v3698_v24, 0.0  ;;  %v3214_v23 = vld [vmem:[#allocation2 + $0x1d8] sm:$0xff] }
 0x285   : > { %v3888_v12 = vpack.c.bf16 %v3760_v38, %v3760_v38  ;;  %2324 = vst.msk [vmem:[#allocation2 + $0x1e0] sm:$0xff] %vm1214_vm1, %v2228_v25  ;;  %v3310_v35 = vadd.f32 %v3214_v23, %v3062_v5 }
 0x286   : > { %v3954_v49 = vpack.c.bf16 %v3826_v22, %v3826_v22  ;;  %2357 = vst.msk [vmem:[#allocation2 + $0x2e8] sm:$0xff] %vm1214_vm1, %v2261_v19 }
 0x287   : > { %4017 = vst.msk [vmem:[%s5572_s25 + $0xe4] sm:$0xf] %vm3959_vm2, %v3888_v12  ;;  %v2096_v53 = vpop.f32.mrf.mxu3 }
 0x288   : > { %v3501_v2 = vld [vmem:[#allocation2 + $0x1d0] sm:$0xff]  ;;  %4083 = vst.msk [vmem:[%s5572_s25 + $0x1ec] sm:$0xf] %vm3959_vm2, %v3954_v49  ;;  %v2293_v31 = vadd.f32 %v2197_v28, %v2096_v53  ;;  %v2199_v53 = vld [vmem:[#allocation2 + $0x3f8] sm:$0xff] }
 0x289   : > { %v3067_v62 = vpop.f32.mrf.mxu2  ;;  %v3633_v47 = vadd.f32 %v6234_v51, %v3501_v2  ;;  %3406 = vst.msk [vmem:[#allocation2 + $0x1d8] sm:$0xff] %vm1214_vm1, %v3310_v35  ;;  %v3567_v5 = vld [vmem:[#allocation2 + $0x3e0] sm:$0xff]  ;;  %v1049_v43 = vpop.f32.mrf.mxu0 }
 0x28a   : > { %v3699_v20 = vadd.f32 %v6234_v51, %v3567_v5  ;;  %v2133_v14 = vld [vmem:[#allocation2 + $0x1e8] sm:$0xff]  ;;  %2389 = vst.msk [vmem:[#allocation2 + $0x3e8] sm:$0xff] %vm1214_vm1, %v2293_v31  ;;  %v2019_v1 = vpop.f32.mrf.mxu1 }
 0x28b   : > { %v3761_v32 = vmax.f32 %v3633_v47, 0.0  ;;  %v2229_v37 = vadd.f32 %v2133_v14, %v5889_v44  ;;  %1277 = vst.msk [vmem:[#allocation2 + $0x1f0] sm:$0xff] %vm1214_vm1, %v1049_v43  ;;  %v2262_v55 = vadd.f32 %v2166_v39, %v2019_v1  ;;  %v2168_v43 = vld [vmem:[#allocation2 + $0x300] sm:$0xff] }
 0x28c   : > { %v3827_v52 = vmax.f32 %v3699_v20, 0.0  ;;  %v3215_v56 = vld [vmem:[#allocation2 + $0x1e0] sm:$0xff]  ;;  %4503 = vmatmul.msk.bf16.gmra.mxu0 %vm692_vm0, %v5187_v33  ;;  %5143 = vmatmul.msk.bf16.gmra.mxu3 %vm692_vm0, %v5315_v42 }
 0x28d   : > { %v3889_v61 = vpack.c.bf16 %v3761_v32, %v3761_v32  ;;  %2325 = vst.msk [vmem:[#allocation2 + $0x1e8] sm:$0xff] %vm1214_vm1, %v2229_v37  ;;  %v3311_v29 = vadd.f32 %v3215_v56, %v3065_v16  ;;  %4775 = vmatmul.msk.bf16.gmra.mxu1 %vm692_vm0, %v5255_v45 }
 0x28e   : > { %5135 = vmatmul.msk.bf16.gmra.mxu2 %vm692_vm0, %v5307_v11  ;;  %v3955_v63 = vpack.c.bf16 %v3827_v52, %v3827_v52  ;;  %2358 = vst.msk [vmem:[#allocation2 + $0x2f0] sm:$0xff] %vm1214_vm1, %v2262_v55  ;;  %v3235_v52 = vld [vmem:[#allocation2 + $0x280] sm:$0xff] }
 0x28f   : > { %4018 = vst.msk [vmem:[%s5572_s25 + $0xe8] sm:$0xf] %vm3959_vm2, %v3889_v61  ;;  %v2099_v44 = vpop.f32.mrf.mxu3 }
 0x290   : > { %v3502_v26 = vld [vmem:[#allocation2 + $0x1d8] sm:$0xff]  ;;  %4084 = vst.msk [vmem:[%s5572_s25 + $0x1f0] sm:$0xf] %vm3959_vm2, %v3955_v63  ;;  %v2294_v18 = vadd.f32 %v2198_v7, %v2099_v44 }
 0x291   : > { %v3070_v6 = vpop.f32.mrf.mxu2  ;;  %v3634_v4 = vadd.f32 %v6234_v51, %v3502_v26  ;;  %3407 = vst.msk [vmem:[#allocation2 + $0x1e0] sm:$0xff] %vm1214_vm1, %v3311_v29  ;;  %v3568_v16 = vld [vmem:[#allocation2 + $0x3e8] sm:$0xff]  ;;  %v1051_v0 = vpop.f32.mrf.mxu0 }
 0x292   : > { %v3700_v8 = vadd.f32 %v6234_v51, %v3568_v16  ;;  %v2134_v24 = vld [vmem:[#allocation2 + $0x1f0] sm:$0xff]  ;;  %2390 = vst.msk [vmem:[#allocation2 + $0x3f0] sm:$0xff] %vm1214_vm1, %v2294_v18  ;;  %v2021_v15 = vpop.f32.mrf.mxu1 }
 0x293   : > { %v3762_v3 = vmax.f32 %v3634_v4, 0.0  ;;  %v2230_v38 = vadd.f32 %v2134_v24, %v5900_v9  ;;  %1278 = vst.msk [vmem:[#allocation2 + $0x1f8] sm:$0xff] %vm1214_vm1, %v1051_v0  ;;  %v2263_v25 = vadd.f32 %v2167_v46, %v2021_v15 }
 0x294   : > { %v3828_v19 = vmax.f32 %v3700_v8, 0.0  ;;  %v3216_v22 = vld [vmem:[#allocation2 + $0x1e8] sm:$0xff] }
 0x295   : > { %v3890_v23 = vpack.c.bf16 %v3762_v3, %v3762_v3  ;;  %2326 = vst.msk [vmem:[#allocation2 + $0x1f0] sm:$0xff] %vm1214_vm1, %v2230_v38  ;;  %v3312_v12 = vadd.f32 %v3216_v22, %v3067_v62 }
 0x296   : > { %v3956_v35 = vpack.c.bf16 %v3828_v19, %v3828_v19  ;;  %2359 = vst.msk [vmem:[#allocation2 + $0x2f8] sm:$0xff] %vm1214_vm1, %v2263_v25 }
 0x297   : > { %4019 = vst.msk [vmem:[%s5572_s25 + $0xec] sm:$0xf] %vm3959_vm2, %v3890_v23  ;;  %v2101_v49 = vpop.f32.mrf.mxu3 }
 0x298   : > { %v3503_v28 = vld [vmem:[#allocation2 + $0x1e0] sm:$0xff]  ;;  %4085 = vst.msk [vmem:[%s5572_s25 + $0x1f4] sm:$0xf] %vm3959_vm2, %v3956_v35  ;;  %v2295_v9 = vadd.f32 %v2199_v53, %v2101_v49 }
 0x299   : > { %v3072_v2 = vpop.f32.mrf.mxu2  ;;  %v3635_v31 = vadd.f32 %v6234_v51, %v3503_v28  ;;  %3408 = vst.msk [vmem:[#allocation2 + $0x1e8] sm:$0xff] %vm1214_vm1, %v3312_v12  ;;  %v3569_v33 = vld [vmem:[#allocation2 + $0x3f0] sm:$0xff]  ;;  %v1054_v42 = vpop.f32.mrf.mxu0 }
 0x29a   : > { %v3701_v62 = vadd.f32 %v6234_v51, %v3569_v33  ;;  %v2135_v47 = vld [vmem:[#allocation2 + $0x1f8] sm:$0xff]  ;;  %2391 = vst.msk [vmem:[#allocation2 + $0x3f8] sm:$0xff] %vm1214_vm1, %v2295_v9  ;;  %v2024_v5 = vpop.f32.mrf.mxu1 }
 0x29b   : > { %v3763_v45 = vmax.f32 %v3635_v31, 0.0  ;;  %v2231_v11 = vadd.f32 %v2135_v47, %v5917_v30  ;;  %1279 = vst.msk [vmem:[#allocation2 + $0x200] sm:$0xff] %vm1214_vm1, %v1054_v42  ;;  %v2264_v20 = vadd.f32 %v2168_v43, %v2024_v5  ;;  %v2170_v42 = vld [vmem:[#allocation2 + $0x310] sm:$0xff] }
 0x29c   : > { %v3829_v14 = vmax.f32 %v3701_v62, 0.0  ;;  %v3217_v1 = vld [vmem:[#allocation2 + $0x1f0] sm:$0xff] }
 0x29d   : > { %v3891_v39 = vpack.c.bf16 %v3763_v45, %v3763_v45  ;;  %2327 = vst.msk [vmem:[#allocation2 + $0x1f8] sm:$0xff] %vm1214_vm1, %v2231_v11  ;;  %v3313_v32 = vadd.f32 %v3217_v1, %v3070_v6  ;;  %v2169_v6 = vld [vmem:[#allocation2 + $0x308] sm:$0xff] }
 0x29e   : > { %v3957_v37 = vpack.c.bf16 %v3829_v14, %v3829_v14  ;;  %2360 = vst.msk [vmem:[#allocation2 + $0x300] sm:$0xff] %vm1214_vm1, %v2264_v20 }
 0x29f   : > { %4020 = vst.msk [vmem:[%s5572_s25 + $0xf0] sm:$0xf] %vm3959_vm2, %v3891_v39  ;;  %v3115_v55 = vpop.f32.mrf.mxu3 }
 0x2a0   : > { %v3504_v56 = vld [vmem:[#allocation2 + $0x1e8] sm:$0xff]  ;;  %4086 = vst.msk [vmem:[%s5572_s25 + $0x1f8] sm:$0xf] %vm3959_vm2, %v3957_v37  ;;  %v3331_v30 = vadd.f32 %v3235_v52, %v3115_v55 }
 0x2a1   : > { %v3075_v61 = vpop.f32.mrf.mxu2  ;;  %v3636_v29 = vadd.f32 %v6234_v51, %v3504_v56  ;;  %3409 = vst.msk [vmem:[#allocation2 + $0x1f0] sm:$0xff] %vm1214_vm1, %v3313_v32  ;;  %v3570_v63 = vld [vmem:[#allocation2 + $0x3f8] sm:$0xff]  ;;  %v1056_v44 = vpop.f32.mrf.mxu0  ;;  %v3237_v32 = vld [vmem:[#allocation2 + $0x290] sm:$0xff] }
 0x2a2   : > { %v3702_v7 = vadd.f32 %v6234_v51, %v3570_v63  ;;  %v2136_v26 = vld [vmem:[#allocation2 + $0x200] sm:$0xff]  ;;  %3427 = vst.msk [vmem:[#allocation2 + $0x280] sm:$0xff] %vm1214_vm1, %v3331_v30  ;;  %v2026_v18 = vpop.f32.mrf.mxu1 }
 0x2a3   : > { %v3764_v4 = vmax.f32 %v3636_v29, 0.0  ;;  %v2232_v16 = vadd.f32 %v2136_v26, %v5929_v59  ;;  %1280 = vst.msk [vmem:[#allocation2 + $0x208] sm:$0xff] %vm1214_vm1, %v1056_v44  ;;  %v2265_v0 = vadd.f32 %v2169_v6, %v2026_v18  ;;  %v3236_v59 = vld [vmem:[#allocation2 + $0x288] sm:$0xff]  ;;  %v2171_v18 = vld [vmem:[#allocation2 + $0x318] sm:$0xff] }
 0x2a4   : > { %v3830_v8 = vmax.f32 %v3702_v7, 0.0  ;;  %v3218_v24 = vld [vmem:[#allocation2 + $0x1f8] sm:$0xff] }
 0x2a5   : > { %v3892_v15 = vpack.c.bf16 %v3764_v4, %v3764_v4  ;;  %2328 = vst.msk [vmem:[#allocation2 + $0x200] sm:$0xff] %vm1214_vm1, %v2232_v16  ;;  %v3539_v46 = vld [vmem:[#allocation2 + $0x300] sm:$0xff]  ;;  %v3314_v3 = vadd.f32 %v3218_v24, %v3072_v2 }
 0x2a6   : > { %v3958_v38 = vpack.c.bf16 %v3830_v8, %v3830_v8  ;;  %v3671_v25 = vadd.f32 %v6234_v51, %v3539_v46  ;;  %2361 = vst.msk [vmem:[#allocation2 + $0x308] sm:$0xff] %vm1214_vm1, %v2265_v0 }
 0x2a7   : > { %4021 = vst.msk [vmem:[%s5572_s25 + $0xf4] sm:$0xf] %vm3959_vm2, %v3892_v15  ;;  %v3117_v19 = vpop.f32.mrf.mxu3 }
 0x2a8   : > { %v3505_v22 = vld [vmem:[#allocation2 + $0x1f0] sm:$0xff]  ;;  %4087 = vst.msk [vmem:[%s5572_s25 + $0x1fc] sm:$0xf] %vm3959_vm2, %v3958_v38  ;;  %v3799_v23 = vmax.f32 %v3671_v25, 0.0  ;;  %v3332_v12 = vadd.f32 %v3236_v59, %v3117_v19  ;;  %v3238_v25 = vld [vmem:[#allocation2 + $0x298] sm:$0xff] }
 0x2a9   : > { %v3077_v35 = vpop.f32.mrf.mxu2  ;;  %v3637_v49 = vadd.f32 %v6234_v51, %v3505_v22  ;;  %3410 = vst.msk [vmem:[#allocation2 + $0x1f8] sm:$0xff] %vm1214_vm1, %v3314_v3  ;;  %v3523_v53 = vld [vmem:[#allocation2 + $0x280] sm:$0xff]  ;;  %v1059_v28 = vpop.f32.mrf.mxu0 }
 0x2aa   : > { %v3927_v9 = vpack.c.bf16 %v3799_v23, %v3799_v23  ;;  %v3655_v2 = vadd.f32 %v6234_v51, %v3523_v53  ;;  %v2137_v31 = vld [vmem:[#allocation2 + $0x208] sm:$0xff]  ;;  %3428 = vst.msk [vmem:[#allocation2 + $0x288] sm:$0xff] %vm1214_vm1, %v3332_v12  ;;  %v2029_v33 = vpop.f32.mrf.mxu1 }
 0x2ab   : > { %v3765_v62 = vmax.f32 %v3637_v49, 0.0  ;;  %v2233_v47 = vadd.f32 %v2137_v31, %v5943_v17  ;;  %1281 = vst.msk [vmem:[#allocation2 + $0x210] sm:$0xff] %vm1214_vm1, %v1059_v28  ;;  %v2266_v5 = vadd.f32 %v2170_v42, %v2029_v33  ;;  %v2172_v31 = vld [vmem:[#allocation2 + $0x320] sm:$0xff] }
 0x2ac   : > { %4056 = vst.msk [vmem:[%s5572_s25 + $0x180] sm:$0xf] %vm3959_vm2, %v3927_v9  ;;  %v3783_v43 = vmax.f32 %v3655_v2, 0.0  ;;  %v3219_v45 = vld [vmem:[#allocation2 + $0x200] sm:$0xff] }
 0x2ad   : > { %v3893_v11 = vpack.c.bf16 %v3765_v62, %v3765_v62  ;;  %2329 = vst.msk [vmem:[#allocation2 + $0x208] sm:$0xff] %vm1214_vm1, %v2233_v47  ;;  %v3540_v20 = vld [vmem:[#allocation2 + $0x308] sm:$0xff]  ;;  %v3315_v14 = vadd.f32 %v3219_v45, %v3075_v61 }
 0x2ae   : > { %v3911_v1 = vpack.c.bf16 %v3783_v43, %v3783_v43  ;;  %v3672_v39 = vadd.f32 %v6234_v51, %v3540_v20  ;;  %2362 = vst.msk [vmem:[#allocation2 + $0x310] sm:$0xff] %vm1214_vm1, %v2266_v5 }
 0x2af   : > { %4022 = vst.msk [vmem:[%s5572_s25 + $0xf8] sm:$0xf] %vm3959_vm2, %v3893_v11  ;;  %v3120_v17 = vpop.f32.mrf.mxu3 }
 0x2b0   : > { %v3506_v37 = vld [vmem:[#allocation2 + $0x1f8] sm:$0xff]  ;;  %4040 = vst.msk [vmem:[%s5572_s25 + $0x140] sm:$0xf] %vm3959_vm2, %v3911_v1  ;;  %v3800_v55 = vmax.f32 %v3672_v39, 0.0  ;;  %v3333_v52 = vadd.f32 %v3237_v32, %v3120_v17  ;;  %v3239_v1 = vld [vmem:[#allocation2 + $0x2a0] sm:$0xff] }
 0x2b1   : > { %v3080_v56 = vpop.f32.mrf.mxu2  ;;  %v3638_v30 = vadd.f32 %v6234_v51, %v3506_v37  ;;  %3411 = vst.msk [vmem:[#allocation2 + $0x200] sm:$0xff] %vm1214_vm1, %v3315_v14  ;;  %v3524_v61 = vld [vmem:[#allocation2 + $0x288] sm:$0xff]  ;;  %v1061_v29 = vpop.f32.mrf.mxu0 }
 0x2b2   : > { %v3928_v63 = vpack.c.bf16 %v3800_v55, %v3800_v55  ;;  %v3656_v44 = vadd.f32 %v6234_v51, %v3524_v61  ;;  %v2138_v7 = vld [vmem:[#allocation2 + $0x210] sm:$0xff]  ;;  %3429 = vst.msk [vmem:[#allocation2 + $0x290] sm:$0xff] %vm1214_vm1, %v3333_v52  ;;  %v2031_v26 = vpop.f32.mrf.mxu1 }
 0x2b3   : > { %v3766_v6 = vmax.f32 %v3638_v30, 0.0  ;;  %v2234_v4 = vadd.f32 %v2138_v7, %v5955_v41  ;;  %1282 = vst.msk [vmem:[#allocation2 + $0x218] sm:$0xff] %vm1214_vm1, %v1061_v29  ;;  %v2267_v16 = vadd.f32 %v2171_v18, %v2031_v26 }
 0x2b4   : > { %4057 = vst.msk [vmem:[%s5572_s25 + $0x184] sm:$0xf] %vm3959_vm2, %v3928_v63  ;;  %v3784_v0 = vmax.f32 %v3656_v44, 0.0  ;;  %v3220_v8 = vld [vmem:[#allocation2 + $0x208] sm:$0xff] }
 0x2b5   : > { %v3894_v24 = vpack.c.bf16 %v3766_v6, %v3766_v6  ;;  %2330 = vst.msk [vmem:[#allocation2 + $0x210] sm:$0xff] %vm1214_vm1, %v2234_v4  ;;  %v3541_v15 = vld [vmem:[#allocation2 + $0x310] sm:$0xff]  ;;  %v3316_v46 = vadd.f32 %v3220_v8, %v3077_v35  ;;  %v2173_v44 = vld [vmem:[#allocation2 + $0x328] sm:$0xff] }
 0x2b6   : > { %v3912_v3 = vpack.c.bf16 %v3784_v0, %v3784_v0  ;;  %v3673_v38 = vadd.f32 %v6234_v51, %v3541_v15  ;;  %2363 = vst.msk [vmem:[#allocation2 + $0x318] sm:$0xff] %vm1214_vm1, %v2267_v16 }
 0x2b7   : > { %4023 = vst.msk [vmem:[%s5572_s25 + $0xfc] sm:$0xf] %vm3959_vm2, %v3894_v24  ;;  %v3122_v41 = vpop.f32.mrf.mxu3 }
 0x2b8   : > { %v3507_v19 = vld [vmem:[#allocation2 + $0x200] sm:$0xff]  ;;  %4041 = vst.msk [vmem:[%s5572_s25 + $0x144] sm:$0xf] %vm3959_vm2, %v3912_v3  ;;  %v3801_v59 = vmax.f32 %v3673_v38, 0.0  ;;  %v3334_v22 = vadd.f32 %v3238_v25, %v3122_v41 }
 0x2b9   : > { %v3082_v23 = vpop.f32.mrf.mxu2  ;;  %v3639_v12 = vadd.f32 %v6234_v51, %v3507_v19  ;;  %3412 = vst.msk [vmem:[#allocation2 + $0x208] sm:$0xff] %vm1214_vm1, %v3316_v46  ;;  %v3525_v35 = vld [vmem:[#allocation2 + $0x290] sm:$0xff]  ;;  %v1064_v49 = vpop.f32.mrf.mxu0  ;;  %v3240_v46 = vld [vmem:[#allocation2 + $0x2a8] sm:$0xff] }
 0x2ba   : > { %v3929_v53 = vpack.c.bf16 %v3801_v59, %v3801_v59  ;;  %v3657_v28 = vadd.f32 %v6234_v51, %v3525_v35  ;;  %v2139_v9 = vld [vmem:[#allocation2 + $0x218] sm:$0xff]  ;;  %3430 = vst.msk [vmem:[#allocation2 + $0x298] sm:$0xff] %vm1214_vm1, %v3334_v22  ;;  %v2034_v2 = vpop.f32.mrf.mxu1 }
 0x2bb   : > { %v3767_v33 = vmax.f32 %v3639_v12, 0.0  ;;  %v2235_v42 = vadd.f32 %v2139_v9, %v5967_v58  ;;  %1283 = vst.msk [vmem:[#allocation2 + $0x220] sm:$0xff] %vm1214_vm1, %v1064_v49  ;;  %v2268_v62 = vadd.f32 %v2172_v31, %v2034_v2 }
 0x2bc   : > { %4058 = vst.msk [vmem:[%s5572_s25 + $0x188] sm:$0xf] %vm3959_vm2, %v3929_v53  ;;  %v3785_v47 = vmax.f32 %v3657_v28, 0.0  ;;  %v3221_v5 = vld [vmem:[#allocation2 + $0x210] sm:$0xff] }
 0x2bd   : > { %v3895_v43 = vpack.c.bf16 %v3767_v33, %v3767_v33  ;;  %2331 = vst.msk [vmem:[#allocation2 + $0x218] sm:$0xff] %vm1214_vm1, %v2235_v42  ;;  %v3542_v45 = vld [vmem:[#allocation2 + $0x318] sm:$0xff]  ;;  %v3317_v11 = vadd.f32 %v3221_v5, %v3080_v56  ;;  %v2174_v53 = vld [vmem:[#allocation2 + $0x330] sm:$0xff]  ;;  %v6491_v5 = vld [vmem:[%s6674_s2] ss:$0 sm:$0xff] }
 0x2be   : > { %v3913_v20 = vpack.c.bf16 %v3785_v47, %v3785_v47  ;;  %v3674_v14 = vadd.f32 %v6234_v51, %v3542_v45  ;;  %2364 = vst.msk [vmem:[#allocation2 + $0x320] sm:$0xff] %vm1214_vm1, %v2268_v62  ;;  %v3241_v45 = vld [vmem:[#allocation2 + $0x2b0] sm:$0xff] }
 0x2bf   : > { %4024 = vst.msk [vmem:[%s5572_s25 + $0x100] sm:$0xf] %vm3959_vm2, %v3895_v43  ;;  %v3125_v58 = vpop.f32.mrf.mxu3 }
 0x2c0   : > { %v3508_v39 = vld [vmem:[#allocation2 + $0x208] sm:$0xff]  ;;  %4042 = vst.msk [vmem:[%s5572_s25 + $0x148] sm:$0xf] %vm3959_vm2, %v3913_v20  ;;  %v3802_v17 = vmax.f32 %v3674_v14, 0.0  ;;  %v3335_v32 = vadd.f32 %v3239_v1, %v3125_v58 }
 0x2c1   : > { %v3085_v37 = vpop.f32.mrf.mxu2  ;;  %v3640_v55 = vadd.f32 %v6234_v51, %v3508_v39  ;;  %3413 = vst.msk [vmem:[#allocation2 + $0x210] sm:$0xff] %vm1214_vm1, %v3317_v11  ;;  %v3526_v52 = vld [vmem:[#allocation2 + $0x298] sm:$0xff]  ;;  %v1066_v56 = vpop.f32.mrf.mxu0 }
 0x2c2   : > { %v3930_v30 = vpack.c.bf16 %v3802_v17, %v3802_v17  ;;  %v3658_v61 = vadd.f32 %v6234_v51, %v3526_v52  ;;  %v2140_v29 = vld [vmem:[#allocation2 + $0x220] sm:$0xff]  ;;  %3431 = vst.msk [vmem:[#allocation2 + $0x2a0] sm:$0xff] %vm1214_vm1, %v3335_v32  ;;  %v2036_v63 = vpop.f32.mrf.mxu1 }
 0x2c3   : > { %v3768_v7 = vmax.f32 %v3640_v55, 0.0  ;;  %v2236_v26 = vadd.f32 %v2140_v29, %v5980_v27  ;;  %1284 = vst.msk [vmem:[#allocation2 + $0x228] sm:$0xff] %vm1214_vm1, %v1066_v56  ;;  %v2269_v18 = vadd.f32 %v2173_v44, %v2036_v63  ;;  %v2175_v56 = vld [vmem:[#allocation2 + $0x338] sm:$0xff] }
 0x2c4   : > { %4059 = vst.msk [vmem:[%s5572_s25 + $0x18c] sm:$0xf] %vm3959_vm2, %v3930_v30  ;;  %v3786_v6 = vmax.f32 %v3658_v61, 0.0  ;;  %v3222_v4 = vld [vmem:[#allocation2 + $0x218] sm:$0xff] }
 0x2c5   : > { %v3896_v16 = vpack.c.bf16 %v3768_v7, %v3768_v7  ;;  %2332 = vst.msk [vmem:[#allocation2 + $0x220] sm:$0xff] %vm1214_vm1, %v2236_v26  ;;  %v3543_v0 = vld [vmem:[#allocation2 + $0x320] sm:$0xff]  ;;  %v3318_v8 = vadd.f32 %v3222_v4, %v3082_v23 }
 0x2c6   : > { %v3914_v24 = vpack.c.bf16 %v3786_v6, %v3786_v6  ;;  %v3675_v15 = vadd.f32 %v6234_v51, %v3543_v0  ;;  %2365 = vst.msk [vmem:[#allocation2 + $0x328] sm:$0xff] %vm1214_vm1, %v2269_v18 }
 0x2c7   : > { %4025 = vst.msk [vmem:[%s5572_s25 + $0x104] sm:$0xf] %vm3959_vm2, %v3896_v16  ;;  %v3127_v27 = vpop.f32.mrf.mxu3  ;;  %v3242_v16 = vld [vmem:[#allocation2 + $0x2b8] sm:$0xff] }
 0x2c8   : > { %v3509_v3 = vld [vmem:[#allocation2 + $0x210] sm:$0xff]  ;;  %4043 = vst.msk [vmem:[%s5572_s25 + $0x14c] sm:$0xf] %vm3959_vm2, %v3914_v24  ;;  %v3803_v38 = vmax.f32 %v3675_v15, 0.0  ;;  %v3336_v41 = vadd.f32 %v3240_v46, %v3127_v27 }
 0x2c9   : > { %v3087_v25 = vpop.f32.mrf.mxu2  ;;  %v3641_v19 = vadd.f32 %v6234_v51, %v3509_v3  ;;  %3414 = vst.msk [vmem:[#allocation2 + $0x218] sm:$0xff] %vm1214_vm1, %v3318_v8  ;;  %v3527_v59 = vld [vmem:[#allocation2 + $0x2a0] sm:$0xff]  ;;  %v1069_v22 = vpop.f32.mrf.mxu0 }
 0x2ca   : > { %v3931_v23 = vpack.c.bf16 %v3803_v38, %v3803_v38  ;;  %v3659_v12 = vadd.f32 %v6234_v51, %v3527_v59  ;;  %v2141_v35 = vld [vmem:[#allocation2 + $0x228] sm:$0xff]  ;;  %3432 = vst.msk [vmem:[#allocation2 + $0x2a8] sm:$0xff] %vm1214_vm1, %v3336_v41  ;;  %v2039_v49 = vpop.f32.mrf.mxu1  ;;  %v2176_v59 = vld [vmem:[#allocation2 + $0x340] sm:$0xff] }
 0x2cb   : > { %v3769_v28 = vmax.f32 %v3641_v19, 0.0  ;;  %v2237_v9 = vadd.f32 %v2141_v35, %v5994_v50  ;;  %1285 = vst.msk [vmem:[#allocation2 + $0x230] sm:$0xff] %vm1214_vm1, %v1069_v22  ;;  %v2270_v2 = vadd.f32 %v2174_v53, %v2039_v49 }
 0x2cc   : > { %4060 = vst.msk [vmem:[%s5572_s25 + $0x190] sm:$0xf] %vm3959_vm2, %v3931_v23  ;;  %v3787_v31 = vmax.f32 %v3659_v12, 0.0  ;;  %v3223_v33 = vld [vmem:[#allocation2 + $0x220] sm:$0xff] }
 0x2cd   : > { %v3897_v42 = vpack.c.bf16 %v3769_v28, %v3769_v28  ;;  %2333 = vst.msk [vmem:[#allocation2 + $0x228] sm:$0xff] %vm1214_vm1, %v2237_v9  ;;  %v3544_v51 = vld [vmem:[#allocation2 + $0x328] sm:$0xff]  ;;  %v3319_v62 = vadd.f32 %v3223_v33, %v3085_v37  ;;  %v3243_v33 = vld [vmem:[#allocation2 + $0x2c0] sm:$0xff] }
 0x2ce   : > { %v3915_v47 = vpack.c.bf16 %v3787_v31, %v3787_v31  ;;  %v3676_v50 = vadd.f32 %v6491_v5, %v3544_v51  ;;  %2366 = vst.msk [vmem:[#allocation2 + $0x330] sm:$0xff] %vm1214_vm1, %v2270_v2 }
 0x2cf   : > { %4026 = vst.msk [vmem:[%s5572_s25 + $0x108] sm:$0xf] %vm3959_vm2, %v3897_v42  ;;  %v3130_v43 = vpop.f32.mrf.mxu3 }
 0x2d0   : > { %v3510_v11 = vld [vmem:[#allocation2 + $0x218] sm:$0xff]  ;;  %4044 = vst.msk [vmem:[%s5572_s25 + $0x150] sm:$0xf] %vm3959_vm2, %v3915_v47  ;;  %v3804_v20 = vmax.f32 %v3676_v50, 0.0  ;;  %v3337_v14 = vadd.f32 %v3241_v45, %v3130_v43 }
 0x2d1   : > { %v3090_v58 = vpop.f32.mrf.mxu2  ;;  %v3642_v1 = vadd.f32 %v6491_v5, %v3510_v11  ;;  %3415 = vst.msk [vmem:[#allocation2 + $0x220] sm:$0xff] %vm1214_vm1, %v3319_v62  ;;  %v3528_v39 = vld [vmem:[#allocation2 + $0x2a8] sm:$0xff]  ;;  %v1071_v17 = vpop.f32.mrf.mxu0 }
 0x2d2   : > { %v3932_v32 = vpack.c.bf16 %v3804_v20, %v3804_v20  ;;  %v3660_v37 = vadd.f32 %v6491_v5, %v3528_v39  ;;  %v2142_v55 = vld [vmem:[#allocation2 + $0x230] sm:$0xff]  ;;  %3433 = vst.msk [vmem:[#allocation2 + $0x2b0] sm:$0xff] %vm1214_vm1, %v3337_v14  ;;  %v2041_v52 = vpop.f32.mrf.mxu1 }
 0x2d3   : > { %v3770_v30 = vmax.f32 %v3642_v1, 0.0  ;;  %v2238_v61 = vadd.f32 %v2142_v55, %v6008_v10  ;;  %1286 = vst.msk [vmem:[#allocation2 + $0x238] sm:$0xff] %vm1214_vm1, %v1071_v17  ;;  %v2271_v29 = vadd.f32 %v2175_v56, %v2041_v52  ;;  %v2177_v1 = vld [vmem:[#allocation2 + $0x348] sm:$0xff] }
 0x2d4   : > { %4061 = vst.msk [vmem:[%s5572_s25 + $0x194] sm:$0xf] %vm3959_vm2, %v3932_v32  ;;  %v3788_v63 = vmax.f32 %v3660_v37, 0.0  ;;  %v3224_v44 = vld [vmem:[#allocation2 + $0x228] sm:$0xff] }
 0x2d5   : > { %v3898_v7 = vpack.c.bf16 %v3770_v30, %v3770_v30  ;;  %2334 = vst.msk [vmem:[#allocation2 + $0x230] sm:$0xff] %vm1214_vm1, %v2238_v61  ;;  %v3545_v26 = vld [vmem:[#allocation2 + $0x330] sm:$0xff]  ;;  %v3320_v18 = vadd.f32 %v3224_v44, %v3087_v25 }
 0x2d6   : > { %v3916_v6 = vpack.c.bf16 %v3788_v63, %v3788_v63  ;;  %v3677_v4 = vadd.f32 %v6491_v5, %v3545_v26  ;;  %2367 = vst.msk [vmem:[#allocation2 + $0x338] sm:$0xff] %vm1214_vm1, %v2271_v29  ;;  %v3244_v63 = vld [vmem:[#allocation2 + $0x2c8] sm:$0xff] }
 0x2d7   : > { %4027 = vst.msk [vmem:[%s5572_s25 + $0x10c] sm:$0xf] %vm3959_vm2, %v3898_v7  ;;  %v3132_v10 = vpop.f32.mrf.mxu3 }
 0x2d8   : > { %v3511_v0 = vld [vmem:[#allocation2 + $0x220] sm:$0xff]  ;;  %4045 = vst.msk [vmem:[%s5572_s25 + $0x154] sm:$0xf] %vm3959_vm2, %v3916_v6  ;;  %v3805_v8 = vmax.f32 %v3677_v4, 0.0  ;;  %v3338_v24 = vadd.f32 %v3242_v16, %v3132_v10 }
 0x2d9   : > { %v3092_v15 = vpop.f32.mrf.mxu2  ;;  %v3643_v27 = vadd.f32 %v6491_v5, %v3511_v0  ;;  %3416 = vst.msk [vmem:[#allocation2 + $0x228] sm:$0xff] %vm1214_vm1, %v3320_v18  ;;  %v3529_v46 = vld [vmem:[#allocation2 + $0x2b0] sm:$0xff]  ;;  %v1074_v3 = vpop.f32.mrf.mxu0 }
 0x2da   : > { %v3933_v38 = vpack.c.bf16 %v3805_v8, %v3805_v8  ;;  %v3661_v41 = vadd.f32 %v6491_v5, %v3529_v46  ;;  %v2143_v25 = vld [vmem:[#allocation2 + $0x238] sm:$0xff]  ;;  %3434 = vst.msk [vmem:[#allocation2 + $0x2b8] sm:$0xff] %vm1214_vm1, %v3338_v24  ;;  %v2044_v19 = vpop.f32.mrf.mxu1 }
 0x2db   : > { %v3771_v22 = vmax.f32 %v3643_v27, 0.0  ;;  %v2239_v23 = vadd.f32 %v2143_v25, %v6022_v40  ;;  %1287 = vst.msk [vmem:[#allocation2 + $0x240] sm:$0xff] %vm1214_vm1, %v1074_v3  ;;  %v2272_v12 = vadd.f32 %v2176_v59, %v2044_v19 }
 0x2dc   : > { %4062 = vst.msk [vmem:[%s5572_s25 + $0x198] sm:$0xf] %vm3959_vm2, %v3933_v38  ;;  %v3789_v35 = vmax.f32 %v3661_v41, 0.0  ;;  %v3225_v49 = vld [vmem:[#allocation2 + $0x230] sm:$0xff] }
 0x2dd   : > { %v3899_v53 = vpack.c.bf16 %v3771_v22, %v3771_v22  ;;  %2335 = vst.msk [vmem:[#allocation2 + $0x238] sm:$0xff] %vm1214_vm1, %v2239_v23  ;;  %v3546_v28 = vld [vmem:[#allocation2 + $0x338] sm:$0xff]  ;;  %v3321_v9 = vadd.f32 %v3225_v49, %v3090_v58 }
 0x2de   : > { %v3917_v2 = vpack.c.bf16 %v3789_v35, %v3789_v35  ;;  %v3678_v31 = vadd.f32 %v6491_v5, %v3546_v28  ;;  %2368 = vst.msk [vmem:[#allocation2 + $0x340] sm:$0xff] %vm1214_vm1, %v2272_v12  ;;  %v3245_v12 = vld [vmem:[#allocation2 + $0x2d0] sm:$0xff] }
 0x2df   : > { %4028 = vst.msk [vmem:[%s5572_s25 + $0x110] sm:$0xf] %vm3959_vm2, %v3899_v53  ;;  %v3135_v40 = vpop.f32.mrf.mxu3 }
 0x2e0   : > { %v3512_v42 = vld [vmem:[#allocation2 + $0x228] sm:$0xff]  ;;  %4046 = vst.msk [vmem:[%s5572_s25 + $0x158] sm:$0xf] %vm3959_vm2, %v3917_v2  ;;  %v3806_v51 = vmax.f32 %v3678_v31, 0.0  ;;  %v3339_v62 = vadd.f32 %v3243_v33, %v3135_v40 }
 0x2e1   : > { %v3095_v47 = vpop.f32.mrf.mxu2  ;;  %v3644_v50 = vadd.f32 %v6491_v5, %v3512_v42  ;;  %3417 = vst.msk [vmem:[#allocation2 + $0x230] sm:$0xff] %vm1214_vm1, %v3321_v9  ;;  %v3530_v43 = vld [vmem:[#allocation2 + $0x2b8] sm:$0xff]  ;;  %v1076_v45 = vpop.f32.mrf.mxu0 }
 0x2e2   : > { %v3934_v11 = vpack.c.bf16 %v3806_v51, %v3806_v51  ;;  %v3662_v20 = vadd.f32 %v6491_v5, %v3530_v43  ;;  %v2144_v14 = vld [vmem:[#allocation2 + $0x240] sm:$0xff]  ;;  %3435 = vst.msk [vmem:[#allocation2 + $0x2c0] sm:$0xff] %vm1214_vm1, %v3339_v62  ;;  %v2046_v58 = vpop.f32.mrf.mxu1  ;;  %v2179_v51 = vld [vmem:[#allocation2 + $0x358] sm:$0xff] }
 0x2e3   : > { %v3772_v39 = vmax.f32 %v3644_v50, 0.0  ;;  %v2240_v17 = vadd.f32 %v2144_v14, %v6036_v13  ;;  %1288 = vst.msk [vmem:[#allocation2 + $0x248] sm:$0xff] %vm1214_vm1, %v1076_v45  ;;  %v2273_v32 = vadd.f32 %v2177_v1, %v2046_v58 }
 0x2e4   : > { %4063 = vst.msk [vmem:[%s5572_s25 + $0x19c] sm:$0xf] %vm3959_vm2, %v3934_v11  ;;  %v3790_v37 = vmax.f32 %v3662_v20, 0.0  ;;  %v3226_v55 = vld [vmem:[#allocation2 + $0x238] sm:$0xff] }
 0x2e5   : > { %v3900_v52 = vpack.c.bf16 %v3772_v39, %v3772_v39  ;;  %2336 = vst.msk [vmem:[#allocation2 + $0x240] sm:$0xff] %vm1214_vm1, %v2240_v17  ;;  %v3547_v56 = vld [vmem:[#allocation2 + $0x340] sm:$0xff]  ;;  %v3322_v30 = vadd.f32 %v3226_v55, %v3092_v15  ;;  %v2178_v15 = vld [vmem:[#allocation2 + $0x350] sm:$0xff]  ;;  %v3246_v17 = vld [vmem:[#allocation2 + $0x2d8] sm:$0xff] }
 0x2e6   : > { %v3918_v61 = vpack.c.bf16 %v3790_v37, %v3790_v37  ;;  %v3679_v29 = vadd.f32 %v6491_v5, %v3547_v56  ;;  %2369 = vst.msk [vmem:[#allocation2 + $0x348] sm:$0xff] %vm1214_vm1, %v2273_v32 }
 0x2e7   : > { %4029 = vst.msk [vmem:[%s5572_s25 + $0x114] sm:$0xf] %vm3959_vm2, %v3900_v52  ;;  %v3137_v13 = vpop.f32.mrf.mxu3 }
 0x2e8   : > { %v3513_v44 = vld [vmem:[#allocation2 + $0x230] sm:$0xff]  ;;  %4047 = vst.msk [vmem:[%s5572_s25 + $0x15c] sm:$0xf] %vm3959_vm2, %v3918_v61  ;;  %v3807_v7 = vmax.f32 %v3679_v29, 0.0  ;;  %v3340_v26 = vadd.f32 %v3244_v63, %v3137_v13 }
 0x2e9   : > { %v3097_v18 = vpop.f32.mrf.mxu2  ;;  %v3645_v6 = vadd.f32 %v6491_v5, %v3513_v44  ;;  %3418 = vst.msk [vmem:[#allocation2 + $0x238] sm:$0xff] %vm1214_vm1, %v3322_v30  ;;  %v3531_v4 = vld [vmem:[#allocation2 + $0x2c0] sm:$0xff]  ;;  %v1079_v10 = vpop.f32.mrf.mxu0 }
 0x2ea   : > { %v3935_v16 = vpack.c.bf16 %v3807_v7, %v3807_v7  ;;  %v3663_v0 = vadd.f32 %v6491_v5, %v3531_v4  ;;  %v2145_v8 = vld [vmem:[#allocation2 + $0x248] sm:$0xff]  ;;  %3436 = vst.msk [vmem:[#allocation2 + $0x2c8] sm:$0xff] %vm1214_vm1, %v3340_v26  ;;  %v2049_v24 = vpop.f32.mrf.mxu1  ;;  %v2180_v44 = vld [vmem:[#allocation2 + $0x360] sm:$0xff] }
 0x2eb   : > { %v3773_v27 = vmax.f32 %v3645_v6, 0.0  ;;  %v2241_v46 = vadd.f32 %v2145_v8, %v6050_v36  ;;  %1289 = vst.msk [vmem:[#allocation2 + $0x250] sm:$0xff] %vm1214_vm1, %v1079_v10  ;;  %v2274_v3 = vadd.f32 %v2178_v15, %v2049_v24 }
 0x2ec   : > { %4064 = vst.msk [vmem:[%s5572_s25 + $0x1a0] sm:$0xf] %vm3959_vm2, %v3935_v16  ;;  %v3791_v38 = vmax.f32 %v3663_v0, 0.0  ;;  %v3227_v41 = vld [vmem:[#allocation2 + $0x240] sm:$0xff] }
 0x2ed   : > { %v3901_v25 = vpack.c.bf16 %v3773_v27, %v3773_v27  ;;  %2337 = vst.msk [vmem:[#allocation2 + $0x248] sm:$0xff] %vm1214_vm1, %v2241_v46  ;;  %v3548_v19 = vld [vmem:[#allocation2 + $0x348] sm:$0xff]  ;;  %v3323_v59 = vadd.f32 %v3227_v41, %v3095_v47  ;;  %v3247_v27 = vld [vmem:[#allocation2 + $0x2e0] sm:$0xff] }
 0x2ee   : > { %v3919_v22 = vpack.c.bf16 %v3791_v38, %v3791_v38  ;;  %v3680_v23 = vadd.f32 %v6491_v5, %v3548_v19  ;;  %2370 = vst.msk [vmem:[#allocation2 + $0x350] sm:$0xff] %vm1214_vm1, %v2274_v3 }
 0x2ef   : > { %4030 = vst.msk [vmem:[%s5572_s25 + $0x118] sm:$0xf] %vm3959_vm2, %v3901_v25  ;;  %v3140_v36 = vpop.f32.mrf.mxu3 }
 0x2f0   : > { %v3514_v35 = vld [vmem:[#allocation2 + $0x238] sm:$0xff]  ;;  %4048 = vst.msk [vmem:[%s5572_s25 + $0x160] sm:$0xf] %vm3959_vm2, %v3919_v22  ;;  %v3808_v49 = vmax.f32 %v3680_v23, 0.0  ;;  %v3341_v53 = vadd.f32 %v3245_v12, %v3140_v36  ;;  %v2181_v12 = vld [vmem:[#allocation2 + $0x368] sm:$0xff] }
 0x2f1   : > { %v3646_v28 = vadd.f32 %v6491_v5, %v3514_v35  ;;  %3419 = vst.msk [vmem:[#allocation2 + $0x240] sm:$0xff] %vm1214_vm1, %v3323_v59  ;;  %v3532_v9 = vld [vmem:[#allocation2 + $0x2c8] sm:$0xff]  ;;  %v1081_v2 = vpop.f32.mrf.mxu0  ;;  %v3100_v62 = vpop.f32.mrf.mxu2 }
 0x2f2   : > { %v3936_v31 = vpack.c.bf16 %v3808_v49, %v3808_v49  ;;  %v3664_v40 = vadd.f32 %v6491_v5, %v3532_v9  ;;  %v2146_v33 = vld [vmem:[#allocation2 + $0x250] sm:$0xff]  ;;  %3437 = vst.msk [vmem:[#allocation2 + $0x2d0] sm:$0xff] %vm1214_vm1, %v3341_v53  ;;  %v2051_v42 = vpop.f32.mrf.mxu1 }
 0x2f3   : > { %v3774_v47 = vmax.f32 %v3646_v28, 0.0  ;;  %v2242_v50 = vadd.f32 %v2146_v33, %v6064_v60  ;;  %1290 = vst.msk [vmem:[#allocation2 + $0x258] sm:$0xff] %vm1214_vm1, %v1081_v2  ;;  %v2275_v43 = vadd.f32 %v2179_v51, %v2051_v42 }
 0x2f4   : > { %4065 = vst.msk [vmem:[%s5572_s25 + $0x1a4] sm:$0xf] %vm3959_vm2, %v3936_v31  ;;  %v3792_v45 = vmax.f32 %v3664_v40, 0.0  ;;  %v3228_v11 = vld [vmem:[#allocation2 + $0x248] sm:$0xff] }
 0x2f5   : > { %v3902_v20 = vpack.c.bf16 %v3774_v47, %v3774_v47  ;;  %2338 = vst.msk [vmem:[#allocation2 + $0x250] sm:$0xff] %vm1214_vm1, %v2242_v50  ;;  %v3549_v14 = vld [vmem:[#allocation2 + $0x350] sm:$0xff]  ;;  %v3324_v58 = vadd.f32 %v3228_v11, %v3097_v18 }
 0x2f6   : > { %v3920_v1 = vpack.c.bf16 %v3792_v45, %v3792_v45  ;;  %v3681_v39 = vadd.f32 %v6491_v5, %v3549_v14  ;;  %2371 = vst.msk [vmem:[#allocation2 + $0x358] sm:$0xff] %vm1214_vm1, %v2275_v43 }
 0x2f7   : > { %4031 = vst.msk [vmem:[%s5572_s25 + $0x11c] sm:$0xf] %vm3959_vm2, %v3902_v20  ;;  %v3142_v60 = vpop.f32.mrf.mxu3 }
 0x2f8   : > { %v3515_v32 = vld [vmem:[#allocation2 + $0x240] sm:$0xff]  ;;  %4049 = vst.msk [vmem:[%s5572_s25 + $0x164] sm:$0xf] %vm3959_vm2, %v3920_v1  ;;  %v3809_v37 = vmax.f32 %v3681_v39, 0.0  ;;  %v3342_v55 = vadd.f32 %v3246_v17, %v3142_v60  ;;  %v2182_v60 = vld [vmem:[#allocation2 + $0x370] sm:$0xff] }
 0x2f9   : > { %v3647_v52 = vadd.f32 %v6491_v5, %v3515_v32  ;;  %3420 = vst.msk [vmem:[#allocation2 + $0x248] sm:$0xff] %vm1214_vm1, %v3324_v58  ;;  %v3533_v56 = vld [vmem:[#allocation2 + $0x2d0] sm:$0xff]  ;;  %v1084_v30 = vpop.f32.mrf.mxu0  ;;  %v3102_v10 = vpop.f32.mrf.mxu2 }
 0x2fa   : > { %v3937_v61 = vpack.c.bf16 %v3809_v37, %v3809_v37  ;;  %v3665_v29 = vadd.f32 %v6491_v5, %v3533_v56  ;;  %v2147_v13 = vld [vmem:[#allocation2 + $0x258] sm:$0xff]  ;;  %3438 = vst.msk [vmem:[#allocation2 + $0x2d8] sm:$0xff] %vm1214_vm1, %v3342_v55  ;;  %v2054_v63 = vpop.f32.mrf.mxu1 }
 0x2fb   : > { %v3775_v7 = vmax.f32 %v3647_v52, 0.0  ;;  %v2243_v26 = vadd.f32 %v2147_v13, %v6078_v34  ;;  %1291 = vst.msk [vmem:[#allocation2 + $0x260] sm:$0xff] %vm1214_vm1, %v1084_v30  ;;  %v2276_v18 = vadd.f32 %v2180_v44, %v2054_v63  ;;  %v3249_v63 = vld [vmem:[#allocation2 + $0x2f0] sm:$0xff] }
 0x2fc   : > { %4066 = vst.msk [vmem:[%s5572_s25 + $0x1a8] sm:$0xf] %vm3959_vm2, %v3937_v61  ;;  %v3793_v6 = vmax.f32 %v3665_v29, 0.0  ;;  %v3229_v4 = vld [vmem:[#allocation2 + $0x250] sm:$0xff] }
 0x2fd   : > { %v3903_v16 = vpack.c.bf16 %v3775_v7, %v3775_v7  ;;  %2339 = vst.msk [vmem:[#allocation2 + $0x258] sm:$0xff] %vm1214_vm1, %v2243_v26  ;;  %v3550_v0 = vld [vmem:[#allocation2 + $0x358] sm:$0xff]  ;;  %v3325_v8 = vadd.f32 %v3229_v4, %v3100_v62  ;;  %v3248_v62 = vld [vmem:[#allocation2 + $0x2e8] sm:$0xff] }
 0x2fe   : > { %v3921_v24 = vpack.c.bf16 %v3793_v6, %v3793_v6  ;;  %v3682_v15 = vadd.f32 %v6491_v5, %v3550_v0  ;;  %2372 = vst.msk [vmem:[#allocation2 + $0x360] sm:$0xff] %vm1214_vm1, %v2276_v18 }
 0x2ff   : > { %4032 = vst.msk [vmem:[%s5572_s25 + $0x120] sm:$0xf] %vm3959_vm2, %v3903_v16  ;;  %v3145_v34 = vpop.f32.mrf.mxu3 }
 0x300   : > { %v3516_v46 = vld [vmem:[#allocation2 + $0x248] sm:$0xff]  ;;  %4050 = vst.msk [vmem:[%s5572_s25 + $0x168] sm:$0xf] %vm3959_vm2, %v3921_v24  ;;  %v3810_v3 = vmax.f32 %v3682_v15, 0.0  ;;  %v3343_v38 = vadd.f32 %v3247_v27, %v3145_v34  ;;  %v2183_v15 = vld [vmem:[#allocation2 + $0x378] sm:$0xff] }
 0x301   : > { %v3648_v41 = vadd.f32 %v6491_v5, %v3516_v46  ;;  %3421 = vst.msk [vmem:[#allocation2 + $0x250] sm:$0xff] %vm1214_vm1, %v3325_v8  ;;  %v3534_v25 = vld [vmem:[#allocation2 + $0x2d8] sm:$0xff]  ;;  %v1086_v19 = vpop.f32.mrf.mxu0  ;;  %v3105_v51 = vpop.f32.mrf.mxu2 }
 0x302   : > { %v3938_v59 = vpack.c.bf16 %v3810_v3, %v3810_v3  ;;  %v3666_v22 = vadd.f32 %v6491_v5, %v3534_v25  ;;  %v2148_v23 = vld [vmem:[#allocation2 + $0x260] sm:$0xff]  ;;  %3439 = vst.msk [vmem:[#allocation2 + $0x2e0] sm:$0xff] %vm1214_vm1, %v3343_v38  ;;  %v2056_v36 = vpop.f32.mrf.mxu1 }
 0x303   : > { %v3776_v35 = vmax.f32 %v3648_v41, 0.0  ;;  %v2244_v49 = vadd.f32 %v2148_v23, %v6092_v54  ;;  %1292 = vst.msk [vmem:[#allocation2 + $0x268] sm:$0xff] %vm1214_vm1, %v1086_v19  ;;  %v2277_v53 = vadd.f32 %v2181_v12, %v2056_v36  ;;  %v3250_v23 = vld [vmem:[#allocation2 + $0x2f8] sm:$0xff] }
 0x304   : > { %4067 = vst.msk [vmem:[%s5572_s25 + $0x1ac] sm:$0xf] %vm3959_vm2, %v3938_v59  ;;  %v3794_v28 = vmax.f32 %v3666_v22, 0.0  ;;  %v3230_v9 = vld [vmem:[#allocation2 + $0x258] sm:$0xff] }
 0x305   : > { %v3904_v2 = vpack.c.bf16 %v3776_v35, %v3776_v35  ;;  %2340 = vst.msk [vmem:[#allocation2 + $0x260] sm:$0xff] %vm1214_vm1, %v2244_v49  ;;  %v3551_v31 = vld [vmem:[#allocation2 + $0x360] sm:$0xff]  ;;  %v3326_v40 = vadd.f32 %v3230_v9, %v3102_v10 }
 0x306   : > { %v3922_v33 = vpack.c.bf16 %v3794_v28, %v3794_v28  ;;  %v3683_v42 = vadd.f32 %v6491_v5, %v3551_v31  ;;  %2373 = vst.msk [vmem:[#allocation2 + $0x368] sm:$0xff] %vm1214_vm1, %v2277_v53 }
 0x307   : > { %4033 = vst.msk [vmem:[%s5572_s25 + $0x124] sm:$0xf] %vm3959_vm2, %v3904_v2  ;;  %v3147_v54 = vpop.f32.mrf.mxu3 }
 0x308   : > { %v3517_v47 = vld [vmem:[#allocation2 + $0x250] sm:$0xff]  ;;  %4051 = vst.msk [vmem:[%s5572_s25 + $0x16c] sm:$0xf] %vm3959_vm2, %v3922_v33  ;;  %v3811_v50 = vmax.f32 %v3683_v42, 0.0  ;;  %v3344_v43 = vadd.f32 %v3248_v62, %v3147_v54 }
 0x309   : > { %v3649_v45 = vadd.f32 %v6491_v5, %v3517_v47  ;;  %3422 = vst.msk [vmem:[#allocation2 + $0x258] sm:$0xff] %vm1214_vm1, %v3326_v40  ;;  %v3535_v11 = vld [vmem:[#allocation2 + $0x2e0] sm:$0xff]  ;;  %v1089_v20 = vpop.f32.mrf.mxu0  ;;  %v3107_v26 = vpop.f32.mrf.mxu2 }
 0x30a   : > { %v3939_v14 = vpack.c.bf16 %v3811_v50, %v3811_v50  ;;  %v3667_v58 = vadd.f32 %v6491_v5, %v3535_v11  ;;  %v2149_v1 = vld [vmem:[#allocation2 + $0x268] sm:$0xff]  ;;  %3440 = vst.msk [vmem:[#allocation2 + $0x2e8] sm:$0xff] %vm1214_vm1, %v3344_v43  ;;  %v2059_v39 = vpop.f32.mrf.mxu1 }
 0x30b   : > { %v3777_v17 = vmax.f32 %v3649_v45, 0.0  ;;  %v2245_v32 = vadd.f32 %v2149_v1, %v6106_v21  ;;  %1293 = vst.msk [vmem:[#allocation2 + $0x270] sm:$0xff] %vm1214_vm1, %v1089_v20  ;;  %v2278_v37 = vadd.f32 %v2182_v60, %v2059_v39 }
 0x30c   : > { %4068 = vst.msk [vmem:[%s5572_s25 + $0x1b0] sm:$0xf] %vm3959_vm2, %v3939_v14  ;;  %v3795_v55 = vmax.f32 %v3667_v58, 0.0  ;;  %v3231_v52 = vld [vmem:[#allocation2 + $0x260] sm:$0xff] }
 0x30d   : > { %v3905_v56 = vpack.c.bf16 %v3777_v17, %v3777_v17  ;;  %2341 = vst.msk [vmem:[#allocation2 + $0x268] sm:$0xff] %vm1214_vm1, %v2245_v32  ;;  %v3552_v30 = vld [vmem:[#allocation2 + $0x368] sm:$0xff]  ;;  %v3327_v61 = vadd.f32 %v3231_v52, %v3105_v51 }
 0x30e   : > { %v3923_v29 = vpack.c.bf16 %v3795_v55, %v3795_v55  ;;  %v3684_v13 = vadd.f32 %v6491_v5, %v3552_v30  ;;  %2374 = vst.msk [vmem:[#allocation2 + $0x370] sm:$0xff] %vm1214_vm1, %v2278_v37 }
 0x30f   : > { %4034 = vst.msk [vmem:[%s5572_s25 + $0x128] sm:$0xf] %vm3959_vm2, %v3905_v56  ;;  %v3150_v21 = vpop.f32.mrf.mxu3 }
 0x310   : > { %v3518_v44 = vld [vmem:[#allocation2 + $0x258] sm:$0xff]  ;;  %4052 = vst.msk [vmem:[%s5572_s25 + $0x170] sm:$0xf] %vm3959_vm2, %v3923_v29  ;;  %v3812_v7 = vmax.f32 %v3684_v13, 0.0  ;;  %v3345_v18 = vadd.f32 %v3249_v63, %v3150_v21 }
 0x311   : > { %v3650_v6 = vadd.f32 %v6491_v5, %v3518_v44  ;;  %3423 = vst.msk [vmem:[#allocation2 + $0x260] sm:$0xff] %vm1214_vm1, %v3327_v61  ;;  %v3536_v4 = vld [vmem:[#allocation2 + $0x2e8] sm:$0xff]  ;;  %v1091_v10 = vpop.f32.mrf.mxu0  ;;  %v3110_v31 = vpop.f32.mrf.mxu2 }
 0x312   : > { %v3940_v16 = vpack.c.bf16 %v3812_v7, %v3812_v7  ;;  %v3668_v0 = vadd.f32 %v6491_v5, %v3536_v4  ;;  %v2150_v8 = vld [vmem:[#allocation2 + $0x270] sm:$0xff]  ;;  %3441 = vst.msk [vmem:[#allocation2 + $0x2f0] sm:$0xff] %vm1214_vm1, %v3345_v18  ;;  %v2061_v24 = vpop.f32.mrf.mxu1 }
 0x313   : > { %v3778_v34 = vmax.f32 %v3650_v6, 0.0  ;;  %v2246_v27 = vadd.f32 %v2150_v8, %v6120_v48  ;;  %1294 = vst.msk [vmem:[#allocation2 + $0x278] sm:$0xff] %vm1214_vm1, %v1091_v10  ;;  %v2279_v46 = vadd.f32 %v2183_v15, %v2061_v24 }
 0x314   : > { %4069 = vst.msk [vmem:[%s5572_s25 + $0x1b4] sm:$0xf] %vm3959_vm2, %v3940_v16  ;;  %v3796_v3 = vmax.f32 %v3668_v0, 0.0  ;;  %v3232_v38 = vld [vmem:[#allocation2 + $0x268] sm:$0xff] }
 0x315   : > { %v3906_v41 = vpack.c.bf16 %v3778_v34, %v3778_v34  ;;  %2342 = vst.msk [vmem:[#allocation2 + $0x270] sm:$0xff] %vm1214_vm1, %v2246_v27  ;;  %v3553_v25 = vld [vmem:[#allocation2 + $0x370] sm:$0xff]  ;;  %v3328_v19 = vadd.f32 %v3232_v38, %v3107_v26 }
 0x316   : > { %v3924_v59 = vpack.c.bf16 %v3796_v3, %v3796_v3  ;;  %v3685_v22 = vadd.f32 %v6491_v5, %v3553_v25  ;;  %2375 = vst.msk [vmem:[#allocation2 + $0x378] sm:$0xff] %vm1214_vm1, %v2279_v46 }
 0x317   : > { %4035 = vst.msk [vmem:[%s5572_s25 + $0x12c] sm:$0xf] %vm3959_vm2, %v3906_v41  ;;  %v3152_v48 = vpop.f32.mrf.mxu3 }
 0x318   : > { %v3519_v36 = vld [vmem:[#allocation2 + $0x260] sm:$0xff]  ;;  %4053 = vst.msk [vmem:[%s5572_s25 + $0x174] sm:$0xf] %vm3959_vm2, %v3924_v59  ;;  %v3813_v12 = vmax.f32 %v3685_v22, 0.0  ;;  %v3346_v35 = vadd.f32 %v3250_v23, %v3152_v48 }
 0x319   : > { %v3651_v49 = vadd.f32 %v6491_v5, %v3519_v36  ;;  %3424 = vst.msk [vmem:[#allocation2 + $0x268] sm:$0xff] %vm1214_vm1, %v3328_v19  ;;  %v3537_v53 = vld [vmem:[#allocation2 + $0x2f0] sm:$0xff]  ;;  %v3112_v60 = vpop.f32.mrf.mxu2 }
 0x31a   : > { %v3941_v28 = vpack.c.bf16 %v3813_v12, %v3813_v12  ;;  %v3669_v9 = vadd.f32 %v6491_v5, %v3537_v53  ;;  %v2151_v2 = vld [vmem:[#allocation2 + $0x278] sm:$0xff]  ;;  %3442 = vst.msk [vmem:[#allocation2 + $0x2f8] sm:$0xff] %vm1214_vm1, %v3346_v35 }
 0x31b   : > { %v3779_v40 = vmax.f32 %v3651_v49, 0.0  ;;  %v2247_v33 = vadd.f32 %v2151_v2, %v6134_v57 }
 0x31c   : > { %4070 = vst.msk [vmem:[%s5572_s25 + $0x1b8] sm:$0xf] %vm3959_vm2, %v3941_v28  ;;  %v3797_v42 = vmax.f32 %v3669_v9, 0.0  ;;  %v3233_v51 = vld [vmem:[#allocation2 + $0x270] sm:$0xff] }
 0x31d   : > { %v3907_v54 = vpack.c.bf16 %v3779_v40, %v3779_v40  ;;  %2343 = vst.msk [vmem:[#allocation2 + $0x278] sm:$0xff] %vm1214_vm1, %v2247_v33  ;;  %v3554_v62 = vld [vmem:[#allocation2 + $0x378] sm:$0xff]  ;;  %v3329_v47 = vadd.f32 %v3233_v51, %v3110_v31 }
 0x31e   : > { %v3925_v50 = vpack.c.bf16 %v3797_v42, %v3797_v42  ;;  %v3686_v43 = vadd.f32 %v6491_v5, %v3554_v62 }
 0x31f   : > { %4036 = vst.msk [vmem:[%s5572_s25 + $0x130] sm:$0xf] %vm3959_vm2, %v3907_v54 }
 0x320   : > { %v3520_v45 = vld [vmem:[#allocation2 + $0x268] sm:$0xff]  ;;  %4054 = vst.msk [vmem:[%s5572_s25 + $0x178] sm:$0xf] %vm3959_vm2, %v3925_v50  ;;  %v3814_v57 = vmax.f32 %v3686_v43, 0.0 }
 0x321   : > { %v3652_v11 = vadd.f32 %v6491_v5, %v3520_v45  ;;  %3425 = vst.msk [vmem:[#allocation2 + $0x270] sm:$0xff] %vm1214_vm1, %v3329_v47  ;;  %v3538_v20 = vld [vmem:[#allocation2 + $0x2f8] sm:$0xff] }
 0x322   : > { %v3942_v14 = vpack.c.bf16 %v3814_v57, %v3814_v57  ;;  %v3670_v58 = vadd.f32 %v6491_v5, %v3538_v20 }
 0x323   : > { %v3780_v1 = vmax.f32 %v3652_v11, 0.0 }
 0x324   : > { %4071 = vst.msk [vmem:[%s5572_s25 + $0x1bc] sm:$0xf] %vm3959_vm2, %v3942_v14  ;;  %v3798_v39 = vmax.f32 %v3670_v58, 0.0  ;;  %v3234_v17 = vld [vmem:[#allocation2 + $0x278] sm:$0xff] }
 0x325   : > { %v3908_v32 = vpack.c.bf16 %v3780_v1, %v3780_v1  ;;  %v3330_v37 = vadd.f32 %v3234_v17, %v3112_v60 }
 0x326   : > { %v3926_v55 = vpack.c.bf16 %v3798_v39, %v3798_v39 }
 0x327   : > { %4037 = vst.msk [vmem:[%s5572_s25 + $0x134] sm:$0xf] %vm3959_vm2, %v3908_v32 }
 0x328   : > { %v3521_v52 = vld [vmem:[#allocation2 + $0x270] sm:$0xff]  ;;  %4055 = vst.msk [vmem:[%s5572_s25 + $0x17c] sm:$0xf] %vm3959_vm2, %v3926_v55 }
 0x329   : > { %v3653_v56 = vadd.f32 %v6491_v5, %v3521_v52  ;;  %3426 = vst.msk [vmem:[#allocation2 + $0x278] sm:$0xff] %vm1214_vm1, %v3330_v37 }
 0x32b   : > { %v3781_v30 = vmax.f32 %v3653_v56, 0.0 }
 0x32d   : > { %v3909_v61 = vpack.c.bf16 %v3781_v30, %v3781_v30 }
 0x32f   : > { %4038 = vst.msk [vmem:[%s5572_s25 + $0x138] sm:$0xf] %vm3959_vm2, %v3909_v61 }
 0x330   : > { %v3522_v29 = vld [vmem:[#allocation2 + $0x278] sm:$0xff] }
 0x331   : > { %v3654_v13 = vadd.f32 %v6491_v5, %v3522_v29 }
 0x333   : > { %v3782_v21 = vmax.f32 %v3654_v13, 0.0 }
 0x335   : > { %v3910_v63 = vpack.c.bf16 %v3782_v21, %v3782_v21 }
 0x337   : > { %4039 = vst.msk [vmem:[%s5572_s25 + $0x13c] sm:$0xf] %vm3959_vm2, %v3910_v63 }
 0x338 PF: > { %s13_s14 = sadd.s32 1, %s5382_s14   ;;  %s6676_s12 = smov %s5378_s13 }
 0x339   : > { %p10_p5 = scmp.ge.s32.totalorder %s13_s14, 4   ;;  %s6677_s13 = smov %s6679_s15 }
 0x33b   :  { %12 = sbr.rel (!%p10_p5) target bundleno = 2 (0x2), region = 65 }

</bundles_post_ra>
